<compile_context>
chip_gen: v6e
topology: v6e:2x2x1
jax: 0.10.0
libtpu: 0.0.40
codegen_flags: <defaults>
</compile_context>

<pallas_src>
import math

import numpy as np
import jax
import jax.numpy as jnp
from jax import lax
from jax.experimental import pallas as pl
from jax.experimental.pallas import tpu as pltpu

# ----------------------------- configuration --------------------------------
HIDDEN = 150          # hidden_size_lstm_sentence  (2*HIDDEN == 300)
H_PAD = 256           # per-gate padded hidden width (lane aligned, 2x128)
DIM_WORD = 128
DIM_SENT = 300        # == 2 * HIDDEN
ATTN = 32             # attention_size
NTAGS = 5
NTAGS_PAD = 128       # classifier output padded to a full lane tile
VOCAB = 50            # len(config.vocab_words)
POS_VOCAB = 12450
SENT_POS_VOCAB = 4009
LN_EPS = 1e-5
NB_MAX = 128
SCRATCH_BUDGET = 24 << 20    # per-block VMEM scratch budget used to size NB
VMEM_LIMIT = 48 * 1024 * 1024


def _choose_nb(T, D, n, budget_bytes=SCRATCH_BUDGET, nb_max=NB_MAX):
    """Pick the batch-block size: as many sequences per grid step as fit the budget."""
    per_seq = T * (8 * D                  # f32 input block, double-buffered
                   + 4 * 4 * H_PAD        # xproj fwd+bwd scratch (bf16)
                   + 2 * H_PAD * 4        # merged hidden-stream scratch (f32)
                   + 4 * H_PAD * 4        # f32 projection temporary
                   + 2 * H_PAD * 4)       # attention-time slab load
    nb = int(budget_bytes // max(per_seq, 1))
    nb = max(8, min(nb_max, (nb // 8) * 8))
    np8 = ((n + 7) // 8) * 8
    nb = min(nb, np8)
    # keep >=2 grid steps when the batch allows it (so megacore / both v7x TCs get work)
    if nb >= np8 and np8 > 8:
        nb = max(8, (((np8 // 2) + 7) // 8) * 8)
    return nb


# ----------------------------- fused kernel body -----------------------------
def _bilstm_attn_ln_body(tmax, x_ref, len_ref, wihf_ref, wihb_ref, bgf_ref, bgb_ref,
                         whhf_ref, whhb_ref, wa_ref, ba_ref, ua_ref, gam_ref, bet_ref,
                         xpf_s, xpb_s, out_s):
    """Fused BiLSTM + masked attention pooling + LayerNorm for one block of sequences.

    x_ref:   (T, NB, D) f32   time-major inputs for this block
    len_ref: (NB, 1) int32    valid lengths (0 allowed -> output zeroed later)
    wih*/whh*: bf16 gate-padded weights; padding columns/rows are exactly zero so the
               padded hidden lanes provably stay zero through the recurrence.
    wa/gam/bet: merged (fwd|bwd) layout over 2*H_PAD lanes (zeros in pad lanes).
    Returns (normed, lenv): LayerNormed pooled features (NB, 2*H_PAD) and the lengths.
    """
    T, NBk, D = x_ref.shape
    HP = H_PAD
    G = 4 * HP

    # (1) hoisted input projection for BOTH directions: two big MXU-friendly matmuls
    #     over all T*NB rows (bf16 operands, f32 accumulate), stored to bf16 scratch.
    x2 = x_ref[...].astype(jnp.bfloat16).reshape(T * NBk, D)
    xpf_s[...] = (jnp.dot(x2, wihf_ref[...], preferred_element_type=jnp.float32)
                  + bgf_ref[...]).astype(jnp.bfloat16).reshape(T, NBk, G)
    xpb_s[...] = (jnp.dot(x2, wihb_ref[...], preferred_element_type=jnp.float32)
                  + bgb_ref[...]).astype(jnp.bfloat16).reshape(T, NBk, G)

    # (2) zero the merged hidden-stream scratch so skipped / masked steps contribute
    #     exact zeros to attention and pooling.
    out_s[...] = jnp.zeros_like(out_s)

    lenv = len_ref[...]                                     # (NB, 1) int32

    def cell(gates, c_prev):
        i_g = jax.nn.sigmoid(gates[:, 0:HP])
        f_g = jax.nn.sigmoid(gates[:, HP:2 * HP])
        g_g = jnp.tanh(gates[:, 2 * HP:3 * HP])
        o_g = jax.nn.sigmoid(gates[:, 3 * HP:4 * HP])
        c_new = f_g * c_prev + i_g * g_g
        return o_g * jnp.tanh(c_new), c_new

    # (3) fwd + bwd recurrences interleaved; h/c kept as SSA loop carries (no VMEM
    #     round trips); loop bound is the per-block max length (padded steps skipped).
    def step(t, carry):
        hf, cf, hb, cb = carry
        tb = tmax - 1 - t
        gates_f = (jnp.dot(hf.astype(jnp.bfloat16), whhf_ref[...],
                           preferred_element_type=jnp.float32)
                   + xpf_s[t].astype(jnp.float32))
        gates_b = (jnp.dot(hb.astype(jnp.bfloat16), whhb_ref[...],
                           preferred_element_type=jnp.float32)
                   + xpb_s[tb].astype(jnp.float32))
        hf_new, cf_new = cell(gates_f, cf)
        hb_new, cb_new = cell(gates_b, cb)
        vf = t < lenv                                       # (NB, 1) bool
        vb = tb < lenv
        out_s[t, :, 0:HP] = jnp.where(vf, hf_new, 0.0)      # fwd stream -> lanes [0:HP)
        out_s[tb, :, HP:2 * HP] = jnp.where(vb, hb_new, 0.0)  # bwd -> lanes [HP:2HP)
        return (jnp.where(vf, hf_new, hf), jnp.where(vf, cf_new, cf),
                jnp.where(vb, hb_new, hb), jnp.where(vb, cb_new, cb))

    z = jnp.zeros((NBk, HP), jnp.float32)
    lax.fori_loop(0, tmax, step, (z, z, z, z))

    # (4) masked additive attention over time on the merged (fwd|bwd) stream.
    h = out_s[...]                                          # (T, NB, 2HP) f32, pad == 0
    A = wa_ref.shape[1]
    U = jnp.tanh(jnp.dot(h.reshape(T * NBk, 2 * HP), wa_ref[...],
                         preferred_element_type=jnp.float32) + ba_ref[...])
    scores = jnp.sum(U.reshape(T, NBk, A) * ua_ref[...].reshape(1, 1, A),
                     axis=-1, keepdims=True)                # (T, NB, 1)
    t_idx = lax.broadcasted_iota(jnp.int32, (T, NBk, 1), 0)
    valid = t_idx < lenv.reshape(1, NBk, 1)
    scores = jnp.where(valid, scores, -1e30)                # finite "-inf" (no NaN)
    m = jnp.max(scores, axis=0, keepdims=True)
    e = jnp.where(valid, jnp.exp(scores - m), 0.0)
    denom = jnp.sum(e, axis=0, keepdims=True)
    a3 = e / jnp.maximum(denom, 1e-30)                      # length-0 -> all-zero weights
    pooled = jnp.sum(h * a3, axis=0)                        # (NB, 2HP), pad lanes == 0

    # (5) LayerNorm over the 2*HIDDEN true features (pad lanes are exactly zero, so
    #     the full-width sums equal the true-feature sums).
    nfeat = 2.0 * HIDDEN
    s1 = jnp.sum(pooled, axis=-1, keepdims=True)
    s2 = jnp.sum(pooled * pooled, axis=-1, keepdims=True)
    mean = s1 / nfeat
    var = jnp.maximum(s2 / nfeat - mean * mean, 0.0)
    rstd = lax.rsqrt(var + LN_EPS)
    normed = (pooled - mean) * rstd * gam_ref[...] + bet_ref[...]
    return normed, lenv


def word_level_kernel(blkmax_ref, x_ref, len_ref, wihf_ref, wihb_ref, bgf_ref, bgb_ref,
                      whhf_ref, whhb_ref, wa_ref, ba_ref, ua_ref, gam_ref, bet_ref,
                      out_ref, xpf_s, xpb_s, out_s):
    tmax = blkmax_ref[pl.program_id(0)]
    normed, lenv = _bilstm_attn_ln_body(
        tmax, x_ref, len_ref, wihf_ref, wihb_ref, bgf_ref, bgb_ref,
        whhf_ref, whhb_ref, wa_ref, ba_ref, ua_ref, gam_ref, bet_ref,
        xpf_s, xpb_s, out_s)
    # padded (length-0) sentences produce exact zeros; lane-dense (NB, 2*H_PAD) output
    out_ref[...] = jnp.where(lenv > 0, normed, 0.0)


def doc_level_kernel(blkmax_ref, x_ref, len_ref, wihf_ref, wihb_ref, bgf_ref, bgb_ref,
                     whhf_ref, whhb_ref, wa_ref, ba_ref, ua_ref, gam_ref, bet_ref,
                     wcls_ref, bcls_ref, out_ref, xpf_s, xpb_s, out_s):
    tmax = blkmax_ref[pl.program_id(0)]
    normed, _ = _bilstm_attn_ln_body(
        tmax, x_ref, len_ref, wihf_ref, wihb_ref, bgf_ref, bgb_ref,
        whhf_ref, whhb_ref, wa_ref, ba_ref, ua_ref, gam_ref, bet_ref,
        xpf_s, xpb_s, out_s)
    # fused final classifier (dropout is identity); weights already laid out in the
    # merged (fwd|bwd) 2*H_PAD space -> a single lane-dense matmul.
    out_ref[...] = (jnp.dot(normed, wcls_ref[...], preferred_element_type=jnp.float32)
                    + bcls_ref[...])


# ----------------------------- kernel wrapper --------------------------------
def fused_bilstm_attn_ln(x_tnd, lengths_n, lw, aw, classifier=None):
    """x_tnd: (T, N, D) f32 time-major, lengths_n: (N,) int32.

    Returns (N, 2*H_PAD) pooled+LayerNormed features in merged (fwd | bwd) padded
    layout (word level), or (N, NTAGS_PAD) classifier logits when `classifier` given.
    """
    T, N, D = x_tnd.shape
    nb = _choose_nb(T, D, N)
    Np = ((N + nb - 1) // nb) * nb
    if Np != N:                                   # pad batch to a multiple of the block
        x_tnd = jnp.pad(x_tnd, ((0, 0), (0, Np - N), (0, 0)))
        lengths_n = jnp.pad(lengths_n, (0, Np - N))
    len2 = lengths_n.astype(jnp.int32).reshape(Np, 1)
    nblk = Np // nb
    # per-block max length (scalar-prefetched) -> dynamic recurrence bound in-kernel
    blk_max = jnp.minimum(jnp.max(len2.reshape(nblk, nb), axis=-1), T).astype(jnp.int32)

    def rep(a):                                   # weight replicated across the grid
        return pl.BlockSpec(a.shape, lambda i, bm: (0,) * a.ndim)

    in_specs = [
        pl.BlockSpec((T, nb, D), lambda i, bm: (0, i, 0)),   # inputs, blocked over batch
        pl.BlockSpec((nb, 1), lambda i, bm: (i, 0)),         # lengths
        rep(lw["wih_f"]), rep(lw["wih_b"]), rep(lw["b_f"]), rep(lw["b_b"]),
        rep(lw["whh_f"]), rep(lw["whh_b"]),
        rep(aw["wa"]), rep(aw["b"]), rep(aw["u"]), rep(aw["gamma"]), rep(aw["beta"]),
    ]
    args = [x_tnd, len2,
            lw["wih_f"], lw["wih_b"], lw["b_f"], lw["b_b"], lw["whh_f"], lw["whh_b"],
            aw["wa"], aw["b"], aw["u"], aw["gamma"], aw["beta"]]

    if classifier is None:
        kernel = word_level_kernel
        out_dim = 2 * H_PAD
    else:
        kernel = doc_level_kernel
        wcls, bcls = classifier
        in_specs += [rep(wcls), rep(bcls)]
        args += [wcls, bcls]
        out_dim = wcls.shape[1]

    scratch = [
        pltpu.VMEM((T, nb, 4 * H_PAD), jnp.bfloat16),    # hoisted fwd input projection
        pltpu.VMEM((T, nb, 4 * H_PAD), jnp.bfloat16),    # hoisted bwd input projection
        pltpu.VMEM((T, nb, 2 * H_PAD), jnp.float32),     # merged (fwd|bwd) hidden stream
    ]

    grid_spec = pltpu.PrefetchScalarGridSpec(
        num_scalar_prefetch=1, grid=(nblk,),
        in_specs=in_specs,
        out_specs=pl.BlockSpec((nb, out_dim), lambda i, bm: (i, 0)),
        scratch_shapes=scratch)

    out = pl.pallas_call(
        kernel,
        out_shape=jax.ShapeDtypeStruct((Np, out_dim), jnp.float32),
        grid_spec=grid_spec,
        compiler_params=pltpu.CompilerParams(
            dimension_semantics=("parallel",),           # megacore-shardable
            vmem_limit_bytes=VMEM_LIMIT),
    )(blk_max, *args)
    return out[:N]


# ----------------------------- parameter packing ------------------------------
def _pad_gate_cols(w, H, HP):
    """(..., 4H) -> (..., 4HP): zero-pad each i/f/g/o gate block to HP lanes."""
    parts = []
    for k in range(4):
        g = w[..., k * H:(k + 1) * H]
        pad = [(0, 0)] * (g.ndim - 1) + [(0, HP - H)]
        parts.append(jnp.pad(g, pad))
    return jnp.concatenate(parts, axis=-1)


def _pack_lstm(lp):
    H, HP = HIDDEN, H_PAD
    return {
        # bf16 MXU operands (f32 accumulation happens in-kernel)
        "wih_f": _pad_gate_cols(lp["wih_f"], H, HP).astype(jnp.bfloat16),   # (D, 4HP)
        "wih_b": _pad_gate_cols(lp["wih_b"], H, HP).astype(jnp.bfloat16),
        "whh_f": jnp.pad(_pad_gate_cols(lp["whh_f"], H, HP),
                         ((0, HP - H), (0, 0))).astype(jnp.bfloat16),       # (HP, 4HP)
        "whh_b": jnp.pad(_pad_gate_cols(lp["whh_b"], H, HP),
                         ((0, HP - H), (0, 0))).astype(jnp.bfloat16),
        "b_f": _pad_gate_cols(lp["b_f"], H, HP),                            # (1, 4HP) f32
        "b_b": _pad_gate_cols(lp["b_b"], H, HP),
    }


def _pack_attn(w, b, u, gamma, beta):
    """Attention / LayerNorm params laid out in the merged (fwd|bwd) 2*H_PAD space."""
    H, HP = HIDDEN, H_PAD
    wa = jnp.zeros((2 * HP, ATTN), jnp.float32)
    wa = wa.at[0:H].set(w[:H]).at[HP:HP + H].set(w[H:])

    def split_pad(v):
        out = jnp.zeros((1, 2 * HP), jnp.float32)
        return out.at[0, 0:H].set(v[:H]).at[0, HP:HP + H].set(v[H:])

    return {"wa": wa,
            "b": b.reshape(1, -1).astype(jnp.float32),      # (1, A)
            "u": u.reshape(1, -1).astype(jnp.float32),      # (1, A)
            "gamma": split_pad(gamma), "beta": split_pad(beta)}


def pack_params(p):
    """Pack / pad / cast all kernel weights once (hoisted out of the forward)."""
    H, HP = HIDDEN, H_PAD
    wcls = jnp.zeros((2 * HP, NTAGS_PAD), jnp.float32)
    wcls = wcls.at[0:H, :NTAGS].set(p["w"][:H]).at[HP:HP + H, :NTAGS].set(p["w"][H:])
    bcls = jnp.pad(p["b"], (0, NTAGS_PAD - NTAGS)).reshape(1, NTAGS_PAD)
    return {
        "lstm_w": _pack_lstm(p["lstm_w"]),
        "lstm_d": _pack_lstm(p["lstm_d"]),
        "attn_w": _pack_attn(p["w_word"], p["b_word"], p["u_word"],
                             p["ln_w_gamma"], p["ln_w_beta"]),
        "attn_d": _pack_attn(p["w_s"], p["b_s"], p["u_s"],
                             p["ln_d_gamma"], p["ln_d_beta"]),
        "w_cls": wcls, "b_cls": bcls,
    }


# ----------------------------- parameter init --------------------------------
def xavier_uniform(key, shape):
    bound = math.sqrt(6.0 / (shape[0] + shape[1]))
    return jax.random.uniform(key, shape, jnp.float32, -bound, bound)


def sinusoidal_embedding(max_len, dim):
    position = jnp.arange(max_len, dtype=jnp.float32)[:, None]
    div_term = jnp.exp(jnp.arange(0, dim, 2, dtype=jnp.float32)
                       * -(math.log(10000.0) / dim))
    table = jnp.zeros((max_len, dim), jnp.float32)
    table = table.at[:, 0::2].set(jnp.sin(position * div_term))
    table = table.at[:, 1::2].set(jnp.cos(position * div_term))
    return table


def lstm_params(key, input_dim, hidden):
    ks = jax.random.split(key, 8)
    bnd = 1.0 / math.sqrt(hidden)
    u = lambda k, shp: jax.random.uniform(k, shp, jnp.float32, -bnd, bnd)
    return {
        "wih_f": u(ks[0], (input_dim, 4 * hidden)),
        "whh_f": u(ks[1], (hidden, 4 * hidden)),
        # bias_ih + bias_hh summed (matches PyTorch's two-bias parameterization)
        "b_f":   u(ks[2], (1, 4 * hidden)) + u(ks[3], (1, 4 * hidden)),
        "wih_b": u(ks[4], (input_dim, 4 * hidden)),
        "whh_b": u(ks[5], (hidden, 4 * hidden)),
        "b_b":   u(ks[6], (1, 4 * hidden)) + u(ks[7], (1, 4 * hidden)),
    }


def init_params(key):
    ks = jax.random.split(key, 8)
    return {
        "char_emb": xavier_uniform(ks[0], (VOCAB, DIM_WORD)),
        "pos_emb": sinusoidal_embedding(POS_VOCAB, DIM_WORD),
        "sent_pos_emb": sinusoidal_embedding(SENT_POS_VOCAB, DIM_SENT),
        "lstm_w": lstm_params(ks[1], DIM_WORD, HIDDEN),
        "lstm_d": lstm_params(ks[2], DIM_SENT, HIDDEN),
        "w": xavier_uniform(ks[3], (2 * HIDDEN, NTAGS)),
        "b": jnp.zeros((NTAGS,), jnp.float32),
        "w_word": xavier_uniform(ks[4], (2 * HIDDEN, ATTN)),
        "b_word": jnp.zeros((ATTN,), jnp.float32),
        "u_word": xavier_uniform(ks[5], (ATTN, 1)),
        "w_s": xavier_uniform(ks[6], (2 * HIDDEN, ATTN)),
        "b_s": jnp.zeros((ATTN,), jnp.float32),
        "u_s": xavier_uniform(ks[7], (ATTN, 1)),
        "ln_w_gamma": jnp.ones((2 * HIDDEN,), jnp.float32),
        "ln_w_beta": jnp.zeros((2 * HIDDEN,), jnp.float32),
        "ln_d_gamma": jnp.ones((2 * HIDDEN,), jnp.float32),
        "ln_d_beta": jnp.zeros((2 * HIDDEN,), jnp.float32),
    }


# ----------------------------- host-side length tables ------------------------
def build_length_tables(document_lengths, sentence_lengths, B, S):
    """Dense (B*S,) word-count table + (B,) doc-length table, built once on host."""
    sent_len_full = np.zeros((B, S), np.int32)
    pos = 0
    for i in range(B):
        L = int(document_lengths[i])
        sent_len_full[i, :L] = np.asarray(sentence_lengths[pos:pos + L], np.int32)
        pos += L
    assert pos == len(sentence_lengths)
    return (jnp.asarray(sent_len_full.reshape(B * S)),
            jnp.asarray(np.asarray(document_lengths, np.int32)))


# ----------------------------- forward pass --------------------------------
@jax.jit
def document_model_forward(params, packed, word_ids, position_ids, sentence_ids,
                           sent_len, doc_len):
    B, S, W = word_ids.shape

    word_emb = params["char_emb"][word_ids]                    # (B, S, W, 128)
    pos_emb = params["pos_emb"][position_ids]                  # (B, S, W, 128)
    sent_emb = params["sent_pos_emb"][sentence_ids]            # (B, S, 300)
    combined = (word_emb + pos_emb).astype(jnp.float32)
    # TODO(synk): nn.Dropout applied as identity (p=0.0 / eval mode) for determinism.

    # ---- word level: fused BiLSTM + masked attention + LayerNorm ----
    x_w = jnp.transpose(combined.reshape(B * S, W, DIM_WORD), (1, 0, 2))  # (W, B*S, 128)
    pooled512 = fused_bilstm_attn_ln(x_w, sent_len,
                                     packed["lstm_w"], packed["attn_w"])  # (B*S, 512)
    # reassemble the merged (fwd|bwd) padded halves into the 300-wide representation
    pooled_w = jnp.concatenate([pooled512[:, :HIDDEN],
                                pooled512[:, H_PAD:H_PAD + HIDDEN]], axis=-1)
    reshaped_outputs = pooled_w.reshape(B, S, DIM_SENT)        # zeros at padded sentences

    sentence_representation = sent_emb.astype(jnp.float32) + reshaped_outputs

    # ---- document level: fused BiLSTM + attention + LayerNorm + classifier ----
    x_d = jnp.transpose(sentence_representation, (1, 0, 2))    # (S, B, 300)
    pred = fused_bilstm_attn_ln(
        x_d, doc_len, packed["lstm_d"], packed["attn_d"],
        classifier=(packed["w_cls"], packed["b_cls"]))         # (B, NTAGS_PAD)
    return pred[:, :NTAGS]


# ----------------------------- main --------------------------------
if __name__ == "__main__":
    key = jax.random.PRNGKey(0)
    k_params, k1, k2, k3 = jax.random.split(key, 4)

    B, S, W = 2, 3, 8                       # batch, max sentences, max words/sentence
    document_lengths = [3, 2]               # sentences per document (max == S)
    sentence_lengths = [8, 5, 3, 8, 6]      # words per valid sentence, flattened

    word_ids = jax.random.randint(k1, (B, S, W), 1, VOCAB, dtype=jnp.int32)
    position_ids = jax.random.randint(k2, (B, S, W), 1, 200, dtype=jnp.int32)
    sentence_ids = jax.random.randint(k3, (B, S), 1, 100, dtype=jnp.int32)

    params = init_params(k_params)
    packed = pack_params(params)            # hoisted: packed/padded/cast once, reused
    sent_len, doc_len = build_length_tables(document_lengths, sentence_lengths, B, S)

    out = document_model_forward(params, packed, word_ids, position_ids, sentence_ids,
                                 sent_len, doc_len)
    out = jax.block_until_ready(out)
    assert out.shape == (B, NTAGS), out.shape
    assert bool(jnp.all(jnp.isfinite(out)))
    print("KERNEL_OK")
</pallas_src>

<mosaic_0001>
module attributes {stable_mosaic.version = 11 : i64} {
  func.func @word_level_kernel(%arg0: i32, %arg1: memref<1xi32, #tpu.memory_space<smem>>, %arg2: memref<8x8x128xf32, #tpu.memory_space<vmem>>, %arg3: memref<8x1xi32, #tpu.memory_space<vmem>>, %arg4: memref<128x1024xbf16, #tpu.memory_space<vmem>>, %arg5: memref<128x1024xbf16, #tpu.memory_space<vmem>>, %arg6: memref<1x1024xf32, #tpu.memory_space<vmem>>, %arg7: memref<1x1024xf32, #tpu.memory_space<vmem>>, %arg8: memref<256x1024xbf16, #tpu.memory_space<vmem>>, %arg9: memref<256x1024xbf16, #tpu.memory_space<vmem>>, %arg10: memref<512x32xf32, #tpu.memory_space<vmem>>, %arg11: memref<1x32xf32, #tpu.memory_space<vmem>>, %arg12: memref<1x32xf32, #tpu.memory_space<vmem>>, %arg13: memref<1x512xf32, #tpu.memory_space<vmem>>, %arg14: memref<1x512xf32, #tpu.memory_space<vmem>>, %arg15: memref<8x512xf32, #tpu.memory_space<vmem>>, %arg16: memref<8x8x1024xbf16, #tpu.memory_space<vmem>>, %arg17: memref<8x8x1024xbf16, #tpu.memory_space<vmem>>, %arg18: memref<8x8x512xf32, #tpu.memory_space<vmem>>) attributes {dimension_semantics = [#tpu.dimension_semantics<parallel>], iteration_bounds = array<i64: 1>, scalar_prefetch = 1 : i64, scratch_operands = 3 : i64, tpu.core_type = #tpu.core_type<tc>, window_params = [{transform_indices = @transform_0, window_bounds = array<i64: 8, 8, 128>}, {transform_indices = @transform_1, window_bounds = array<i64: 8, 1>}, {pipeline_mode = #tpu.pipeline_mode<synchronous>, transform_indices = @transform_2, window_bounds = array<i64: 128, 1024>}, {pipeline_mode = #tpu.pipeline_mode<synchronous>, transform_indices = @transform_3, window_bounds = array<i64: 128, 1024>}, {pipeline_mode = #tpu.pipeline_mode<synchronous>, transform_indices = @transform_4, window_bounds = array<i64: 1, 1024>}, {pipeline_mode = #tpu.pipeline_mode<synchronous>, transform_indices = @transform_5, window_bounds = array<i64: 1, 1024>}, {pipeline_mode = #tpu.pipeline_mode<synchronous>, transform_indices = @transform_6, window_bounds = array<i64: 256, 1024>}, {pipeline_mode = #tpu.pipeline_mode<synchronous>, transform_indices = @transform_7, window_bounds = array<i64: 256, 1024>}, {pipeline_mode = #tpu.pipeline_mode<synchronous>, transform_indices = @transform_8, window_bounds = array<i64: 512, 32>}, {pipeline_mode = #tpu.pipeline_mode<synchronous>, transform_indices = @transform_9, window_bounds = array<i64: 1, 32>}, {pipeline_mode = #tpu.pipeline_mode<synchronous>, transform_indices = @transform_10, window_bounds = array<i64: 1, 32>}, {pipeline_mode = #tpu.pipeline_mode<synchronous>, transform_indices = @transform_11, window_bounds = array<i64: 1, 512>}, {pipeline_mode = #tpu.pipeline_mode<synchronous>, transform_indices = @transform_12, window_bounds = array<i64: 1, 512>}, {transform_indices = @transform_13, window_bounds = array<i64: 8, 512>}]} {
    %0 = arith.index_cast %arg0 : i32 to index
    %1 = memref.load %arg1[%0] : memref<1xi32, #tpu.memory_space<smem>>
    %c0 = arith.constant 0 : index
    %c0_0 = arith.constant 0 : index
    %c0_1 = arith.constant 0 : index
    %2 = vector.load %arg2[%c0, %c0_0, %c0_1] : memref<8x8x128xf32, #tpu.memory_space<vmem>>, vector<8x8x128xf32>
    %3 = arith.truncf %2 : vector<8x8x128xf32> to vector<8x8x128xbf16>
    %4 = vector.shape_cast %3 : vector<8x8x128xbf16> to vector<64x128xbf16>
    %c0_2 = arith.constant 0 : index
    %c0_3 = arith.constant 0 : index
    %5 = vector.load %arg4[%c0_2, %c0_3] : memref<128x1024xbf16, #tpu.memory_space<vmem>>, vector<128x1024xbf16>
    %cst = arith.constant dense<0.000000e+00> : vector<64x1024xf32>
    %6 = tpu.matmul %4, %5, %cst {dimension_numbers = #tpu.dot_dimension_numbers<[1], [0], [0], [1], [0, 0, 1, 1], [], []>} : vector<64x128xbf16>, vector<128x1024xbf16>, vector<64x1024xf32> -> vector<64x1024xf32>
    %c0_4 = arith.constant 0 : index
    %c0_5 = arith.constant 0 : index
    %7 = vector.load %arg6[%c0_4, %c0_5] : memref<1x1024xf32, #tpu.memory_space<vmem>>, vector<1x1024xf32>
    %8 = vector.broadcast %7 : vector<1x1024xf32> to vector<64x1024xf32>
    %9 = arith.addf %6, %8 : vector<64x1024xf32>
    %10 = arith.truncf %9 : vector<64x1024xf32> to vector<64x1024xbf16>
    %11 = vector.shape_cast %10 : vector<64x1024xbf16> to vector<8x8x1024xbf16>
    %c0_6 = arith.constant 0 : index
    %c0_7 = arith.constant 0 : index
    %c0_8 = arith.constant 0 : index
    %12 = vector.load %arg16[%c0_6, %c0_7, %c0_8] : memref<8x8x1024xbf16, #tpu.memory_space<vmem>>, vector<8x8x1024xbf16>
    tpu.vector_store %arg16[%c0_6, %c0_7, %c0_8], %11 {strides = array<i32>} : memref<8x8x1024xbf16, #tpu.memory_space<vmem>>, vector<8x8x1024xbf16>,
    %c0_9 = arith.constant 0 : index
    %c0_10 = arith.constant 0 : index
    %13 = vector.load %arg5[%c0_9, %c0_10] : memref<128x1024xbf16, #tpu.memory_space<vmem>>, vector<128x1024xbf16>
    %cst_11 = arith.constant dense<0.000000e+00> : vector<64x1024xf32>
    %14 = tpu.matmul %4, %13, %cst_11 {dimension_numbers = #tpu.dot_dimension_numbers<[1], [0], [0], [1], [0, 0, 1, 1], [], []>} : vector<64x128xbf16>, vector<128x1024xbf16>, vector<64x1024xf32> -> vector<64x1024xf32>
    %c0_12 = arith.constant 0 : index
    %c0_13 = arith.constant 0 : index
    %15 = vector.load %arg7[%c0_12, %c0_13] : memref<1x1024xf32, #tpu.memory_space<vmem>>, vector<1x1024xf32>
    %16 = vector.broadcast %15 : vector<1x1024xf32> to vector<64x1024xf32>
    %17 = arith.addf %14, %16 : vector<64x1024xf32>
    %18 = arith.truncf %17 : vector<64x1024xf32> to vector<64x1024xbf16>
    %19 = vector.shape_cast %18 : vector<64x1024xbf16> to vector<8x8x1024xbf16>
    %c0_14 = arith.constant 0 : index
    %c0_15 = arith.constant 0 : index
    %c0_16 = arith.constant 0 : index
    %20 = vector.load %arg17[%c0_14, %c0_15, %c0_16] : memref<8x8x1024xbf16, #tpu.memory_space<vmem>>, vector<8x8x1024xbf16>
    tpu.vector_store %arg17[%c0_14, %c0_15, %c0_16], %19 {strides = array<i32>} : memref<8x8x1024xbf16, #tpu.memory_space<vmem>>, vector<8x8x1024xbf16>,
    %cst_17 = arith.constant 0.000000e+00 : f32
    %21 = vector.broadcast %cst_17 : f32 to vector<8x8x512xf32>
    %c0_18 = arith.constant 0 : index
    %c0_19 = arith.constant 0 : index
    %c0_20 = arith.constant 0 : index
    %22 = vector.load %arg18[%c0_18, %c0_19, %c0_20] : memref<8x8x512xf32, #tpu.memory_space<vmem>>, vector<8x8x512xf32>
    tpu.vector_store %arg18[%c0_18, %c0_19, %c0_20], %21 {strides = array<i32>} : memref<8x8x512xf32, #tpu.memory_space<vmem>>, vector<8x8x512xf32>,
    %c0_21 = arith.constant 0 : index
    %c0_22 = arith.constant 0 : index
    %23 = vector.load %arg3[%c0_21, %c0_22] : memref<8x1xi32, #tpu.memory_space<vmem>>, vector<8x1xi32>
    %cst_23 = arith.constant 0.000000e+00 : f32
    %24 = vector.broadcast %cst_23 : f32 to vector<8x256xf32>
    %c0_i32 = arith.constant 0 : i32
    %25 = arith.subi %1, %c0_i32 : i32
    %26 = arith.addi %c0_i32, %25 : i32
    %c1_i32 = arith.constant 1 : i32
    %27:4 = scf.for %arg19 = %c0_i32 to %26 step %c1_i32 iter_args(%arg20 = %24, %arg21 = %24, %arg22 = %24, %arg23 = %24) -> (vector<8x256xf32>, vector<8x256xf32>, vector<8x256xf32>, vector<8x256xf32>)  : i32 {
      %c1_i32_55 = arith.constant 1 : i32
      %98 = arith.subi %1, %c1_i32_55 : i32
      %99 = arith.subi %98, %arg19 : i32
      %100 = arith.truncf %arg20 : vector<8x256xf32> to vector<8x256xbf16>
      %c0_56 = arith.constant 0 : index
      %c0_57 = arith.constant 0 : index
      %101 = vector.load %arg8[%c0_56, %c0_57] : memref<256x1024xbf16, #tpu.memory_space<vmem>>, vector<256x1024xbf16>
      %cst_58 = arith.constant dense<0.000000e+00> : vector<8x1024xf32>
      %102 = tpu.matmul %100, %101, %cst_58 {dimension_numbers = #tpu.dot_dimension_numbers<[1], [0], [0], [1], [0, 0, 1, 1], [], []>} : vector<8x256xbf16>, vector<256x1024xbf16>, vector<8x1024xf32> -> vector<8x1024xf32>
      %103 = arith.index_cast %arg19 : i32 to index
      %c0_59 = arith.constant 0 : index
      %c0_60 = arith.constant 0 : index
      %104 = vector.load %arg16[%103, %c0_59, %c0_60] : memref<8x8x1024xbf16, #tpu.memory_space<vmem>>, vector<1x8x1024xbf16>
      %105 = vector.shape_cast %104 : vector<1x8x1024xbf16> to vector<8x1024xbf16>
      %106 = arith.extf %105 : vector<8x1024xbf16> to vector<8x1024xf32>
      %107 = arith.addf %102, %106 : vector<8x1024xf32>
      %108 = arith.truncf %arg22 : vector<8x256xf32> to vector<8x256xbf16>
      %c0_61 = arith.constant 0 : index
      %c0_62 = arith.constant 0 : index
      %109 = vector.load %arg9[%c0_61, %c0_62] : memref<256x1024xbf16, #tpu.memory_space<vmem>>, vector<256x1024xbf16>
      %cst_63 = arith.constant dense<0.000000e+00> : vector<8x1024xf32>
      %110 = tpu.matmul %108, %109, %cst_63 {dimension_numbers = #tpu.dot_dimension_numbers<[1], [0], [0], [1], [0, 0, 1, 1], [], []>} : vector<8x256xbf16>, vector<256x1024xbf16>, vector<8x1024xf32> -> vector<8x1024xf32>
      %111 = arith.index_cast %99 : i32 to index
      %c0_64 = arith.constant 0 : index
      %c0_65 = arith.constant 0 : index
      %112 = vector.load %arg17[%111, %c0_64, %c0_65] : memref<8x8x1024xbf16, #tpu.memory_space<vmem>>, vector<1x8x1024xbf16>
      %113 = vector.shape_cast %112 : vector<1x8x1024xbf16> to vector<8x1024xbf16>
      %114 = arith.extf %113 : vector<8x1024xbf16> to vector<8x1024xf32>
      %115 = arith.addf %110, %114 : vector<8x1024xf32>
      %116 = vector.extract_strided_slice %107 {offsets = [0, 0], sizes = [8, 256], strides = [1, 1]} : vector<8x1024xf32> to vector<8x256xf32>
      %117 = arith.negf %116 : vector<8x256xf32>
      %118 = math.exp %117 : vector<8x256xf32>
      %cst_66 = arith.constant 1.000000e+00 : f32
      %119 = vector.broadcast %cst_66 : f32 to vector<8x256xf32>
      %120 = arith.addf %119, %118 : vector<8x256xf32>
      %121 = arith.divf %119, %120 : vector<8x256xf32>
      %122 = vector.extract_strided_slice %107 {offsets = [0, 256], sizes = [8, 256], strides = [1, 1]} : vector<8x1024xf32> to vector<8x256xf32>
      %123 = arith.negf %122 : vector<8x256xf32>
      %124 = math.exp %123 : vector<8x256xf32>
      %cst_67 = arith.constant 1.000000e+00 : f32
      %125 = vector.broadcast %cst_67 : f32 to vector<8x256xf32>
      %126 = arith.addf %125, %124 : vector<8x256xf32>
      %127 = arith.divf %125, %126 : vector<8x256xf32>
      %128 = vector.extract_strided_slice %107 {offsets = [0, 512], sizes = [8, 256], strides = [1, 1]} : vector<8x1024xf32> to vector<8x256xf32>
      %129 = math.tanh %128 : vector<8x256xf32>
      %130 = vector.extract_strided_slice %107 {offsets = [0, 768], sizes = [8, 256], strides = [1, 1]} : vector<8x1024xf32> to vector<8x256xf32>
      %131 = arith.negf %130 : vector<8x256xf32>
      %132 = math.exp %131 : vector<8x256xf32>
      %cst_68 = arith.constant 1.000000e+00 : f32
      %133 = vector.broadcast %cst_68 : f32 to vector<8x256xf32>
      %134 = arith.addf %133, %132 : vector<8x256xf32>
      %135 = arith.divf %133, %134 : vector<8x256xf32>
      %136 = arith.mulf %127, %arg21 : vector<8x256xf32>
      %137 = arith.mulf %121, %129 : vector<8x256xf32>
      %138 = arith.addf %136, %137 : vector<8x256xf32>
      %139 = math.tanh %138 : vector<8x256xf32>
      %140 = arith.mulf %135, %139 : vector<8x256xf32>
      %141 = vector.extract_strided_slice %115 {offsets = [0, 0], sizes = [8, 256], strides = [1, 1]} : vector<8x1024xf32> to vector<8x256xf32>
      %142 = arith.negf %141 : vector<8x256xf32>
      %143 = math.exp %142 : vector<8x256xf32>
      %cst_69 = arith.constant 1.000000e+00 : f32
      %144 = vector.broadcast %cst_69 : f32 to vector<8x256xf32>
      %145 = arith.addf %144, %143 : vector<8x256xf32>
      %146 = arith.divf %144, %145 : vector<8x256xf32>
      %147 = vector.extract_strided_slice %115 {offsets = [0, 256], sizes = [8, 256], strides = [1, 1]} : vector<8x1024xf32> to vector<8x256xf32>
      %148 = arith.negf %147 : vector<8x256xf32>
      %149 = math.exp %148 : vector<8x256xf32>
      %cst_70 = arith.constant 1.000000e+00 : f32
      %150 = vector.broadcast %cst_70 : f32 to vector<8x256xf32>
      %151 = arith.addf %150, %149 : vector<8x256xf32>
      %152 = arith.divf %150, %151 : vector<8x256xf32>
      %153 = vector.extract_strided_slice %115 {offsets = [0, 512], sizes = [8, 256], strides = [1, 1]} : vector<8x1024xf32> to vector<8x256xf32>
      %154 = math.tanh %153 : vector<8x256xf32>
      %155 = vector.extract_strided_slice %115 {offsets = [0, 768], sizes = [8, 256], strides = [1, 1]} : vector<8x1024xf32> to vector<8x256xf32>
      %156 = arith.negf %155 : vector<8x256xf32>
      %157 = math.exp %156 : vector<8x256xf32>
      %cst_71 = arith.constant 1.000000e+00 : f32
      %158 = vector.broadcast %cst_71 : f32 to vector<8x256xf32>
      %159 = arith.addf %158, %157 : vector<8x256xf32>
      %160 = arith.divf %158, %159 : vector<8x256xf32>
      %161 = arith.mulf %152, %arg23 : vector<8x256xf32>
      %162 = arith.mulf %146, %154 : vector<8x256xf32>
      %163 = arith.addf %161, %162 : vector<8x256xf32>
      %164 = math.tanh %163 : vector<8x256xf32>
      %165 = arith.mulf %160, %164 : vector<8x256xf32>
      %166 = vector.broadcast %arg19 : i32 to vector<8x1xi32>
      %167 = arith.cmpi slt, %166, %23 : vector<8x1xi32>
      %168 = vector.broadcast %99 : i32 to vector<8x1xi32>
      %169 = arith.cmpi slt, %168, %23 : vector<8x1xi32>
      %cst_72 = arith.constant 0.000000e+00 : f32
      %170 = vector.shape_cast %167 : vector<8x1xi1> to vector<8x1xi1>
      %171 = vector.broadcast %170 : vector<8x1xi1> to vector<8x256xi1>
      %172 = vector.broadcast %cst_72 : f32 to vector<8x256xf32>
      %173 = arith.select %171, %140, %172 : vector<8x256xi1>, vector<8x256xf32>
      %174 = arith.index_cast %arg19 : i32 to index
      %c0_73 = arith.constant 0 : index
      %c0_74 = arith.constant 0 : index
      %175 = vector.load %arg18[%174, %c0_73, %c0_74] : memref<8x8x512xf32, #tpu.memory_space<vmem>>, vector<1x8x256xf32>
      %176 = vector.shape_cast %175 : vector<1x8x256xf32> to vector<8x256xf32>
      %177 = vector.shape_cast %173 : vector<8x256xf32> to vector<1x8x256xf32>
      tpu.vector_store %arg18[%174, %c0_73, %c0_74], %177 {strides = array<i32>} : memref<8x8x512xf32, #tpu.memory_space<vmem>>, vector<1x8x256xf32>,
      %cst_75 = arith.constant 0.000000e+00 : f32
      %178 = vector.shape_cast %169 : vector<8x1xi1> to vector<8x1xi1>
      %179 = vector.broadcast %178 : vector<8x1xi1> to vector<8x256xi1>
      %180 = vector.broadcast %cst_75 : f32 to vector<8x256xf32>
      %181 = arith.select %179, %165, %180 : vector<8x256xi1>, vector<8x256xf32>
      %182 = arith.index_cast %99 : i32 to index
      %c0_76 = arith.constant 0 : index
      %c256 = arith.constant 256 : index
      %183 = vector.load %arg18[%182, %c0_76, %c256] : memref<8x8x512xf32, #tpu.memory_space<vmem>>, vector<1x8x256xf32>
      %184 = vector.shape_cast %183 : vector<1x8x256xf32> to vector<8x256xf32>
      %185 = vector.shape_cast %181 : vector<8x256xf32> to vector<1x8x256xf32>
      tpu.vector_store %arg18[%182, %c0_76, %c256], %185 {strides = array<i32>} : memref<8x8x512xf32, #tpu.memory_space<vmem>>, vector<1x8x256xf32>,
      %186 = vector.shape_cast %167 : vector<8x1xi1> to vector<8x1xi1>
      %187 = vector.broadcast %186 : vector<8x1xi1> to vector<8x256xi1>
      %188 = arith.select %187, %140, %arg20 : vector<8x256xi1>, vector<8x256xf32>
      %189 = vector.shape_cast %167 : vector<8x1xi1> to vector<8x1xi1>
      %190 = vector.broadcast %189 : vector<8x1xi1> to vector<8x256xi1>
      %191 = arith.select %190, %138, %arg21 : vector<8x256xi1>, vector<8x256xf32>
      %192 = vector.shape_cast %169 : vector<8x1xi1> to vector<8x1xi1>
      %193 = vector.broadcast %192 : vector<8x1xi1> to vector<8x256xi1>
      %194 = arith.select %193, %165, %arg22 : vector<8x256xi1>, vector<8x256xf32>
      %195 = vector.shape_cast %169 : vector<8x1xi1> to vector<8x1xi1>
      %196 = vector.broadcast %195 : vector<8x1xi1> to vector<8x256xi1>
      %197 = arith.select %196, %163, %arg23 : vector<8x256xi1>, vector<8x256xf32>
      scf.yield %188, %191, %194, %197 : vector<8x256xf32>, vector<8x256xf32>, vector<8x256xf32>, vector<8x256xf32>
    }
    %c0_24 = arith.constant 0 : index
    %c0_25 = arith.constant 0 : index
    %c0_26 = arith.constant 0 : index
    %28 = vector.load %arg18[%c0_24, %c0_25, %c0_26] : memref<8x8x512xf32, #tpu.memory_space<vmem>>, vector<8x8x512xf32>
    %29 = vector.shape_cast %28 : vector<8x8x512xf32> to vector<64x512xf32>
    %c0_27 = arith.constant 0 : index
    %c0_28 = arith.constant 0 : index
    %30 = vector.load %arg10[%c0_27, %c0_28] : memref<512x32xf32, #tpu.memory_space<vmem>>, vector<512x32xf32>
    %cst_29 = arith.constant dense<0.000000e+00> : vector<64x32xf32>
    %31 = tpu.matmul %29, %30, %cst_29 {dimension_numbers = #tpu.dot_dimension_numbers<[1], [0], [0], [1], [0, 0, 1, 1], [], []>} : vector<64x512xf32>, vector<512x32xf32>, vector<64x32xf32> -> vector<64x32xf32>
    %c0_30 = arith.constant 0 : index
    %c0_31 = arith.constant 0 : index
    %32 = vector.load %arg11[%c0_30, %c0_31] : memref<1x32xf32, #tpu.memory_space<vmem>>, vector<1x32xf32>
    %33 = vector.broadcast %32 : vector<1x32xf32> to vector<64x32xf32>
    %34 = arith.addf %31, %33 : vector<64x32xf32>
    %35 = math.tanh %34 : vector<64x32xf32>
    %36 = vector.shape_cast %35 : vector<64x32xf32> to vector<8x8x32xf32>
    %c0_32 = arith.constant 0 : index
    %c0_33 = arith.constant 0 : index
    %37 = vector.load %arg12[%c0_32, %c0_33] : memref<1x32xf32, #tpu.memory_space<vmem>>, vector<1x32xf32>
    %38 = vector.shape_cast %37 : vector<1x32xf32> to vector<1x1x32xf32>
    %39 = vector.broadcast %38 : vector<1x1x32xf32> to vector<8x8x32xf32>
    %40 = arith.mulf %36, %39 : vector<8x8x32xf32>
    %cst_34 = arith.constant dense<0.000000e+00> : vector<8x8xf32>
    %41 = vector.multi_reduction <add>, %40, %cst_34 [2] : vector<8x8x32xf32> to vector<8x8xf32>
    %42 = vector.shape_cast %41 : vector<8x8xf32> to vector<8x8x1xf32>
    %43 = tpu.iota {dimensions = array<i32: 0>} : vector<8x8x1xi32>
    %44 = vector.shape_cast %23 : vector<8x1xi32> to vector<1x8x1xi32>
    %45 = vector.broadcast %44 : vector<1x8x1xi32> to vector<8x8x1xi32>
    %46 = arith.cmpi slt, %43, %45 : vector<8x8x1xi32>
    %cst_35 = arith.constant -1.000000e+30 : f32
    %47 = vector.broadcast %cst_35 : f32 to vector<8x8x1xf32>
    %48 = arith.select %46, %42, %47 : vector<8x8x1xi1>, vector<8x8x1xf32>
    %cst_36 = arith.constant dense<0xFF800000> : vector<8x1xf32>
    %49 = vector.multi_reduction <maximumf>, %48, %cst_36 [0] : vector<8x8x1xf32> to vector<8x1xf32>
    %50 = vector.shape_cast %49 : vector<8x1xf32> to vector<1x8x1xf32>
    %51 = vector.broadcast %50 : vector<1x8x1xf32> to vector<8x8x1xf32>
    %52 = arith.subf %48, %51 : vector<8x8x1xf32>
    %53 = math.exp %52 : vector<8x8x1xf32>
    %cst_37 = arith.constant 0.000000e+00 : f32
    %54 = vector.broadcast %cst_37 : f32 to vector<8x8x1xf32>
    %55 = arith.select %46, %53, %54 : vector<8x8x1xi1>, vector<8x8x1xf32>
    %cst_38 = arith.constant dense<0.000000e+00> : vector<8x1xf32>
    %56 = vector.multi_reduction <add>, %55, %cst_38 [0] : vector<8x8x1xf32> to vector<8x1xf32>
    %57 = vector.shape_cast %56 : vector<8x1xf32> to vector<1x8x1xf32>
    %cst_39 = arith.constant 1.000000e-30 : f32
    %58 = vector.broadcast %cst_39 : f32 to vector<1x8x1xf32>
    %59 = arith.maximumf %57, %58 : vector<1x8x1xf32>
    %60 = vector.broadcast %59 : vector<1x8x1xf32> to vector<8x8x1xf32>
    %61 = arith.divf %55, %60 : vector<8x8x1xf32>
    %62 = vector.broadcast %61 : vector<8x8x1xf32> to vector<8x8x512xf32>
    %63 = arith.mulf %28, %62 : vector<8x8x512xf32>
    %cst_40 = arith.constant dense<0.000000e+00> : vector<8x512xf32>
    %64 = vector.multi_reduction <add>, %63, %cst_40 [0] : vector<8x8x512xf32> to vector<8x512xf32>
    %cst_41 = arith.constant dense<0.000000e+00> : vector<8xf32>
    %65 = vector.multi_reduction <add>, %64, %cst_41 [1] : vector<8x512xf32> to vector<8xf32>
    %66 = vector.shape_cast %65 : vector<8xf32> to vector<8x1xf32>
    %67 = arith.mulf %64, %64 : vector<8x512xf32>
    %cst_42 = arith.constant dense<0.000000e+00> : vector<8xf32>
    %68 = vector.multi_reduction <add>, %67, %cst_42 [1] : vector<8x512xf32> to vector<8xf32>
    %69 = vector.shape_cast %68 : vector<8xf32> to vector<8x1xf32>
    %cst_43 = arith.constant 3.000000e+02 : f32
    %70 = vector.broadcast %cst_43 : f32 to vector<8x1xf32>
    %71 = arith.divf %66, %70 : vector<8x1xf32>
    %cst_44 = arith.constant 3.000000e+02 : f32
    %72 = vector.broadcast %cst_44 : f32 to vector<8x1xf32>
    %73 = arith.divf %69, %72 : vector<8x1xf32>
    %74 = arith.mulf %71, %71 : vector<8x1xf32>
    %75 = arith.subf %73, %74 : vector<8x1xf32>
    %cst_45 = arith.constant 0.000000e+00 : f32
    %76 = vector.broadcast %cst_45 : f32 to vector<8x1xf32>
    %77 = arith.maximumf %75, %76 : vector<8x1xf32>
    %cst_46 = arith.constant 9.99999974E-6 : f32
    %78 = vector.broadcast %cst_46 : f32 to vector<8x1xf32>
    %79 = arith.addf %77, %78 : vector<8x1xf32>
    %80 = math.rsqrt %79 : vector<8x1xf32>
    %81 = vector.broadcast %71 : vector<8x1xf32> to vector<8x512xf32>
    %82 = arith.subf %64, %81 : vector<8x512xf32>
    %83 = vector.broadcast %80 : vector<8x1xf32> to vector<8x512xf32>
    %84 = arith.mulf %82, %83 : vector<8x512xf32>
    %c0_47 = arith.constant 0 : index
    %c0_48 = arith.constant 0 : index
    %85 = vector.load %arg13[%c0_47, %c0_48] : memref<1x512xf32, #tpu.memory_space<vmem>>, vector<1x512xf32>
    %86 = vector.broadcast %85 : vector<1x512xf32> to vector<8x512xf32>
    %87 = arith.mulf %84, %86 : vector<8x512xf32>
    %c0_49 = arith.constant 0 : index
    %c0_50 = arith.constant 0 : index
    %88 = vector.load %arg14[%c0_49, %c0_50] : memref<1x512xf32, #tpu.memory_space<vmem>>, vector<1x512xf32>
    %89 = vector.broadcast %88 : vector<1x512xf32> to vector<8x512xf32>
    %90 = arith.addf %87, %89 : vector<8x512xf32>
    %c0_i32_51 = arith.constant 0 : i32
    %91 = vector.broadcast %c0_i32_51 : i32 to vector<8x1xi32>
    %92 = arith.cmpi sgt, %23, %91 : vector<8x1xi32>
    %cst_52 = arith.constant 0.000000e+00 : f32
    %93 = vector.shape_cast %92 : vector<8x1xi1> to vector<8x1xi1>
    %94 = vector.broadcast %93 : vector<8x1xi1> to vector<8x512xi1>
    %95 = vector.broadcast %cst_52 : f32 to vector<8x512xf32>
    %96 = arith.select %94, %90, %95 : vector<8x512xi1>, vector<8x512xf32>
    %c0_53 = arith.constant 0 : index
    %c0_54 = arith.constant 0 : index
    %97 = vector.load %arg15[%c0_53, %c0_54] : memref<8x512xf32, #tpu.memory_space<vmem>>, vector<8x512xf32>
    tpu.vector_store %arg15[%c0_53, %c0_54], %96 {strides = array<i32>} : memref<8x512xf32, #tpu.memory_space<vmem>>, vector<8x512xf32>,
    return
  }
  func.func @transform_0(%arg0: i32, %arg1: memref<1xi32, #tpu.memory_space<smem>>) -> (i32, i32, i32) {
    %c0_i32 = arith.constant 0 : i32
    %c0_i32_0 = arith.constant 0 : i32
    %c0_i32_1 = arith.constant 0 : i32
    return %c0_i32, %arg0, %c0_i32_0 : i32, i32, i32
  }
  func.func @transform_1(%arg0: i32, %arg1: memref<1xi32, #tpu.memory_space<smem>>) -> (i32, i32) {
    %c0_i32 = arith.constant 0 : i32
    %c0_i32_0 = arith.constant 0 : i32
    return %arg0, %c0_i32 : i32, i32
  }
  func.func @transform_2(%arg0: i32, %arg1: memref<1xi32, #tpu.memory_space<smem>>) -> (i32, i32) {
    %c0_i32 = arith.constant 0 : i32
    %c0_i32_0 = arith.constant 0 : i32
    %c0_i32_1 = arith.constant 0 : i32
    return %c0_i32, %c0_i32_0 : i32, i32
  }
  func.func @transform_3(%arg0: i32, %arg1: memref<1xi32, #tpu.memory_space<smem>>) -> (i32, i32) {
    %c0_i32 = arith.constant 0 : i32
    %c0_i32_0 = arith.constant 0 : i32
    %c0_i32_1 = arith.constant 0 : i32
    return %c0_i32, %c0_i32_0 : i32, i32
  }
  func.func @transform_4(%arg0: i32, %arg1: memref<1xi32, #tpu.memory_space<smem>>) -> (i32, i32) {
    %c0_i32 = arith.constant 0 : i32
    %c0_i32_0 = arith.constant 0 : i32
    %c0_i32_1 = arith.constant 0 : i32
    return %c0_i32, %c0_i32_0 : i32, i32
  }
  func.func @transform_5(%arg0: i32, %arg1: memref<1xi32, #tpu.memory_space<smem>>) -> (i32, i32) {
    %c0_i32 = arith.constant 0 : i32
    %c0_i32_0 = arith.constant 0 : i32
    %c0_i32_1 = arith.constant 0 : i32
    return %c0_i32, %c0_i32_0 : i32, i32
  }
  func.func @transform_6(%arg0: i32, %arg1: memref<1xi32, #tpu.memory_space<smem>>) -> (i32, i32) {
    %c0_i32 = arith.constant 0 : i32
    %c0_i32_0 = arith.constant 0 : i32
    %c0_i32_1 = arith.constant 0 : i32
    return %c0_i32, %c0_i32_0 : i32, i32
  }
  func.func @transform_7(%arg0: i32, %arg1: memref<1xi32, #tpu.memory_space<smem>>) -> (i32, i32) {
    %c0_i32 = arith.constant 0 : i32
    %c0_i32_0 = arith.constant 0 : i32
    %c0_i32_1 = arith.constant 0 : i32
    return %c0_i32, %c0_i32_0 : i32, i32
  }
  func.func @transform_8(%arg0: i32, %arg1: memref<1xi32, #tpu.memory_space<smem>>) -> (i32, i32) {
    %c0_i32 = arith.constant 0 : i32
    %c0_i32_0 = arith.constant 0 : i32
    %c0_i32_1 = arith.constant 0 : i32
    return %c0_i32, %c0_i32_0 : i32, i32
  }
  func.func @transform_9(%arg0: i32, %arg1: memref<1xi32, #tpu.memory_space<smem>>) -> (i32, i32) {
    %c0_i32 = arith.constant 0 : i32
    %c0_i32_0 = arith.constant 0 : i32
    %c0_i32_1 = arith.constant 0 : i32
    return %c0_i32, %c0_i32_0 : i32, i32
  }
  func.func @transform_10(%arg0: i32, %arg1: memref<1xi32, #tpu.memory_space<smem>>) -> (i32, i32) {
    %c0_i32 = arith.constant 0 : i32
    %c0_i32_0 = arith.constant 0 : i32
    %c0_i32_1 = arith.constant 0 : i32
    return %c0_i32, %c0_i32_0 : i32, i32
  }
  func.func @transform_11(%arg0: i32, %arg1: memref<1xi32, #tpu.memory_space<smem>>) -> (i32, i32) {
    %c0_i32 = arith.constant 0 : i32
    %c0_i32_0 = arith.constant 0 : i32
    %c0_i32_1 = arith.constant 0 : i32
    return %c0_i32, %c0_i32_0 : i32, i32
  }
  func.func @transform_12(%arg0: i32, %arg1: memref<1xi32, #tpu.memory_space<smem>>) -> (i32, i32) {
    %c0_i32 = arith.constant 0 : i32
    %c0_i32_0 = arith.constant 0 : i32
    %c0_i32_1 = arith.constant 0 : i32
    return %c0_i32, %c0_i32_0 : i32, i32
  }
  func.func @transform_13(%arg0: i32, %arg1: memref<1xi32, #tpu.memory_space<smem>>) -> (i32, i32) {
    %c0_i32 = arith.constant 0 : i32
    %c0_i32_0 = arith.constant 0 : i32
    return %arg0, %c0_i32 : i32, i32
  }
}

module attributes {stable_mosaic.version = 11 : i64} {
  func.func @doc_level_kernel(%arg0: i32, %arg1: memref<1xi32, #tpu.memory_space<smem>>, %arg2: memref<3x8x300xf32, #tpu.memory_space<vmem>>, %arg3: memref<8x1xi32, #tpu.memory_space<vmem>>, %arg4: memref<300x1024xbf16, #tpu.memory_space<vmem>>, %arg5: memref<300x1024xbf16, #tpu.memory_space<vmem>>, %arg6: memref<1x1024xf32, #tpu.memory_space<vmem>>, %arg7: memref<1x1024xf32, #tpu.memory_space<vmem>>, %arg8: memref<256x1024xbf16, #tpu.memory_space<vmem>>, %arg9: memref<256x1024xbf16, #tpu.memory_space<vmem>>, %arg10: memref<512x32xf32, #tpu.memory_space<vmem>>, %arg11: memref<1x32xf32, #tpu.memory_space<vmem>>, %arg12: memref<1x32xf32, #tpu.memory_space<vmem>>, %arg13: memref<1x512xf32, #tpu.memory_space<vmem>>, %arg14: memref<1x512xf32, #tpu.memory_space<vmem>>, %arg15: memref<512x128xf32, #tpu.memory_space<vmem>>, %arg16: memref<1x128xf32, #tpu.memory_space<vmem>>, %arg17: memref<8x128xf32, #tpu.memory_space<vmem>>, %arg18: memref<3x8x1024xbf16, #tpu.memory_space<vmem>>, %arg19: memref<3x8x1024xbf16, #tpu.memory_space<vmem>>, %arg20: memref<3x8x512xf32, #tpu.memory_space<vmem>>) attributes {dimension_semantics = [#tpu.dimension_semantics<parallel>], iteration_bounds = array<i64: 1>, scalar_prefetch = 1 : i64, scratch_operands = 3 : i64, tpu.core_type = #tpu.core_type<tc>, window_params = [{transform_indices = @transform_0, window_bounds = array<i64: 3, 8, 300>}, {transform_indices = @transform_1, window_bounds = array<i64: 8, 1>}, {pipeline_mode = #tpu.pipeline_mode<synchronous>, transform_indices = @transform_2, window_bounds = array<i64: 300, 1024>}, {pipeline_mode = #tpu.pipeline_mode<synchronous>, transform_indices = @transform_3, window_bounds = array<i64: 300, 1024>}, {pipeline_mode = #tpu.pipeline_mode<synchronous>, transform_indices = @transform_4, window_bounds = array<i64: 1, 1024>}, {pipeline_mode = #tpu.pipeline_mode<synchronous>, transform_indices = @transform_5, window_bounds = array<i64: 1, 1024>}, {pipeline_mode = #tpu.pipeline_mode<synchronous>, transform_indices = @transform_6, window_bounds = array<i64: 256, 1024>}, {pipeline_mode = #tpu.pipeline_mode<synchronous>, transform_indices = @transform_7, window_bounds = array<i64: 256, 1024>}, {pipeline_mode = #tpu.pipeline_mode<synchronous>, transform_indices = @transform_8, window_bounds = array<i64: 512, 32>}, {pipeline_mode = #tpu.pipeline_mode<synchronous>, transform_indices = @transform_9, window_bounds = array<i64: 1, 32>}, {pipeline_mode = #tpu.pipeline_mode<synchronous>, transform_indices = @transform_10, window_bounds = array<i64: 1, 32>}, {pipeline_mode = #tpu.pipeline_mode<synchronous>, transform_indices = @transform_11, window_bounds = array<i64: 1, 512>}, {pipeline_mode = #tpu.pipeline_mode<synchronous>, transform_indices = @transform_12, window_bounds = array<i64: 1, 512>}, {pipeline_mode = #tpu.pipeline_mode<synchronous>, transform_indices = @transform_13, window_bounds = array<i64: 512, 128>}, {pipeline_mode = #tpu.pipeline_mode<synchronous>, transform_indices = @transform_14, window_bounds = array<i64: 1, 128>}, {transform_indices = @transform_15, window_bounds = array<i64: 8, 128>}]} {
    %0 = arith.index_cast %arg0 : i32 to index
    %1 = memref.load %arg1[%0] : memref<1xi32, #tpu.memory_space<smem>>
    %c0 = arith.constant 0 : index
    %c0_0 = arith.constant 0 : index
    %c0_1 = arith.constant 0 : index
    %2 = vector.load %arg2[%c0, %c0_0, %c0_1] : memref<3x8x300xf32, #tpu.memory_space<vmem>>, vector<3x8x300xf32>
    %3 = arith.truncf %2 : vector<3x8x300xf32> to vector<3x8x300xbf16>
    %4 = vector.shape_cast %3 : vector<3x8x300xbf16> to vector<24x300xbf16>
    %c0_2 = arith.constant 0 : index
    %c0_3 = arith.constant 0 : index
    %5 = vector.load %arg4[%c0_2, %c0_3] : memref<300x1024xbf16, #tpu.memory_space<vmem>>, vector<300x1024xbf16>
    %cst = arith.constant dense<0.000000e+00> : vector<24x1024xf32>
    %6 = tpu.matmul %4, %5, %cst {dimension_numbers = #tpu.dot_dimension_numbers<[1], [0], [0], [1], [0, 0, 1, 1], [], []>} : vector<24x300xbf16>, vector<300x1024xbf16>, vector<24x1024xf32> -> vector<24x1024xf32>
    %c0_4 = arith.constant 0 : index
    %c0_5 = arith.constant 0 : index
    %7 = vector.load %arg6[%c0_4, %c0_5] : memref<1x1024xf32, #tpu.memory_space<vmem>>, vector<1x1024xf32>
    %8 = vector.broadcast %7 : vector<1x1024xf32> to vector<24x1024xf32>
    %9 = arith.addf %6, %8 : vector<24x1024xf32>
    %10 = arith.truncf %9 : vector<24x1024xf32> to vector<24x1024xbf16>
    %11 = vector.shape_cast %10 : vector<24x1024xbf16> to vector<3x8x1024xbf16>
    %c0_6 = arith.constant 0 : index
    %c0_7 = arith.constant 0 : index
    %c0_8 = arith.constant 0 : index
    %12 = vector.load %arg18[%c0_6, %c0_7, %c0_8] : memref<3x8x1024xbf16, #tpu.memory_space<vmem>>, vector<3x8x1024xbf16>
    tpu.vector_store %arg18[%c0_6, %c0_7, %c0_8], %11 {strides = array<i32>} : memref<3x8x1024xbf16, #tpu.memory_space<vmem>>, vector<3x8x1024xbf16>,
    %c0_9 = arith.constant 0 : index
    %c0_10 = arith.constant 0 : index
    %13 = vector.load %arg5[%c0_9, %c0_10] : memref<300x1024xbf16, #tpu.memory_space<vmem>>, vector<300x1024xbf16>
    %cst_11 = arith.constant dense<0.000000e+00> : vector<24x1024xf32>
    %14 = tpu.matmul %4, %13, %cst_11 {dimension_numbers = #tpu.dot_dimension_numbers<[1], [0], [0], [1], [0, 0, 1, 1], [], []>} : vector<24x300xbf16>, vector<300x1024xbf16>, vector<24x1024xf32> -> vector<24x1024xf32>
    %c0_12 = arith.constant 0 : index
    %c0_13 = arith.constant 0 : index
    %15 = vector.load %arg7[%c0_12, %c0_13] : memref<1x1024xf32, #tpu.memory_space<vmem>>, vector<1x1024xf32>
    %16 = vector.broadcast %15 : vector<1x1024xf32> to vector<24x1024xf32>
    %17 = arith.addf %14, %16 : vector<24x1024xf32>
    %18 = arith.truncf %17 : vector<24x1024xf32> to vector<24x1024xbf16>
    %19 = vector.shape_cast %18 : vector<24x1024xbf16> to vector<3x8x1024xbf16>
    %c0_14 = arith.constant 0 : index
    %c0_15 = arith.constant 0 : index
    %c0_16 = arith.constant 0 : index
    %20 = vector.load %arg19[%c0_14, %c0_15, %c0_16] : memref<3x8x1024xbf16, #tpu.memory_space<vmem>>, vector<3x8x1024xbf16>
    tpu.vector_store %arg19[%c0_14, %c0_15, %c0_16], %19 {strides = array<i32>} : memref<3x8x1024xbf16, #tpu.memory_space<vmem>>, vector<3x8x1024xbf16>,
    %cst_17 = arith.constant 0.000000e+00 : f32
    %21 = vector.broadcast %cst_17 : f32 to vector<3x8x512xf32>
    %c0_18 = arith.constant 0 : index
    %c0_19 = arith.constant 0 : index
    %c0_20 = arith.constant 0 : index
    %22 = vector.load %arg20[%c0_18, %c0_19, %c0_20] : memref<3x8x512xf32, #tpu.memory_space<vmem>>, vector<3x8x512xf32>
    tpu.vector_store %arg20[%c0_18, %c0_19, %c0_20], %21 {strides = array<i32>} : memref<3x8x512xf32, #tpu.memory_space<vmem>>, vector<3x8x512xf32>,
    %c0_21 = arith.constant 0 : index
    %c0_22 = arith.constant 0 : index
    %23 = vector.load %arg3[%c0_21, %c0_22] : memref<8x1xi32, #tpu.memory_space<vmem>>, vector<8x1xi32>
    %cst_23 = arith.constant 0.000000e+00 : f32
    %24 = vector.broadcast %cst_23 : f32 to vector<8x256xf32>
    %c0_i32 = arith.constant 0 : i32
    %25 = arith.subi %1, %c0_i32 : i32
    %26 = arith.addi %c0_i32, %25 : i32
    %c1_i32 = arith.constant 1 : i32
    %27:4 = scf.for %arg21 = %c0_i32 to %26 step %c1_i32 iter_args(%arg22 = %24, %arg23 = %24, %arg24 = %24, %arg25 = %24) -> (vector<8x256xf32>, vector<8x256xf32>, vector<8x256xf32>, vector<8x256xf32>)  : i32 {
      %c1_i32_58 = arith.constant 1 : i32
      %97 = arith.subi %1, %c1_i32_58 : i32
      %98 = arith.subi %97, %arg21 : i32
      %99 = arith.truncf %arg22 : vector<8x256xf32> to vector<8x256xbf16>
      %c0_59 = arith.constant 0 : index
      %c0_60 = arith.constant 0 : index
      %100 = vector.load %arg8[%c0_59, %c0_60] : memref<256x1024xbf16, #tpu.memory_space<vmem>>, vector<256x1024xbf16>
      %cst_61 = arith.constant dense<0.000000e+00> : vector<8x1024xf32>
      %101 = tpu.matmul %99, %100, %cst_61 {dimension_numbers = #tpu.dot_dimension_numbers<[1], [0], [0], [1], [0, 0, 1, 1], [], []>} : vector<8x256xbf16>, vector<256x1024xbf16>, vector<8x1024xf32> -> vector<8x1024xf32>
      %102 = arith.index_cast %arg21 : i32 to index
      %c0_62 = arith.constant 0 : index
      %c0_63 = arith.constant 0 : index
      %103 = vector.load %arg18[%102, %c0_62, %c0_63] : memref<3x8x1024xbf16, #tpu.memory_space<vmem>>, vector<1x8x1024xbf16>
      %104 = vector.shape_cast %103 : vector<1x8x1024xbf16> to vector<8x1024xbf16>
      %105 = arith.extf %104 : vector<8x1024xbf16> to vector<8x1024xf32>
      %106 = arith.addf %101, %105 : vector<8x1024xf32>
      %107 = arith.truncf %arg24 : vector<8x256xf32> to vector<8x256xbf16>
      %c0_64 = arith.constant 0 : index
      %c0_65 = arith.constant 0 : index
      %108 = vector.load %arg9[%c0_64, %c0_65] : memref<256x1024xbf16, #tpu.memory_space<vmem>>, vector<256x1024xbf16>
      %cst_66 = arith.constant dense<0.000000e+00> : vector<8x1024xf32>
      %109 = tpu.matmul %107, %108, %cst_66 {dimension_numbers = #tpu.dot_dimension_numbers<[1], [0], [0], [1], [0, 0, 1, 1], [], []>} : vector<8x256xbf16>, vector<256x1024xbf16>, vector<8x1024xf32> -> vector<8x1024xf32>
      %110 = arith.index_cast %98 : i32 to index
      %c0_67 = arith.constant 0 : index
      %c0_68 = arith.constant 0 : index
      %111 = vector.load %arg19[%110, %c0_67, %c0_68] : memref<3x8x1024xbf16, #tpu.memory_space<vmem>>, vector<1x8x1024xbf16>
      %112 = vector.shape_cast %111 : vector<1x8x1024xbf16> to vector<8x1024xbf16>
      %113 = arith.extf %112 : vector<8x1024xbf16> to vector<8x1024xf32>
      %114 = arith.addf %109, %113 : vector<8x1024xf32>
      %115 = vector.extract_strided_slice %106 {offsets = [0, 0], sizes = [8, 256], strides = [1, 1]} : vector<8x1024xf32> to vector<8x256xf32>
      %116 = arith.negf %115 : vector<8x256xf32>
      %117 = math.exp %116 : vector<8x256xf32>
      %cst_69 = arith.constant 1.000000e+00 : f32
      %118 = vector.broadcast %cst_69 : f32 to vector<8x256xf32>
      %119 = arith.addf %118, %117 : vector<8x256xf32>
      %120 = arith.divf %118, %119 : vector<8x256xf32>
      %121 = vector.extract_strided_slice %106 {offsets = [0, 256], sizes = [8, 256], strides = [1, 1]} : vector<8x1024xf32> to vector<8x256xf32>
      %122 = arith.negf %121 : vector<8x256xf32>
      %123 = math.exp %122 : vector<8x256xf32>
      %cst_70 = arith.constant 1.000000e+00 : f32
      %124 = vector.broadcast %cst_70 : f32 to vector<8x256xf32>
      %125 = arith.addf %124, %123 : vector<8x256xf32>
      %126 = arith.divf %124, %125 : vector<8x256xf32>
      %127 = vector.extract_strided_slice %106 {offsets = [0, 512], sizes = [8, 256], strides = [1, 1]} : vector<8x1024xf32> to vector<8x256xf32>
      %128 = math.tanh %127 : vector<8x256xf32>
      %129 = vector.extract_strided_slice %106 {offsets = [0, 768], sizes = [8, 256], strides = [1, 1]} : vector<8x1024xf32> to vector<8x256xf32>
      %130 = arith.negf %129 : vector<8x256xf32>
      %131 = math.exp %130 : vector<8x256xf32>
      %cst_71 = arith.constant 1.000000e+00 : f32
      %132 = vector.broadcast %cst_71 : f32 to vector<8x256xf32>
      %133 = arith.addf %132, %131 : vector<8x256xf32>
      %134 = arith.divf %132, %133 : vector<8x256xf32>
      %135 = arith.mulf %126, %arg23 : vector<8x256xf32>
      %136 = arith.mulf %120, %128 : vector<8x256xf32>
      %137 = arith.addf %135, %136 : vector<8x256xf32>
      %138 = math.tanh %137 : vector<8x256xf32>
      %139 = arith.mulf %134, %138 : vector<8x256xf32>
      %140 = vector.extract_strided_slice %114 {offsets = [0, 0], sizes = [8, 256], strides = [1, 1]} : vector<8x1024xf32> to vector<8x256xf32>
      %141 = arith.negf %140 : vector<8x256xf32>
      %142 = math.exp %141 : vector<8x256xf32>
      %cst_72 = arith.constant 1.000000e+00 : f32
      %143 = vector.broadcast %cst_72 : f32 to vector<8x256xf32>
      %144 = arith.addf %143, %142 : vector<8x256xf32>
      %145 = arith.divf %143, %144 : vector<8x256xf32>
      %146 = vector.extract_strided_slice %114 {offsets = [0, 256], sizes = [8, 256], strides = [1, 1]} : vector<8x1024xf32> to vector<8x256xf32>
      %147 = arith.negf %146 : vector<8x256xf32>
      %148 = math.exp %147 : vector<8x256xf32>
      %cst_73 = arith.constant 1.000000e+00 : f32
      %149 = vector.broadcast %cst_73 : f32 to vector<8x256xf32>
      %150 = arith.addf %149, %148 : vector<8x256xf32>
      %151 = arith.divf %149, %150 : vector<8x256xf32>
      %152 = vector.extract_strided_slice %114 {offsets = [0, 512], sizes = [8, 256], strides = [1, 1]} : vector<8x1024xf32> to vector<8x256xf32>
      %153 = math.tanh %152 : vector<8x256xf32>
      %154 = vector.extract_strided_slice %114 {offsets = [0, 768], sizes = [8, 256], strides = [1, 1]} : vector<8x1024xf32> to vector<8x256xf32>
      %155 = arith.negf %154 : vector<8x256xf32>
      %156 = math.exp %155 : vector<8x256xf32>
      %cst_74 = arith.constant 1.000000e+00 : f32
      %157 = vector.broadcast %cst_74 : f32 to vector<8x256xf32>
      %158 = arith.addf %157, %156 : vector<8x256xf32>
      %159 = arith.divf %157, %158 : vector<8x256xf32>
      %160 = arith.mulf %151, %arg25 : vector<8x256xf32>
      %161 = arith.mulf %145, %153 : vector<8x256xf32>
      %162 = arith.addf %160, %161 : vector<8x256xf32>
      %163 = math.tanh %162 : vector<8x256xf32>
      %164 = arith.mulf %159, %163 : vector<8x256xf32>
      %165 = vector.broadcast %arg21 : i32 to vector<8x1xi32>
      %166 = arith.cmpi slt, %165, %23 : vector<8x1xi32>
      %167 = vector.broadcast %98 : i32 to vector<8x1xi32>
      %168 = arith.cmpi slt, %167, %23 : vector<8x1xi32>
      %cst_75 = arith.constant 0.000000e+00 : f32
      %169 = vector.shape_cast %166 : vector<8x1xi1> to vector<8x1xi1>
      %170 = vector.broadcast %169 : vector<8x1xi1> to vector<8x256xi1>
      %171 = vector.broadcast %cst_75 : f32 to vector<8x256xf32>
      %172 = arith.select %170, %139, %171 : vector<8x256xi1>, vector<8x256xf32>
      %173 = arith.index_cast %arg21 : i32 to index
      %c0_76 = arith.constant 0 : index
      %c0_77 = arith.constant 0 : index
      %174 = vector.load %arg20[%173, %c0_76, %c0_77] : memref<3x8x512xf32, #tpu.memory_space<vmem>>, vector<1x8x256xf32>
      %175 = vector.shape_cast %174 : vector<1x8x256xf32> to vector<8x256xf32>
      %176 = vector.shape_cast %172 : vector<8x256xf32> to vector<1x8x256xf32>
      tpu.vector_store %arg20[%173, %c0_76, %c0_77], %176 {strides = array<i32>} : memref<3x8x512xf32, #tpu.memory_space<vmem>>, vector<1x8x256xf32>,
      %cst_78 = arith.constant 0.000000e+00 : f32
      %177 = vector.shape_cast %168 : vector<8x1xi1> to vector<8x1xi1>
      %178 = vector.broadcast %177 : vector<8x1xi1> to vector<8x256xi1>
      %179 = vector.broadcast %cst_78 : f32 to vector<8x256xf32>
      %180 = arith.select %178, %164, %179 : vector<8x256xi1>, vector<8x256xf32>
      %181 = arith.index_cast %98 : i32 to index
      %c0_79 = arith.constant 0 : index
      %c256 = arith.constant 256 : index
      %182 = vector.load %arg20[%181, %c0_79, %c256] : memref<3x8x512xf32, #tpu.memory_space<vmem>>, vector<1x8x256xf32>
      %183 = vector.shape_cast %182 : vector<1x8x256xf32> to vector<8x256xf32>
      %184 = vector.shape_cast %180 : vector<8x256xf32> to vector<1x8x256xf32>
      tpu.vector_store %arg20[%181, %c0_79, %c256], %184 {strides = array<i32>} : memref<3x8x512xf32, #tpu.memory_space<vmem>>, vector<1x8x256xf32>,
      %185 = vector.shape_cast %166 : vector<8x1xi1> to vector<8x1xi1>
      %186 = vector.broadcast %185 : vector<8x1xi1> to vector<8x256xi1>
      %187 = arith.select %186, %139, %arg22 : vector<8x256xi1>, vector<8x256xf32>
      %188 = vector.shape_cast %166 : vector<8x1xi1> to vector<8x1xi1>
      %189 = vector.broadcast %188 : vector<8x1xi1> to vector<8x256xi1>
      %190 = arith.select %189, %137, %arg23 : vector<8x256xi1>, vector<8x256xf32>
      %191 = vector.shape_cast %168 : vector<8x1xi1> to vector<8x1xi1>
      %192 = vector.broadcast %191 : vector<8x1xi1> to vector<8x256xi1>
      %193 = arith.select %192, %164, %arg24 : vector<8x256xi1>, vector<8x256xf32>
      %194 = vector.shape_cast %168 : vector<8x1xi1> to vector<8x1xi1>
      %195 = vector.broadcast %194 : vector<8x1xi1> to vector<8x256xi1>
      %196 = arith.select %195, %162, %arg25 : vector<8x256xi1>, vector<8x256xf32>
      scf.yield %187, %190, %193, %196 : vector<8x256xf32>, vector<8x256xf32>, vector<8x256xf32>, vector<8x256xf32>
    }
    %c0_24 = arith.constant 0 : index
    %c0_25 = arith.constant 0 : index
    %c0_26 = arith.constant 0 : index
    %28 = vector.load %arg20[%c0_24, %c0_25, %c0_26] : memref<3x8x512xf32, #tpu.memory_space<vmem>>, vector<3x8x512xf32>
    %29 = vector.shape_cast %28 : vector<3x8x512xf32> to vector<24x512xf32>
    %c0_27 = arith.constant 0 : index
    %c0_28 = arith.constant 0 : index
    %30 = vector.load %arg10[%c0_27, %c0_28] : memref<512x32xf32, #tpu.memory_space<vmem>>, vector<512x32xf32>
    %cst_29 = arith.constant dense<0.000000e+00> : vector<24x32xf32>
    %31 = tpu.matmul %29, %30, %cst_29 {dimension_numbers = #tpu.dot_dimension_numbers<[1], [0], [0], [1], [0, 0, 1, 1], [], []>} : vector<24x512xf32>, vector<512x32xf32>, vector<24x32xf32> -> vector<24x32xf32>
    %c0_30 = arith.constant 0 : index
    %c0_31 = arith.constant 0 : index
    %32 = vector.load %arg11[%c0_30, %c0_31] : memref<1x32xf32, #tpu.memory_space<vmem>>, vector<1x32xf32>
    %33 = vector.broadcast %32 : vector<1x32xf32> to vector<24x32xf32>
    %34 = arith.addf %31, %33 : vector<24x32xf32>
    %35 = math.tanh %34 : vector<24x32xf32>
    %36 = vector.shape_cast %35 : vector<24x32xf32> to vector<3x8x32xf32>
    %c0_32 = arith.constant 0 : index
    %c0_33 = arith.constant 0 : index
    %37 = vector.load %arg12[%c0_32, %c0_33] : memref<1x32xf32, #tpu.memory_space<vmem>>, vector<1x32xf32>
    %38 = vector.shape_cast %37 : vector<1x32xf32> to vector<1x1x32xf32>
    %39 = vector.broadcast %38 : vector<1x1x32xf32> to vector<3x8x32xf32>
    %40 = arith.mulf %36, %39 : vector<3x8x32xf32>
    %cst_34 = arith.constant dense<0.000000e+00> : vector<3x8xf32>
    %41 = vector.multi_reduction <add>, %40, %cst_34 [2] : vector<3x8x32xf32> to vector<3x8xf32>
    %42 = vector.shape_cast %41 : vector<3x8xf32> to vector<3x8x1xf32>
    %43 = tpu.iota {dimensions = array<i32: 0>} : vector<3x8x1xi32>
    %44 = vector.shape_cast %23 : vector<8x1xi32> to vector<1x8x1xi32>
    %45 = vector.broadcast %44 : vector<1x8x1xi32> to vector<3x8x1xi32>
    %46 = arith.cmpi slt, %43, %45 : vector<3x8x1xi32>
    %cst_35 = arith.constant -1.000000e+30 : f32
    %47 = vector.broadcast %cst_35 : f32 to vector<3x8x1xf32>
    %48 = arith.select %46, %42, %47 : vector<3x8x1xi1>, vector<3x8x1xf32>
    %cst_36 = arith.constant dense<0xFF800000> : vector<8x1xf32>
    %49 = vector.multi_reduction <maximumf>, %48, %cst_36 [0] : vector<3x8x1xf32> to vector<8x1xf32>
    %50 = vector.shape_cast %49 : vector<8x1xf32> to vector<1x8x1xf32>
    %51 = vector.broadcast %50 : vector<1x8x1xf32> to vector<3x8x1xf32>
    %52 = arith.subf %48, %51 : vector<3x8x1xf32>
    %53 = math.exp %52 : vector<3x8x1xf32>
    %cst_37 = arith.constant 0.000000e+00 : f32
    %54 = vector.broadcast %cst_37 : f32 to vector<3x8x1xf32>
    %55 = arith.select %46, %53, %54 : vector<3x8x1xi1>, vector<3x8x1xf32>
    %cst_38 = arith.constant dense<0.000000e+00> : vector<8x1xf32>
    %56 = vector.multi_reduction <add>, %55, %cst_38 [0] : vector<3x8x1xf32> to vector<8x1xf32>
    %57 = vector.shape_cast %56 : vector<8x1xf32> to vector<1x8x1xf32>
    %cst_39 = arith.constant 1.000000e-30 : f32
    %58 = vector.broadcast %cst_39 : f32 to vector<1x8x1xf32>
    %59 = arith.maximumf %57, %58 : vector<1x8x1xf32>
    %60 = vector.broadcast %59 : vector<1x8x1xf32> to vector<3x8x1xf32>
    %61 = arith.divf %55, %60 : vector<3x8x1xf32>
    %62 = vector.broadcast %61 : vector<3x8x1xf32> to vector<3x8x512xf32>
    %63 = arith.mulf %28, %62 : vector<3x8x512xf32>
    %cst_40 = arith.constant dense<0.000000e+00> : vector<8x512xf32>
    %64 = vector.multi_reduction <add>, %63, %cst_40 [0] : vector<3x8x512xf32> to vector<8x512xf32>
    %cst_41 = arith.constant dense<0.000000e+00> : vector<8xf32>
    %65 = vector.multi_reduction <add>, %64, %cst_41 [1] : vector<8x512xf32> to vector<8xf32>
    %66 = vector.shape_cast %65 : vector<8xf32> to vector<8x1xf32>
    %67 = arith.mulf %64, %64 : vector<8x512xf32>
    %cst_42 = arith.constant dense<0.000000e+00> : vector<8xf32>
    %68 = vector.multi_reduction <add>, %67, %cst_42 [1] : vector<8x512xf32> to vector<8xf32>
    %69 = vector.shape_cast %68 : vector<8xf32> to vector<8x1xf32>
    %cst_43 = arith.constant 3.000000e+02 : f32
    %70 = vector.broadcast %cst_43 : f32 to vector<8x1xf32>
    %71 = arith.divf %66, %70 : vector<8x1xf32>
    %cst_44 = arith.constant 3.000000e+02 : f32
    %72 = vector.broadcast %cst_44 : f32 to vector<8x1xf32>
    %73 = arith.divf %69, %72 : vector<8x1xf32>
    %74 = arith.mulf %71, %71 : vector<8x1xf32>
    %75 = arith.subf %73, %74 : vector<8x1xf32>
    %cst_45 = arith.constant 0.000000e+00 : f32
    %76 = vector.broadcast %cst_45 : f32 to vector<8x1xf32>
    %77 = arith.maximumf %75, %76 : vector<8x1xf32>
    %cst_46 = arith.constant 9.99999974E-6 : f32
    %78 = vector.broadcast %cst_46 : f32 to vector<8x1xf32>
    %79 = arith.addf %77, %78 : vector<8x1xf32>
    %80 = math.rsqrt %79 : vector<8x1xf32>
    %81 = vector.broadcast %71 : vector<8x1xf32> to vector<8x512xf32>
    %82 = arith.subf %64, %81 : vector<8x512xf32>
    %83 = vector.broadcast %80 : vector<8x1xf32> to vector<8x512xf32>
    %84 = arith.mulf %82, %83 : vector<8x512xf32>
    %c0_47 = arith.constant 0 : index
    %c0_48 = arith.constant 0 : index
    %85 = vector.load %arg13[%c0_47, %c0_48] : memref<1x512xf32, #tpu.memory_space<vmem>>, vector<1x512xf32>
    %86 = vector.broadcast %85 : vector<1x512xf32> to vector<8x512xf32>
    %87 = arith.mulf %84, %86 : vector<8x512xf32>
    %c0_49 = arith.constant 0 : index
    %c0_50 = arith.constant 0 : index
    %88 = vector.load %arg14[%c0_49, %c0_50] : memref<1x512xf32, #tpu.memory_space<vmem>>, vector<1x512xf32>
    %89 = vector.broadcast %88 : vector<1x512xf32> to vector<8x512xf32>
    %90 = arith.addf %87, %89 : vector<8x512xf32>
    %c0_51 = arith.constant 0 : index
    %c0_52 = arith.constant 0 : index
    %91 = vector.load %arg15[%c0_51, %c0_52] : memref<512x128xf32, #tpu.memory_space<vmem>>, vector<512x128xf32>
    %cst_53 = arith.constant dense<0.000000e+00> : vector<8x128xf32>
    %92 = tpu.matmul %90, %91, %cst_53 {dimension_numbers = #tpu.dot_dimension_numbers<[1], [0], [0], [1], [0, 0, 1, 1], [], []>} : vector<8x512xf32>, vector<512x128xf32>, vector<8x128xf32> -> vector<8x128xf32>
    %c0_54 = arith.constant 0 : index
    %c0_55 = arith.constant 0 : index
    %93 = vector.load %arg16[%c0_54, %c0_55] : memref<1x128xf32, #tpu.memory_space<vmem>>, vector<1x128xf32>
    %94 = vector.broadcast %93 : vector<1x128xf32> to vector<8x128xf32>
    %95 = arith.addf %92, %94 : vector<8x128xf32>
    %c0_56 = arith.constant 0 : index
    %c0_57 = arith.constant 0 : index
    %96 = vector.load %arg17[%c0_56, %c0_57] : memref<8x128xf32, #tpu.memory_space<vmem>>, vector<8x128xf32>
    tpu.vector_store %arg17[%c0_56, %c0_57], %95 {strides = array<i32>} : memref<8x128xf32, #tpu.memory_space<vmem>>, vector<8x128xf32>,
    return
  }
  func.func @transform_0(%arg0: i32, %arg1: memref<1xi32, #tpu.memory_space<smem>>) -> (i32, i32, i32) {
    %c0_i32 = arith.constant 0 : i32
    %c0_i32_0 = arith.constant 0 : i32
    %c0_i32_1 = arith.constant 0 : i32
    return %c0_i32, %arg0, %c0_i32_0 : i32, i32, i32
  }
  func.func @transform_1(%arg0: i32, %arg1: memref<1xi32, #tpu.memory_space<smem>>) -> (i32, i32) {
    %c0_i32 = arith.constant 0 : i32
    %c0_i32_0 = arith.constant 0 : i32
    return %arg0, %c0_i32 : i32, i32
  }
  func.func @transform_2(%arg0: i32, %arg1: memref<1xi32, #tpu.memory_space<smem>>) -> (i32, i32) {
    %c0_i32 = arith.constant 0 : i32
    %c0_i32_0 = arith.constant 0 : i32
    %c0_i32_1 = arith.constant 0 : i32
    return %c0_i32, %c0_i32_0 : i32, i32
  }
  func.func @transform_3(%arg0: i32, %arg1: memref<1xi32, #tpu.memory_space<smem>>) -> (i32, i32) {
    %c0_i32 = arith.constant 0 : i32
    %c0_i32_0 = arith.constant 0 : i32
    %c0_i32_1 = arith.constant 0 : i32
    return %c0_i32, %c0_i32_0 : i32, i32
  }
  func.func @transform_4(%arg0: i32, %arg1: memref<1xi32, #tpu.memory_space<smem>>) -> (i32, i32) {
    %c0_i32 = arith.constant 0 : i32
    %c0_i32_0 = arith.constant 0 : i32
    %c0_i32_1 = arith.constant 0 : i32
    return %c0_i32, %c0_i32_0 : i32, i32
  }
  func.func @transform_5(%arg0: i32, %arg1: memref<1xi32, #tpu.memory_space<smem>>) -> (i32, i32) {
    %c0_i32 = arith.constant 0 : i32
    %c0_i32_0 = arith.constant 0 : i32
    %c0_i32_1 = arith.constant 0 : i32
    return %c0_i32, %c0_i32_0 : i32, i32
  }
  func.func @transform_6(%arg0: i32, %arg1: memref<1xi32, #tpu.memory_space<smem>>) -> (i32, i32) {
    %c0_i32 = arith.constant 0 : i32
    %c0_i32_0 = arith.constant 0 : i32
    %c0_i32_1 = arith.constant 0 : i32
    return %c0_i32, %c0_i32_0 : i32, i32
  }
  func.func @transform_7(%arg0: i32, %arg1: memref<1xi32, #tpu.memory_space<smem>>) -> (i32, i32) {
    %c0_i32 = arith.constant 0 : i32
    %c0_i32_0 = arith.constant 0 : i32
    %c0_i32_1 = arith.constant 0 : i32
    return %c0_i32, %c0_i32_0 : i32, i32
  }
  func.func @transform_8(%arg0: i32, %arg1: memref<1xi32, #tpu.memory_space<smem>>) -> (i32, i32) {
    %c0_i32 = arith.constant 0 : i32
    %c0_i32_0 = arith.constant 0 : i32
    %c0_i32_1 = arith.constant 0 : i32
    return %c0_i32, %c0_i32_0 : i32, i32
  }
  func.func @transform_9(%arg0: i32, %arg1: memref<1xi32, #tpu.memory_space<smem>>) -> (i32, i32) {
    %c0_i32 = arith.constant 0 : i32
    %c0_i32_0 = arith.constant 0 : i32
    %c0_i32_1 = arith.constant 0 : i32
    return %c0_i32, %c0_i32_0 : i32, i32
  }
  func.func @transform_10(%arg0: i32, %arg1: memref<1xi32, #tpu.memory_space<smem>>) -> (i32, i32) {
    %c0_i32 = arith.constant 0 : i32
    %c0_i32_0 = arith.constant 0 : i32
    %c0_i32_1 = arith.constant 0 : i32
    return %c0_i32, %c0_i32_0 : i32, i32
  }
  func.func @transform_11(%arg0: i32, %arg1: memref<1xi32, #tpu.memory_space<smem>>) -> (i32, i32) {
    %c0_i32 = arith.constant 0 : i32
    %c0_i32_0 = arith.constant 0 : i32
    %c0_i32_1 = arith.constant 0 : i32
    return %c0_i32, %c0_i32_0 : i32, i32
  }
  func.func @transform_12(%arg0: i32, %arg1: memref<1xi32, #tpu.memory_space<smem>>) -> (i32, i32) {
    %c0_i32 = arith.constant 0 : i32
    %c0_i32_0 = arith.constant 0 : i32
    %c0_i32_1 = arith.constant 0 : i32
    return %c0_i32, %c0_i32_0 : i32, i32
  }
  func.func @transform_13(%arg0: i32, %arg1: memref<1xi32, #tpu.memory_space<smem>>) -> (i32, i32) {
    %c0_i32 = arith.constant 0 : i32
    %c0_i32_0 = arith.constant 0 : i32
    %c0_i32_1 = arith.constant 0 : i32
    return %c0_i32, %c0_i32_0 : i32, i32
  }
  func.func @transform_14(%arg0: i32, %arg1: memref<1xi32, #tpu.memory_space<smem>>) -> (i32, i32) {
    %c0_i32 = arith.constant 0 : i32
    %c0_i32_0 = arith.constant 0 : i32
    %c0_i32_1 = arith.constant 0 : i32
    return %c0_i32, %c0_i32_0 : i32, i32
  }
  func.func @transform_15(%arg0: i32, %arg1: memref<1xi32, #tpu.memory_space<smem>>) -> (i32, i32) {
    %c0_i32 = arith.constant 0 : i32
    %c0_i32_0 = arith.constant 0 : i32
    return %arg0, %c0_i32 : i32, i32
  }
}

</mosaic_0001>

<bundles_post_ra>
// kernel: document_model_forward.2
= control target key start
LH: loop header
LB: loop body
LE: loop exit
PB: predicated region body
PF: predicated region fallthrough
CT: control target
= control target key end

     0   :  { %v7813_v3 = vmov 0   ;;  %s7798_s0 = inlined_call_operand.<no memory space> [shape: s32[1], index: 0, kind: input, shape index: {}]   ;;  %s7799_s3 = inlined_call_operand.vmem [shape: bf16[128,1024], index: 3, kind: input, shape index: {}]   ;;  %s7800_s7 = inlined_call_operand.vmem [shape: bf16[256,1024], index: 7, kind: input, shape index: {}]   ;;  %s7801_s8 = inlined_call_operand.vmem [shape: bf16[256,1024], index: 8, kind: input, shape index: {}]   ;;  %s7802_s9 = inlined_call_operand.vmem [shape: f32[512,32], index: 9, kind: input, shape index: {}]   ;;  %s7803_s10 = inlined_call_operand.vmem [shape: f32[1,32], index: 10, kind: input, shape index: {}]   ;;  %s7804_s11 = inlined_call_operand.vmem [shape: f32[1,32], index: 11, kind: input, shape index: {}]   ;;  %s7805_s12 = inlined_call_operand.vmem [shape: f32[1,512], index: 12, kind: input, shape index: {}]   ;;  %s7806_s13 = inlined_call_operand.vmem [shape: f32[1,512], index: 13, kind: input, shape index: {}]   ;;  %s7807_s14 = inlined_call_operand.vmem [shape: f32[8,512], index: 14, kind: output, shape index: {}]   ;;  %s7808_s1 = inlined_call_operand.vmem [shape: f32[8,8,128], index: 1, kind: input, shape index: {}]   ;;  %s7809_s4 = inlined_call_operand.vmem [shape: bf16[128,1024], index: 4, kind: input, shape index: {}]   ;;  %s7810_s5 = inlined_call_operand.vmem [shape: f32[1,1024], index: 5, kind: input, shape index: {}]   ;;  %s7811_s2 = inlined_call_operand.vmem [shape: s32[8,1], index: 2, kind: input, shape index: {}]   ;;  %s7812_s6 = inlined_call_operand.vmem [shape: f32[1,1024], index: 6, kind: input, shape index: {}]  }
   0x1   :  { %v120_v0 = vld [vmem:[%s7799_s3 + $0x1c0] sm:$0xff]  ;;  %v121_v2 = vld [vmem:[%s7799_s3 + $0x1c8] sm:$0xff]  ;;  %546 = vmatprep.mubr.bf16.mxu0 %v7813_v3  ;;  %619 = vmatprep.mubr.bf16.mxu1 %v7813_v3  ;;  %v122_v63 = vld [vmem:[%s7799_s3 + $0x1d0] sm:$0xff]  ;;  %p4933_p0 = scmp.le.s32.totalorder %s7798_s0, 0 }
   0x2   :  { %v124_v1 = vld [vmem:[%s7799_s3 + $0x1e0] sm:$0xff]  ;;  %v125_v5 = vld [vmem:[%s7799_s3 + $0x1e8] sm:$0xff]  ;;  %s6457_s17 = smov (!%p4933_p0), 0  }
   0x3   :  { %v4798_v4 = vcombine.high %v120_v0, %v124_v1  ;;  %v4797_v6 = vcombine.low %v120_v0, %v124_v1  ;;  %v112_v7 = vld [vmem:[%s7799_s3 + $0x180] sm:$0xff]  ;;  %v4800_v9 = vcombine.high %v121_v2, %v125_v5  ;;  %v4799_v10 = vcombine.low %v121_v2, %v125_v5  ;;  %v113_v12 = vld [vmem:[%s7799_s3 + $0x188] sm:$0xff]  ;;  %v126_v0 = vld [vmem:[%s7799_s3 + $0x1f0] sm:$0xff] }
   0x4   :  { %v116_v8 = vld [vmem:[%s7799_s3 + $0x1a0] sm:$0xff]  ;;  %v117_v13 = vld [vmem:[%s7799_s3 + $0x1a8] sm:$0xff]  ;;  %v123_v1 = vld [vmem:[%s7799_s3 + $0x1d8] sm:$0xff] }
   0x5   :  { %v4790_v11 = vcombine.high %v112_v7, %v116_v8  ;;  %v104_v14 = vld [vmem:[%s7799_s3 + $0x140] sm:$0xff]  ;;  %514 = vmatprep.subr.bf16.mxu0 %v4798_v4  ;;  %v4792_v15 = vcombine.high %v113_v12, %v117_v13  ;;  %v105_v17 = vld [vmem:[%s7799_s3 + $0x148] sm:$0xff]  ;;  %587 = vmatprep.subr.bf16.mxu1 %v4800_v9  ;;  %v4789_v19 = vcombine.low %v112_v7, %v116_v8  ;;  %v127_v2 = vld [vmem:[%s7799_s3 + $0x1f8] sm:$0xff] }
   0x6   :  { %v108_v16 = vld [vmem:[%s7799_s3 + $0x160] sm:$0xff]  ;;  %v109_v18 = vld [vmem:[%s7799_s3 + $0x168] sm:$0xff]  ;;  %515 = vmatpush1.bf16.msra.mxu0 %v4797_v6  ;;  %588 = vmatpush1.bf16.msra.mxu1 %v4799_v10  ;;  %v4791_v20 = vcombine.low %v113_v12, %v117_v13  ;;  %v4802_v8 = vcombine.high %v122_v63, %v126_v0  ;;  %v4804_v9 = vcombine.high %v123_v1, %v127_v2  ;;  %v114_v10 = vld [vmem:[%s7799_s3 + $0x190] sm:$0xff] }
   0x7   :  { %516 = vmatprep.subr.bf16.mxu0 %v4790_v11  ;;  %v4782_v21 = vcombine.high %v104_v14, %v108_v16  ;;  %589 = vmatprep.subr.bf16.mxu1 %v4792_v15  ;;  %v4784_v22 = vcombine.high %v105_v17, %v109_v18  ;;  %v96_v23 = vld [vmem:[%s7799_s3 + $0x100] sm:$0xff]  ;;  %v97_v25 = vld [vmem:[%s7799_s3 + $0x108] sm:$0xff]  ;;  %v4781_v27 = vcombine.low %v104_v14, %v108_v16  ;;  %v118_v11 = vld [vmem:[%s7799_s3 + $0x1b0] sm:$0xff] }
   0x8   :  { %v100_v24 = vld [vmem:[%s7799_s3 + $0x120] sm:$0xff]  ;;  %v101_v26 = vld [vmem:[%s7799_s3 + $0x128] sm:$0xff]  ;;  %v4783_v28 = vcombine.low %v105_v17, %v109_v18  ;;  %v115_v13 = vld [vmem:[%s7799_s3 + $0x198] sm:$0xff]  ;;  %v4801_v15 = vcombine.low %v122_v63, %v126_v0  ;;  %v4803_v16 = vcombine.low %v123_v1, %v127_v2  ;;  %v4794_v17 = vcombine.high %v114_v10, %v118_v11 }
   0x9   :  { %v4774_v29 = vcombine.high %v96_v23, %v100_v24  ;;  %v4776_v30 = vcombine.high %v97_v25, %v101_v26  ;;  %v88_v31 = vld [vmem:[%s7799_s3 + $0xc0] sm:$0xff]  ;;  %v89_v33 = vld [vmem:[%s7799_s3 + $0xc8] sm:$0xff]  ;;  %v4773_v35 = vcombine.low %v96_v23, %v100_v24  ;;  %v4775_v36 = vcombine.low %v97_v25, %v101_v26  ;;  %v119_v14 = vld [vmem:[%s7799_s3 + $0x1b8] sm:$0xff] }
   0xa   :  { %517 = vmatpush1.bf16.msra.mxu0 %v4789_v19  ;;  %590 = vmatpush1.bf16.msra.mxu1 %v4791_v20  ;;  %v92_v32 = vld [vmem:[%s7799_s3 + $0xe0] sm:$0xff]  ;;  %v93_v34 = vld [vmem:[%s7799_s3 + $0xe8] sm:$0xff]  ;;  %v4796_v18 = vcombine.high %v115_v13, %v119_v14  ;;  %v106_v19 = vld [vmem:[%s7799_s3 + $0x150] sm:$0xff]  ;;  %v4793_v23 = vcombine.low %v114_v10, %v118_v11  ;;  %v4795_v26 = vcombine.low %v115_v13, %v119_v14 }
   0xb   :  { %518 = vmatprep.subr.bf16.mxu0 %v4782_v21  ;;  %591 = vmatprep.subr.bf16.mxu1 %v4784_v22  ;;  %v4766_v37 = vcombine.high %v88_v31, %v92_v32  ;;  %v4768_v38 = vcombine.high %v89_v33, %v93_v34  ;;  %v80_v39 = vld [vmem:[%s7799_s3 + $0x80] sm:$0xff]  ;;  %v81_v41 = vld [vmem:[%s7799_s3 + $0x88] sm:$0xff]  ;;  %v4765_v43 = vcombine.low %v88_v31, %v92_v32  ;;  %v110_v20 = vld [vmem:[%s7799_s3 + $0x170] sm:$0xff] }
   0xc   :  { %v84_v40 = vld [vmem:[%s7799_s3 + $0xa0] sm:$0xff]  ;;  %v85_v42 = vld [vmem:[%s7799_s3 + $0xa8] sm:$0xff]  ;;  %v4767_v44 = vcombine.low %v89_v33, %v93_v34  ;;  %v107_v21 = vld [vmem:[%s7799_s3 + $0x158] sm:$0xff]  ;;  %v4785_v34 = vcombine.low %v106_v19, %v110_v20 }
   0xd   :  { %v4758_v45 = vcombine.high %v80_v39, %v84_v40  ;;  %v4760_v46 = vcombine.high %v81_v41, %v85_v42  ;;  %v72_v47 = vld [vmem:[%s7799_s3 + $0x40] sm:$0xff]  ;;  %v73_v49 = vld [vmem:[%s7799_s3 + $0x48] sm:$0xff]  ;;  %v4757_v51 = vcombine.low %v80_v39, %v84_v40  ;;  %v4759_v52 = vcombine.low %v81_v41, %v85_v42  ;;  %v111_v22 = vld [vmem:[%s7799_s3 + $0x178] sm:$0xff] }
   0xe   :  { %519 = vmatpush1.bf16.msra.mxu0 %v4781_v27  ;;  %592 = vmatpush1.bf16.msra.mxu1 %v4783_v28  ;;  %v76_v48 = vld [vmem:[%s7799_s3 + $0x60] sm:$0xff]  ;;  %v77_v50 = vld [vmem:[%s7799_s3 + $0x68] sm:$0xff]  ;;  %v50_v24 = vld [vmem:[%s7808_s1 + $0x10] sm:$0xff]  ;;  %v4786_v27 = vcombine.high %v106_v19, %v110_v20  ;;  %v4788_v28 = vcombine.high %v107_v21, %v111_v22 }
   0xf   :  { %520 = vmatprep.subr.bf16.mxu0 %v4774_v29  ;;  %593 = vmatprep.subr.bf16.mxu1 %v4776_v30  ;;  %v4750_v53 = vcombine.high %v72_v47, %v76_v48  ;;  %v4752_v54 = vcombine.high %v73_v49, %v77_v50  ;;  %v64_v55 = vld [vmem:[%s7799_s3] sm:$0xff]  ;;  %v65_v57 = vld [vmem:[%s7799_s3 + $0x8] sm:$0xff]  ;;  %v4749_v59 = vcombine.low %v72_v47, %v76_v48  ;;  %v51_v25 = vld [vmem:[%s7808_s1 + $0x18] sm:$0xff] }
  0x10   :  { %v68_v56 = vld [vmem:[%s7799_s3 + $0x20] sm:$0xff]  ;;  %v69_v58 = vld [vmem:[%s7799_s3 + $0x28] sm:$0xff]  ;;  %v4751_v60 = vcombine.low %v73_v49, %v77_v50  ;;  %v98_v29 = vld [vmem:[%s7799_s3 + $0x110] sm:$0xff]  ;;  %v5883_v31 = vpack.c.bf16 %v51_v25, %v50_v24 }
  0x11   :  { %v4742_v61 = vcombine.high %v64_v55, %v68_v56  ;;  %v4744_v62 = vcombine.high %v65_v57, %v69_v58  ;;  %v4741_v4 = vcombine.low %v64_v55, %v68_v56  ;;  %v48_v5 = vld [vmem:[%s7808_s1] sm:$0xff]  ;;  %v49_v6 = vld [vmem:[%s7808_s1 + $0x8] sm:$0xff]  ;;  %v4743_v7 = vcombine.low %v65_v57, %v69_v58  ;;  %v102_v30 = vld [vmem:[%s7799_s3 + $0x130] sm:$0xff] }
  0x12   :  { %521 = vmatpush1.bf16.msra.mxu0 %v4773_v35  ;;  %594 = vmatpush1.bf16.msra.mxu1 %v4775_v36  ;;  %v5847_v12 = vpack.c.bf16 %v49_v6, %v48_v5  ;;  %v99_v32 = vld [vmem:[%s7799_s3 + $0x118] sm:$0xff]  ;;  %v4787_v35 = vcombine.low %v107_v21, %v111_v22  ;;  %v4778_v36 = vcombine.high %v98_v29, %v102_v30  ;;  %v94_v39 = vld [vmem:[%s7799_s3 + $0xf0] sm:$0xff]  ;;  %v1086_v14 = vld [vmem:[%s7809_s4 + $0x1c0] sm:$0xff] }
  0x13   :  { %522 = vmatprep.subr.bf16.mxu0 %v4766_v37  ;;  %595 = vmatprep.subr.bf16.mxu1 %v4768_v38  ;;  %v103_v33 = vld [vmem:[%s7799_s3 + $0x138] sm:$0xff]  ;;  %v90_v38 = vld [vmem:[%s7799_s3 + $0xd0] sm:$0xff]  ;;  %v4777_v42 = vcombine.low %v98_v29, %v102_v30  ;;  %v1078_v22 = vld [vmem:[%s7809_s4 + $0x180] sm:$0xff] }
  0x14   :  { %v4780_v37 = vcombine.high %v99_v32, %v103_v33  ;;  %v91_v40 = vld [vmem:[%s7799_s3 + $0xd8] sm:$0xff]  ;;  %v82_v48 = vld [vmem:[%s7799_s3 + $0x90] sm:$0xff]  ;;  %v1079_v24 = vld [vmem:[%s7809_s4 + $0x188] sm:$0xff] }
  0x15   :  { %v95_v41 = vld [vmem:[%s7799_s3 + $0xf8] sm:$0xff]  ;;  %v86_v49 = vld [vmem:[%s7799_s3 + $0xb0] sm:$0xff]  ;;  %v1083_v25 = vld [vmem:[%s7809_s4 + $0x1a8] sm:$0xff] }
  0x16   :  { %523 = vmatpush1.bf16.msra.mxu0 %v4765_v43  ;;  %596 = vmatpush1.bf16.msra.mxu1 %v4767_v44  ;;  %v52_v43 = vld [vmem:[%s7808_s1 + $0x20] sm:$0xff]  ;;  %v53_v44 = vld [vmem:[%s7808_s1 + $0x28] sm:$0xff]  ;;  %v4772_v47 = vcombine.high %v91_v40, %v95_v41  ;;  %v4762_v55 = vcombine.high %v82_v48, %v86_v49  ;;  %v74_v57 = vld [vmem:[%s7799_s3 + $0x50] sm:$0xff]  ;;  %v4888_v29 = vcombine.high %v1079_v24, %v1083_v25 }
  0x17   :  { %524 = vmatprep.subr.bf16.mxu0 %v4758_v45  ;;  %597 = vmatprep.subr.bf16.mxu1 %v4760_v46  ;;  %v4779_v45 = vcombine.low %v99_v32, %v103_v33  ;;  %v4770_v46 = vcombine.high %v90_v38, %v94_v39  ;;  %v5919_v50 = vpack.c.bf16 %v53_v44, %v52_v43  ;;  %v78_v58 = vld [vmem:[%s7799_s3 + $0x70] sm:$0xff]  ;;  %v55_v63 = vld [vmem:[%s7808_s1 + $0x38] sm:$0xff]  ;;  %v1070_v30 = vld [vmem:[%s7809_s4 + $0x140] sm:$0xff] }
  0x18   :  { %v4754_v1 = vcombine.high %v74_v57, %v78_v58  ;;  %v70_v5 = vld [vmem:[%s7799_s3 + $0x30] sm:$0xff]  ;;  %v1074_v32 = vld [vmem:[%s7809_s4 + $0x160] sm:$0xff]  ;;  %v1071_v33 = vld [vmem:[%s7809_s4 + $0x148] sm:$0xff] }
  0x19   :  { %v4877_v43 = vcombine.low %v1070_v30, %v1074_v32 }
  0x1a   :  { %525 = vmatpush1.bf16.msra.mxu0 %v4757_v51  ;;  %598 = vmatpush1.bf16.msra.mxu1 %v4759_v52  ;;  %v83_v51 = vld [vmem:[%s7799_s3 + $0x98] sm:$0xff] }
  0x1b   :  { %526 = vmatprep.subr.bf16.mxu0 %v4750_v53  ;;  %599 = vmatprep.subr.bf16.mxu1 %v4752_v54  ;;  %v87_v52 = vld [vmem:[%s7799_s3 + $0xb8] sm:$0xff]  ;;  %v4769_v53 = vcombine.low %v90_v38, %v94_v39  ;;  %v4771_v54 = vcombine.low %v91_v40, %v95_v41  ;;  %v1062_v39 = vld [vmem:[%s7809_s4 + $0x100] sm:$0xff]  ;;  %v1063_v41 = vld [vmem:[%s7809_s4 + $0x108] sm:$0xff] }
  0x1c   :  { %v4764_v56 = vcombine.high %v83_v51, %v87_v52  ;;  %v4763_v0 = vcombine.low %v83_v51, %v87_v52  ;;  %v1066_v40 = vld [vmem:[%s7809_s4 + $0x120] sm:$0xff]  ;;  %v1059_v51 = vld [vmem:[%s7809_s4 + $0xe8] sm:$0xff] }
  0x1d   :  { %v4869_v52 = vcombine.low %v1062_v39, %v1066_v40 }
  0x1e   :  { %527 = vmatpush1.bf16.msra.mxu0 %v4749_v59  ;;  %600 = vmatpush1.bf16.msra.mxu1 %v4751_v60  ;;  %v75_v59 = vld [vmem:[%s7799_s3 + $0x58] sm:$0xff] }
  0x1f   :  { %528 = vmatprep.subr.bf16.mxu0 %v4742_v61  ;;  %601 = vmatprep.subr.bf16.mxu1 %v4744_v62  ;;  %v79_v60 = vld [vmem:[%s7799_s3 + $0x78] sm:$0xff]  ;;  %v4761_v61 = vcombine.low %v82_v48, %v86_v49  ;;  %v54_v62 = vld [vmem:[%s7808_s1 + $0x30] sm:$0xff]  ;;  %v1058_v48 = vld [vmem:[%s7809_s4 + $0xe0] sm:$0xff] }
  0x20   :  { %v4756_v2 = vcombine.high %v75_v59, %v79_v60  ;;  %v5955_v6 = vpack.c.bf16 %v55_v63, %v54_v62  ;;  %v4755_v10 = vcombine.low %v75_v59, %v79_v60  ;;  %v1055_v49 = vld [vmem:[%s7809_s4 + $0xc8] sm:$0xff] }
  0x21   :  { %v1051_v59 = vld [vmem:[%s7809_s4 + $0xa8] sm:$0xff] }
  0x22   :  { %529 = vmatpush1.bf16.msra.mxu0 %v4741_v4  ;;  %602 = vmatpush1.bf16.msra.mxu1 %v4743_v7  ;;  %v66_v4 = vld [vmem:[%s7799_s3 + $0x10] sm:$0xff]  ;;  %v67_v7 = vld [vmem:[%s7799_s3 + $0x18] sm:$0xff] }
  0x23   :  { %660 = vmatprep.subr.bf16.mxu0 %v4802_v8  ;;  %733 = vmatprep.subr.bf16.mxu1 %v4804_v9  ;;  %v71_v8 = vld [vmem:[%s7799_s3 + $0x38] sm:$0xff]  ;;  %v4753_v9 = vcombine.low %v74_v57, %v78_v58  ;;  %v4746_v11 = vcombine.high %v66_v4, %v70_v5  ;;  %v1050_v57 = vld [vmem:[%s7809_s4 + $0xa0] sm:$0xff]  ;;  %v1047_v58 = vld [vmem:[%s7809_s4 + $0x88] sm:$0xff] }
  0x24   :  { %v4748_v13 = vcombine.high %v67_v7, %v71_v8  ;;  %v4747_v19 = vcombine.low %v67_v7, %v71_v8  ;;  %v4856_v63 = vcombine.high %v1047_v58, %v1051_v59  ;;  %v4855_v7 = vcombine.low %v1047_v58, %v1051_v59 }
  0x25   :  { %547 = vmatmul.mubr.bf16.vlgmr.msra.gmra.mxu0 %v5847_v12  ;;  %620 = vmatmul.mubr.bf16.vlgmr.msra.gmra.mxu1 %v5847_v12 }
  0x26   :  { %661 = vmatpush1.bf16.msra.mxu0 %v4801_v15  ;;  %734 = vmatpush1.bf16.msra.mxu1 %v4803_v16  ;;  %v1090_v15 = vld [vmem:[%s7809_s4 + $0x1e0] sm:$0xff]  ;;  %v1087_v16 = vld [vmem:[%s7809_s4 + $0x1c8] sm:$0xff] }
  0x27   :  { %662 = vmatprep.subr.bf16.mxu0 %v4794_v17  ;;  %735 = vmatprep.subr.bf16.mxu1 %v4796_v18  ;;  %v1091_v17 = vld [vmem:[%s7809_s4 + $0x1e8] sm:$0xff]  ;;  %v4745_v18 = vcombine.low %v66_v4, %v70_v5  ;;  %v4894_v20 = vcombine.high %v1086_v14, %v1090_v15 }
  0x28   :  { %556 = vmatprep.mubr.bf16.mxu0 %v7813_v3  ;;  %629 = vmatprep.mubr.bf16.mxu1 %v7813_v3  ;;  %v4896_v21 = vcombine.high %v1087_v16, %v1091_v17  ;;  %v1043_v4 = vld [vmem:[%s7809_s4 + $0x68] sm:$0xff] }
  0x2a   :  { %663 = vmatpush1.bf16.msra.mxu0 %v4793_v23  ;;  %736 = vmatpush1.bf16.msra.mxu1 %v4795_v26  ;;  %v1082_v23 = vld [vmem:[%s7809_s4 + $0x1a0] sm:$0xff]  ;;  %v4893_v26 = vcombine.low %v1086_v14, %v1090_v15  ;;  %v1035_v14 = vld [vmem:[%s7809_s4 + $0x28] sm:$0xff] }
  0x2b   :  { %664 = vmatprep.subr.bf16.mxu0 %v4786_v27  ;;  %737 = vmatprep.subr.bf16.mxu1 %v4788_v28  ;;  %v4895_v27 = vcombine.low %v1087_v16, %v1091_v17  ;;  %v4886_v28 = vcombine.high %v1078_v22, %v1082_v23 }
  0x2d   :  { %557 = vmatmul.mubr.bf16.gmra.mxu0 %v5883_v31  ;;  %630 = vmatmul.mubr.bf16.gmra.mxu1 %v5883_v31 }
  0x2e   :  { %665 = vmatpush1.bf16.msra.mxu0 %v4785_v34  ;;  %738 = vmatpush1.bf16.msra.mxu1 %v4787_v35  ;;  %v1075_v34 = vld [vmem:[%s7809_s4 + $0x168] sm:$0xff]  ;;  %v4885_v35 = vcombine.low %v1078_v22, %v1082_v23  ;;  %v1093_v22 = vld [vmem:[%s7809_s4 + $0x1f8] sm:$0xff] }
  0x2f   :  { %666 = vmatprep.subr.bf16.mxu0 %v4778_v36  ;;  %739 = vmatprep.subr.bf16.mxu1 %v4780_v37  ;;  %v4887_v36 = vcombine.low %v1079_v24, %v1083_v25  ;;  %v4878_v37 = vcombine.high %v1070_v30, %v1074_v32  ;;  %v4880_v38 = vcombine.high %v1071_v33, %v1075_v34  ;;  %v1085_v30 = vld [vmem:[%s7809_s4 + $0x1b8] sm:$0xff] }
  0x30   :  { %566 = vmatprep.mubr.bf16.mxu0 %v7813_v3  ;;  %639 = vmatprep.mubr.bf16.mxu1 %v7813_v3  ;;  %v4879_v44 = vcombine.low %v1071_v33, %v1075_v34 }
  0x32   :  { %667 = vmatpush1.bf16.msra.mxu0 %v4777_v42  ;;  %740 = vmatpush1.bf16.msra.mxu1 %v4779_v45  ;;  %v1067_v42 = vld [vmem:[%s7809_s4 + $0x128] sm:$0xff]  ;;  %v4870_v45 = vcombine.high %v1062_v39, %v1066_v40  ;;  %v1077_v39 = vld [vmem:[%s7809_s4 + $0x178] sm:$0xff] }
  0x33   :  { %668 = vmatprep.subr.bf16.mxu0 %v4770_v46  ;;  %741 = vmatprep.subr.bf16.mxu1 %v4772_v47  ;;  %v4872_v46 = vcombine.high %v1063_v41, %v1067_v42  ;;  %v1054_v47 = vld [vmem:[%s7809_s4 + $0xc0] sm:$0xff] }
  0x34   :  { %v4861_v60 = vcombine.low %v1054_v47, %v1058_v48 }
  0x35   :  { %567 = vmatmul.mubr.bf16.gmra.mxu0 %v5919_v50  ;;  %640 = vmatmul.mubr.bf16.gmra.mxu1 %v5919_v50 }
  0x36   :  { %669 = vmatpush1.bf16.msra.mxu0 %v4769_v53  ;;  %742 = vmatpush1.bf16.msra.mxu1 %v4771_v54  ;;  %v4871_v53 = vcombine.low %v1063_v41, %v1067_v42  ;;  %v4862_v54 = vcombine.high %v1054_v47, %v1058_v48  ;;  %v1069_v47 = vld [vmem:[%s7809_s4 + $0x138] sm:$0xff] }
  0x37   :  { %670 = vmatprep.subr.bf16.mxu0 %v4762_v55  ;;  %743 = vmatprep.subr.bf16.mxu1 %v4764_v56  ;;  %v4864_v55 = vcombine.high %v1055_v49, %v1059_v51  ;;  %v1046_v56 = vld [vmem:[%s7809_s4 + $0x80] sm:$0xff] }
  0x38   :  { %576 = vmatprep.mubr.bf16.mxu0 %v7813_v3  ;;  %649 = vmatprep.mubr.bf16.mxu1 %v7813_v3  ;;  %v4854_v62 = vcombine.high %v1046_v56, %v1050_v57  ;;  %v4853_v5 = vcombine.low %v1046_v56, %v1050_v57  ;;  %v1061_v56 = vld [vmem:[%s7809_s4 + $0xf8] sm:$0xff] }
  0x3a   :  { %671 = vmatpush1.bf16.msra.mxu0 %v4761_v61  ;;  %744 = vmatpush1.bf16.msra.mxu1 %v4763_v0  ;;  %v4863_v61 = vcombine.low %v1055_v49, %v1059_v51  ;;  %v1038_v0 = vld [vmem:[%s7809_s4 + $0x40] sm:$0xff] }
  0x3b   :  { %672 = vmatprep.subr.bf16.mxu0 %v4754_v1  ;;  %745 = vmatprep.subr.bf16.mxu1 %v4756_v2  ;;  %v1042_v1 = vld [vmem:[%s7809_s4 + $0x60] sm:$0xff]  ;;  %v1039_v2 = vld [vmem:[%s7809_s4 + $0x48] sm:$0xff] }
  0x3c   :  { %v4846_v8 = vcombine.high %v1038_v0, %v1042_v1  ;;  %v4845_v15 = vcombine.low %v1038_v0, %v1042_v1  ;;  %v4847_v16 = vcombine.low %v1039_v2, %v1043_v4  ;;  %v1053_v0 = vld [vmem:[%s7809_s4 + $0xb8] sm:$0xff] }
  0x3d   :  { %577 = vmatmul.mubr.bf16.gmra.mxu0 %v5955_v6  ;;  %650 = vmatmul.mubr.bf16.gmra.mxu1 %v5955_v6 }
  0x3e   :  { %673 = vmatpush1.bf16.msra.mxu0 %v4753_v9  ;;  %746 = vmatpush1.bf16.msra.mxu1 %v4755_v10  ;;  %v4848_v9 = vcombine.high %v1039_v2, %v1043_v4  ;;  %v1030_v10 = vld [vmem:[%s7809_s4] sm:$0xff] }
  0x3f   :  { %674 = vmatprep.subr.bf16.mxu0 %v4746_v11  ;;  %747 = vmatprep.subr.bf16.mxu1 %v4748_v13  ;;  %v1034_v11 = vld [vmem:[%s7809_s4 + $0x20] sm:$0xff]  ;;  %v1031_v13 = vld [vmem:[%s7809_s4 + $0x8] sm:$0xff] }
  0x40   :  { %692 = vmatprep.mubr.bf16.mxu0 %v7813_v3  ;;  %765 = vmatprep.mubr.bf16.mxu1 %v7813_v3  ;;  %v4838_v17 = vcombine.high %v1030_v10, %v1034_v11  ;;  %v4837_v23 = vcombine.low %v1030_v10, %v1034_v11  ;;  %v4839_v24 = vcombine.low %v1031_v13, %v1035_v14  ;;  %v1045_v10 = vld [vmem:[%s7809_s4 + $0x78] sm:$0xff] }
  0x42   :  { %675 = vmatpush1.bf16.msra.mxu0 %v4745_v18  ;;  %748 = vmatpush1.bf16.msra.mxu1 %v4747_v19  ;;  %v4840_v18 = vcombine.high %v1031_v13, %v1035_v14  ;;  %v1088_v19 = vld [vmem:[%s7809_s4 + $0x1d0] sm:$0xff] }
  0x43   :  { %1456 = vmatprep.subr.bf16.mxu0 %v4894_v20  ;;  %1529 = vmatprep.subr.bf16.mxu1 %v4896_v21  ;;  %v1092_v20 = vld [vmem:[%s7809_s4 + $0x1f0] sm:$0xff]  ;;  %v1089_v21 = vld [vmem:[%s7809_s4 + $0x1d8] sm:$0xff] }
  0x44   :  { %v4898_v25 = vcombine.high %v1088_v19, %v1092_v20  ;;  %v4897_v32 = vcombine.low %v1088_v19, %v1092_v20  ;;  %v4899_v33 = vcombine.low %v1089_v21, %v1093_v22  ;;  %v1037_v19 = vld [vmem:[%s7809_s4 + $0x38] sm:$0xff] }
  0x45   :  { %693 = vmatmul.mubr.bf16.vlgmr.msra.gmra.mxu0 %v5847_v12  ;;  %766 = vmatmul.mubr.bf16.vlgmr.msra.gmra.mxu1 %v5847_v12 }
  0x46   :  { %1457 = vmatpush1.bf16.msra.mxu0 %v4893_v26  ;;  %1530 = vmatpush1.bf16.msra.mxu1 %v4895_v27  ;;  %v4900_v26 = vcombine.high %v1089_v21, %v1093_v22  ;;  %v1080_v27 = vld [vmem:[%s7809_s4 + $0x190] sm:$0xff] }
  0x47   :  { %1458 = vmatprep.subr.bf16.mxu0 %v4886_v28  ;;  %1531 = vmatprep.subr.bf16.mxu1 %v4888_v29  ;;  %v1084_v28 = vld [vmem:[%s7809_s4 + $0x1b0] sm:$0xff]  ;;  %v1081_v29 = vld [vmem:[%s7809_s4 + $0x198] sm:$0xff] }
  0x48   :  { %702 = vmatprep.mubr.bf16.mxu0 %v7813_v3  ;;  %775 = vmatprep.mubr.bf16.mxu1 %v7813_v3  ;;  %v4890_v34 = vcombine.high %v1080_v27, %v1084_v28  ;;  %v4889_v40 = vcombine.low %v1080_v27, %v1084_v28  ;;  %v4891_v41 = vcombine.low %v1081_v29, %v1085_v30 }
  0x4a   :  { %1459 = vmatpush1.bf16.msra.mxu0 %v4885_v35  ;;  %1532 = vmatpush1.bf16.msra.mxu1 %v4887_v36  ;;  %v4892_v35 = vcombine.high %v1081_v29, %v1085_v30  ;;  %v1072_v36 = vld [vmem:[%s7809_s4 + $0x150] sm:$0xff] }
  0x4b   :  { %1460 = vmatprep.subr.bf16.mxu0 %v4878_v37  ;;  %1533 = vmatprep.subr.bf16.mxu1 %v4880_v38  ;;  %v1076_v37 = vld [vmem:[%s7809_s4 + $0x170] sm:$0xff]  ;;  %v1073_v38 = vld [vmem:[%s7809_s4 + $0x158] sm:$0xff] }
  0x4c   :  { %v4882_v42 = vcombine.high %v1072_v36, %v1076_v37  ;;  %v4881_v48 = vcombine.low %v1072_v36, %v1076_v37  ;;  %v4883_v49 = vcombine.low %v1073_v38, %v1077_v39 }
  0x4d   :  { %703 = vmatmul.mubr.bf16.gmra.mxu0 %v5883_v31  ;;  %776 = vmatmul.mubr.bf16.gmra.mxu1 %v5883_v31 }
  0x4e   :  { %1461 = vmatpush1.bf16.msra.mxu0 %v4877_v43  ;;  %1534 = vmatpush1.bf16.msra.mxu1 %v4879_v44  ;;  %v4884_v43 = vcombine.high %v1073_v38, %v1077_v39  ;;  %v1064_v44 = vld [vmem:[%s7809_s4 + $0x110] sm:$0xff] }
  0x4f   :  { %1462 = vmatprep.subr.bf16.mxu0 %v4870_v45  ;;  %1535 = vmatprep.subr.bf16.mxu1 %v4872_v46  ;;  %v1068_v45 = vld [vmem:[%s7809_s4 + $0x130] sm:$0xff]  ;;  %v1065_v46 = vld [vmem:[%s7809_s4 + $0x118] sm:$0xff] }
  0x50   :  { %712 = vmatprep.mubr.bf16.mxu0 %v7813_v3  ;;  %785 = vmatprep.mubr.bf16.mxu1 %v7813_v3  ;;  %v4874_v51 = vcombine.high %v1064_v44, %v1068_v45  ;;  %v4873_v57 = vcombine.low %v1064_v44, %v1068_v45  ;;  %v4875_v58 = vcombine.low %v1065_v46, %v1069_v47  ;;  %v6247_v44 = vld [vmem:[%s7811_s2] sm:$0xff] }
  0x52   :  { %1463 = vmatpush1.bf16.msra.mxu0 %v4869_v52  ;;  %1536 = vmatpush1.bf16.msra.mxu1 %v4871_v53  ;;  %v4876_v52 = vcombine.high %v1065_v46, %v1069_v47  ;;  %v1056_v53 = vld [vmem:[%s7809_s4 + $0xd0] sm:$0xff] }
  0x53   :  { %1464 = vmatprep.subr.bf16.mxu0 %v4862_v54  ;;  %1537 = vmatprep.subr.bf16.mxu1 %v4864_v55  ;;  %v1060_v54 = vld [vmem:[%s7809_s4 + $0xf0] sm:$0xff]  ;;  %v1057_v55 = vld [vmem:[%s7809_s4 + $0xd8] sm:$0xff] }
  0x54   :  { %v4866_v59 = vcombine.high %v1056_v53, %v1060_v54  ;;  %v4865_v1 = vcombine.low %v1056_v53, %v1060_v54  ;;  %v4867_v2 = vcombine.low %v1057_v55, %v1061_v56 }
  0x55   :  { %713 = vmatmul.mubr.bf16.gmra.mxu0 %v5919_v50  ;;  %786 = vmatmul.mubr.bf16.gmra.mxu1 %v5919_v50 }
  0x56   :  { %1465 = vmatpush1.bf16.msra.mxu0 %v4861_v60  ;;  %1538 = vmatpush1.bf16.msra.mxu1 %v4863_v61  ;;  %v4868_v60 = vcombine.high %v1057_v55, %v1061_v56  ;;  %v1048_v61 = vld [vmem:[%s7809_s4 + $0x90] sm:$0xff] }
  0x57   :  { %1466 = vmatprep.subr.bf16.mxu0 %v4854_v62  ;;  %1539 = vmatprep.subr.bf16.mxu1 %v4856_v63  ;;  %v1052_v62 = vld [vmem:[%s7809_s4 + $0xb0] sm:$0xff]  ;;  %v1049_v63 = vld [vmem:[%s7809_s4 + $0x98] sm:$0xff] }
  0x58   :  { %722 = vmatprep.mubr.bf16.mxu0 %v7813_v3  ;;  %795 = vmatprep.mubr.bf16.mxu1 %v7813_v3  ;;  %v4858_v4 = vcombine.high %v1048_v61, %v1052_v62  ;;  %v4857_v11 = vcombine.low %v1048_v61, %v1052_v62  ;;  %v4859_v13 = vcombine.low %v1049_v63, %v1053_v0 }
  0x5a   :  { %1467 = vmatpush1.bf16.msra.mxu0 %v4853_v5  ;;  %1540 = vmatpush1.bf16.msra.mxu1 %v4855_v7  ;;  %v4860_v5 = vcombine.high %v1049_v63, %v1053_v0  ;;  %v1040_v7 = vld [vmem:[%s7809_s4 + $0x50] sm:$0xff] }
  0x5b   :  { %1468 = vmatprep.subr.bf16.mxu0 %v4846_v8  ;;  %1541 = vmatprep.subr.bf16.mxu1 %v4848_v9  ;;  %v1044_v8 = vld [vmem:[%s7809_s4 + $0x70] sm:$0xff]  ;;  %v1041_v9 = vld [vmem:[%s7809_s4 + $0x58] sm:$0xff] }
  0x5c   :  { %v4850_v14 = vcombine.high %v1040_v7, %v1044_v8  ;;  %v4849_v20 = vcombine.low %v1040_v7, %v1044_v8  ;;  %v4851_v21 = vcombine.low %v1041_v9, %v1045_v10 }
  0x5d   :  { %723 = vmatmul.mubr.bf16.gmra.mxu0 %v5955_v6  ;;  %796 = vmatmul.mubr.bf16.gmra.mxu1 %v5955_v6 }
  0x5e   :  { %1469 = vmatpush1.bf16.msra.mxu0 %v4845_v15  ;;  %1542 = vmatpush1.bf16.msra.mxu1 %v4847_v16  ;;  %v4852_v15 = vcombine.high %v1041_v9, %v1045_v10  ;;  %v1032_v16 = vld [vmem:[%s7809_s4 + $0x10] sm:$0xff] }
  0x5f   :  { %1470 = vmatprep.subr.bf16.mxu0 %v4838_v17  ;;  %1543 = vmatprep.subr.bf16.mxu1 %v4840_v18  ;;  %v1036_v17 = vld [vmem:[%s7809_s4 + $0x30] sm:$0xff]  ;;  %v1033_v18 = vld [vmem:[%s7809_s4 + $0x18] sm:$0xff] }
  0x60   :  { %1488 = vmatprep.mubr.bf16.mxu0 %v7813_v3  ;;  %1561 = vmatprep.mubr.bf16.mxu1 %v7813_v3  ;;  %v4842_v22 = vcombine.high %v1032_v16, %v1036_v17 }
  0x62   :  { %1471 = vmatpush1.bf16.msra.mxu0 %v4837_v23  ;;  %1544 = vmatpush1.bf16.msra.mxu1 %v4839_v24  ;;  %v4844_v23 = vcombine.high %v1033_v18, %v1037_v19  ;;  %v4841_v24 = vcombine.low %v1032_v16, %v1036_v17 }
  0x63   :  { %1602 = vmatprep.subr.bf16.mxu0 %v4898_v25  ;;  %1675 = vmatprep.subr.bf16.mxu1 %v4900_v26  ;;  %v4843_v25 = vcombine.low %v1033_v18, %v1037_v19 }
  0x65   :  { %1489 = vmatmul.mubr.bf16.vlgmr.msra.gmra.mxu0 %v5847_v12  ;;  %1562 = vmatmul.mubr.bf16.vlgmr.msra.gmra.mxu1 %v5847_v12 }
  0x66   :  { %1603 = vmatpush1.bf16.msra.mxu0 %v4897_v32  ;;  %1676 = vmatpush1.bf16.msra.mxu1 %v4899_v33 }
  0x67   :  { %1604 = vmatprep.subr.bf16.mxu0 %v4890_v34  ;;  %1677 = vmatprep.subr.bf16.mxu1 %v4892_v35 }
  0x68   :  { %1498 = vmatprep.mubr.bf16.mxu0 %v7813_v3  ;;  %1571 = vmatprep.mubr.bf16.mxu1 %v7813_v3 }
  0x6a   :  { %1605 = vmatpush1.bf16.msra.mxu0 %v4889_v40  ;;  %1678 = vmatpush1.bf16.msra.mxu1 %v4891_v41 }
  0x6b   :  { %1606 = vmatprep.subr.bf16.mxu0 %v4882_v42  ;;  %1679 = vmatprep.subr.bf16.mxu1 %v4884_v43  ;;  %v5648_v43 = vmov 0.0  }
  0x6c   :  { %1972 = vst [vmem:[#allocation4] sm:$0xff] %v5648_v43  ;;  %1973 = vst [vmem:[#allocation4 + $0x8] sm:$0xff] %v5648_v43 }
  0x6d   :  { %1499 = vmatmul.mubr.bf16.gmra.mxu0 %v5883_v31  ;;  %1572 = vmatmul.mubr.bf16.gmra.mxu1 %v5883_v31  ;;  %1974 = vst [vmem:[#allocation4 + $0x10] sm:$0xff] %v5648_v43  ;;  %1975 = vst [vmem:[#allocation4 + $0x18] sm:$0xff] %v5648_v43 }
  0x6e   :  { %1607 = vmatpush1.bf16.msra.mxu0 %v4881_v48  ;;  %1680 = vmatpush1.bf16.msra.mxu1 %v4883_v49  ;;  %1976 = vst [vmem:[#allocation4 + $0x20] sm:$0xff] %v5648_v43  ;;  %1977 = vst [vmem:[#allocation4 + $0x28] sm:$0xff] %v5648_v43 }
  0x6f   :  { %1608 = vmatprep.subr.bf16.mxu0 %v4874_v51  ;;  %1681 = vmatprep.subr.bf16.mxu1 %v4876_v52  ;;  %1978 = vst [vmem:[#allocation4 + $0x30] sm:$0xff] %v5648_v43  ;;  %1979 = vst [vmem:[#allocation4 + $0x38] sm:$0xff] %v5648_v43 }
  0x70   :  { %1508 = vmatprep.mubr.bf16.mxu0 %v7813_v3  ;;  %1581 = vmatprep.mubr.bf16.mxu1 %v7813_v3  ;;  %1980 = vst [vmem:[#allocation4 + $0x40] sm:$0xff] %v5648_v43  ;;  %1981 = vst [vmem:[#allocation4 + $0x48] sm:$0xff] %v5648_v43 }
  0x71   :  { %1982 = vst [vmem:[#allocation4 + $0x50] sm:$0xff] %v5648_v43  ;;  %1983 = vst [vmem:[#allocation4 + $0x58] sm:$0xff] %v5648_v43 }
  0x72   :  { %1609 = vmatpush1.bf16.msra.mxu0 %v4873_v57  ;;  %1682 = vmatpush1.bf16.msra.mxu1 %v4875_v58  ;;  %1984 = vst [vmem:[#allocation4 + $0x60] sm:$0xff] %v5648_v43  ;;  %1985 = vst [vmem:[#allocation4 + $0x68] sm:$0xff] %v5648_v43 }
  0x73   :  { %1610 = vmatprep.subr.bf16.mxu0 %v4866_v59  ;;  %1683 = vmatprep.subr.bf16.mxu1 %v4868_v60  ;;  %1986 = vst [vmem:[#allocation4 + $0x70] sm:$0xff] %v5648_v43  ;;  %1987 = vst [vmem:[#allocation4 + $0x78] sm:$0xff] %v5648_v43 }
  0x74   :  { %1988 = vst [vmem:[#allocation4 + $0x80] sm:$0xff] %v5648_v43  ;;  %1989 = vst [vmem:[#allocation4 + $0x88] sm:$0xff] %v5648_v43 }
  0x75   :  { %1509 = vmatmul.mubr.bf16.gmra.mxu0 %v5919_v50  ;;  %1582 = vmatmul.mubr.bf16.gmra.mxu1 %v5919_v50  ;;  %1990 = vst [vmem:[#allocation4 + $0x90] sm:$0xff] %v5648_v43  ;;  %1991 = vst [vmem:[#allocation4 + $0x98] sm:$0xff] %v5648_v43 }
  0x76   :  { %1611 = vmatpush1.bf16.msra.mxu0 %v4865_v1  ;;  %1684 = vmatpush1.bf16.msra.mxu1 %v4867_v2  ;;  %1992 = vst [vmem:[#allocation4 + $0xa0] sm:$0xff] %v5648_v43  ;;  %1993 = vst [vmem:[#allocation4 + $0xa8] sm:$0xff] %v5648_v43 }
  0x77   :  { %1612 = vmatprep.subr.bf16.mxu0 %v4858_v4  ;;  %1685 = vmatprep.subr.bf16.mxu1 %v4860_v5  ;;  %1994 = vst [vmem:[#allocation4 + $0xb0] sm:$0xff] %v5648_v43  ;;  %1995 = vst [vmem:[#allocation4 + $0xb8] sm:$0xff] %v5648_v43 }
  0x78   :  { %1518 = vmatprep.mubr.bf16.mxu0 %v7813_v3  ;;  %1591 = vmatprep.mubr.bf16.mxu1 %v7813_v3  ;;  %1996 = vst [vmem:[#allocation4 + $0xc0] sm:$0xff] %v5648_v43  ;;  %1997 = vst [vmem:[#allocation4 + $0xc8] sm:$0xff] %v5648_v43 }
  0x79   :  { %1998 = vst [vmem:[#allocation4 + $0xd0] sm:$0xff] %v5648_v43  ;;  %1999 = vst [vmem:[#allocation4 + $0xd8] sm:$0xff] %v5648_v43 }
  0x7a   :  { %1613 = vmatpush1.bf16.msra.mxu0 %v4857_v11  ;;  %1686 = vmatpush1.bf16.msra.mxu1 %v4859_v13  ;;  %2000 = vst [vmem:[#allocation4 + $0xe0] sm:$0xff] %v5648_v43  ;;  %2001 = vst [vmem:[#allocation4 + $0xe8] sm:$0xff] %v5648_v43 }
  0x7b   :  { %1614 = vmatprep.subr.bf16.mxu0 %v4850_v14  ;;  %1687 = vmatprep.subr.bf16.mxu1 %v4852_v15  ;;  %2002 = vst [vmem:[#allocation4 + $0xf0] sm:$0xff] %v5648_v43  ;;  %2003 = vst [vmem:[#allocation4 + $0xf8] sm:$0xff] %v5648_v43 }
  0x7d   :  { %1519 = vmatmul.mubr.bf16.gmra.mxu0 %v5955_v6  ;;  %1592 = vmatmul.mubr.bf16.gmra.mxu1 %v5955_v6 }
  0x7e   :  { %1615 = vmatpush1.bf16.msra.mxu0 %v4849_v20  ;;  %1688 = vmatpush1.bf16.msra.mxu1 %v4851_v21 }
  0x7f   :  { %1616 = vmatprep.subr.bf16.mxu0 %v4842_v22  ;;  %1689 = vmatprep.subr.bf16.mxu1 %v4844_v23 }
  0x80   :  { %1634 = vmatprep.mubr.bf16.mxu0 %v7813_v3  ;;  %1707 = vmatprep.mubr.bf16.mxu1 %v7813_v3 }
  0x82   :  { %1617 = vmatpush1.bf16.msra.mxu0 %v4841_v24  ;;  %1690 = vmatpush1.bf16.msra.mxu1 %v4843_v25 }
  0x85   :  { %1635 = vmatmul.mubr.bf16.vlgmr.msra.gmra.mxu0 %v5847_v12  ;;  %1708 = vmatmul.mubr.bf16.vlgmr.msra.gmra.mxu1 %v5847_v12  ;;  %v130_v12 = vlaneseq }
  0x86   :  { %1644 = vmatprep.mubr.bf16.mxu0 %v7813_v3  ;;  %1717 = vmatprep.mubr.bf16.mxu1 %v7813_v3 }
  0x87   :  { %v6205_v26 = vshrl.u32 %v130_v12, 7 }
  0x89   :  { %v6211_v27 = vsub.s32 1, %v6205_v26  ;;  %v6219_v28 = vsub.s32 2, %v6205_v26  ;;  %v6222_v29 = vsub.s32 3, %v6205_v26 }
  0x8b   :  { %7826 = vst [vmem:[#allocation8_spill] sm:$0xff] %v6211_v27  ;;  %7827 = vst [vmem:[#allocation9_spill] sm:$0xff] %v6219_v28 }
  0x8c   :  { %7828 = vst [vmem:[#allocation10_spill] sm:$0xff] %v6222_v29 }
  0x8d   :  { %1645 = vmatmul.mubr.bf16.gmra.mxu0 %v5883_v31  ;;  %1718 = vmatmul.mubr.bf16.gmra.mxu1 %v5883_v31  ;;  %v6208_v31 = vsub.s32 0, %v6205_v26 }
  0x8e   :  { %1654 = vmatprep.mubr.bf16.mxu0 %v7813_v3  ;;  %1727 = vmatprep.mubr.bf16.mxu1 %v7813_v3 }
  0x8f   :  { %7825 = vst [vmem:[#allocation7_spill] sm:$0xff] %v6208_v31 }
  0x95   :  { %1655 = vmatmul.mubr.bf16.gmra.mxu0 %v5919_v50  ;;  %1728 = vmatmul.mubr.bf16.gmra.mxu1 %v5919_v50  ;;  %v6216_v50 = vld [vmem:[%s7810_s5] sm:$0xff] }
  0x96   :  { %1664 = vmatprep.mubr.bf16.mxu0 %v7813_v3  ;;  %1737 = vmatprep.mubr.bf16.mxu1 %v7813_v3  ;;  %v6230_v30 = vrot.slane %v6216_v50, %v6211_v27  ;;  %v6234_v33 = vrot.slane %v6216_v50, %v6219_v28  ;;  %v6238_v34 = vrot.slane %v6216_v50, %v6222_v29 }
  0x9d   :  { %1665 = vmatmul.mubr.bf16.gmra.mxu0 %v5955_v6  ;;  %1738 = vmatmul.mubr.bf16.gmra.mxu1 %v5955_v6  ;;  %v6226_v6 = vrot.slane %v6216_v50, %v6208_v31 }
  0xe5   :  { %v548_v32 = vpop.f32.mrf.mxu0  ;;  %v621_v35 = vpop.f32.mrf.mxu1 }
  0xe6   :  { %v549_v37 = vadd.f32 %v548_v32, %v6226_v6  ;;  %v622_v40 = vadd.f32 %v621_v35, %v6234_v33 }
  0xe7   :  { %v550_v36 = vpop.f32.mrf.mxu0  ;;  %v623_v39 = vpop.f32.mrf.mxu1 }
  0xe8   :  { %v551_v38 = vadd.f32 %v550_v36, %v6230_v30  ;;  %v624_v41 = vadd.f32 %v623_v39, %v6238_v34 }
  0xe9   :  { %v552_v42 = vpop.f32.mrf.mxu0  ;;  %v625_v46 = vpop.f32.mrf.mxu1 }
  0xea   :  { %v5217_v45 = vpack.c.bf16 %v551_v38, %v549_v37  ;;  %v5218_v47 = vpack.c.bf16 %v624_v41, %v622_v40  ;;  %v553_v49 = vadd.f32 %v552_v42, %v6226_v6  ;;  %v626_v53 = vadd.f32 %v625_v46, %v6234_v33 }
  0xeb   :  { %v554_v48 = vpop.f32.mrf.mxu0  ;;  %v627_v52 = vpop.f32.mrf.mxu1 }
  0xec   :  { %998 = vst [vmem:[#allocation2] sm:$0xff] %v5217_v45  ;;  %v555_v51 = vadd.f32 %v554_v48, %v6230_v30  ;;  %999 = vst [vmem:[#allocation2 + $0x8] sm:$0xff] %v5218_v47  ;;  %v628_v54 = vadd.f32 %v627_v52, %v6238_v34  ;;  %v152_v52 = vsub.s32 5, %v6205_v26 }
  0xed   :  { %v558_v55 = vpop.f32.mrf.mxu0  ;;  %v631_v57 = vpop.f32.mrf.mxu1 }
  0xee   :  { %v5221_v56 = vpack.c.bf16 %v555_v51, %v553_v49  ;;  %v5222_v58 = vpack.c.bf16 %v628_v54, %v626_v53  ;;  %v559_v60 = vadd.f32 %v558_v55, %v6226_v6  ;;  %v632_v63 = vadd.f32 %v631_v57, %v6234_v33 }
  0xef   :  { %v560_v59 = vpop.f32.mrf.mxu0  ;;  %v633_v62 = vpop.f32.mrf.mxu1  ;;  %v148_v51 = vsub.s32 4, %v6205_v26  ;;  %v160_v57 = vsub.s32 7, %v6205_v26 }
  0xf0   :  { %1002 = vst [vmem:[#allocation2 + $0x20] sm:$0xff] %v5221_v56  ;;  %v561_v61 = vadd.f32 %v560_v59, %v6230_v30  ;;  %1003 = vst [vmem:[#allocation2 + $0x28] sm:$0xff] %v5222_v58  ;;  %v634_v0 = vadd.f32 %v633_v62, %v6238_v34  ;;  %v156_v56 = vsub.s32 6, %v6205_v26 }
  0xf1   :  { %v562_v1 = vpop.f32.mrf.mxu0  ;;  %v635_v4 = vpop.f32.mrf.mxu1 }
  0xf2   :  { %v5225_v2 = vpack.c.bf16 %v561_v61, %v559_v60  ;;  %v5226_v5 = vpack.c.bf16 %v634_v0, %v632_v63  ;;  %v563_v8 = vadd.f32 %v562_v1, %v6226_v6  ;;  %v636_v11 = vadd.f32 %v635_v4, %v6234_v33 }
  0xf3   :  { %v564_v7 = vpop.f32.mrf.mxu0  ;;  %v637_v10 = vpop.f32.mrf.mxu1  ;;  %v6282_v1 = vrot.slane %v6216_v50, %v148_v51 }
  0xf4   :  { %1006 = vst [vmem:[#allocation2 + $0x40] sm:$0xff] %v5225_v2  ;;  %v565_v9 = vadd.f32 %v564_v7, %v6230_v30  ;;  %1007 = vst [vmem:[#allocation2 + $0x48] sm:$0xff] %v5226_v5  ;;  %v638_v13 = vadd.f32 %v637_v10, %v6238_v34  ;;  %v6287_v2 = vrot.slane %v6216_v50, %v152_v52 }
  0xf5   :  { %v568_v14 = vpop.f32.mrf.mxu0  ;;  %v641_v16 = vpop.f32.mrf.mxu1 }
  0xf6   :  { %v5229_v15 = vpack.c.bf16 %v565_v9, %v563_v8  ;;  %v5230_v17 = vpack.c.bf16 %v638_v13, %v636_v11  ;;  %v569_v19 = vadd.f32 %v568_v14, %v6226_v6  ;;  %v642_v22 = vadd.f32 %v641_v16, %v6234_v33 }
  0xf7   :  { %v570_v18 = vpop.f32.mrf.mxu0  ;;  %v643_v21 = vpop.f32.mrf.mxu1 }
  0xf8   :  { %1010 = vst [vmem:[#allocation2 + $0x60] sm:$0xff] %v5229_v15  ;;  %v571_v20 = vadd.f32 %v570_v18, %v6230_v30  ;;  %1011 = vst [vmem:[#allocation2 + $0x68] sm:$0xff] %v5230_v17  ;;  %v644_v23 = vadd.f32 %v643_v21, %v6238_v34 }
  0xf9   :  { %v572_v24 = vpop.f32.mrf.mxu0  ;;  %v645_v12 = vpop.f32.mrf.mxu1 }
  0xfa   :  { %v5233_v25 = vpack.c.bf16 %v571_v20, %v569_v19  ;;  %v5234_v32 = vpack.c.bf16 %v644_v23, %v642_v22  ;;  %v573_v36 = vadd.f32 %v572_v24, %v6226_v6  ;;  %v646_v39 = vadd.f32 %v645_v12, %v6234_v33 }
  0xfb   :  { %v574_v35 = vpop.f32.mrf.mxu0  ;;  %v647_v38 = vpop.f32.mrf.mxu1 }
  0xfc   :  { %1014 = vst [vmem:[#allocation2 + $0x80] sm:$0xff] %v5233_v25  ;;  %v575_v37 = vadd.f32 %v574_v35, %v6230_v30  ;;  %1015 = vst [vmem:[#allocation2 + $0x88] sm:$0xff] %v5234_v32  ;;  %v648_v40 = vadd.f32 %v647_v38, %v6238_v34 }
  0xfd   :  { %v578_v41 = vpop.f32.mrf.mxu0  ;;  %v651_v43 = vpop.f32.mrf.mxu1 }
  0xfe   :  { %v5237_v42 = vpack.c.bf16 %v575_v37, %v573_v36  ;;  %v5238_v45 = vpack.c.bf16 %v648_v40, %v646_v39  ;;  %v579_v47 = vadd.f32 %v578_v41, %v6226_v6  ;;  %v652_v53 = vadd.f32 %v651_v43, %v6234_v33 }
  0xff   :  { %v580_v46 = vpop.f32.mrf.mxu0  ;;  %v653_v49 = vpop.f32.mrf.mxu1 }
 0x100   :  { %1018 = vst [vmem:[#allocation2 + $0xa0] sm:$0xff] %v5237_v42  ;;  %v581_v48 = vadd.f32 %v580_v46, %v6230_v30  ;;  %1019 = vst [vmem:[#allocation2 + $0xa8] sm:$0xff] %v5238_v45  ;;  %v654_v54 = vadd.f32 %v653_v49, %v6238_v34 }
 0x101   :  { %v582_v55 = vpop.f32.mrf.mxu0  ;;  %v655_v59 = vpop.f32.mrf.mxu1 }
 0x102   :  { %v5241_v58 = vpack.c.bf16 %v581_v48, %v579_v47  ;;  %v5242_v60 = vpack.c.bf16 %v654_v54, %v652_v53  ;;  %v583_v62 = vadd.f32 %v582_v55, %v6226_v6  ;;  %v656_v4 = vadd.f32 %v655_v59, %v6234_v33 }
 0x103   :  { %v584_v61 = vpop.f32.mrf.mxu0  ;;  %v657_v0 = vpop.f32.mrf.mxu1  ;;  %v6294_v6 = vrot.slane %v6216_v50, %v156_v56 }
 0x104   :  { %1022 = vst [vmem:[#allocation2 + $0xc0] sm:$0xff] %v5241_v58  ;;  %v585_v63 = vadd.f32 %v584_v61, %v6230_v30  ;;  %1023 = vst [vmem:[#allocation2 + $0xc8] sm:$0xff] %v5242_v60  ;;  %v658_v5 = vadd.f32 %v657_v0, %v6238_v34  ;;  %v6299_v30 = vrot.slane %v6216_v50, %v160_v57 }
 0x105   :  { %v694_v7 = vpop.f32.mrf.mxu0  ;;  %v767_v9 = vpop.f32.mrf.mxu1 }
 0x106   :  { %v5245_v8 = vpack.c.bf16 %v585_v63, %v583_v62  ;;  %v5246_v10 = vpack.c.bf16 %v658_v5, %v656_v4  ;;  %v695_v33 = vadd.f32 %v694_v7, %v6282_v1  ;;  %v768_v14 = vadd.f32 %v767_v9, %v6294_v6 }
 0x107   :  { %v696_v11 = vpop.f32.mrf.mxu0  ;;  %v769_v13 = vpop.f32.mrf.mxu1 }
 0x108   :  { %1026 = vst [vmem:[#allocation2 + $0xe0] sm:$0xff] %v5245_v8  ;;  %v697_v34 = vadd.f32 %v696_v11, %v6287_v2  ;;  %1027 = vst [vmem:[#allocation2 + $0xe8] sm:$0xff] %v5246_v10  ;;  %v770_v15 = vadd.f32 %v769_v13, %v6299_v30 }
 0x109   :  { %v698_v16 = vpop.f32.mrf.mxu0  ;;  %v771_v18 = vpop.f32.mrf.mxu1 }
 0x10a   :  { %v5219_v17 = vpack.c.bf16 %v697_v34, %v695_v33  ;;  %v5220_v50 = vpack.c.bf16 %v770_v15, %v768_v14  ;;  %v699_v20 = vadd.f32 %v698_v16, %v6282_v1  ;;  %v772_v23 = vadd.f32 %v771_v18, %v6294_v6 }
 0x10b   :  { %v700_v19 = vpop.f32.mrf.mxu0  ;;  %v773_v22 = vpop.f32.mrf.mxu1 }
 0x10c   :  { %1000 = vst [vmem:[#allocation2 + $0x10] sm:$0xff] %v5219_v17  ;;  %v701_v21 = vadd.f32 %v700_v19, %v6287_v2  ;;  %1001 = vst [vmem:[#allocation2 + $0x18] sm:$0xff] %v5220_v50  ;;  %v774_v24 = vadd.f32 %v773_v22, %v6299_v30 }
 0x10d   :  { %v704_v25 = vpop.f32.mrf.mxu0  ;;  %v777_v32 = vpop.f32.mrf.mxu1 }
 0x10e   :  { %v5223_v12 = vpack.c.bf16 %v701_v21, %v699_v20  ;;  %v5224_v35 = vpack.c.bf16 %v774_v24, %v772_v23  ;;  %v705_v37 = vadd.f32 %v704_v25, %v6282_v1  ;;  %v778_v40 = vadd.f32 %v777_v32, %v6294_v6  ;;  %v6332_v32 = vld [vmem:[%s7812_s6] sm:$0xff] }
 0x10f   :  { %v706_v36 = vpop.f32.mrf.mxu0  ;;  %v779_v39 = vpop.f32.mrf.mxu1 }
 0x110   :  { %1004 = vst [vmem:[#allocation2 + $0x30] sm:$0xff] %v5223_v12  ;;  %v707_v38 = vadd.f32 %v706_v36, %v6287_v2  ;;  %1005 = vst [vmem:[#allocation2 + $0x38] sm:$0xff] %v5224_v35  ;;  %v780_v41 = vadd.f32 %v779_v39, %v6299_v30 }
 0x111   :  { %v708_v42 = vpop.f32.mrf.mxu0  ;;  %v781_v45 = vpop.f32.mrf.mxu1 }
 0x112   :  { %v5227_v43 = vpack.c.bf16 %v707_v38, %v705_v37  ;;  %v5228_v46 = vpack.c.bf16 %v780_v41, %v778_v40  ;;  %v709_v48 = vadd.f32 %v708_v42, %v6282_v1  ;;  %v782_v54 = vadd.f32 %v781_v45, %v6294_v6 }
 0x113   :  { %v710_v47 = vpop.f32.mrf.mxu0  ;;  %v783_v53 = vpop.f32.mrf.mxu1  ;;  %v6338_v42 = vrot.slane %v6332_v32, %v6208_v31 }
 0x114   :  { %1008 = vst [vmem:[#allocation2 + $0x50] sm:$0xff] %v5227_v43  ;;  %v711_v49 = vadd.f32 %v710_v47, %v6287_v2  ;;  %1009 = vst [vmem:[#allocation2 + $0x58] sm:$0xff] %v5228_v46  ;;  %v784_v55 = vadd.f32 %v783_v53, %v6299_v30  ;;  %v6342_v43 = vrot.slane %v6332_v32, %v6211_v27 }
 0x115   :  { %v714_v58 = vpop.f32.mrf.mxu0  ;;  %v787_v60 = vpop.f32.mrf.mxu1 }
 0x116   :  { %v5231_v59 = vpack.c.bf16 %v711_v49, %v709_v48  ;;  %v5232_v61 = vpack.c.bf16 %v784_v55, %v782_v54  ;;  %v715_v63 = vadd.f32 %v714_v58, %v6282_v1  ;;  %v788_v5 = vadd.f32 %v787_v60, %v6294_v6 }
 0x117   :  { %v716_v62 = vpop.f32.mrf.mxu0  ;;  %v789_v4 = vpop.f32.mrf.mxu1 }
 0x118   :  { %1012 = vst [vmem:[#allocation2 + $0x70] sm:$0xff] %v5231_v59  ;;  %v717_v0 = vadd.f32 %v716_v62, %v6287_v2  ;;  %1013 = vst [vmem:[#allocation2 + $0x78] sm:$0xff] %v5232_v61  ;;  %v790_v7 = vadd.f32 %v789_v4, %v6299_v30 }
 0x119   :  { %v718_v8 = vpop.f32.mrf.mxu0  ;;  %v791_v10 = vpop.f32.mrf.mxu1 }
 0x11a   :  { %v5235_v9 = vpack.c.bf16 %v717_v0, %v715_v63  ;;  %v5236_v11 = vpack.c.bf16 %v790_v7, %v788_v5  ;;  %v719_v34 = vadd.f32 %v718_v8, %v6282_v1  ;;  %v792_v15 = vadd.f32 %v791_v10, %v6294_v6 }
 0x11b   :  { %v720_v33 = vpop.f32.mrf.mxu0  ;;  %v793_v14 = vpop.f32.mrf.mxu1 }
 0x11c   :  { %1016 = vst [vmem:[#allocation2 + $0x90] sm:$0xff] %v5235_v9  ;;  %v721_v13 = vadd.f32 %v720_v33, %v6287_v2  ;;  %1017 = vst [vmem:[#allocation2 + $0x98] sm:$0xff] %v5236_v11  ;;  %v794_v16 = vadd.f32 %v793_v14, %v6299_v30 }
 0x11d   :  { %v724_v17 = vpop.f32.mrf.mxu0  ;;  %v797_v50 = vpop.f32.mrf.mxu1 }
 0x11e   :  { %v5239_v18 = vpack.c.bf16 %v721_v13, %v719_v34  ;;  %v5240_v19 = vpack.c.bf16 %v794_v16, %v792_v15  ;;  %v725_v21 = vadd.f32 %v724_v17, %v6282_v1  ;;  %v798_v24 = vadd.f32 %v797_v50, %v6294_v6 }
 0x11f   :  { %v726_v20 = vpop.f32.mrf.mxu0  ;;  %v799_v23 = vpop.f32.mrf.mxu1 }
 0x120   :  { %1020 = vst [vmem:[#allocation2 + $0xb0] sm:$0xff] %v5239_v18  ;;  %v727_v22 = vadd.f32 %v726_v20, %v6287_v2  ;;  %1021 = vst [vmem:[#allocation2 + $0xb8] sm:$0xff] %v5240_v19  ;;  %v800_v25 = vadd.f32 %v799_v23, %v6299_v30 }
 0x121   :  { %v728_v12 = vpop.f32.mrf.mxu0  ;;  %v801_v36 = vpop.f32.mrf.mxu1 }
 0x122   :  { %v5243_v35 = vpack.c.bf16 %v727_v22, %v725_v21  ;;  %v5244_v37 = vpack.c.bf16 %v800_v25, %v798_v24  ;;  %v729_v39 = vadd.f32 %v728_v12, %v6282_v1  ;;  %v802_v45 = vadd.f32 %v801_v36, %v6294_v6 }
 0x123   :  { %v730_v38 = vpop.f32.mrf.mxu0  ;;  %v803_v41 = vpop.f32.mrf.mxu1  ;;  %v6348_v1 = vrot.slane %v6332_v32, %v6219_v28 }
 0x124   :  { %1024 = vst [vmem:[#allocation2 + $0xd0] sm:$0xff] %v5243_v35  ;;  %v731_v40 = vadd.f32 %v730_v38, %v6287_v2  ;;  %1025 = vst [vmem:[#allocation2 + $0xd8] sm:$0xff] %v5244_v37  ;;  %v804_v46 = vadd.f32 %v803_v41, %v6299_v30  ;;  %v6352_v2 = vrot.slane %v6332_v32, %v6222_v29 }
 0x125   :  { %v1490_v47 = vpop.f32.mrf.mxu0  ;;  %v1563_v49 = vpop.f32.mrf.mxu1 }
 0x126   :  { %v5247_v48 = vpack.c.bf16 %v731_v40, %v729_v39  ;;  %v5248_v53 = vpack.c.bf16 %v804_v46, %v802_v45  ;;  %v1491_v55 = vadd.f32 %v1490_v47, %v6338_v42  ;;  %v1564_v30 = vadd.f32 %v1563_v49, %v6348_v1 }
 0x127   :  { %v1492_v54 = vpop.f32.mrf.mxu0  ;;  %v1565_v58 = vpop.f32.mrf.mxu1 }
 0x128   :  { %1028 = vst [vmem:[#allocation2 + $0xf0] sm:$0xff] %v5247_v48  ;;  %v1493_v6 = vadd.f32 %v1492_v54, %v6342_v43  ;;  %1029 = vst [vmem:[#allocation2 + $0xf8] sm:$0xff] %v5248_v53  ;;  %v1566_v59 = vadd.f32 %v1565_v58, %v6352_v2 }
 0x129   :  { %v1494_v60 = vpop.f32.mrf.mxu0  ;;  %v1567_v62 = vpop.f32.mrf.mxu1 }
 0x12a   :  { %v5249_v61 = vpack.c.bf16 %v1493_v6, %v1491_v55  ;;  %v5250_v63 = vpack.c.bf16 %v1566_v59, %v1564_v30  ;;  %v1495_v4 = vadd.f32 %v1494_v60, %v6338_v42  ;;  %v1568_v8 = vadd.f32 %v1567_v62, %v6348_v1 }
 0x12b   :  { %v1496_v0 = vpop.f32.mrf.mxu0  ;;  %v1569_v7 = vpop.f32.mrf.mxu1 }
 0x12c   :  { %1940 = vst [vmem:[#allocation3] sm:$0xff] %v5249_v61  ;;  %v1497_v5 = vadd.f32 %v1496_v0, %v6342_v43  ;;  %1941 = vst [vmem:[#allocation3 + $0x8] sm:$0xff] %v5250_v63  ;;  %v1570_v9 = vadd.f32 %v1569_v7, %v6352_v2 }
 0x12d   :  { %v1500_v10 = vpop.f32.mrf.mxu0  ;;  %v1573_v33 = vpop.f32.mrf.mxu1 }
 0x12e   :  { %v5253_v11 = vpack.c.bf16 %v1497_v5, %v1495_v4  ;;  %v5254_v34 = vpack.c.bf16 %v1570_v9, %v1568_v8  ;;  %v1501_v14 = vadd.f32 %v1500_v10, %v6338_v42  ;;  %v1574_v17 = vadd.f32 %v1573_v33, %v6348_v1 }
 0x12f   :  { %v1502_v13 = vpop.f32.mrf.mxu0  ;;  %v1575_v16 = vpop.f32.mrf.mxu1 }
 0x130   :  { %1944 = vst [vmem:[#allocation3 + $0x20] sm:$0xff] %v5253_v11  ;;  %v1503_v15 = vadd.f32 %v1502_v13, %v6342_v43  ;;  %1945 = vst [vmem:[#allocation3 + $0x28] sm:$0xff] %v5254_v34  ;;  %v1576_v18 = vadd.f32 %v1575_v16, %v6352_v2 }
 0x131   :  { %v1504_v50 = vpop.f32.mrf.mxu0  ;;  %v1577_v20 = vpop.f32.mrf.mxu1 }
 0x132   :  { %v5257_v19 = vpack.c.bf16 %v1503_v15, %v1501_v14  ;;  %v5258_v21 = vpack.c.bf16 %v1576_v18, %v1574_v17  ;;  %v1505_v23 = vadd.f32 %v1504_v50, %v6338_v42  ;;  %v1578_v12 = vadd.f32 %v1577_v20, %v6348_v1 }
 0x133   :  { %v1506_v22 = vpop.f32.mrf.mxu0  ;;  %v1579_v25 = vpop.f32.mrf.mxu1  ;;  %v6387_v50 = vrot.slane %v6332_v32, %v148_v51  ;;  %v6404_v51 = vrot.slane %v6332_v32, %v160_v57 }
 0x134   :  { %1948 = vst [vmem:[#allocation3 + $0x40] sm:$0xff] %v5257_v19  ;;  %v1507_v24 = vadd.f32 %v1506_v22, %v6342_v43  ;;  %1949 = vst [vmem:[#allocation3 + $0x48] sm:$0xff] %v5258_v21  ;;  %v1580_v35 = vadd.f32 %v1579_v25, %v6352_v2  ;;  %v6392_v19 = vrot.slane %v6332_v32, %v152_v52 }
 0x135   :  { %v1510_v36 = vpop.f32.mrf.mxu0  ;;  %v1583_v38 = vpop.f32.mrf.mxu1 }
 0x136   :  { %v5261_v37 = vpack.c.bf16 %v1507_v24, %v1505_v23  ;;  %v5262_v39 = vpack.c.bf16 %v1580_v35, %v1578_v12  ;;  %v1511_v41 = vadd.f32 %v1510_v36, %v6338_v42  ;;  %v1584_v47 = vadd.f32 %v1583_v38, %v6348_v1 }
 0x137   :  { %v1512_v40 = vpop.f32.mrf.mxu0  ;;  %v1585_v46 = vpop.f32.mrf.mxu1 }
 0x138   :  { %1952 = vst [vmem:[#allocation3 + $0x60] sm:$0xff] %v5261_v37  ;;  %v1513_v45 = vadd.f32 %v1512_v40, %v6342_v43  ;;  %1953 = vst [vmem:[#allocation3 + $0x68] sm:$0xff] %v5262_v39  ;;  %v1586_v48 = vadd.f32 %v1585_v46, %v6352_v2 }
 0x139   :  { %v1514_v49 = vpop.f32.mrf.mxu0  ;;  %v1587_v54 = vpop.f32.mrf.mxu1 }
 0x13a   :  { %v5265_v53 = vpack.c.bf16 %v1513_v45, %v1511_v41  ;;  %v5266_v55 = vpack.c.bf16 %v1586_v48, %v1584_v47  ;;  %v1515_v58 = vadd.f32 %v1514_v49, %v6338_v42  ;;  %v1588_v60 = vadd.f32 %v1587_v54, %v6348_v1 }
 0x13b   :  { %v1516_v6 = vpop.f32.mrf.mxu0  ;;  %v1589_v59 = vpop.f32.mrf.mxu1 }
 0x13c   :  { %1956 = vst [vmem:[#allocation3 + $0x80] sm:$0xff] %v5265_v53  ;;  %v1517_v30 = vadd.f32 %v1516_v6, %v6342_v43  ;;  %1957 = vst [vmem:[#allocation3 + $0x88] sm:$0xff] %v5266_v55  ;;  %v1590_v61 = vadd.f32 %v1589_v59, %v6352_v2 }
 0x13d   :  { %v1520_v62 = vpop.f32.mrf.mxu0  ;;  %v1593_v0 = vpop.f32.mrf.mxu1 }
 0x13e   :  { %v5269_v63 = vpack.c.bf16 %v1517_v30, %v1515_v58  ;;  %v5270_v4 = vpack.c.bf16 %v1590_v61, %v1588_v60  ;;  %v1521_v7 = vadd.f32 %v1520_v62, %v6338_v42  ;;  %v1594_v10 = vadd.f32 %v1593_v0, %v6348_v1 }
 0x13f   :  { %v1522_v5 = vpop.f32.mrf.mxu0  ;;  %v1595_v9 = vpop.f32.mrf.mxu1 }
 0x140   :  { %1960 = vst [vmem:[#allocation3 + $0xa0] sm:$0xff] %v5269_v63  ;;  %v1523_v8 = vadd.f32 %v1522_v5, %v6342_v43  ;;  %1961 = vst [vmem:[#allocation3 + $0xa8] sm:$0xff] %v5270_v4  ;;  %v1596_v11 = vadd.f32 %v1595_v9, %v6352_v2 }
 0x141   :  { %v1524_v33 = vpop.f32.mrf.mxu0  ;;  %v1597_v13 = vpop.f32.mrf.mxu1 }
 0x142   :  { %v5273_v34 = vpack.c.bf16 %v1523_v8, %v1521_v7  ;;  %v5274_v14 = vpack.c.bf16 %v1596_v11, %v1594_v10  ;;  %v1525_v16 = vadd.f32 %v1524_v33, %v6338_v42  ;;  %v1598_v20 = vadd.f32 %v1597_v13, %v6348_v1 }
 0x143   :  { %v1526_v15 = vpop.f32.mrf.mxu0  ;;  %v1599_v18 = vpop.f32.mrf.mxu1  ;;  %v6399_v42 = vrot.slane %v6332_v32, %v156_v56 }
 0x144   :  { %1964 = vst [vmem:[#allocation3 + $0xc0] sm:$0xff] %v5273_v34  ;;  %v1527_v17 = vadd.f32 %v1526_v15, %v6342_v43  ;;  %1965 = vst [vmem:[#allocation3 + $0xc8] sm:$0xff] %v5274_v14  ;;  %v1600_v21 = vadd.f32 %v1599_v18, %v6352_v2 }
 0x145   :  { %v1636_v22 = vpop.f32.mrf.mxu0  ;;  %v1709_v23 = vpop.f32.mrf.mxu1 }
 0x146   :  { %v5277_v43 = vpack.c.bf16 %v1527_v17, %v1525_v16  ;;  %v5278_v52 = vpack.c.bf16 %v1600_v21, %v1598_v20  ;;  %v1637_v1 = vadd.f32 %v1636_v22, %v6387_v50  ;;  %v1710_v12 = vadd.f32 %v1709_v23, %v6399_v42 }
 0x147   :  { %v1638_v24 = vpop.f32.mrf.mxu0  ;;  %v1711_v25 = vpop.f32.mrf.mxu1 }
 0x148   :  { %1968 = vst [vmem:[#allocation3 + $0xe0] sm:$0xff] %v5277_v43  ;;  %v1639_v2 = vadd.f32 %v1638_v24, %v6392_v19  ;;  %1969 = vst [vmem:[#allocation3 + $0xe8] sm:$0xff] %v5278_v52  ;;  %v1712_v56 = vadd.f32 %v1711_v25, %v6404_v51 }
 0x149   :  { %v1640_v35 = vpop.f32.mrf.mxu0  ;;  %v1713_v36 = vpop.f32.mrf.mxu1 }
 0x14a   :  { %v5251_v26 = vpack.c.bf16 %v1639_v2, %v1637_v1  ;;  %v5252_v57 = vpack.c.bf16 %v1712_v56, %v1710_v12  ;;  %v1641_v37 = vadd.f32 %v1640_v35, %v6387_v50  ;;  %v1714_v40 = vadd.f32 %v1713_v36, %v6399_v42 }
 0x14b   :  { %v1642_v32 = vpop.f32.mrf.mxu0  ;;  %v1715_v39 = vpop.f32.mrf.mxu1 }
 0x14c   :  { %1942 = vst [vmem:[#allocation3 + $0x10] sm:$0xff] %v5251_v26  ;;  %v1643_v38 = vadd.f32 %v1642_v32, %v6392_v19  ;;  %1943 = vst [vmem:[#allocation3 + $0x18] sm:$0xff] %v5252_v57  ;;  %v1716_v41 = vadd.f32 %v1715_v39, %v6404_v51 }
 0x14d   :  { %v1646_v45 = vpop.f32.mrf.mxu0  ;;  %v1719_v47 = vpop.f32.mrf.mxu1 }
 0x14e   :  { %v5255_v46 = vpack.c.bf16 %v1643_v38, %v1641_v37  ;;  %v5256_v48 = vpack.c.bf16 %v1716_v41, %v1714_v40  ;;  %v1647_v53 = vadd.f32 %v1646_v45, %v6387_v50  ;;  %v1720_v6 = vadd.f32 %v1719_v47, %v6399_v42 }
 0x14f   :  { %v1648_v49 = vpop.f32.mrf.mxu0  ;;  %v1721_v55 = vpop.f32.mrf.mxu1 }
 0x150   :  { %1946 = vst [vmem:[#allocation3 + $0x30] sm:$0xff] %v5255_v46  ;;  %v1649_v54 = vadd.f32 %v1648_v49, %v6392_v19  ;;  %1947 = vst [vmem:[#allocation3 + $0x38] sm:$0xff] %v5256_v48  ;;  %v1722_v58 = vadd.f32 %v1721_v55, %v6404_v51 }
 0x151   :  { %v1650_v30 = vpop.f32.mrf.mxu0  ;;  %v1723_v60 = vpop.f32.mrf.mxu1 }
 0x152   :  { %v5259_v59 = vpack.c.bf16 %v1649_v54, %v1647_v53  ;;  %v5260_v61 = vpack.c.bf16 %v1722_v58, %v1720_v6  ;;  %v1651_v63 = vadd.f32 %v1650_v30, %v6387_v50  ;;  %v1724_v5 = vadd.f32 %v1723_v60, %v6399_v42 }
 0x153   :  { %v1652_v62 = vpop.f32.mrf.mxu0  ;;  %v1725_v4 = vpop.f32.mrf.mxu1 }
 0x154   :  { %1950 = vst [vmem:[#allocation3 + $0x50] sm:$0xff] %v5259_v59  ;;  %v1653_v0 = vadd.f32 %v1652_v62, %v6392_v19  ;;  %1951 = vst [vmem:[#allocation3 + $0x58] sm:$0xff] %v5260_v61  ;;  %v1726_v7 = vadd.f32 %v1725_v4, %v6404_v51 }
 0x155   :  { %v1656_v8 = vpop.f32.mrf.mxu0  ;;  %v1729_v10 = vpop.f32.mrf.mxu1 }
 0x156   :  { %v5263_v9 = vpack.c.bf16 %v1653_v0, %v1651_v63  ;;  %v5264_v11 = vpack.c.bf16 %v1726_v7, %v1724_v5  ;;  %v1657_v34 = vadd.f32 %v1656_v8, %v6387_v50  ;;  %v1730_v15 = vadd.f32 %v1729_v10, %v6399_v42 }
 0x157   :  { %v1658_v33 = vpop.f32.mrf.mxu0  ;;  %v1731_v14 = vpop.f32.mrf.mxu1 }
 0x158   :  { %1954 = vst [vmem:[#allocation3 + $0x70] sm:$0xff] %v5263_v9  ;;  %v1659_v13 = vadd.f32 %v1658_v33, %v6392_v19  ;;  %1955 = vst [vmem:[#allocation3 + $0x78] sm:$0xff] %v5264_v11  ;;  %v1732_v16 = vadd.f32 %v1731_v14, %v6404_v51 }
 0x159   :  { %v1660_v17 = vpop.f32.mrf.mxu0  ;;  %v1733_v20 = vpop.f32.mrf.mxu1 }
 0x15a   :  { %v5267_v18 = vpack.c.bf16 %v1659_v13, %v1657_v34  ;;  %v5268_v21 = vpack.c.bf16 %v1732_v16, %v1730_v15  ;;  %v1661_v43 = vadd.f32 %v1660_v17, %v6387_v50  ;;  %v1734_v24 = vadd.f32 %v1733_v20, %v6399_v42 }
 0x15b   :  { %v1662_v22 = vpop.f32.mrf.mxu0  ;;  %v1735_v52 = vpop.f32.mrf.mxu1 }
 0x15c   :  { %1958 = vst [vmem:[#allocation3 + $0x90] sm:$0xff] %v5267_v18  ;;  %v1663_v23 = vadd.f32 %v1662_v22, %v6392_v19  ;;  %1959 = vst [vmem:[#allocation3 + $0x98] sm:$0xff] %v5268_v21  ;;  %v1736_v1 = vadd.f32 %v1735_v52, %v6404_v51 }
 0x15d   :  { %v1666_v2 = vpop.f32.mrf.mxu0  ;;  %v1739_v12 = vpop.f32.mrf.mxu1 }
 0x15e   :  { %v5271_v25 = vpack.c.bf16 %v1663_v23, %v1661_v43  ;;  %v5272_v56 = vpack.c.bf16 %v1736_v1, %v1734_v24  ;;  %v1667_v26 = vadd.f32 %v1666_v2, %v6387_v50  ;;  %v1740_v32 = vadd.f32 %v1739_v12, %v6399_v42 }
 0x15f   :  { %v1668_v35 = vpop.f32.mrf.mxu0  ;;  %v1741_v57 = vpop.f32.mrf.mxu1 }
 0x160   :  { %1962 = vst [vmem:[#allocation3 + $0xb0] sm:$0xff] %v5271_v25  ;;  %v1669_v36 = vadd.f32 %v1668_v35, %v6392_v19  ;;  %1963 = vst [vmem:[#allocation3 + $0xb8] sm:$0xff] %v5272_v56  ;;  %v1742_v37 = vadd.f32 %v1741_v57, %v6404_v51 }
 0x161   :  { %v1670_v38 = vpop.f32.mrf.mxu0  ;;  %v1743_v40 = vpop.f32.mrf.mxu1 }
 0x162   :  { %v5275_v39 = vpack.c.bf16 %v1669_v36, %v1667_v26  ;;  %v5276_v41 = vpack.c.bf16 %v1742_v37, %v1740_v32  ;;  %v1671_v46 = vadd.f32 %v1670_v38, %v6387_v50  ;;  %v1744_v49 = vadd.f32 %v1743_v40, %v6399_v42 }
 0x163   :  { %v1672_v45 = vpop.f32.mrf.mxu0  ;;  %v1745_v48 = vpop.f32.mrf.mxu1 }
 0x164   :  { %1966 = vst [vmem:[#allocation3 + $0xd0] sm:$0xff] %v5275_v39  ;;  %v1673_v47 = vadd.f32 %v1672_v45, %v6392_v19  ;;  %1967 = vst [vmem:[#allocation3 + $0xd8] sm:$0xff] %v5276_v41  ;;  %v1746_v53 = vadd.f32 %v1745_v48, %v6404_v51  ;;  %4718 = sbr.rel (%p4933_p0) target bundleno = 857 (0x359), region = 77 }
 0x166   :  { %v5279_v54 = vpack.c.bf16 %v1673_v47, %v1671_v46  ;;  %v5280_v55 = vpack.c.bf16 %v1746_v53, %v1744_v49 }
 0x168   :  { %1970 = vst [vmem:[#allocation3 + $0xf0] sm:$0xff] %v5279_v54  ;;  %1971 = vst [vmem:[#allocation3 + $0xf8] sm:$0xff] %v5280_v55 }
 0x169   :  { %v6441_v6 = vmov 0.0   ;;  %v6443_v50 = vmov 0.0   ;;  %v6445_v19 = vmov 0.0   ;;  %v6447_v58 = vmov 0.0  }
 0x16a   :  { %v6449_v42 = vmov 0.0   ;;  %v6451_v51 = vmov 0.0   ;;  %v6453_v30 = vmov 0.0   ;;  %v6455_v59 = vmov 0.0  }
 0x16b LB: > { %v2079_v60 = vld [vmem:[%s7800_s7 + $0x1c0] sm:$0xff]  ;;  %v2080_v62 = vld [vmem:[%s7800_s7 + $0x1c8] sm:$0xff]  ;;  %v6524_v17 = vpack.c.bf16 %v5637_v30, %v5637_v30  ;;  %s4934_s26 = sadd.s32 4294967295, %s7798_s0  ;;  %s5281_s5 = sshll.u32 %s5645_s17, 5  ;;  %s5645_s17 = sphi %s6457_s17, %s2008_s17   ;;  %v5641_v59 = vphi %v6455_v59, %v7315_v59   ;;  %v5637_v30 = vphi %v6453_v30, %v7322_v30   ;;  %v5633_v51 = vphi %v6451_v51, %v7306_v51   ;;  %v5629_v42 = vphi %v6449_v42, %v7310_v42   ;;  %v5625_v58 = vphi %v6447_v58, %v4047_v58   ;;  %v5621_v19 = vphi %v6445_v19, %v4048_v19   ;;  %v5617_v50 = vphi %v6443_v50, %v4049_v50   ;;  %v5613_v6 = vphi %v6441_v6, %v4050_v6  }
 0x16c   : > { %v2083_v61 = vld [vmem:[%s7800_s7 + $0x1e0] sm:$0xff]  ;;  %v2084_v0 = vld [vmem:[%s7800_s7 + $0x1e8] sm:$0xff]  ;;  %s7196_s27 = ssub.s32 %s4934_s26, %s5645_s17  ;;  %s2153_s15 = scalar_lea.vmem [#allocation2], %s5281_s5 }
 0x16d   : > { %v4994_v63 = vcombine.high %v2079_v60, %v2083_v61  ;;  %v4993_v4 = vcombine.low %v2079_v60, %v2083_v61  ;;  %v2071_v5 = vld [vmem:[%s7800_s7 + $0x180] sm:$0xff]  ;;  %v4996_v8 = vcombine.high %v2080_v62, %v2084_v0  ;;  %v4995_v9 = vcombine.low %v2080_v62, %v2084_v0  ;;  %v2072_v11 = vld [vmem:[%s7800_s7 + $0x188] sm:$0xff]  ;;  %2838 = vmatprep.mubr.bf16.mxu0 %v6524_v17  ;;  %s4028_s2 = scalar_lea.vmem [#allocation4], %s5281_s5  ;;  %s5282_s16 = sshll.u32 %s7196_s27, 5 }
 0x16e   : > { %v2075_v7 = vld [vmem:[%s7800_s7 + $0x1a0] sm:$0xff]  ;;  %v2076_v33 = vld [vmem:[%s7800_s7 + $0x1a8] sm:$0xff]  ;;  %2879 = vmatprep.mubr.bf16.mxu1 %v6524_v17  ;;  %s3102_s6 = scalar_lea.vmem [#allocation3], %s5282_s16  ;;  %s4040_s3 = scalar_lea.vmem [#allocation4], %s5282_s16 }
 0x16f   : > { %v4986_v10 = vcombine.high %v2071_v5, %v2075_v7  ;;  %v2063_v34 = vld [vmem:[%s7800_s7 + $0x140] sm:$0xff]  ;;  %2806 = vmatprep.subr.bf16.mxu0 %v4994_v63  ;;  %v4988_v13 = vcombine.high %v2072_v11, %v2076_v33  ;;  %v2064_v15 = vld [vmem:[%s7800_s7 + $0x148] sm:$0xff]  ;;  %2847 = vmatprep.subr.bf16.mxu1 %v4996_v8  ;;  %v4985_v18 = vcombine.low %v2071_v5, %v2075_v7 }
 0x170   : > { %v2067_v14 = vld [vmem:[%s7800_s7 + $0x160] sm:$0xff]  ;;  %v2068_v16 = vld [vmem:[%s7800_s7 + $0x168] sm:$0xff]  ;;  %2807 = vmatpush1.bf16.msra.mxu0 %v4993_v4  ;;  %2848 = vmatpush1.bf16.msra.mxu1 %v4995_v9  ;;  %v4987_v20 = vcombine.low %v2072_v11, %v2076_v33 }
 0x171   : > { %2808 = vmatprep.subr.bf16.mxu0 %v4986_v10  ;;  %v4978_v21 = vcombine.high %v2063_v34, %v2067_v14  ;;  %2849 = vmatprep.subr.bf16.mxu1 %v4988_v13  ;;  %v4980_v22 = vcombine.high %v2064_v15, %v2068_v16  ;;  %v2055_v43 = vld [vmem:[%s7800_s7 + $0x100] sm:$0xff]  ;;  %v2056_v52 = vld [vmem:[%s7800_s7 + $0x108] sm:$0xff]  ;;  %v4977_v1 = vcombine.low %v2063_v34, %v2067_v14 }
 0x172   : > { %v2059_v23 = vld [vmem:[%s7800_s7 + $0x120] sm:$0xff]  ;;  %v2060_v24 = vld [vmem:[%s7800_s7 + $0x128] sm:$0xff]  ;;  %v4979_v2 = vcombine.low %v2064_v15, %v2068_v16 }
 0x173   : > { %v4970_v25 = vcombine.high %v2055_v43, %v2059_v23  ;;  %v4972_v12 = vcombine.high %v2056_v52, %v2060_v24  ;;  %v2047_v56 = vld [vmem:[%s7800_s7 + $0xc0] sm:$0xff]  ;;  %v2048_v26 = vld [vmem:[%s7800_s7 + $0xc8] sm:$0xff]  ;;  %v4969_v57 = vcombine.low %v2055_v43, %v2059_v23  ;;  %v4971_v32 = vcombine.low %v2056_v52, %v2060_v24 }
 0x174   : > { %2809 = vmatpush1.bf16.msra.mxu0 %v4985_v18  ;;  %2850 = vmatpush1.bf16.msra.mxu1 %v4987_v20  ;;  %v2051_v35 = vld [vmem:[%s7800_s7 + $0xe0] sm:$0xff]  ;;  %v2052_v36 = vld [vmem:[%s7800_s7 + $0xe8] sm:$0xff] }
 0x175   : > { %2810 = vmatprep.subr.bf16.mxu0 %v4978_v21  ;;  %2851 = vmatprep.subr.bf16.mxu1 %v4980_v22  ;;  %v4962_v37 = vcombine.high %v2047_v56, %v2051_v35  ;;  %v4964_v38 = vcombine.high %v2048_v26, %v2052_v36  ;;  %v2039_v39 = vld [vmem:[%s7800_s7 + $0x80] sm:$0xff]  ;;  %v2040_v41 = vld [vmem:[%s7800_s7 + $0x88] sm:$0xff]  ;;  %v4961_v46 = vcombine.low %v2047_v56, %v2051_v35 }
 0x176   : > { %v2043_v40 = vld [vmem:[%s7800_s7 + $0xa0] sm:$0xff]  ;;  %v2044_v45 = vld [vmem:[%s7800_s7 + $0xa8] sm:$0xff]  ;;  %v4963_v47 = vcombine.low %v2048_v26, %v2052_v36 }
 0x177   : > { %v4954_v48 = vcombine.high %v2039_v39, %v2043_v40  ;;  %v4956_v49 = vcombine.high %v2040_v41, %v2044_v45  ;;  %v2031_v53 = vld [vmem:[%s7800_s7 + $0x40] sm:$0xff]  ;;  %v2032_v55 = vld [vmem:[%s7800_s7 + $0x48] sm:$0xff]  ;;  %v4953_v61 = vcombine.low %v2039_v39, %v2043_v40  ;;  %v4955_v62 = vcombine.low %v2040_v41, %v2044_v45 }
 0x178   : > { %2811 = vmatpush1.bf16.msra.mxu0 %v4977_v1  ;;  %2852 = vmatpush1.bf16.msra.mxu1 %v4979_v2  ;;  %v2035_v54 = vld [vmem:[%s7800_s7 + $0x60] sm:$0xff]  ;;  %v2036_v60 = vld [vmem:[%s7800_s7 + $0x68] sm:$0xff] }
 0x179   : > { %2812 = vmatprep.subr.bf16.mxu0 %v4970_v25  ;;  %2853 = vmatprep.subr.bf16.mxu1 %v4972_v12  ;;  %v4946_v63 = vcombine.high %v2031_v53, %v2035_v54  ;;  %v4948_v0 = vcombine.high %v2032_v55, %v2036_v60  ;;  %v2023_v4 = vld [vmem:[%s7800_s7] sm:$0xff]  ;;  %v2024_v7 = vld [vmem:[%s7800_s7 + $0x8] sm:$0xff]  ;;  %v4945_v9 = vcombine.low %v2031_v53, %v2035_v54 }
 0x17a   : > { %v2027_v5 = vld [vmem:[%s7800_s7 + $0x20] sm:$0xff]  ;;  %v2028_v8 = vld [vmem:[%s7800_s7 + $0x28] sm:$0xff]  ;;  %v4947_v10 = vcombine.low %v2032_v55, %v2036_v60 }
 0x17b   : > { %v4938_v11 = vcombine.high %v2023_v4, %v2027_v5  ;;  %v4940_v33 = vcombine.high %v2024_v7, %v2028_v8  ;;  %v2143_v34 = vld [vmem:[%s7800_s7 + $0x3c0] sm:$0xff]  ;;  %v2144_v14 = vld [vmem:[%s7800_s7 + $0x3c8] sm:$0xff]  ;;  %v4937_v16 = vcombine.low %v2023_v4, %v2027_v5  ;;  %v4939_v18 = vcombine.low %v2024_v7, %v2028_v8 }
 0x17c   : > { %2813 = vmatpush1.bf16.msra.mxu0 %v4969_v57  ;;  %2854 = vmatpush1.bf16.msra.mxu1 %v4971_v32  ;;  %v2147_v13 = vld [vmem:[%s7800_s7 + $0x3e0] sm:$0xff]  ;;  %v2148_v15 = vld [vmem:[%s7800_s7 + $0x3e8] sm:$0xff] }
 0x17d   : > { %2814 = vmatprep.subr.bf16.mxu0 %v4962_v37  ;;  %2855 = vmatprep.subr.bf16.mxu1 %v4964_v38  ;;  %v5058_v20 = vcombine.high %v2143_v34, %v2147_v13  ;;  %v5060_v21 = vcombine.high %v2144_v14, %v2148_v15  ;;  %v2135_v22 = vld [vmem:[%s7800_s7 + $0x380] sm:$0xff]  ;;  %v2136_v23 = vld [vmem:[%s7800_s7 + $0x388] sm:$0xff]  ;;  %v5057_v24 = vcombine.low %v2143_v34, %v2147_v13 }
 0x17e   : > { %v2139_v43 = vld [vmem:[%s7800_s7 + $0x3a0] sm:$0xff]  ;;  %v2140_v52 = vld [vmem:[%s7800_s7 + $0x3a8] sm:$0xff]  ;;  %v5059_v1 = vcombine.low %v2144_v14, %v2148_v15 }
 0x17f   : > { %v5050_v2 = vcombine.high %v2135_v22, %v2139_v43  ;;  %v5052_v25 = vcombine.high %v2136_v23, %v2140_v52  ;;  %v2127_v12 = vld [vmem:[%s7800_s7 + $0x340] sm:$0xff]  ;;  %v2128_v35 = vld [vmem:[%s7800_s7 + $0x348] sm:$0xff]  ;;  %v5049_v36 = vcombine.low %v2135_v22, %v2139_v43  ;;  %v5051_v57 = vcombine.low %v2136_v23, %v2140_v52 }
 0x180   : > { %2815 = vmatpush1.bf16.msra.mxu0 %v4961_v46  ;;  %2856 = vmatpush1.bf16.msra.mxu1 %v4963_v47  ;;  %v2131_v56 = vld [vmem:[%s7800_s7 + $0x360] sm:$0xff]  ;;  %v2132_v26 = vld [vmem:[%s7800_s7 + $0x368] sm:$0xff] }
 0x181   : > { %2816 = vmatprep.subr.bf16.mxu0 %v4954_v48  ;;  %2857 = vmatprep.subr.bf16.mxu1 %v4956_v49  ;;  %v5042_v32 = vcombine.high %v2127_v12, %v2131_v56  ;;  %v5044_v37 = vcombine.high %v2128_v35, %v2132_v26  ;;  %v2119_v38 = vld [vmem:[%s7800_s7 + $0x300] sm:$0xff]  ;;  %v2120_v40 = vld [vmem:[%s7800_s7 + $0x308] sm:$0xff]  ;;  %v5041_v45 = vcombine.low %v2127_v12, %v2131_v56  ;;  %v2085_v12 = vld [vmem:[%s7800_s7 + $0x1f0] sm:$0xff] }
 0x182   : > { %v2123_v39 = vld [vmem:[%s7800_s7 + $0x320] sm:$0xff]  ;;  %v2124_v41 = vld [vmem:[%s7800_s7 + $0x328] sm:$0xff]  ;;  %v5043_v46 = vcombine.low %v2128_v35, %v2132_v26  ;;  %v2082_v56 = vld [vmem:[%s7800_s7 + $0x1d8] sm:$0xff] }
 0x183   : > { %v5034_v47 = vcombine.high %v2119_v38, %v2123_v39  ;;  %v5036_v48 = vcombine.high %v2120_v40, %v2124_v41  ;;  %v2111_v49 = vld [vmem:[%s7800_s7 + $0x2c0] sm:$0xff]  ;;  %v2112_v54 = vld [vmem:[%s7800_s7 + $0x2c8] sm:$0xff]  ;;  %v5033_v60 = vcombine.low %v2119_v38, %v2123_v39  ;;  %v2086_v35 = vld [vmem:[%s7800_s7 + $0x1f8] sm:$0xff]  ;;  %v6704_v39 = vpack.c.bf16 %v5641_v59, %v5641_v59 }
 0x184   : > { %2817 = vmatpush1.bf16.msra.mxu0 %v4953_v61  ;;  %2858 = vmatpush1.bf16.msra.mxu1 %v4955_v62  ;;  %v2115_v53 = vld [vmem:[%s7800_s7 + $0x2e0] sm:$0xff]  ;;  %v2116_v55 = vld [vmem:[%s7800_s7 + $0x2e8] sm:$0xff]  ;;  %v5035_v61 = vcombine.low %v2120_v40, %v2124_v41  ;;  %v2077_v38 = vld [vmem:[%s7800_s7 + $0x1b0] sm:$0xff] }
 0x185   : > { %2818 = vmatprep.subr.bf16.mxu0 %v4946_v63  ;;  %2859 = vmatprep.subr.bf16.mxu1 %v4948_v0  ;;  %v5026_v62 = vcombine.high %v2111_v49, %v2115_v53  ;;  %v5028_v63 = vcombine.high %v2112_v54, %v2116_v55  ;;  %v2103_v0 = vld [vmem:[%s7800_s7 + $0x280] sm:$0xff]  ;;  %v2104_v5 = vld [vmem:[%s7800_s7 + $0x288] sm:$0xff]  ;;  %v5025_v8 = vcombine.low %v2111_v49, %v2115_v53  ;;  %v2074_v40 = vld [vmem:[%s7800_s7 + $0x198] sm:$0xff] }
 0x186   : > { %v2107_v4 = vld [vmem:[%s7800_s7 + $0x2a0] sm:$0xff]  ;;  %v2108_v7 = vld [vmem:[%s7800_s7 + $0x2a8] sm:$0xff]  ;;  %v2078_v41 = vld [vmem:[%s7800_s7 + $0x1b8] sm:$0xff] }
 0x187   : > { %v2099_v34 = vld [vmem:[%s7800_s7 + $0x260] sm:$0xff]  ;;  %v2096_v13 = vld [vmem:[%s7800_s7 + $0x248] sm:$0xff]  ;;  %v5017_v15 = vcombine.low %v2103_v0, %v2107_v4  ;;  %v2065_v49 = vld [vmem:[%s7800_s7 + $0x150] sm:$0xff] }
 0x188   : > { %2819 = vmatpush1.bf16.msra.mxu0 %v4945_v9  ;;  %2860 = vmatpush1.bf16.msra.mxu1 %v4947_v10  ;;  %v5027_v9 = vcombine.low %v2112_v54, %v2116_v55  ;;  %v5018_v10 = vcombine.high %v2103_v0, %v2107_v4  ;;  %v2100_v14 = vld [vmem:[%s7800_s7 + $0x268] sm:$0xff]  ;;  %v2091_v22 = vld [vmem:[%s7800_s7 + $0x220] sm:$0xff]  ;;  %v2069_v53 = vld [vmem:[%s7800_s7 + $0x170] sm:$0xff] }
 0x189   : > { %2820 = vmatprep.subr.bf16.mxu0 %v4938_v11  ;;  %2861 = vmatprep.subr.bf16.mxu1 %v4940_v33  ;;  %v5020_v11 = vcombine.high %v2104_v5, %v2108_v7  ;;  %v2095_v33 = vld [vmem:[%s7800_s7 + $0x240] sm:$0xff]  ;;  %v2088_v43 = vld [vmem:[%s7800_s7 + $0x208] sm:$0xff]  ;;  %v2066_v54 = vld [vmem:[%s7800_s7 + $0x158] sm:$0xff] }
 0x18a   : > { %v2092_v23 = vld [vmem:[%s7800_s7 + $0x228] sm:$0xff]  ;;  %v5009_v52 = vcombine.low %v2095_v33, %v2099_v34  ;;  %v2070_v55 = vld [vmem:[%s7800_s7 + $0x178] sm:$0xff]  ;;  %v2057_v0 = vld [vmem:[%s7800_s7 + $0x110] sm:$0xff] }
 0x18b   : > { %v2061_v4 = vld [vmem:[%s7800_s7 + $0x130] sm:$0xff] }
 0x18c   : > { %2821 = vmatpush1.bf16.msra.mxu0 %v4937_v16  ;;  %2862 = vmatpush1.bf16.msra.mxu1 %v4939_v18  ;;  %v5019_v16 = vcombine.low %v2104_v5, %v2108_v7  ;;  %v5010_v18 = vcombine.high %v2095_v33, %v2099_v34  ;;  %v2058_v5 = vld [vmem:[%s7800_s7 + $0x118] sm:$0xff]  ;;  %v2049_v33 = vld [vmem:[%s7800_s7 + $0xd0] sm:$0xff] }
 0x18d   : > { %2822 = vmatprep.subr.bf16.mxu0 %v5058_v20  ;;  %2863 = vmatprep.subr.bf16.mxu1 %v5060_v21  ;;  %v5012_v20 = vcombine.high %v2096_v13, %v2100_v14  ;;  %v2087_v21 = vld [vmem:[%s7800_s7 + $0x200] sm:$0xff]  ;;  %v2062_v7 = vld [vmem:[%s7800_s7 + $0x138] sm:$0xff]  ;;  %v2053_v34 = vld [vmem:[%s7800_s7 + $0xf0] sm:$0xff] }
 0x18e   : > { %v5001_v26 = vcombine.low %v2087_v21, %v2091_v22 }
 0x190   : > { %2823 = vmatpush2.bf16.msra.mxu0 %v5057_v24  ;;  %2864 = vmatpush2.bf16.msra.mxu1 %v5059_v1  ;;  %v5011_v24 = vcombine.low %v2096_v13, %v2100_v14  ;;  %v5002_v1 = vcombine.high %v2087_v21, %v2091_v22  ;;  %v2054_v13 = vld [vmem:[%s7800_s7 + $0xf8] sm:$0xff]  ;;  %v4973_v14 = vcombine.low %v2057_v0, %v2061_v4  ;;  %v2045_v21 = vld [vmem:[%s7800_s7 + $0xb0] sm:$0xff] }
 0x191   : > { %2824 = vmatprep.subr.bf16.mxu0 %v5050_v2  ;;  %2865 = vmatprep.subr.bf16.mxu1 %v5052_v25  ;;  %v5004_v2 = vcombine.high %v2088_v43, %v2092_v23  ;;  %v2081_v25 = vld [vmem:[%s7800_s7 + $0x1d0] sm:$0xff]  ;;  %v2042_v22 = vld [vmem:[%s7800_s7 + $0x98] sm:$0xff] }
 0x194   : > { %2825 = vmatpush2.bf16.msra.mxu0 %v5049_v36  ;;  %2866 = vmatpush2.bf16.msra.mxu1 %v5051_v57  ;;  %v5003_v36 = vcombine.low %v2088_v43, %v2092_v23  ;;  %v4998_v57 = vcombine.high %v2081_v25, %v2085_v12  ;;  %v2046_v43 = vld [vmem:[%s7800_s7 + $0xb8] sm:$0xff]  ;;  %v4965_v23 = vcombine.low %v2049_v33, %v2053_v34 }
 0x195   : > { %2826 = vmatprep.subr.bf16.mxu0 %v5042_v32  ;;  %2867 = vmatprep.subr.bf16.mxu1 %v5044_v37  ;;  %v5000_v32 = vcombine.high %v2082_v56, %v2086_v35  ;;  %v2073_v37 = vld [vmem:[%s7800_s7 + $0x190] sm:$0xff] }
 0x198   : > { %2827 = vmatpush2.bf16.msra.mxu0 %v5041_v45  ;;  %2868 = vmatpush2.bf16.msra.mxu1 %v5043_v46  ;;  %v4997_v45 = vcombine.low %v2081_v25, %v2085_v12  ;;  %v4999_v46 = vcombine.low %v2082_v56, %v2086_v35  ;;  %v2037_v25 = vld [vmem:[%s7800_s7 + $0x70] sm:$0xff]  ;;  %v2034_v12 = vld [vmem:[%s7800_s7 + $0x58] sm:$0xff] }
 0x199   : > { %2828 = vmatprep.subr.bf16.mxu0 %v5034_v47  ;;  %2869 = vmatprep.subr.bf16.mxu1 %v5036_v48  ;;  %v4990_v47 = vcombine.high %v2073_v37, %v2077_v38  ;;  %v4992_v48 = vcombine.high %v2074_v40, %v2078_v41  ;;  %v2038_v56 = vld [vmem:[%s7800_s7 + $0x78] sm:$0xff] }
 0x19c   : > { %2829 = vmatpush2.bf16.msra.mxu0 %v5033_v60  ;;  %2870 = vmatpush2.bf16.msra.mxu1 %v5035_v61  ;;  %v4989_v60 = vcombine.low %v2073_v37, %v2077_v38  ;;  %v4991_v61 = vcombine.low %v2074_v40, %v2078_v41  ;;  %v2029_v37 = vld [vmem:[%s7800_s7 + $0x30] sm:$0xff]  ;;  %v2026_v38 = vld [vmem:[%s7800_s7 + $0x18] sm:$0xff] }
 0x19d   : > { %2830 = vmatprep.subr.bf16.mxu0 %v5026_v62  ;;  %2871 = vmatprep.subr.bf16.mxu1 %v5028_v63  ;;  %v4982_v62 = vcombine.high %v2065_v49, %v2069_v53  ;;  %v4984_v63 = vcombine.high %v2066_v54, %v2070_v55  ;;  %v2030_v40 = vld [vmem:[%s7800_s7 + $0x38] sm:$0xff] }
 0x1a0   : > { %2831 = vmatpush2.bf16.msra.mxu0 %v5025_v8  ;;  %2872 = vmatpush2.bf16.msra.mxu1 %v5027_v9  ;;  %v4981_v8 = vcombine.low %v2065_v49, %v2069_v53  ;;  %v4983_v9 = vcombine.low %v2066_v54, %v2070_v55  ;;  %v2145_v49 = vld [vmem:[%s7800_s7 + $0x3d0] sm:$0xff]  ;;  %v5649_v54 = vmov 0   ;;  %v2146_v55 = vld [vmem:[%s7800_s7 + $0x3d8] sm:$0xff] }
 0x1a1   : > { %2832 = vmatprep.subr.bf16.mxu0 %v5018_v10  ;;  %2873 = vmatprep.subr.bf16.mxu1 %v5020_v11  ;;  %v4974_v10 = vcombine.high %v2057_v0, %v2061_v4  ;;  %v4976_v11 = vcombine.high %v2058_v5, %v2062_v7  ;;  %v2149_v53 = vld [vmem:[%s7800_s7 + $0x3f0] sm:$0xff] }
 0x1a2   : > { %5472 = vset.pattern.permute.xlu0 %v5649_v54  ;;  %v5062_v0 = vcombine.high %v2145_v49, %v2149_v53 }
 0x1a4   : > { %2833 = vmatpush2.bf16.msra.mxu0 %v5017_v15  ;;  %2874 = vmatpush2.bf16.msra.mxu1 %v5019_v16  ;;  %v4975_v15 = vcombine.low %v2058_v5, %v2062_v7  ;;  %v4966_v16 = vcombine.high %v2049_v33, %v2053_v34  ;;  %v2137_v5 = vld [vmem:[%s7800_s7 + $0x390] sm:$0xff] }
 0x1a5   : > { %2834 = vmatprep.subr.bf16.mxu0 %v5010_v18  ;;  %2875 = vmatprep.subr.bf16.mxu1 %v5012_v20  ;;  %v2041_v20 = vld [vmem:[%s7800_s7 + $0x90] sm:$0xff] }
 0x1a6   : > { %v4957_v35 = vcombine.low %v2041_v20, %v2045_v21  ;;  %v2141_v7 = vld [vmem:[%s7800_s7 + $0x3b0] sm:$0xff] }
 0x1a7   : > { %v5054_v33 = vcombine.high %v2137_v5, %v2141_v7 }
 0x1a8   : > { %2835 = vmatpush2.bf16.msra.mxu0 %v5009_v52  ;;  %2876 = vmatpush2.bf16.msra.mxu1 %v5011_v24  ;;  %v4958_v24 = vcombine.high %v2041_v20, %v2045_v21 }
 0x1a9   : > { %2836 = vmatprep.subr.bf16.mxu0 %v5002_v1  ;;  %2877 = vmatprep.subr.bf16.mxu1 %v5004_v2  ;;  %v4960_v1 = vcombine.high %v2042_v22, %v2046_v43  ;;  %v2033_v2 = vld [vmem:[%s7800_s7 + $0x50] sm:$0xff] }
 0x1aa   : > { %v4949_v41 = vcombine.low %v2033_v2, %v2037_v25 }
 0x1ac   : > { %2837 = vmatpush2.bf16.msra.mxu0 %v5001_v26  ;;  %2878 = vmatpush2.bf16.msra.mxu1 %v5003_v36  ;;  %v4959_v26 = vcombine.low %v2042_v22, %v2046_v43  ;;  %v4950_v36 = vcombine.high %v2033_v2, %v2037_v25  ;;  %v2121_v22 = vld [vmem:[%s7800_s7 + $0x310] sm:$0xff] }
 0x1ad   : > { %2888 = vmatprep.subr.bf16.mxu0 %v4998_v57  ;;  %2929 = vmatprep.subr.bf16.mxu1 %v5000_v32  ;;  %v4952_v57 = vcombine.high %v2034_v12, %v2038_v56  ;;  %v2025_v32 = vld [vmem:[%s7800_s7 + $0x10] sm:$0xff] }
 0x1ae   : > { %v2125_v43 = vld [vmem:[%s7800_s7 + $0x330] sm:$0xff] }
 0x1af   : > { %2839 = vmatmul.mubr.bf16.vlgmr.msra.gmra.mxu0 %v6704_v39  ;;  %2880 = vmatmul.mubr.bf16.vlgmr.msra.gmra.mxu1 %v6704_v39  ;;  %v5038_v2 = vcombine.high %v2121_v22, %v2125_v43 }
 0x1b0   : > { %2889 = vmatpush1.bf16.msra.mxu0 %v4997_v45  ;;  %2930 = vmatpush1.bf16.msra.mxu1 %v4999_v46  ;;  %v4951_v45 = vcombine.low %v2034_v12, %v2038_v56  ;;  %v4942_v46 = vcombine.high %v2025_v32, %v2029_v37  ;;  %v2113_v12 = vld [vmem:[%s7800_s7 + $0x2d0] sm:$0xff] }
 0x1b1   : > { %2890 = vmatprep.subr.bf16.mxu0 %v4990_v47  ;;  %2931 = vmatprep.subr.bf16.mxu1 %v4992_v48  ;;  %v4015_v47 = vstv %s5645_s17  ;;  %v4944_v48 = vcombine.high %v2026_v38, %v2030_v40  ;;  %v2117_v56 = vld [vmem:[%s7800_s7 + $0x2f0] sm:$0xff]  ;;  %s2008_s17 = sadd.s32 1, %s5645_s17  }
 0x1b2   : > { %2920 = vmatprep.mubr.bf16.mxu0 %v6524_v17  ;;  %2961 = vmatprep.mubr.bf16.mxu1 %v6524_v17  ;;  %v2050_v17 = vld [vmem:[%s7800_s7 + $0xd8] sm:$0xff]  ;;  %vm4016_vm0 = vcmp.lt.s32.totalorder %v4015_v47, %v6247_v44  ;;  %p2007_p1 = scmp.ge.s32.totalorder %s2008_s17, %s7798_s0 }
 0x1b3   : > { %v4968_v18 = vcombine.high %v2050_v17, %v2054_v13  ;;  %v4967_v52 = vcombine.low %v2050_v17, %v2054_v13  ;;  %v2129_v17 = vld [vmem:[%s7800_s7 + $0x350] sm:$0xff] }
 0x1b4   : > { %2891 = vmatpush1.bf16.msra.mxu0 %v4989_v60  ;;  %2932 = vmatpush1.bf16.msra.mxu1 %v4991_v61  ;;  %v2150_v60 = vld [vmem:[%s7800_s7 + $0x3f8] sm:$0xff]  ;;  %v4019_v61 = vsel %vm4016_vm0, 1, %v5649_v54  ;;  %v2133_v13 = vld [vmem:[%s7800_s7 + $0x370] sm:$0xff] }
 0x1b5   : > { %2892 = vmatprep.subr.bf16.mxu0 %v4982_v62  ;;  %2933 = vmatprep.subr.bf16.mxu1 %v4984_v63  ;;  %v4941_v62 = vcombine.low %v2025_v32, %v2029_v37  ;;  %v4943_v63 = vcombine.low %v2026_v38, %v2030_v40  ;;  %v5064_v4 = vcombine.high %v2146_v55, %v2150_v60  ;;  %v2105_v38 = vld [vmem:[%s7800_s7 + $0x290] sm:$0xff] }
 0x1b6   : > { %4021 = vperm.xlu0 %5472, %v4019_v61   ;;  %v5046_v20 = vcombine.high %v2129_v17, %v2133_v13  ;;  %v5030_v32 = vcombine.high %v2113_v12, %v2117_v56  ;;  %v2109_v40 = vld [vmem:[%s7800_s7 + $0x2b0] sm:$0xff]  ;;  %v2102_v61 = vld [vmem:[%s7800_s7 + $0x278] sm:$0xff] }
 0x1b8   : > { %2893 = vmatpush1.bf16.msra.mxu0 %v4981_v8  ;;  %2934 = vmatpush1.bf16.msra.mxu1 %v4983_v9  ;;  %v2138_v8 = vld [vmem:[%s7800_s7 + $0x398] sm:$0xff] }
 0x1b9   : > { %2894 = vmatprep.subr.bf16.mxu0 %v4974_v10  ;;  %2935 = vmatprep.subr.bf16.mxu1 %v4976_v11  ;;  %v2142_v9 = vld [vmem:[%s7800_s7 + $0x3b8] sm:$0xff]  ;;  %v5061_v10 = vcombine.low %v2145_v49, %v2149_v53  ;;  %v5063_v11 = vcombine.low %v2146_v55, %v2150_v60  ;;  %v2097_v53 = vld [vmem:[%s7800_s7 + $0x250] sm:$0xff] }
 0x1ba   : > { %v5056_v34 = vcombine.high %v2138_v8, %v2142_v9  ;;  %v2101_v55 = vld [vmem:[%s7800_s7 + $0x270] sm:$0xff]  ;;  %v2098_v60 = vld [vmem:[%s7800_s7 + $0x258] sm:$0xff] }
 0x1bc   : > { %2895 = vmatpush1.bf16.msra.mxu0 %v4973_v14  ;;  %2936 = vmatpush1.bf16.msra.mxu1 %v4975_v15  ;;  %v2130_v14 = vld [vmem:[%s7800_s7 + $0x358] sm:$0xff] }
 0x1bd   : > { %2896 = vmatprep.subr.bf16.mxu0 %v4966_v16  ;;  %2937 = vmatprep.subr.bf16.mxu1 %v4968_v18  ;;  %v2134_v15 = vld [vmem:[%s7800_s7 + $0x378] sm:$0xff]  ;;  %v5053_v16 = vcombine.low %v2137_v5, %v2141_v7  ;;  %v5055_v18 = vcombine.low %v2138_v8, %v2142_v9  ;;  %v2089_v5 = vld [vmem:[%s7800_s7 + $0x210] sm:$0xff] }
 0x1be   : > { %v5048_v21 = vcombine.high %v2130_v14, %v2134_v15  ;;  %v2093_v7 = vld [vmem:[%s7800_s7 + $0x230] sm:$0xff]  ;;  %v2090_v8 = vld [vmem:[%s7800_s7 + $0x218] sm:$0xff] }
 0x1bf   : > { %v2094_v9 = vld [vmem:[%s7800_s7 + $0x238] sm:$0xff] }
 0x1c0   : > { %2897 = vmatpush1.bf16.msra.mxu0 %v4965_v23  ;;  %2938 = vmatpush1.bf16.msra.mxu1 %v4967_v52  ;;  %v2122_v23 = vld [vmem:[%s7800_s7 + $0x318] sm:$0xff] }
 0x1c1   : > { %2898 = vmatprep.subr.bf16.mxu0 %v4958_v24  ;;  %2939 = vmatprep.subr.bf16.mxu1 %v4960_v1  ;;  %v2126_v52 = vld [vmem:[%s7800_s7 + $0x338] sm:$0xff]  ;;  %v5045_v24 = vcombine.low %v2129_v17, %v2133_v13  ;;  %v5047_v1 = vcombine.low %v2130_v14, %v2134_v15  ;;  %v3028_v17 = vld [vmem:[%s7801_s8 + $0x1c0] sm:$0xff]  ;;  %v3029_v14 = vld [vmem:[%s7801_s8 + $0x1c8] sm:$0xff] }
 0x1c2   : > { %v5040_v25 = vcombine.high %v2122_v23, %v2126_v52  ;;  %v3032_v13 = vld [vmem:[%s7801_s8 + $0x1e0] sm:$0xff]  ;;  %v3033_v15 = vld [vmem:[%s7801_s8 + $0x1e8] sm:$0xff] }
 0x1c4   : > { %2899 = vmatpush1.bf16.msra.mxu0 %v4957_v35  ;;  %2940 = vmatpush1.bf16.msra.mxu1 %v4959_v26  ;;  %v2114_v35 = vld [vmem:[%s7800_s7 + $0x2d8] sm:$0xff] }
 0x1c5   : > { %2900 = vmatprep.subr.bf16.mxu0 %v4950_v36  ;;  %2941 = vmatprep.subr.bf16.mxu1 %v4952_v57  ;;  %v2118_v26 = vld [vmem:[%s7800_s7 + $0x2f8] sm:$0xff]  ;;  %v5037_v36 = vcombine.low %v2121_v22, %v2125_v43  ;;  %v5039_v57 = vcombine.low %v2122_v23, %v2126_v52  ;;  %v3020_v22 = vld [vmem:[%s7801_s8 + $0x180] sm:$0xff]  ;;  %v3021_v23 = vld [vmem:[%s7801_s8 + $0x188] sm:$0xff] }
 0x1c6   : > { %v5032_v37 = vcombine.high %v2114_v35, %v2118_v26  ;;  %v5031_v47 = vcombine.low %v2114_v35, %v2118_v26  ;;  %v3024_v43 = vld [vmem:[%s7801_s8 + $0x1a0] sm:$0xff]  ;;  %v3025_v52 = vld [vmem:[%s7801_s8 + $0x1a8] sm:$0xff]  ;;  %v6920_v35 = vpack.c.bf16 %v5621_v19, %v5621_v19 }
 0x1c7   : > { %v3013_v26 = vld [vmem:[%s7801_s8 + $0x148] sm:$0xff] }
 0x1c8   : > { %2901 = vmatpush1.bf16.msra.mxu0 %v4949_v41  ;;  %2942 = vmatpush1.bf16.msra.mxu1 %v4951_v45  ;;  %v2106_v41 = vld [vmem:[%s7800_s7 + $0x298] sm:$0xff] }
 0x1c9   : > { %2902 = vmatprep.subr.bf16.mxu0 %v4942_v46  ;;  %2943 = vmatprep.subr.bf16.mxu1 %v4944_v48  ;;  %v2110_v45 = vld [vmem:[%s7800_s7 + $0x2b8] sm:$0xff]  ;;  %v5029_v46 = vcombine.low %v2113_v12, %v2117_v56  ;;  %v5022_v48 = vcombine.high %v2105_v38, %v2109_v40  ;;  %v3012_v12 = vld [vmem:[%s7801_s8 + $0x140] sm:$0xff] }
 0x1ca   : > { %v5024_v49 = vcombine.high %v2106_v41, %v2110_v45  ;;  %v3016_v56 = vld [vmem:[%s7801_s8 + $0x160] sm:$0xff] }
 0x1cc   : > { %2903 = vmatpush1.bf16.msra.mxu0 %v4941_v62  ;;  %2944 = vmatpush1.bf16.msra.mxu1 %v4943_v63  ;;  %v5021_v62 = vcombine.low %v2105_v38, %v2109_v40  ;;  %v5023_v63 = vcombine.low %v2106_v41, %v2110_v45  ;;  %v3004_v40 = vld [vmem:[%s7801_s8 + $0x100] sm:$0xff]  ;;  %v3009_v45 = vld [vmem:[%s7801_s8 + $0x128] sm:$0xff] }
 0x1cd   : > { %2904 = vmatprep.subr.bf16.mxu0 %v5062_v0  ;;  %2945 = vmatprep.subr.bf16.mxu1 %v5064_v4  ;;  %v5014_v0 = vcombine.high %v2097_v53, %v2101_v55  ;;  %v5016_v4 = vcombine.high %v2098_v60, %v2102_v61  ;;  %v3008_v41 = vld [vmem:[%s7801_s8 + $0x120] sm:$0xff] }
 0x1d0   : > { %2905 = vmatpush2.bf16.msra.mxu0 %v5061_v10  ;;  %2946 = vmatpush2.bf16.msra.mxu1 %v5063_v11  ;;  %v5013_v10 = vcombine.low %v2097_v53, %v2101_v55  ;;  %v5015_v11 = vcombine.low %v2098_v60, %v2102_v61  ;;  %v2996_v53 = vld [vmem:[%s7801_s8 + $0xc0] sm:$0xff]  ;;  %v2997_v60 = vld [vmem:[%s7801_s8 + $0xc8] sm:$0xff] }
 0x1d1   : > { %2906 = vmatprep.subr.bf16.mxu0 %v5054_v33  ;;  %2947 = vmatprep.subr.bf16.mxu1 %v5056_v34  ;;  %v5006_v33 = vcombine.high %v2089_v5, %v2093_v7  ;;  %v5008_v34 = vcombine.high %v2090_v8, %v2094_v9  ;;  %v3000_v55 = vld [vmem:[%s7801_s8 + $0xe0] sm:$0xff]  ;;  %v3001_v61 = vld [vmem:[%s7801_s8 + $0xe8] sm:$0xff] }
 0x1d4   : > { %2907 = vmatpush2.bf16.msra.mxu0 %v5053_v16  ;;  %2948 = vmatpush2.bf16.msra.mxu1 %v5055_v18  ;;  %v5005_v16 = vcombine.low %v2089_v5, %v2093_v7  ;;  %v5007_v18 = vcombine.low %v2090_v8, %v2094_v9  ;;  %v2988_v5 = vld [vmem:[%s7801_s8 + $0x80] sm:$0xff]  ;;  %v2989_v8 = vld [vmem:[%s7801_s8 + $0x88] sm:$0xff] }
 0x1d5   : > { %2908 = vmatprep.subr.bf16.mxu0 %v5046_v20  ;;  %2949 = vmatprep.subr.bf16.mxu1 %v5048_v21  ;;  %v5124_v20 = vcombine.high %v3028_v17, %v3032_v13  ;;  %v5126_v21 = vcombine.high %v3029_v14, %v3033_v15  ;;  %v2992_v7 = vld [vmem:[%s7801_s8 + $0xa0] sm:$0xff]  ;;  %v2993_v9 = vld [vmem:[%s7801_s8 + $0xa8] sm:$0xff] }
 0x1d8   : > { %2909 = vmatpush2.bf16.msra.mxu0 %v5045_v24  ;;  %2950 = vmatpush2.bf16.msra.mxu1 %v5047_v1  ;;  %v5123_v24 = vcombine.low %v3028_v17, %v3032_v13  ;;  %v5125_v1 = vcombine.low %v3029_v14, %v3033_v15  ;;  %v2980_v17 = vld [vmem:[%s7801_s8 + $0x40] sm:$0xff]  ;;  %v2981_v14 = vld [vmem:[%s7801_s8 + $0x48] sm:$0xff] }
 0x1d9   : > { %2910 = vmatprep.subr.bf16.mxu0 %v5038_v2  ;;  %2951 = vmatprep.subr.bf16.mxu1 %v5040_v25  ;;  %v5116_v2 = vcombine.high %v3020_v22, %v3024_v43  ;;  %v5118_v25 = vcombine.high %v3021_v23, %v3025_v52  ;;  %v2984_v13 = vld [vmem:[%s7801_s8 + $0x60] sm:$0xff]  ;;  %v2985_v15 = vld [vmem:[%s7801_s8 + $0x68] sm:$0xff] }
 0x1dc   : > { %2911 = vmatpush2.bf16.msra.mxu0 %v5037_v36  ;;  %2952 = vmatpush2.bf16.msra.mxu1 %v5039_v57  ;;  %v3017_v36 = vld [vmem:[%s7801_s8 + $0x168] sm:$0xff]  ;;  %v5115_v57 = vcombine.low %v3020_v22, %v3024_v43  ;;  %v2972_v22 = vld [vmem:[%s7801_s8] sm:$0xff] }
 0x1dd   : > { %2912 = vmatprep.subr.bf16.mxu0 %v5030_v32  ;;  %2953 = vmatprep.subr.bf16.mxu1 %v5032_v37  ;;  %v5117_v32 = vcombine.low %v3021_v23, %v3025_v52  ;;  %v5108_v37 = vcombine.high %v3012_v12, %v3016_v56  ;;  %v5110_v38 = vcombine.high %v3013_v26, %v3017_v36  ;;  %v2976_v43 = vld [vmem:[%s7801_s8 + $0x20] sm:$0xff]  ;;  %v2973_v23 = vld [vmem:[%s7801_s8 + $0x8] sm:$0xff] }
 0x1de   : > { %v2977_v52 = vld [vmem:[%s7801_s8 + $0x28] sm:$0xff] }
 0x1e0   : > { %2913 = vmatpush2.bf16.msra.mxu0 %v5029_v46  ;;  %2954 = vmatpush2.bf16.msra.mxu1 %v5031_v47  ;;  %v5107_v46 = vcombine.low %v3012_v12, %v3016_v56  ;;  %v5109_v47 = vcombine.low %v3013_v26, %v3017_v36  ;;  %v3092_v12 = vld [vmem:[%s7801_s8 + $0x3c0] sm:$0xff]  ;;  %v3093_v26 = vld [vmem:[%s7801_s8 + $0x3c8] sm:$0xff] }
 0x1e1   : > { %2914 = vmatprep.subr.bf16.mxu0 %v5022_v48  ;;  %2955 = vmatprep.subr.bf16.mxu1 %v5024_v49  ;;  %v5100_v48 = vcombine.high %v3004_v40, %v3008_v41  ;;  %v3096_v56 = vld [vmem:[%s7801_s8 + $0x3e0] sm:$0xff]  ;;  %v3097_v36 = vld [vmem:[%s7801_s8 + $0x3e8] sm:$0xff] }
 0x1e4   : > { %2915 = vmatpush2.bf16.msra.mxu0 %v5021_v62  ;;  %2956 = vmatpush2.bf16.msra.mxu1 %v5023_v63  ;;  %v5099_v62 = vcombine.low %v3004_v40, %v3008_v41  ;;  %v3084_v40 = vld [vmem:[%s7801_s8 + $0x380] sm:$0xff] }
 0x1e5   : > { %2916 = vmatprep.subr.bf16.mxu0 %v5014_v0  ;;  %2957 = vmatprep.subr.bf16.mxu1 %v5016_v4  ;;  %v5092_v0 = vcombine.high %v2996_v53, %v3000_v55  ;;  %v5094_v4 = vcombine.high %v2997_v60, %v3001_v61  ;;  %v3088_v41 = vld [vmem:[%s7801_s8 + $0x3a0] sm:$0xff] }
 0x1e8   : > { %2917 = vmatpush2.bf16.msra.mxu0 %v5013_v10  ;;  %2958 = vmatpush2.bf16.msra.mxu1 %v5015_v11  ;;  %v5091_v10 = vcombine.low %v2996_v53, %v3000_v55  ;;  %v5093_v11 = vcombine.low %v2997_v60, %v3001_v61  ;;  %v3076_v53 = vld [vmem:[%s7801_s8 + $0x340] sm:$0xff]  ;;  %v3077_v60 = vld [vmem:[%s7801_s8 + $0x348] sm:$0xff] }
 0x1e9   : > { %2918 = vmatprep.subr.bf16.mxu0 %v5006_v33  ;;  %2959 = vmatprep.subr.bf16.mxu1 %v5008_v34  ;;  %v5084_v33 = vcombine.high %v2988_v5, %v2992_v7  ;;  %v5086_v34 = vcombine.high %v2989_v8, %v2993_v9  ;;  %v3080_v55 = vld [vmem:[%s7801_s8 + $0x360] sm:$0xff]  ;;  %v3081_v61 = vld [vmem:[%s7801_s8 + $0x368] sm:$0xff] }
 0x1ec   : > { %2919 = vmatpush2.bf16.msra.mxu0 %v5005_v16  ;;  %2960 = vmatpush2.bf16.msra.mxu1 %v5007_v18  ;;  %v5083_v16 = vcombine.low %v2988_v5, %v2992_v7  ;;  %v5085_v18 = vcombine.low %v2989_v8, %v2993_v9  ;;  %v3068_v5 = vld [vmem:[%s7801_s8 + $0x300] sm:$0xff]  ;;  %v3069_v8 = vld [vmem:[%s7801_s8 + $0x308] sm:$0xff] }
 0x1ed   : > { %3755 = vmatprep.subr.bf16.mxu0 %v5124_v20  ;;  %3796 = vmatprep.subr.bf16.mxu1 %v5126_v21  ;;  %v5076_v20 = vcombine.high %v2980_v17, %v2984_v13  ;;  %v5078_v21 = vcombine.high %v2981_v14, %v2985_v15  ;;  %v3072_v7 = vld [vmem:[%s7801_s8 + $0x320] sm:$0xff]  ;;  %v3073_v9 = vld [vmem:[%s7801_s8 + $0x328] sm:$0xff] }
 0x1ef   : > { %2921 = vmatmul.mubr.bf16.vlgmr.msra.gmra.mxu0 %v6704_v39  ;;  %2962 = vmatmul.mubr.bf16.vlgmr.msra.gmra.mxu1 %v6704_v39  ;;  %v3005_v39 = vld [vmem:[%s7801_s8 + $0x108] sm:$0xff] }
 0x1f0   : > { %3756 = vmatpush1.bf16.msra.mxu0 %v5123_v24  ;;  %3797 = vmatpush1.bf16.msra.mxu1 %v5125_v1  ;;  %v5102_v49 = vcombine.high %v3005_v39, %v3009_v45  ;;  %v5101_v63 = vcombine.low %v3005_v39, %v3009_v45  ;;  %v5075_v24 = vcombine.low %v2980_v17, %v2984_v13  ;;  %v3085_v39 = vld [vmem:[%s7801_s8 + $0x388] sm:$0xff]  ;;  %v3060_v17 = vld [vmem:[%s7801_s8 + $0x2c0] sm:$0xff] }
 0x1f1   : > { %3757 = vmatprep.subr.bf16.mxu0 %v5116_v2  ;;  %3798 = vmatprep.subr.bf16.mxu1 %v5118_v25  ;;  %v5077_v1 = vcombine.low %v2981_v14, %v2985_v15  ;;  %v5068_v2 = vcombine.high %v2972_v22, %v2976_v43  ;;  %v5070_v25 = vcombine.high %v2973_v23, %v2977_v52  ;;  %v3089_v45 = vld [vmem:[%s7801_s8 + $0x3a8] sm:$0xff]  ;;  %v3064_v13 = vld [vmem:[%s7801_s8 + $0x2e0] sm:$0xff] }
 0x1f2   : > { %3787 = vmatprep.mubr.bf16.mxu0 %v6920_v35  ;;  %3828 = vmatprep.mubr.bf16.mxu1 %v6920_v35  ;;  %v3061_v14 = vld [vmem:[%s7801_s8 + $0x2c8] sm:$0xff] }
 0x1f3   : > { %v3065_v15 = vld [vmem:[%s7801_s8 + $0x2e8] sm:$0xff] }
 0x1f4   : > { %3758 = vmatpush1.bf16.msra.mxu0 %v5115_v57  ;;  %3799 = vmatpush1.bf16.msra.mxu1 %v5117_v32  ;;  %v5067_v57 = vcombine.low %v2972_v22, %v2976_v43  ;;  %v5069_v32 = vcombine.low %v2973_v23, %v2977_v52  ;;  %v3052_v22 = vld [vmem:[%s7801_s8 + $0x280] sm:$0xff]  ;;  %v3053_v23 = vld [vmem:[%s7801_s8 + $0x288] sm:$0xff] }
 0x1f5   : > { %3759 = vmatprep.subr.bf16.mxu0 %v5108_v37  ;;  %3800 = vmatprep.subr.bf16.mxu1 %v5110_v38  ;;  %v5188_v37 = vcombine.high %v3092_v12, %v3096_v56  ;;  %v5190_v38 = vcombine.high %v3093_v26, %v3097_v36  ;;  %v3056_v43 = vld [vmem:[%s7801_s8 + $0x2a0] sm:$0xff]  ;;  %v3057_v52 = vld [vmem:[%s7801_s8 + $0x2a8] sm:$0xff] }
 0x1f8   : > { %3760 = vmatpush1.bf16.msra.mxu0 %v5107_v46  ;;  %3801 = vmatpush1.bf16.msra.mxu1 %v5109_v47  ;;  %v5187_v46 = vcombine.low %v3092_v12, %v3096_v56  ;;  %v5189_v47 = vcombine.low %v3093_v26, %v3097_v36  ;;  %v3044_v12 = vld [vmem:[%s7801_s8 + $0x240] sm:$0xff]  ;;  %v3045_v26 = vld [vmem:[%s7801_s8 + $0x248] sm:$0xff] }
 0x1f9   : > { %3761 = vmatprep.subr.bf16.mxu0 %v5100_v48  ;;  %3802 = vmatprep.subr.bf16.mxu1 %v5102_v49  ;;  %v5180_v48 = vcombine.high %v3084_v40, %v3088_v41  ;;  %v5182_v49 = vcombine.high %v3085_v39, %v3089_v45  ;;  %v3048_v56 = vld [vmem:[%s7801_s8 + $0x260] sm:$0xff]  ;;  %v3049_v36 = vld [vmem:[%s7801_s8 + $0x268] sm:$0xff] }
 0x1fc   : > { %3762 = vmatpush1.bf16.msra.mxu0 %v5099_v62  ;;  %3803 = vmatpush1.bf16.msra.mxu1 %v5101_v63  ;;  %v5179_v62 = vcombine.low %v3084_v40, %v3088_v41  ;;  %v5181_v63 = vcombine.low %v3085_v39, %v3089_v45  ;;  %v3036_v40 = vld [vmem:[%s7801_s8 + $0x200] sm:$0xff]  ;;  %v3037_v39 = vld [vmem:[%s7801_s8 + $0x208] sm:$0xff] }
 0x1fd   : > { %3763 = vmatprep.subr.bf16.mxu0 %v5092_v0  ;;  %3804 = vmatprep.subr.bf16.mxu1 %v5094_v4  ;;  %v5172_v0 = vcombine.high %v3076_v53, %v3080_v55  ;;  %v5174_v4 = vcombine.high %v3077_v60, %v3081_v61  ;;  %v3040_v41 = vld [vmem:[%s7801_s8 + $0x220] sm:$0xff]  ;;  %v3041_v45 = vld [vmem:[%s7801_s8 + $0x228] sm:$0xff] }
 0x200   : > { %3764 = vmatpush1.bf16.msra.mxu0 %v5091_v10  ;;  %3805 = vmatpush1.bf16.msra.mxu1 %v5093_v11  ;;  %v5171_v10 = vcombine.low %v3076_v53, %v3080_v55  ;;  %v5173_v11 = vcombine.low %v3077_v60, %v3081_v61  ;;  %v3030_v53 = vld [vmem:[%s7801_s8 + $0x1d0] sm:$0xff]  ;;  %v3031_v60 = vld [vmem:[%s7801_s8 + $0x1d8] sm:$0xff] }
 0x201   : > { %3765 = vmatprep.subr.bf16.mxu0 %v5084_v33  ;;  %3806 = vmatprep.subr.bf16.mxu1 %v5086_v34  ;;  %v5164_v33 = vcombine.high %v3068_v5, %v3072_v7  ;;  %v5166_v34 = vcombine.high %v3069_v8, %v3073_v9  ;;  %v3034_v55 = vld [vmem:[%s7801_s8 + $0x1f0] sm:$0xff]  ;;  %v3035_v61 = vld [vmem:[%s7801_s8 + $0x1f8] sm:$0xff] }
 0x204   : > { %3766 = vmatpush1.bf16.msra.mxu0 %v5083_v16  ;;  %3807 = vmatpush1.bf16.msra.mxu1 %v5085_v18  ;;  %v5163_v16 = vcombine.low %v3068_v5, %v3072_v7  ;;  %v5165_v18 = vcombine.low %v3069_v8, %v3073_v9  ;;  %v3022_v5 = vld [vmem:[%s7801_s8 + $0x190] sm:$0xff]  ;;  %v7108_v8 = vpack.c.bf16 %v5625_v58, %v5625_v58  ;;  %v3023_v9 = vld [vmem:[%s7801_s8 + $0x198] sm:$0xff] }
 0x205   : > { %3767 = vmatprep.subr.bf16.mxu0 %v5076_v20  ;;  %3808 = vmatprep.subr.bf16.mxu1 %v5078_v21  ;;  %v5156_v20 = vcombine.high %v3060_v17, %v3064_v13  ;;  %v5158_v21 = vcombine.high %v3061_v14, %v3065_v15  ;;  %v3026_v7 = vld [vmem:[%s7801_s8 + $0x1b0] sm:$0xff] }
 0x208   : > { %3768 = vmatpush1.bf16.msra.mxu0 %v5075_v24  ;;  %3809 = vmatpush1.bf16.msra.mxu1 %v5077_v1  ;;  %v5155_v24 = vcombine.low %v3060_v17, %v3064_v13  ;;  %v5157_v1 = vcombine.low %v3061_v14, %v3065_v15  ;;  %v3014_v13 = vld [vmem:[%s7801_s8 + $0x150] sm:$0xff]  ;;  %v3015_v15 = vld [vmem:[%s7801_s8 + $0x158] sm:$0xff] }
 0x209   : > { %3769 = vmatprep.subr.bf16.mxu0 %v5068_v2  ;;  %3810 = vmatprep.subr.bf16.mxu1 %v5070_v25  ;;  %v5148_v2 = vcombine.high %v3052_v22, %v3056_v43  ;;  %v5150_v25 = vcombine.high %v3053_v23, %v3057_v52  ;;  %v3018_v14 = vld [vmem:[%s7801_s8 + $0x170] sm:$0xff] }
 0x20c   : > { %3770 = vmatpush1.bf16.msra.mxu0 %v5067_v57  ;;  %3811 = vmatpush1.bf16.msra.mxu1 %v5069_v32  ;;  %v5147_v57 = vcombine.low %v3052_v22, %v3056_v43  ;;  %v5149_v32 = vcombine.low %v3053_v23, %v3057_v52  ;;  %v3006_v43 = vld [vmem:[%s7801_s8 + $0x110] sm:$0xff]  ;;  %v3007_v52 = vld [vmem:[%s7801_s8 + $0x118] sm:$0xff] }
 0x20d   : > { %3771 = vmatprep.subr.bf16.mxu0 %v5188_v37  ;;  %3812 = vmatprep.subr.bf16.mxu1 %v5190_v38  ;;  %v5140_v37 = vcombine.high %v3044_v12, %v3048_v56  ;;  %v5142_v38 = vcombine.high %v3045_v26, %v3049_v36  ;;  %v3010_v23 = vld [vmem:[%s7801_s8 + $0x130] sm:$0xff] }
 0x210   : > { %3772 = vmatpush2.bf16.msra.mxu0 %v5187_v46  ;;  %3813 = vmatpush2.bf16.msra.mxu1 %v5189_v47  ;;  %v5139_v46 = vcombine.low %v3044_v12, %v3048_v56  ;;  %v5141_v47 = vcombine.low %v3045_v26, %v3049_v36  ;;  %v2998_v56 = vld [vmem:[%s7801_s8 + $0xd0] sm:$0xff]  ;;  %v3003_v36 = vld [vmem:[%s7801_s8 + $0xf8] sm:$0xff] }
 0x211   : > { %3773 = vmatprep.subr.bf16.mxu0 %v5180_v48  ;;  %3814 = vmatprep.subr.bf16.mxu1 %v5182_v49  ;;  %v5132_v48 = vcombine.high %v3036_v40, %v3040_v41  ;;  %v5134_v49 = vcombine.high %v3037_v39, %v3041_v45  ;;  %v3002_v26 = vld [vmem:[%s7801_s8 + $0xf0] sm:$0xff] }
 0x214   : > { %3774 = vmatpush2.bf16.msra.mxu0 %v5179_v62  ;;  %3815 = vmatpush2.bf16.msra.mxu1 %v5181_v63  ;;  %v5131_v62 = vcombine.low %v3036_v40, %v3040_v41  ;;  %v5133_v63 = vcombine.low %v3037_v39, %v3041_v45  ;;  %v2990_v40 = vld [vmem:[%s7801_s8 + $0x90] sm:$0xff]  ;;  %v2991_v39 = vld [vmem:[%s7801_s8 + $0x98] sm:$0xff] }
 0x215   : > { %3775 = vmatprep.subr.bf16.mxu0 %v5172_v0  ;;  %3816 = vmatprep.subr.bf16.mxu1 %v5174_v4  ;;  %v5128_v0 = vcombine.high %v3030_v53, %v3034_v55  ;;  %v5130_v4 = vcombine.high %v3031_v60, %v3035_v61  ;;  %v2994_v41 = vld [vmem:[%s7801_s8 + $0xb0] sm:$0xff]  ;;  %v2995_v45 = vld [vmem:[%s7801_s8 + $0xb8] sm:$0xff] }
 0x218   : > { %3776 = vmatpush2.bf16.msra.mxu0 %v5171_v10  ;;  %3817 = vmatpush2.bf16.msra.mxu1 %v5173_v11  ;;  %v3027_v10 = vld [vmem:[%s7801_s8 + $0x1b8] sm:$0xff]  ;;  %v5127_v11 = vcombine.low %v3030_v53, %v3034_v55  ;;  %v2982_v53 = vld [vmem:[%s7801_s8 + $0x50] sm:$0xff] }
 0x219   : > { %3777 = vmatprep.subr.bf16.mxu0 %v5164_v33  ;;  %3818 = vmatprep.subr.bf16.mxu1 %v5166_v34  ;;  %v5129_v33 = vcombine.low %v3031_v60, %v3035_v61  ;;  %v5120_v34 = vcombine.high %v3022_v5, %v3026_v7  ;;  %v5122_v17 = vcombine.high %v3023_v9, %v3027_v10  ;;  %v2986_v55 = vld [vmem:[%s7801_s8 + $0x70] sm:$0xff]  ;;  %v2983_v60 = vld [vmem:[%s7801_s8 + $0x58] sm:$0xff] }
 0x21a   : > { %v2987_v61 = vld [vmem:[%s7801_s8 + $0x78] sm:$0xff] }
 0x21c   : > { %3778 = vmatpush2.bf16.msra.mxu0 %v5163_v16  ;;  %3819 = vmatpush2.bf16.msra.mxu1 %v5165_v18  ;;  %v3019_v16 = vld [vmem:[%s7801_s8 + $0x178] sm:$0xff]  ;;  %v5119_v18 = vcombine.low %v3022_v5, %v3026_v7  ;;  %v2974_v5 = vld [vmem:[%s7801_s8 + $0x10] sm:$0xff] }
 0x21d   : > { %3779 = vmatprep.subr.bf16.mxu0 %v5156_v20  ;;  %3820 = vmatprep.subr.bf16.mxu1 %v5158_v21  ;;  %v5121_v20 = vcombine.low %v3023_v9, %v3027_v10  ;;  %v5112_v21 = vcombine.high %v3014_v13, %v3018_v14  ;;  %v5114_v22 = vcombine.high %v3015_v15, %v3019_v16  ;;  %v2978_v7 = vld [vmem:[%s7801_s8 + $0x30] sm:$0xff]  ;;  %v2975_v9 = vld [vmem:[%s7801_s8 + $0x18] sm:$0xff] }
 0x21e   : > { %v2979_v10 = vld [vmem:[%s7801_s8 + $0x38] sm:$0xff] }
 0x220   : > { %3780 = vmatpush2.bf16.msra.mxu0 %v5155_v24  ;;  %3821 = vmatpush2.bf16.msra.mxu1 %v5157_v1  ;;  %v3011_v24 = vld [vmem:[%s7801_s8 + $0x138] sm:$0xff]  ;;  %v5111_v1 = vcombine.low %v3014_v13, %v3018_v14  ;;  %v5074_v13 = vcombine.high %v2975_v9, %v2979_v10  ;;  %v3094_v14 = vld [vmem:[%s7801_s8 + $0x3d0] sm:$0xff] }
 0x221   : > { %3781 = vmatprep.subr.bf16.mxu0 %v5148_v2  ;;  %3822 = vmatprep.subr.bf16.mxu1 %v5150_v25  ;;  %v5113_v2 = vcombine.low %v3015_v15, %v3019_v16  ;;  %v5104_v25 = vcombine.high %v3006_v43, %v3010_v23  ;;  %v5106_v12 = vcombine.high %v3007_v52, %v3011_v24  ;;  %v3098_v15 = vld [vmem:[%s7801_s8 + $0x3f0] sm:$0xff]  ;;  %v3095_v16 = vld [vmem:[%s7801_s8 + $0x3d8] sm:$0xff] }
 0x224   : > { %3782 = vmatpush2.bf16.msra.mxu0 %v5147_v57  ;;  %3823 = vmatpush2.bf16.msra.mxu1 %v5149_v32  ;;  %v5103_v57 = vcombine.low %v3006_v43, %v3010_v23  ;;  %v5105_v32 = vcombine.low %v3007_v52, %v3011_v24  ;;  %v5192_v43 = vcombine.high %v3094_v14, %v3098_v15  ;;  %v3086_v52 = vld [vmem:[%s7801_s8 + $0x390] sm:$0xff] }
 0x225   : > { %3783 = vmatprep.subr.bf16.mxu0 %v5140_v37  ;;  %3824 = vmatprep.subr.bf16.mxu1 %v5142_v38  ;;  %v5096_v37 = vcombine.high %v2998_v56, %v3002_v26  ;;  %v3090_v24 = vld [vmem:[%s7801_s8 + $0x3b0] sm:$0xff] }
 0x228   : > { %3784 = vmatpush2.bf16.msra.mxu0 %v5139_v46  ;;  %3825 = vmatpush2.bf16.msra.mxu1 %v5141_v47  ;;  %v5095_v46 = vcombine.low %v2998_v56, %v3002_v26  ;;  %v3078_v26 = vld [vmem:[%s7801_s8 + $0x350] sm:$0xff] }
 0x229   : > { %3785 = vmatprep.subr.bf16.mxu0 %v5132_v48  ;;  %3826 = vmatprep.subr.bf16.mxu1 %v5134_v49  ;;  %v5088_v48 = vcombine.high %v2990_v40, %v2994_v41  ;;  %v5090_v49 = vcombine.high %v2991_v39, %v2995_v45 }
 0x22c   : > { %3786 = vmatpush2.bf16.msra.mxu0 %v5131_v62  ;;  %3827 = vmatpush2.bf16.msra.mxu1 %v5133_v63  ;;  %v5087_v62 = vcombine.low %v2990_v40, %v2994_v41  ;;  %v5089_v63 = vcombine.low %v2991_v39, %v2995_v45  ;;  %v3070_v41 = vld [vmem:[%s7801_s8 + $0x310] sm:$0xff]  ;;  %v3071_v45 = vld [vmem:[%s7801_s8 + $0x318] sm:$0xff] }
 0x22d   : > { %3837 = vmatprep.subr.bf16.mxu0 %v5128_v0  ;;  %3878 = vmatprep.subr.bf16.mxu1 %v5130_v4  ;;  %v5080_v0 = vcombine.high %v2982_v53, %v2986_v55  ;;  %v5082_v4 = vcombine.high %v2983_v60, %v2987_v61  ;;  %v3074_v39 = vld [vmem:[%s7801_s8 + $0x330] sm:$0xff] }
 0x22f   : > { %3788 = vmatmul.mubr.bf16.vlgmr.msra.gmra.mxu0 %v7108_v8  ;;  %3829 = vmatmul.mubr.bf16.vlgmr.msra.gmra.mxu1 %v7108_v8 }
 0x230   : > { %3838 = vmatpush1.bf16.msra.mxu0 %v5127_v11  ;;  %3879 = vmatpush1.bf16.msra.mxu1 %v5129_v33  ;;  %v5079_v11 = vcombine.low %v2982_v53, %v2986_v55  ;;  %v5081_v33 = vcombine.low %v2983_v60, %v2987_v61  ;;  %v3062_v55 = vld [vmem:[%s7801_s8 + $0x2d0] sm:$0xff]  ;;  %v3063_v61 = vld [vmem:[%s7801_s8 + $0x2d8] sm:$0xff] }
 0x231   : > { %3839 = vmatprep.subr.bf16.mxu0 %v5120_v34  ;;  %3880 = vmatprep.subr.bf16.mxu1 %v5122_v17  ;;  %v5072_v34 = vcombine.high %v2974_v5, %v2978_v7  ;;  %v4017_v17 = vstv %s7196_s27  ;;  %v3066_v60 = vld [vmem:[%s7801_s8 + $0x2f0] sm:$0xff] }
 0x232   : > { %3869 = vmatprep.mubr.bf16.mxu0 %v6920_v35  ;;  %3910 = vmatprep.mubr.bf16.mxu1 %v6920_v35  ;;  %v2999_v35 = vld [vmem:[%s7801_s8 + $0xd8] sm:$0xff]  ;;  %vm4018_vm1 = vcmp.lt.s32.totalorder %v4017_v17, %v6247_v44 }
 0x233   : > { %v5098_v38 = vcombine.high %v2999_v35, %v3003_v36  ;;  %v5097_v47 = vcombine.low %v2999_v35, %v3003_v36  ;;  %v3082_v35 = vld [vmem:[%s7801_s8 + $0x370] sm:$0xff]  ;;  %v3079_v36 = vld [vmem:[%s7801_s8 + $0x358] sm:$0xff] }
 0x234   : > { %3840 = vmatpush1.bf16.msra.mxu0 %v5119_v18  ;;  %3881 = vmatpush1.bf16.msra.mxu1 %v5121_v20  ;;  %v3099_v18 = vld [vmem:[%s7801_s8 + $0x3f8] sm:$0xff]  ;;  %v4031_v20 = vsel %vm4018_vm1, 1, %v5649_v54 }
 0x235   : > { %3841 = vmatprep.subr.bf16.mxu0 %v5112_v21  ;;  %3882 = vmatprep.subr.bf16.mxu1 %v5114_v22  ;;  %v5071_v21 = vcombine.low %v2974_v5, %v2978_v7  ;;  %v5073_v22 = vcombine.low %v2975_v9, %v2979_v10  ;;  %v5194_v23 = vcombine.high %v3095_v16, %v3099_v18  ;;  %v3087_v54 = vld [vmem:[%s7801_s8 + $0x398] sm:$0xff]  ;;  %v3054_v7 = vld [vmem:[%s7801_s8 + $0x290] sm:$0xff] }
 0x236   : > { %4033 = vperm.xlu0 %5472, %v4031_v20   ;;  %v3058_v9 = vld [vmem:[%s7801_s8 + $0x2b0] sm:$0xff]  ;;  %v3055_v10 = vld [vmem:[%s7801_s8 + $0x298] sm:$0xff] }
 0x237   : > { %v5152_v17 = vcombine.high %v3054_v7, %v3058_v9  ;;  %v5151_v20 = vcombine.low %v3054_v7, %v3058_v9  ;;  %v2156_v7 = vld [vmem:[%s2153_s15 + $0x10] sm:$0xff] }
 0x238   : > { %3842 = vmatpush1.bf16.msra.mxu0 %v5111_v1  ;;  %3883 = vmatpush1.bf16.msra.mxu1 %v5113_v2  ;;  %v3091_v1 = vld [vmem:[%s7801_s8 + $0x3b8] sm:$0xff]  ;;  %v5191_v2 = vcombine.low %v3094_v14, %v3098_v15  ;;  %v3046_v14 = vld [vmem:[%s7801_s8 + $0x250] sm:$0xff] }
 0x239   : > { %3843 = vmatprep.subr.bf16.mxu0 %v5104_v25  ;;  %3884 = vmatprep.subr.bf16.mxu1 %v5106_v12  ;;  %v5193_v25 = vcombine.low %v3095_v16, %v3099_v18  ;;  %v5184_v12 = vcombine.high %v3086_v52, %v3090_v24  ;;  %v5186_v56 = vcombine.high %v3087_v54, %v3091_v1  ;;  %v3050_v15 = vld [vmem:[%s7801_s8 + $0x270] sm:$0xff]  ;;  %v3047_v16 = vld [vmem:[%s7801_s8 + $0x258] sm:$0xff] }
 0x23a   : > { %v3051_v18 = vld [vmem:[%s7801_s8 + $0x278] sm:$0xff] }
 0x23c   : > { %3844 = vmatpush1.bf16.msra.mxu0 %v5103_v57  ;;  %3885 = vmatpush1.bf16.msra.mxu1 %v5105_v32  ;;  %v3083_v57 = vld [vmem:[%s7801_s8 + $0x378] sm:$0xff]  ;;  %v5183_v32 = vcombine.low %v3086_v52, %v3090_v24  ;;  %v3042_v52 = vld [vmem:[%s7801_s8 + $0x230] sm:$0xff] }
 0x23d   : > { %3845 = vmatprep.subr.bf16.mxu0 %v5096_v37  ;;  %3886 = vmatprep.subr.bf16.mxu1 %v5098_v38  ;;  %v5185_v37 = vcombine.low %v3087_v54, %v3091_v1  ;;  %v5176_v38 = vcombine.high %v3078_v26, %v3082_v35  ;;  %v5178_v40 = vcombine.high %v3079_v36, %v3083_v57  ;;  %v3039_v24 = vld [vmem:[%s7801_s8 + $0x218] sm:$0xff] }
 0x23e   : > { %v3043_v54 = vld [vmem:[%s7801_s8 + $0x238] sm:$0xff]  ;;  %v5143_v1 = vcombine.low %v3046_v14, %v3050_v15 }
 0x240   : > { %3846 = vmatpush1.bf16.msra.mxu0 %v5095_v46  ;;  %3887 = vmatpush1.bf16.msra.mxu1 %v5097_v47  ;;  %v3075_v46 = vld [vmem:[%s7801_s8 + $0x338] sm:$0xff]  ;;  %v5175_v47 = vcombine.low %v3078_v26, %v3082_v35  ;;  %v5137_v26 = vcombine.low %v3039_v24, %v3043_v54 }
 0x241   : > { %3847 = vmatprep.subr.bf16.mxu0 %v5088_v48  ;;  %3888 = vmatprep.subr.bf16.mxu1 %v5090_v49  ;;  %v5177_v48 = vcombine.low %v3079_v36, %v3083_v57  ;;  %v5168_v49 = vcombine.high %v3070_v41, %v3074_v39  ;;  %v5170_v53 = vcombine.high %v3071_v45, %v3075_v46 }
 0x244   : > { %3848 = vmatpush1.bf16.msra.mxu0 %v5087_v62  ;;  %3889 = vmatpush1.bf16.msra.mxu1 %v5089_v63  ;;  %v3067_v62 = vld [vmem:[%s7801_s8 + $0x2f8] sm:$0xff]  ;;  %v5167_v63 = vcombine.low %v3070_v41, %v3074_v39  ;;  %v2154_v39 = vld [vmem:[%s2153_s15] sm:$0xff] }
 0x245   : > { %3849 = vmatprep.subr.bf16.mxu0 %v5080_v0  ;;  %3890 = vmatprep.subr.bf16.mxu1 %v5082_v4  ;;  %v5169_v0 = vcombine.low %v3071_v45, %v3075_v46  ;;  %v5160_v4 = vcombine.high %v3062_v55, %v3066_v60  ;;  %v5162_v5 = vcombine.high %v3063_v61, %v3067_v62  ;;  %v2155_v45 = vld [vmem:[%s2153_s15 + $0x8] sm:$0xff]  ;;  %v2158_v46 = vunpack.c.l.bf16 %v2154_v39 }
 0x248   : > { %3850 = vmatpush1.bf16.msra.mxu0 %v5079_v11  ;;  %3891 = vmatpush1.bf16.msra.mxu1 %v5081_v33  ;;  %v3059_v11 = vld [vmem:[%s7801_s8 + $0x2b8] sm:$0xff]  ;;  %v5159_v33 = vcombine.low %v3062_v55, %v3066_v60 }
 0x249   : > { %3851 = vmatprep.subr.bf16.mxu0 %v5072_v34  ;;  %3892 = vmatprep.subr.bf16.mxu1 %v5074_v13  ;;  %v5161_v34 = vcombine.low %v3063_v61, %v3067_v62  ;;  %v5154_v13 = vcombine.high %v3055_v10, %v3059_v11 }
 0x24c   : > { %3852 = vmatpush1.bf16.msra.mxu0 %v5071_v21  ;;  %3893 = vmatpush1.bf16.msra.mxu1 %v5073_v22  ;;  %v5153_v21 = vcombine.low %v3055_v10, %v3059_v11  ;;  %v5144_v22 = vcombine.high %v3046_v14, %v3050_v15  ;;  %v2157_v10 = vld [vmem:[%s2153_s15 + $0x18] sm:$0xff]  ;;  %v2163_v15 = vunpack.c.h.bf16 %v2156_v7 }
 0x24d   : > { %3853 = vmatprep.subr.bf16.mxu0 %v5192_v43  ;;  %3894 = vmatprep.subr.bf16.mxu1 %v5194_v23  ;;  %v5146_v43 = vcombine.high %v3047_v16, %v3051_v18  ;;  %v3038_v23 = vld [vmem:[%s7801_s8 + $0x210] sm:$0xff]  ;;  %v2164_v14 = vunpack.c.l.bf16 %v2157_v10 }
 0x250   : > { %3854 = vmatpush2.bf16.msra.mxu0 %v5191_v2  ;;  %3895 = vmatpush2.bf16.msra.mxu1 %v5193_v25  ;;  %v5145_v2 = vcombine.low %v3047_v16, %v3051_v18  ;;  %v5136_v25 = vcombine.high %v3038_v23, %v3042_v52 }
 0x251   : > { %3855 = vmatprep.subr.bf16.mxu0 %v5184_v12  ;;  %3896 = vmatprep.subr.bf16.mxu1 %v5186_v56  ;;  %v5138_v12 = vcombine.high %v3039_v24, %v3043_v54  ;;  %v5135_v56 = vcombine.low %v3038_v23, %v3042_v52 }
 0x254   : > { %3856 = vmatpush2.bf16.msra.mxu0 %v5183_v32  ;;  %3897 = vmatpush2.bf16.msra.mxu1 %v5185_v37 }
 0x255   : > { %3857 = vmatprep.subr.bf16.mxu0 %v5176_v38  ;;  %3898 = vmatprep.subr.bf16.mxu1 %v5178_v40 }
 0x258   : > { %3858 = vmatpush2.bf16.msra.mxu0 %v5175_v47  ;;  %3899 = vmatpush2.bf16.msra.mxu1 %v5177_v48  ;;  %v2160_v47 = vunpack.c.l.bf16 %v2155_v45  ;;  %v2161_v48 = vunpack.c.h.bf16 %v2155_v45 }
 0x259   : > { %3859 = vmatprep.subr.bf16.mxu0 %v5168_v49  ;;  %3900 = vmatprep.subr.bf16.mxu1 %v5170_v53  ;;  %v2159_v53 = vunpack.c.h.bf16 %v2154_v39 }
 0x25c   : > { %3860 = vmatpush2.bf16.msra.mxu0 %v5167_v63  ;;  %3901 = vmatpush2.bf16.msra.mxu1 %v5169_v0 }
 0x25d   : > { %3861 = vmatprep.subr.bf16.mxu0 %v5160_v4  ;;  %3902 = vmatprep.subr.bf16.mxu1 %v5162_v5 }
 0x260   : > { %3862 = vmatpush2.bf16.msra.mxu0 %v5159_v33  ;;  %3903 = vmatpush2.bf16.msra.mxu1 %v5161_v34 }
 0x261   : > { %3863 = vmatprep.subr.bf16.mxu0 %v5152_v17  ;;  %3904 = vmatprep.subr.bf16.mxu1 %v5154_v13  ;;  %v2162_v17 = vunpack.c.l.bf16 %v2156_v7 }
 0x264   : > { %3864 = vmatpush2.bf16.msra.mxu0 %v5151_v20  ;;  %3905 = vmatpush2.bf16.msra.mxu1 %v5153_v21  ;;  %v2165_v20 = vunpack.c.h.bf16 %v2157_v10 }
 0x265   : > { %3865 = vmatprep.subr.bf16.mxu0 %v5144_v22  ;;  %3906 = vmatprep.subr.bf16.mxu1 %v5146_v43 }
 0x268   : > { %3866 = vmatpush2.bf16.msra.mxu0 %v5143_v1  ;;  %3907 = vmatpush2.bf16.msra.mxu1 %v5145_v2 }
 0x269   : > { %3867 = vmatprep.subr.bf16.mxu0 %v5136_v25  ;;  %3908 = vmatprep.subr.bf16.mxu1 %v5138_v12 }
 0x26c   : > { %3868 = vmatpush2.bf16.msra.mxu0 %v5135_v56  ;;  %3909 = vmatpush2.bf16.msra.mxu1 %v5137_v26 }
 0x26f   : > { %v2840_v35 = vpop.f32.mrf.mxu0  ;;  %3870 = vmatmul.mubr.bf16.vlgmr.msra.gmra.mxu0 %v7108_v8  ;;  %v2881_v36 = vpop.f32.mrf.mxu1  ;;  %3911 = vmatmul.mubr.bf16.vlgmr.msra.gmra.mxu1 %v7108_v8 }
 0x270   : > { %v2841_v49 = vadd.f32 %v2840_v35, %v2158_v46  ;;  %v2882_v55 = vadd.f32 %v2881_v36, %v2160_v47 }
 0x271   : > { %v2842_v57 = vpop.f32.mrf.mxu0  ;;  %v2883_v32 = vpop.f32.mrf.mxu1 }
 0x272   : > { %v2884_v60 = vadd.f32 %v2883_v32, %v2161_v48  ;;  %v5195_v61 = vmul.f32 -1.442695, %v2841_v49  ;;  %v2843_v8 = vadd.f32 %v2842_v57, %v2159_v53  ;;  %v5197_v62 = vmul.f32 -1.442695, %v2882_v55  ;;  %v4022_v32 = vpop.permute.xlu0 %4021 }
 0x273   : > { %v2844_v37 = vpop.f32.mrf.mxu0  ;;  %v2885_v38 = vpop.f32.mrf.mxu1  ;;  %vm4023_vm2 = vcmp.eq.s32.totalorder %v4022_v32, 1 }
 0x274   : > { %v5198_v63 = vmul.f32 -1.442695, %v2884_v60  ;;  %5473 = vpow2.f32 %v5195_v61  ;;  %v5196_v0 = vmul.f32 -1.442695, %v2843_v8 }
 0x275   : > { %v2845_v40 = vpop.f32.mrf.mxu0  ;;  %v2886_v41 = vpop.f32.mrf.mxu1  ;;  %5475 = vpow2.f32 %v5197_v62 }
 0x276   : > { %5477 = vpow2.f32 %v5198_v63 }
 0x277   : > { %5479 = vpow2.f32 %v5196_v0 }
 0x281   : > { %v5474_v4 = vpop.eup %5473 }
 0x282   : > { %v5476_v5 = vpop.eup %5475  ;;  %v3925_v11 = vadd.f32 1.0, %v5474_v4 }
 0x283   : > { %v5478_v9 = vpop.eup %5477  ;;  %v3937_v34 = vadd.f32 1.0, %v5476_v5 }
 0x284   : > { %v5480_v33 = vpop.eup %5479  ;;  %v3938_v13 = vadd.f32 1.0, %v5478_v9  ;;  %5481 = vrcp.f32 %v3925_v11 }
 0x285   : > { %v3926_v16 = vadd.f32 1.0, %v5480_v33  ;;  %5483 = vrcp.f32 %v3937_v34 }
 0x286   : > { %5485 = vrcp.f32 %v3938_v13 }
 0x291   : > { %v5482_v35 = vpop.eup %5481 }
 0x292   : > { %v5484_v36 = vpop.eup %5483 }
 0x293   : > { %v5486_v57 = vpop.eup %5485  ;;  %v3957_v41 = vmul.f32 %v5633_v51, %v5484_v36  ;;  %v3106_v36 = vld [vmem:[%s3102_s6 + $0x18] sm:$0xff] }
 0x294   : > { %v3958_v47 = vmul.f32 %v5629_v42, %v5486_v57 }
 0x2af   : > { %v2922_v18 = vpop.f32.mrf.mxu0  ;;  %v2963_v22 = vpop.f32.mrf.mxu1 }
 0x2b0   : > { %v2923_v21 = vadd.f32 %v2922_v18, %v2162_v17  ;;  %v2964_v43 = vadd.f32 %v2963_v22, %v2164_v14 }
 0x2b1   : > { %v2924_v23 = vpop.f32.mrf.mxu0  ;;  %v2965_v24 = vpop.f32.mrf.mxu1 }
 0x2b2   : > { %5487 = vtanh.f32 %v2923_v21  ;;  %v2925_v52 = vadd.f32 %v2924_v23, %v2163_v15  ;;  %v5199_v54 = vmul.f32 -1.442695, %v2964_v43  ;;  %v2966_v1 = vadd.f32 %v2965_v24, %v2165_v20  ;;  %v3103_v15 = vld [vmem:[%s3102_s6] sm:$0xff] }
 0x2b3   : > { %5489 = vrcp.f32 %v3926_v16  ;;  %v2926_v2 = vpop.f32.mrf.mxu0  ;;  %v2967_v25 = vpop.f32.mrf.mxu1  ;;  %v3104_v16 = vld [vmem:[%s3102_s6 + $0x8] sm:$0xff]  ;;  %v3107_v18 = vunpack.c.l.bf16 %v3103_v15  ;;  %v3108_v43 = vunpack.c.h.bf16 %v3103_v15 }
 0x2b4   : > { %5491 = vtanh.f32 %v2925_v52  ;;  %v5200_v12 = vmul.f32 -1.442695, %v2966_v1  ;;  %v3109_v20 = vunpack.c.l.bf16 %v3104_v16  ;;  %v3110_v21 = vunpack.c.h.bf16 %v3104_v16 }
 0x2b5   : > { %5493 = vpow2.f32 %v5199_v54  ;;  %v2927_v56 = vpop.f32.mrf.mxu0  ;;  %v2968_v26 = vpop.f32.mrf.mxu1 }
 0x2b6   : > { %5495 = vpow2.f32 %v5200_v12  ;;  %v3105_v26 = vld [vmem:[%s3102_s6 + $0x10] sm:$0xff] }
 0x2bf   : > { %v5488_v37 = vpop.eup %5487 }
 0x2c0   : > { %v5490_v38 = vpop.eup %5489  ;;  %v3959_v40 = vmul.f32 %v5488_v37, %v5482_v35 }
 0x2c1   : > { %v5492_v39 = vpop.eup %5491 }
 0x2c2   : > { %v5494_v45 = vpop.eup %5493  ;;  %v3960_v46 = vmul.f32 %v5492_v39, %v5490_v38  ;;  %v3961_v48 = vadd.f32 %v3959_v40, %v3957_v41  ;;  %v3111_v38 = vunpack.c.l.bf16 %v3105_v26  ;;  %v3113_v41 = vunpack.c.l.bf16 %v3106_v36 }
 0x2c3   : > { %v3951_v49 = vadd.f32 1.0, %v5494_v45  ;;  %v5496_v53 = vpop.eup %5495  ;;  %v3112_v39 = vunpack.c.h.bf16 %v3105_v26 }
 0x2c4   : > { %v3962_v55 = vadd.f32 %v3960_v46, %v3958_v47  ;;  %5497 = vtanh.f32 %v3961_v48  ;;  %v7306_v51 = vsel %vm4023_vm2, %v3961_v48, %v5633_v51   ;;  %v3952_v60 = vadd.f32 1.0, %v5496_v53 }
 0x2c5   : > { %5499 = vrcp.f32 %v3951_v49  ;;  %v3114_v47 = vunpack.c.h.bf16 %v3106_v36 }
 0x2c6   : > { %5501 = vtanh.f32 %v3962_v55  ;;  %v7310_v42 = vsel %vm4023_vm2, %v3962_v55, %v5629_v42  }
 0x2c7   : > { %5503 = vrcp.f32 %v3952_v60 }
 0x2d1   : > { %v5498_v61 = vpop.eup %5497 }
 0x2d2   : > { %v5500_v8 = vpop.eup %5499 }
 0x2d3   : > { %v5502_v62 = vpop.eup %5501  ;;  %v3965_v63 = vmul.f32 %v5500_v8, %v5498_v61 }
 0x2d4   : > { %v5504_v0 = vpop.eup %5503 }
 0x2d5   : > { %v3966_v4 = vmul.f32 %v5504_v0, %v5502_v62  ;;  %v4024_v5 = vsel %vm4023_vm2, %v3965_v63, 0.0  ;;  %v7315_v59 = vsel %vm4023_vm2, %v3965_v63, %v5641_v59  }
 0x2d6   : > { %4029 = vst [vmem:[%s4028_s2] sm:$0xff] %v4024_v5 }
 0x2d7   : > { %v4025_v7 = vsel %vm4023_vm2, %v3966_v4, 0.0  ;;  %v7322_v30 = vsel %vm4023_vm2, %v3966_v4, %v5637_v30  }
 0x2d8   : > { %4030 = vst [vmem:[%s4028_s2 + $0x8] sm:$0xff] %v4025_v7 }
 0x2ef   : > { %v3789_v9 = vpop.f32.mrf.mxu0  ;;  %v3830_v10 = vpop.f32.mrf.mxu1 }
 0x2f0   : > { %v3790_v22 = vadd.f32 %v3789_v9, %v3107_v18  ;;  %v3831_v23 = vadd.f32 %v3830_v10, %v3109_v20 }
 0x2f1   : > { %v3791_v11 = vpop.f32.mrf.mxu0  ;;  %v3832_v33 = vpop.f32.mrf.mxu1 }
 0x2f2   : > { %v3833_v52 = vadd.f32 %v3832_v33, %v3110_v21  ;;  %v5201_v24 = vmul.f32 -1.442695, %v3790_v22  ;;  %v3792_v54 = vadd.f32 %v3791_v11, %v3108_v43  ;;  %v5203_v1 = vmul.f32 -1.442695, %v3831_v23  ;;  %v4034_v33 = vpop.permute.xlu0 %4033 }
 0x2f3   : > { %v3793_v34 = vpop.f32.mrf.mxu0  ;;  %v3834_v17 = vpop.f32.mrf.mxu1  ;;  %vm4035_vm3 = vcmp.eq.s32.totalorder %v4034_v33, 1 }
 0x2f4   : > { %v5204_v2 = vmul.f32 -1.442695, %v3833_v52  ;;  %5505 = vpow2.f32 %v5201_v24  ;;  %v5202_v25 = vmul.f32 -1.442695, %v3792_v54 }
 0x2f5   : > { %v3794_v13 = vpop.f32.mrf.mxu0  ;;  %v3835_v14 = vpop.f32.mrf.mxu1  ;;  %5507 = vpow2.f32 %v5203_v1 }
 0x2f6   : > { %5509 = vpow2.f32 %v5204_v2 }
 0x2f7   : > { %5511 = vpow2.f32 %v5202_v25 }
 0x301   : > { %v5506_v12 = vpop.eup %5505 }
 0x302   : > { %v5508_v56 = vpop.eup %5507  ;;  %v3973_v57 = vadd.f32 1.0, %v5506_v12 }
 0x303   : > { %v5510_v35 = vpop.eup %5509  ;;  %v3985_v37 = vadd.f32 1.0, %v5508_v56 }
 0x304   : > { %v5512_v32 = vpop.eup %5511  ;;  %v3986_v40 = vadd.f32 1.0, %v5510_v35  ;;  %5513 = vrcp.f32 %v3973_v57 }
 0x305   : > { %v3974_v45 = vadd.f32 1.0, %v5512_v32  ;;  %5515 = vrcp.f32 %v3985_v37 }
 0x306   : > { %5517 = vrcp.f32 %v3986_v40 }
 0x311   : > { %v5514_v9 = vpop.eup %5513 }
 0x312   : > { %v5516_v10 = vpop.eup %5515 }
 0x313   : > { %v5518_v11 = vpop.eup %5517  ;;  %v4005_v14 = vmul.f32 %v5617_v50, %v5516_v10 }
 0x314   : > { %v4006_v20 = vmul.f32 %v5613_v6, %v5518_v11 }
 0x32f   : > { %v3871_v46 = vpop.f32.mrf.mxu0  ;;  %v3912_v49 = vpop.f32.mrf.mxu1 }
 0x330   : > { %v3872_v48 = vadd.f32 %v3871_v46, %v3111_v38  ;;  %v3913_v53 = vadd.f32 %v3912_v49, %v3113_v41 }
 0x331   : > { %v3873_v55 = vpop.f32.mrf.mxu0  ;;  %v3914_v61 = vpop.f32.mrf.mxu1 }
 0x332   : > { %5519 = vtanh.f32 %v3872_v48  ;;  %v3874_v60 = vadd.f32 %v3873_v55, %v3112_v39  ;;  %v5205_v8 = vmul.f32 -1.442695, %v3913_v53  ;;  %v3915_v62 = vadd.f32 %v3914_v61, %v3114_v47 }
 0x333   : > { %5521 = vrcp.f32 %v3974_v45  ;;  %v3875_v63 = vpop.f32.mrf.mxu0  ;;  %v3916_v0 = vpop.f32.mrf.mxu1 }
 0x334   : > { %5523 = vtanh.f32 %v3874_v60  ;;  %v5206_v4 = vmul.f32 -1.442695, %v3915_v62 }
 0x335   : > { %5525 = vpow2.f32 %v5205_v8  ;;  %v3876_v5 = vpop.f32.mrf.mxu0  ;;  %v3917_v7 = vpop.f32.mrf.mxu1 }
 0x336   : > { %5527 = vpow2.f32 %v5206_v4 }
 0x33f   : > { %v5520_v34 = vpop.eup %5519 }
 0x340   : > { %v5522_v17 = vpop.eup %5521  ;;  %v4007_v13 = vmul.f32 %v5520_v34, %v5514_v9 }
 0x341   : > { %v5524_v15 = vpop.eup %5523 }
 0x342   : > { %v5526_v16 = vpop.eup %5525  ;;  %v4008_v18 = vmul.f32 %v5524_v15, %v5522_v17  ;;  %v4009_v21 = vadd.f32 %v4007_v13, %v4005_v14 }
 0x343   : > { %v3999_v22 = vadd.f32 1.0, %v5526_v16  ;;  %v5528_v43 = vpop.eup %5527 }
 0x344   : > { %v4010_v23 = vadd.f32 %v4008_v18, %v4006_v20  ;;  %5529 = vtanh.f32 %v4009_v21  ;;  %v4049_v50 = vsel %vm4035_vm3, %v4009_v21, %v5617_v50   ;;  %v4000_v52 = vadd.f32 1.0, %v5528_v43 }
 0x345   : > { %5531 = vrcp.f32 %v3999_v22 }
 0x346   : > { %5533 = vtanh.f32 %v4010_v23  ;;  %v4050_v6 = vsel %vm4035_vm3, %v4010_v23, %v5613_v6  }
 0x347   : > { %5535 = vrcp.f32 %v4000_v52 }
 0x351   : > { %v5530_v24 = vpop.eup %5529 }
 0x352   : > { %v5532_v54 = vpop.eup %5531 }
 0x353   : > { %v5534_v1 = vpop.eup %5533  ;;  %v4013_v2 = vmul.f32 %v5532_v54, %v5530_v24 }
 0x354   : > { %v5536_v25 = vpop.eup %5535  ;;  %2010 = sbr.rel (!%p2007_p1) target bundleno = 363 (0x16b), region = 83 }
 0x355   : > { %v4014_v12 = vmul.f32 %v5536_v25, %v5534_v1  ;;  %v4036_v56 = vsel %vm4035_vm3, %v4013_v2, 0.0  ;;  %v4047_v58 = vsel %vm4035_vm3, %v4013_v2, %v5625_v58  }
 0x356   : > { %4041 = vst [vmem:[%s4040_s3 + $0x10] sm:$0xff] %v4036_v56 }
 0x357   : > { %v4037_v26 = vsel %vm4035_vm3, %v4014_v12, 0.0  ;;  %v4048_v19 = vsel %vm4035_vm3, %v4014_v12, %v5621_v19  }
 0x358   : > { %4042 = vst [vmem:[%s4040_s3 + $0x18] sm:$0xff] %v4037_v26 }
 0x359 PF:  { %v4114_v35 = vld [vmem:[%s7802_s9 + $0xf8] sm:$0xff]  ;;  %5538 = vset.pattern.permute.xlu1 %v7813_v3  ;;  %5537 = vset.pattern.permute.xlu0 %v7813_v3  ;;  %v4113_v50 = vld [vmem:[%s7802_s9 + $0xf0] sm:$0xff]  ;;  %v4112_v51 = vld [vmem:[%s7802_s9 + $0xe8] sm:$0xff]  ;;  %vm4387_vm4 = vcmask 261120   ;;  %vm4417_vm5 = vcmp.gt.s32.totalorder %v6247_v44, 5  ;;  %vm4413_vm6 = vcmp.gt.s32.totalorder %v6247_v44, 1 }
 0x35a   :  { %v4146_v36 = vld [vmem:[%s7802_s9 + $0x1f8] sm:$0xff]  ;;  %5285 = vmatprep.subr.mxu0 %v4114_v35  ;;  %v4145_v19 = vld [vmem:[%s7802_s9 + $0x1f0] sm:$0xff]  ;;  %v4144_v30 = vld [vmem:[%s7802_s9 + $0x1e8] sm:$0xff]  ;;  %vm4416_vm7 = vcmp.gt.s32.totalorder %v6247_v44, 4  ;;  %vm4418_vm8 = vcmp.gt.s32.totalorder %v6247_v44, 6  ;;  %vm4412_vm9 = vcmp.gt.s32.totalorder %v6247_v44, 0 }
 0x35b   :  { %v4098_v57 = vld [vmem:[%s7802_s9 + $0x78] sm:$0xff]  ;;  %5341 = vmatprep.subr.mxu1 %v4146_v36  ;;  %v4097_v58 = vld [vmem:[%s7802_s9 + $0x70] sm:$0xff]  ;;  %v4096_v59 = vld [vmem:[%s7802_s9 + $0x68] sm:$0xff]  ;;  %vm4428_vm10 = vcmask 7168   ;;  %vm4414_vm11 = vcmp.gt.s32.totalorder %v6247_v44, 2  ;;  %vm4415_vm12 = vcmp.gt.s32.totalorder %v6247_v44, 3 }
 0x35c   :  { %v4130_v6 = vld [vmem:[%s7802_s9 + $0x178] sm:$0xff]  ;;  %5286 = vmatpush3.msra.mxu0 %v4098_v57  ;;  %v4129_v42 = vld [vmem:[%s7802_s9 + $0x170] sm:$0xff]  ;;  %v4128_v32 = vld [vmem:[%s7802_s9 + $0x168] sm:$0xff]  ;;  %vm4419_vm13 = vcmp.gt.s32.totalorder %v6247_v44, 7 }
 0x35d   :  { %5342 = vmatpush3.msra.mxu1 %v4130_v6  ;;  %5287 = vmatprep.subr.mxu0 %v4113_v50  ;;  %v4111_v37 = vld [vmem:[%s7802_s9 + $0xe0] sm:$0xff]  ;;  %v4110_v39 = vld [vmem:[%s7802_s9 + $0xd8] sm:$0xff]  ;;  %v4109_v48 = vld [vmem:[%s7802_s9 + $0xd0] sm:$0xff] }
 0x35e   :  { %5343 = vmatprep.subr.mxu1 %v4145_v19  ;;  %5288 = vmatpush3.msra.mxu0 %v4097_v58  ;;  %v4143_v38 = vld [vmem:[%s7802_s9 + $0x1e0] sm:$0xff]  ;;  %v4142_v45 = vld [vmem:[%s7802_s9 + $0x1d8] sm:$0xff]  ;;  %v4141_v49 = vld [vmem:[%s7802_s9 + $0x1d0] sm:$0xff] }
 0x35f   :  { %5344 = vmatpush3.msra.mxu1 %v4129_v42  ;;  %5289 = vmatprep.subr.mxu0 %v4112_v51  ;;  %v4095_v40 = vld [vmem:[%s7802_s9 + $0x60] sm:$0xff]  ;;  %v4094_v46 = vld [vmem:[%s7802_s9 + $0x58] sm:$0xff]  ;;  %v4093_v53 = vld [vmem:[%s7802_s9 + $0x50] sm:$0xff] }
 0x360   :  { %5345 = vmatprep.subr.mxu1 %v4144_v30  ;;  %v4127_v41 = vld [vmem:[%s7802_s9 + $0x160] sm:$0xff]  ;;  %5290 = vmatpush3.msra.mxu0 %v4096_v59  ;;  %v4126_v47 = vld [vmem:[%s7802_s9 + $0x158] sm:$0xff]  ;;  %v4125_v55 = vld [vmem:[%s7802_s9 + $0x150] sm:$0xff] }
 0x361   :  { %5346 = vmatpush3.msra.mxu1 %v4128_v32  ;;  %5291 = vmatprep.subr.mxu0 %v4111_v37  ;;  %v4108_v60 = vld [vmem:[%s7802_s9 + $0xc8] sm:$0xff]  ;;  %v4107_v63 = vld [vmem:[%s7802_s9 + $0xc0] sm:$0xff]  ;;  %v4106_v7 = vld [vmem:[%s7802_s9 + $0xb8] sm:$0xff] }
 0x362   :  { %5347 = vmatprep.subr.mxu1 %v4143_v38  ;;  %5292 = vmatpush3.msra.mxu0 %v4095_v40  ;;  %v4140_v61 = vld [vmem:[%s7802_s9 + $0x1c8] sm:$0xff]  ;;  %v4139_v0 = vld [vmem:[%s7802_s9 + $0x1c0] sm:$0xff]  ;;  %v4138_v9 = vld [vmem:[%s7802_s9 + $0x1b8] sm:$0xff] }
 0x363   :  { %5348 = vmatpush3.msra.mxu1 %v4127_v41  ;;  %5293 = vmatprep.subr.mxu0 %v4110_v39  ;;  %v4092_v8 = vld [vmem:[%s7802_s9 + $0x48] sm:$0xff]  ;;  %v4091_v4 = vld [vmem:[%s7802_s9 + $0x40] sm:$0xff]  ;;  %v4090_v10 = vld [vmem:[%s7802_s9 + $0x38] sm:$0xff] }
 0x364   :  { %5349 = vmatprep.subr.mxu1 %v4142_v45  ;;  %5294 = vmatpush3.msra.mxu0 %v4094_v46  ;;  %v4124_v62 = vld [vmem:[%s7802_s9 + $0x148] sm:$0xff]  ;;  %v4123_v5 = vld [vmem:[%s7802_s9 + $0x140] sm:$0xff]  ;;  %v4122_v11 = vld [vmem:[%s7802_s9 + $0x138] sm:$0xff] }
 0x365   :  { %5350 = vmatpush3.msra.mxu1 %v4126_v47  ;;  %5295 = vmatprep.subr.mxu0 %v4109_v48  ;;  %v4105_v33 = vld [vmem:[%s7802_s9 + $0xb0] sm:$0xff]  ;;  %v4104_v14 = vld [vmem:[%s7802_s9 + $0xa8] sm:$0xff]  ;;  %v4103_v20 = vld [vmem:[%s7802_s9 + $0xa0] sm:$0xff] }
 0x366   :  { %5351 = vmatprep.subr.mxu1 %v4141_v49  ;;  %5296 = vmatpush3.msra.mxu0 %v4093_v53  ;;  %v4137_v34 = vld [vmem:[%s7802_s9 + $0x1b0] sm:$0xff]  ;;  %v4136_v15 = vld [vmem:[%s7802_s9 + $0x1a8] sm:$0xff]  ;;  %v4135_v21 = vld [vmem:[%s7802_s9 + $0x1a0] sm:$0xff] }
 0x367   :  { %5352 = vmatpush3.msra.mxu1 %v4125_v55  ;;  %5297 = vmatprep.subr.mxu0 %v4108_v60  ;;  %v4089_v17 = vld [vmem:[%s7802_s9 + $0x30] sm:$0xff]  ;;  %v4088_v16 = vld [vmem:[%s7802_s9 + $0x28] sm:$0xff]  ;;  %v4087_v22 = vld [vmem:[%s7802_s9 + $0x20] sm:$0xff] }
 0x368   :  { %5353 = vmatprep.subr.mxu1 %v4140_v61  ;;  %5298 = vmatpush3.msra.mxu0 %v4092_v8  ;;  %v4121_v13 = vld [vmem:[%s7802_s9 + $0x130] sm:$0xff]  ;;  %v4120_v18 = vld [vmem:[%s7802_s9 + $0x128] sm:$0xff]  ;;  %v4119_v43 = vld [vmem:[%s7802_s9 + $0x120] sm:$0xff] }
 0x369   :  { %5354 = vmatpush3.msra.mxu1 %v4124_v62  ;;  %5299 = vmatprep.subr.mxu0 %v4107_v63  ;;  %v4102_v23 = vld [vmem:[%s7802_s9 + $0x98] sm:$0xff]  ;;  %v4101_v1 = vld [vmem:[%s7802_s9 + $0x90] sm:$0xff]  ;;  %v4100_v56 = vld [vmem:[%s7802_s9 + $0x88] sm:$0xff] }
 0x36a   :  { %5355 = vmatprep.subr.mxu1 %v4139_v0  ;;  %5300 = vmatpush3.msra.mxu0 %v4091_v4  ;;  %v4134_v52 = vld [vmem:[%s7802_s9 + $0x198] sm:$0xff]  ;;  %v4133_v2 = vld [vmem:[%s7802_s9 + $0x190] sm:$0xff]  ;;  %v4132_v26 = vld [vmem:[%s7802_s9 + $0x188] sm:$0xff] }
 0x36b   :  { %5356 = vmatpush3.msra.mxu1 %v4123_v5  ;;  %5301 = vmatprep.subr.mxu0 %v4106_v7  ;;  %v4086_v24 = vld [vmem:[%s7802_s9 + $0x18] sm:$0xff]  ;;  %v4085_v25 = vld [vmem:[%s7802_s9 + $0x10] sm:$0xff]  ;;  %v4084_v35 = vld [vmem:[%s7802_s9 + $0x8] sm:$0xff] }
 0x36c   :  { %5357 = vmatprep.subr.mxu1 %v4138_v9  ;;  %5302 = vmatpush3.msra.mxu0 %v4090_v10  ;;  %v4118_v54 = vld [vmem:[%s7802_s9 + $0x118] sm:$0xff]  ;;  %v4117_v12 = vld [vmem:[%s7802_s9 + $0x110] sm:$0xff]  ;;  %v4116_v36 = vld [vmem:[%s7802_s9 + $0x108] sm:$0xff] }
 0x36d   :  { %5358 = vmatpush3.msra.mxu1 %v4122_v11  ;;  %5303 = vmatprep.subr.mxu0 %v4105_v33  ;;  %v4099_v57 = vld [vmem:[%s7802_s9 + $0x80] sm:$0xff]  ;;  %v7558_v19 = vld [vmem:[#allocation4 + $0x8] sm:$0xff]  ;;  %v7563_v42 = vld [vmem:[#allocation4 + $0x18] sm:$0xff] }
 0x36e   :  { %5359 = vmatprep.subr.mxu1 %v4137_v34  ;;  %5304 = vmatpush3.msra.mxu0 %v4089_v17  ;;  %v4131_v6 = vld [vmem:[%s7802_s9 + $0x180] sm:$0xff]  ;;  %v7567_v30 = vld [vmem:[#allocation4 + $0x10] sm:$0xff]  ;;  %v7570_v59 = vld [vmem:[#allocation4 + $0x28] sm:$0xff] }
 0x36f   :  { %5360 = vmatpush3.msra.mxu1 %v4121_v13  ;;  %5305 = vmatprep.subr.mxu0 %v4104_v14  ;;  %v4083_v50 = vld [vmem:[%s7802_s9] sm:$0xff]  ;;  %v7572_v32 = vld [vmem:[#allocation4 + $0x38] sm:$0xff]  ;;  %v7581_v38 = vld [vmem:[#allocation4 + $0x30] sm:$0xff] }
 0x370   :  { %5361 = vmatprep.subr.mxu1 %v4136_v15  ;;  %5306 = vmatpush3.msra.mxu0 %v4088_v16  ;;  %v4115_v58 = vld [vmem:[%s7802_s9 + $0x100] sm:$0xff]  ;;  %v7583_v40 = vld [vmem:[#allocation4 + $0x48] sm:$0xff]  ;;  %v7585_v41 = vld [vmem:[#allocation4 + $0x58] sm:$0xff] }
 0x371   :  { %5362 = vmatpush3.msra.mxu1 %v4120_v18  ;;  %5307 = vmatprep.subr.mxu0 %v4103_v20  ;;  %v7565_v51 = vld [vmem:[#allocation4] sm:$0xff]  ;;  %v7593_v45 = vld [vmem:[#allocation4 + $0x50] sm:$0xff]  ;;  %v7595_v46 = vld [vmem:[#allocation4 + $0x68] sm:$0xff] }
 0x372   :  { %5363 = vmatprep.subr.mxu1 %v4135_v21  ;;  %5308 = vmatpush3.msra.mxu0 %v4087_v22  ;;  %v7579_v37 = vld [vmem:[#allocation4 + $0x20] sm:$0xff]  ;;  %v7597_v47 = vld [vmem:[#allocation4 + $0x78] sm:$0xff]  ;;  %v7605_v49 = vld [vmem:[#allocation4 + $0x70] sm:$0xff] }
 0x373   :  { %5364 = vmatpush3.msra.mxu1 %v4119_v43  ;;  %5309 = vmatprep.subr.mxu0 %v4102_v23  ;;  %v7591_v39 = vld [vmem:[#allocation4 + $0x40] sm:$0xff]  ;;  %v7607_v53 = vld [vmem:[#allocation4 + $0x88] sm:$0xff]  ;;  %v7609_v55 = vld [vmem:[#allocation4 + $0x98] sm:$0xff] }
 0x374   :  { %5365 = vmatprep.subr.mxu1 %v4134_v52  ;;  %5310 = vmatpush3.msra.mxu0 %v4086_v24  ;;  %v7603_v48 = vld [vmem:[#allocation4 + $0x60] sm:$0xff]  ;;  %v7617_v61 = vld [vmem:[#allocation4 + $0x90] sm:$0xff]  ;;  %v7619_v8 = vld [vmem:[#allocation4 + $0xa8] sm:$0xff] }
 0x375   :  { %5366 = vmatpush3.msra.mxu1 %v4118_v54  ;;  %5311 = vmatprep.subr.mxu0 %v4101_v1  ;;  %v7615_v60 = vld [vmem:[#allocation4 + $0x80] sm:$0xff]  ;;  %v7621_v62 = vld [vmem:[#allocation4 + $0xb8] sm:$0xff]  ;;  %v7629_v0 = vld [vmem:[#allocation4 + $0xb0] sm:$0xff] }
 0x376   :  { %5367 = vmatprep.subr.mxu1 %v4133_v2  ;;  %5312 = vmatpush3.msra.mxu0 %v4085_v25  ;;  %v7627_v63 = vld [vmem:[#allocation4 + $0xa0] sm:$0xff]  ;;  %v7631_v4 = vld [vmem:[#allocation4 + $0xc8] sm:$0xff]  ;;  %v7633_v5 = vld [vmem:[#allocation4 + $0xd8] sm:$0xff] }
 0x377   :  { %5368 = vmatpush3.msra.mxu1 %v4117_v12  ;;  %5313 = vmatprep.subr.mxu0 %v4100_v56  ;;  %v7639_v7 = vld [vmem:[#allocation4 + $0xc0] sm:$0xff]  ;;  %v7641_v9 = vld [vmem:[#allocation4 + $0xd0] sm:$0xff]  ;;  %v7643_v10 = vld [vmem:[#allocation4 + $0xe8] sm:$0xff] }
 0x378   :  { %5369 = vmatprep.subr.mxu1 %v4132_v26  ;;  %5314 = vmatpush3.msra.mxu0 %v4084_v35  ;;  %7829 = vst [vmem:[#allocation11_spill] sm:$0xff] %v7643_v10  ;;  %v7645_v11 = vld [vmem:[#allocation4 + $0xf8] sm:$0xff]  ;;  %v7651_v33 = vld [vmem:[#allocation4 + $0xe0] sm:$0xff]  ;;  %v7653_v34 = vld [vmem:[#allocation4 + $0xf0] sm:$0xff] }
 0x379   :  { %5370 = vmatpush3.msra.mxu1 %v4116_v36  ;;  %5315 = vmatprep.subr.mxu0 %v4099_v57  ;;  %7830 = vst [vmem:[#allocation12_spill] sm:$0xff] %v7645_v11  ;;  %7831 = vst [vmem:[#allocation13_spill] sm:$0xff] %v7653_v34  ;;  %v7660_v14 = vld [vmem:[%s7803_s10] ss:$0 sm:$0xff] }
 0x37a   :  { %5371 = vmatprep.subr.mxu1 %v4131_v6  ;;  %5316 = vmatpush3.msra.mxu0 %v4083_v50  ;;  %v7836_v44 = vld [vmem:[#allocation7_spill] sm:$0xff] }
 0x37b   :  { %4218 = vmatprep.mubr.f32.mxu0 %v7558_v19  ;;  %5372 = vmatpush3.msra.mxu1 %v4115_v58 }
 0x37c   :  { %4323 = vmatprep.mubr.f32.mxu1 %v7563_v42  ;;  %4219 = vmatmul.mubr.f32.vlgmr.msra.gmra.mxu0 %v7565_v51 }
 0x37d   :  { %4324 = vmatmul.mubr.f32.vlgmr.msra.gmra.mxu1 %v7567_v30  ;;  %4223 = vmatprep.mubr.f32.mxu0 %v7570_v59 }
 0x37e   :  { %4328 = vmatprep.mubr.f32.mxu1 %v7572_v32 }
 0x380   :  { %4224 = vmatmul.mubr.f32.gmra.mxu0 %v7579_v37 }
 0x381   :  { %4329 = vmatmul.mubr.f32.gmra.mxu1 %v7581_v38  ;;  %4228 = vmatprep.mubr.f32.mxu0 %v7583_v40 }
 0x382   :  { %4333 = vmatprep.mubr.f32.mxu1 %v7585_v41 }
 0x384   :  { %4229 = vmatmul.mubr.f32.gmra.mxu0 %v7591_v39 }
 0x385   :  { %4334 = vmatmul.mubr.f32.gmra.mxu1 %v7593_v45  ;;  %4233 = vmatprep.mubr.f32.mxu0 %v7595_v46 }
 0x386   :  { %4338 = vmatprep.mubr.f32.mxu1 %v7597_v47 }
 0x388   :  { %4234 = vmatmul.mubr.f32.gmra.mxu0 %v7603_v48 }
 0x389   :  { %4339 = vmatmul.mubr.f32.gmra.mxu1 %v7605_v49  ;;  %4238 = vmatprep.mubr.f32.mxu0 %v7607_v53 }
 0x38a   :  { %4343 = vmatprep.mubr.f32.mxu1 %v7609_v55 }
 0x38c   :  { %4239 = vmatmul.mubr.f32.gmra.mxu0 %v7615_v60 }
 0x38d   :  { %4344 = vmatmul.mubr.f32.gmra.mxu1 %v7617_v61  ;;  %4243 = vmatprep.mubr.f32.mxu0 %v7619_v8 }
 0x38e   :  { %4348 = vmatprep.mubr.f32.mxu1 %v7621_v62 }
 0x390   :  { %4244 = vmatmul.mubr.f32.gmra.mxu0 %v7627_v63 }
 0x391   :  { %4349 = vmatmul.mubr.f32.gmra.mxu1 %v7629_v0  ;;  %4248 = vmatprep.mubr.f32.mxu0 %v7631_v4 }
 0x392   :  { %4353 = vmatprep.mubr.f32.mxu1 %v7633_v5 }
 0x394   :  { %4249 = vmatmul.mubr.f32.gmra.mxu0 %v7639_v7 }
 0x395   :  { %4354 = vmatmul.mubr.f32.gmra.mxu1 %v7641_v9  ;;  %4253 = vmatprep.mubr.f32.mxu0 %v7643_v10 }
 0x396   :  { %4358 = vmatprep.mubr.f32.mxu1 %v7645_v11 }
 0x398   :  { %4254 = vmatmul.mubr.f32.gmra.mxu0 %v7651_v33 }
 0x399   :  { %4359 = vmatmul.mubr.f32.gmra.mxu1 %v7653_v34 }
 0x43c   :  { %v5317_v17 = vpop.f32.mrf.mxu0 }
 0x43d   :  { %v5373_v13 = vpop.f32.mrf.mxu1 }
 0x43e   :  { %v5318_v15 = vpop.f32.mrf.mxu0 }
 0x43f   :  { %v5374_v16 = vpop.f32.mrf.mxu1  ;;  %v5319_v18 = vadd.f32 %v5318_v15, %v5317_v17 }
 0x440   :  { %v5320_v20 = vpop.f32.mrf.mxu0  ;;  %v5375_v43 = vadd.f32 %v5374_v16, %v5373_v13 }
 0x441   :  { %v5376_v21 = vpop.f32.mrf.mxu1  ;;  %v4221_v22 = vadd.f32 %v5319_v18, %v7660_v14 }
 0x442   :  { %v5321_v23 = vpop.f32.mrf.mxu0 }
 0x443   :  { %v5377_v52 = vpop.f32.mrf.mxu1  ;;  %v4326_v24 = vadd.f32 %v5375_v43, %v4221_v22  ;;  %v5322_v54 = vadd.f32 %v5321_v23, %v5320_v20 }
 0x444   :  { %v5323_v1 = vpop.f32.mrf.mxu0  ;;  %v5378_v12 = vadd.f32 %v5377_v52, %v5376_v21 }
 0x445   :  { %v5379_v2 = vpop.f32.mrf.mxu1  ;;  %5539 = vtanh.f32 %v4326_v24  ;;  %v4226_v25 = vadd.f32 %v5322_v54, %v7660_v14 }
 0x446   :  { %v5324_v56 = vpop.f32.mrf.mxu0 }
 0x447   :  { %v5380_v26 = vpop.f32.mrf.mxu1  ;;  %v4331_v35 = vadd.f32 %v5378_v12, %v4226_v25  ;;  %v5325_v36 = vadd.f32 %v5324_v56, %v5323_v1 }
 0x448   :  { %v5326_v57 = vpop.f32.mrf.mxu0  ;;  %v5381_v58 = vadd.f32 %v5380_v26, %v5379_v2  ;;  %v5212_v2 = vld [vmem:[%s7804_s11] ss:$0 sm:$0xff] }
 0x449   :  { %v5382_v6 = vpop.f32.mrf.mxu1  ;;  %5541 = vtanh.f32 %v4331_v35  ;;  %v4231_v50 = vadd.f32 %v5325_v36, %v7660_v14 }
 0x44a   :  { %v5327_v17 = vpop.f32.mrf.mxu0 }
 0x44b   :  { %v5383_v13 = vpop.f32.mrf.mxu1  ;;  %v4336_v15 = vadd.f32 %v5381_v58, %v4231_v50  ;;  %v5328_v16 = vadd.f32 %v5327_v17, %v5326_v57 }
 0x44c   :  { %v5329_v18 = vpop.f32.mrf.mxu0  ;;  %v5384_v21 = vadd.f32 %v5383_v13, %v5382_v6 }
 0x44d   :  { %v5385_v20 = vpop.f32.mrf.mxu1  ;;  %5543 = vtanh.f32 %v4336_v15  ;;  %v4236_v22 = vadd.f32 %v5328_v16, %v7660_v14 }
 0x44e   :  { %v5330_v43 = vpop.f32.mrf.mxu0 }
 0x44f   :  { %v5386_v23 = vpop.f32.mrf.mxu1  ;;  %v4341_v52 = vadd.f32 %v5384_v21, %v4236_v22  ;;  %v5331_v24 = vadd.f32 %v5330_v43, %v5329_v18 }
 0x450   :  { %v5332_v54 = vpop.f32.mrf.mxu0  ;;  %v5387_v12 = vadd.f32 %v5386_v23, %v5385_v20 }
 0x451   :  { %v5388_v1 = vpop.f32.mrf.mxu1  ;;  %5545 = vtanh.f32 %v4341_v52  ;;  %v4241_v25 = vadd.f32 %v5331_v24, %v7660_v14 }
 0x452   :  { %v5540_v56 = vpop.eup %5539  ;;  %v5333_v26 = vpop.f32.mrf.mxu0 }
 0x453   :  { %v5389_v35 = vpop.f32.mrf.mxu1  ;;  %v4346_v36 = vadd.f32 %v5387_v12, %v4241_v25  ;;  %v5334_v57 = vadd.f32 %v5333_v26, %v5332_v54  ;;  %v4379_v6 = vmul.f32 %v5540_v56, %v5212_v2 }
 0x454   :  { %v5335_v50 = vpop.f32.mrf.mxu0  ;;  %v5390_v13 = vadd.f32 %v5389_v35, %v5388_v1 }
 0x455   :  { %v5391_v58 = vpop.f32.mrf.mxu1  ;;  %5547 = vtanh.f32 %v4346_v36  ;;  %v4246_v17 = vadd.f32 %v5334_v57, %v7660_v14  ;;  %v4388_v15 = vsel %vm4387_vm4, %v4379_v6, 0.0 }
 0x456   :  { %v5542_v16 = vpop.eup %5541  ;;  %v5336_v18 = vpop.f32.mrf.mxu0  ;;  %4389 = vadd.xlane.f32.xlu0 %v4388_v15 }
 0x457   :  { %v5392_v22 = vpop.f32.mrf.mxu1  ;;  %v4351_v20 = vadd.f32 %v5390_v13, %v4246_v17  ;;  %v5337_v21 = vadd.f32 %v5336_v18, %v5335_v50  ;;  %v4380_v43 = vmul.f32 %v5542_v16, %v5212_v2 }
 0x458   :  { %v5338_v23 = vpop.f32.mrf.mxu0  ;;  %v5393_v54 = vadd.f32 %v5392_v22, %v5391_v58 }
 0x459   :  { %v5394_v52 = vpop.f32.mrf.mxu1  ;;  %5549 = vtanh.f32 %v4351_v20  ;;  %v4251_v24 = vadd.f32 %v5337_v21, %v7660_v14  ;;  %v4391_v25 = vsel %vm4387_vm4, %v4380_v43, 0.0 }
 0x45a   :  { %v5544_v12 = vpop.eup %5543  ;;  %v5339_v56 = vpop.f32.mrf.mxu0  ;;  %4392 = vadd.xlane.f32.xlu0 %v4391_v25 }
 0x45b   :  { %v5395_v1 = vpop.f32.mrf.mxu1  ;;  %v4356_v26 = vadd.f32 %v5393_v54, %v4251_v24  ;;  %v5340_v35 = vadd.f32 %v5339_v56, %v5338_v23  ;;  %v4381_v36 = vmul.f32 %v5544_v12, %v5212_v2 }
 0x45c   :  { %v5396_v6 = vadd.f32 %v5395_v1, %v5394_v52 }
 0x45d   :  { %5551 = vtanh.f32 %v4356_v26  ;;  %v4256_v57 = vadd.f32 %v5340_v35, %v7660_v14  ;;  %v4394_v50 = vsel %vm4387_vm4, %v4381_v36, 0.0 }
 0x45e   :  { %v5546_v17 = vpop.eup %5545  ;;  %4395 = vadd.xlane.f32.xlu1 %v4394_v50 }
 0x45f   :  { %v4361_v13 = vadd.f32 %v5396_v6, %v4256_v57  ;;  %v4382_v15 = vmul.f32 %v5546_v17, %v5212_v2 }
 0x461   :  { %5553 = vtanh.f32 %v4361_v13  ;;  %v4397_v58 = vsel %vm4387_vm4, %v4382_v15, 0.0 }
 0x462   :  { %v5548_v16 = vpop.eup %5547  ;;  %4398 = vadd.xlane.f32.xlu1 %v4397_v58 }
 0x463   :  { %v4383_v18 = vmul.f32 %v5548_v16, %v5212_v2 }
 0x465   :  { %v4400_v22 = vsel %vm4387_vm4, %v4383_v18, 0.0 }
 0x466   :  { %v5550_v20 = vpop.eup %5549  ;;  %4401 = vadd.xlane.f32.xlu0 %v4400_v22 }
 0x467   :  { %v4384_v21 = vmul.f32 %v5550_v20, %v5212_v2 }
 0x469   :  { %v4403_v14 = vsel %vm4387_vm4, %v4384_v21, 0.0 }
 0x46a   :  { %v5552_v43 = vpop.eup %5551  ;;  %4404 = vadd.xlane.f32.xlu1 %v4403_v14 }
 0x46b   :  { %v4385_v23 = vmul.f32 %v5552_v43, %v5212_v2 }
 0x46d   :  { %v4406_v52 = vsel %vm4387_vm4, %v4385_v23, 0.0 }
 0x46e   :  { %v5554_v24 = vpop.eup %5553  ;;  %4407 = vadd.xlane.f32.xlu0 %v4406_v52 }
 0x46f   :  { %v4386_v54 = vmul.f32 %v5554_v24, %v5212_v2 }
 0x471   :  { %v4409_v25 = vsel %vm4387_vm4, %v4386_v54, 0.0 }
 0x472   :  { %4410 = vadd.xlane.f32.xlu1 %v4409_v25 }
 0x4df   :  { %v4390_v12 = vpop.xlane.xlu0 %4389 }
 0x4e0   :  { %v4420_v15 = vsel %vm4412_vm9, %v4390_v12, -1e+30 }
 0x4e1   :  { %v4429_v23 = vsel %vm4428_vm10, %v4420_v15, -inf }
 0x4e3   :  { %v4393_v1 = vpop.xlane.xlu0 %4392 }
 0x4e4   :  { %v4421_v6 = vsel %vm4413_vm6, %v4393_v1, -1e+30 }
 0x4e5   :  { %v4430_v18 = vsel %vm4428_vm10, %v4421_v6, -inf }
 0x4e7   :  { %v4396_v56 = vpop.xlane.xlu1 %4395 }
 0x4e8   :  { %v4422_v58 = vsel %vm4414_vm11, %v4396_v56, -1e+30 }
 0x4e9   :  { %v4431_v52 = vsel %vm4428_vm10, %v4422_v58, -inf }
 0x4eb   :  { %v4399_v26 = vpop.xlane.xlu1 %4398 }
 0x4ec   :  { %v4423_v16 = vsel %vm4415_vm12, %v4399_v26, -1e+30 }
 0x4ed   :  { %v4432_v24 = vsel %vm4428_vm10, %v4423_v16, -inf }
 0x4ef   :  { %v4402_v35 = vpop.xlane.xlu0 %4401 }
 0x4f0   :  { %v4424_v50 = vsel %vm4416_vm7, %v4402_v35, -1e+30 }
 0x4f1   :  { %v4433_v22 = vsel %vm4428_vm10, %v4424_v50, -inf }
 0x4f2   :  { %v4434_v25 = vmax.f32 %v4429_v23, %v4433_v22 }
 0x4f3   :  { %v4405_v36 = vpop.xlane.xlu1 %4404 }
 0x4f4   :  { %v4425_v2 = vsel %vm4417_vm5, %v4405_v36, -1e+30 }
 0x4f5   :  { %v4435_v13 = vsel %vm4428_vm10, %v4425_v2, -inf }
 0x4f6   :  { %v4436_v14 = vmax.f32 %v4430_v18, %v4435_v13 }
 0x4f7   :  { %v4408_v57 = vpop.xlane.xlu0 %4407 }
 0x4f8   :  { %v4426_v17 = vsel %vm4418_vm8, %v4408_v57, -1e+30  ;;  %v4441_v1 = vmax.f32 %v4434_v25, %v4436_v14 }
 0x4f9   :  { %v4437_v20 = vsel %vm4428_vm10, %v4426_v17, -inf }
 0x4fa   :  { %v4438_v12 = vmax.f32 %v4431_v52, %v4437_v20 }
 0x4fb   :  { %v4411_v21 = vpop.xlane.xlu1 %4410 }
 0x4fc   :  { %v4427_v43 = vsel %vm4419_vm13, %v4411_v21, -1e+30 }
 0x4fd   :  { %v4439_v54 = vsel %vm4428_vm10, %v4427_v43, -inf }
 0x4fe   :  { %v4440_v56 = vmax.f32 %v4432_v24, %v4439_v54 }
 0x500   :  { %v4442_v26 = vmax.f32 %v4438_v12, %v4440_v56 }
 0x502   :  { %v4443_v35 = vmax.f32 %v4441_v1, %v4442_v26 }
 0x504   :  { %v4444_v36 = vsub.f32 %v4420_v15, %v4443_v35  ;;  %v4445_v57 = vsub.f32 %v4421_v6, %v4443_v35  ;;  %v4446_v13 = vsub.f32 %v4422_v58, %v4443_v35  ;;  %v4447_v18 = vsub.f32 %v4423_v16, %v4443_v35 }
 0x505   :  { %v4448_v3 = vsub.f32 %v4424_v50, %v4443_v35  ;;  %v4449_v21 = vsub.f32 %v4425_v2, %v4443_v35  ;;  %v4450_v31 = vsub.f32 %v4426_v17, %v4443_v35  ;;  %v4451_v10 = vsub.f32 %v4427_v43, %v4443_v35 }
 0x506   :  { %v4452_v29 = vmul.f32 1.442695, %v4444_v36  ;;  %v4454_v28 = vmul.f32 1.442695, %v4445_v57  ;;  %v4456_v27 = vmul.f32 1.442695, %v4446_v13 }
 0x507   :  { %v4458_v11 = vmul.f32 1.442695, %v4447_v18  ;;  %v4460_v34 = vmul.f32 1.442695, %v4448_v3  ;;  %v4462_v22 = vmul.f32 1.442695, %v4449_v21 }
 0x508   :  { %5555 = vpow2.f32 %v4452_v29  ;;  %v4464_v20 = vmul.f32 1.442695, %v4450_v31  ;;  %v4466_v6 = vmul.f32 1.442695, %v4451_v10 }
 0x509   :  { %5557 = vpow2.f32 %v4454_v28 }
 0x50a   :  { %5559 = vpow2.f32 %v4456_v27 }
 0x50b   :  { %5561 = vpow2.f32 %v4458_v11 }
 0x50c   :  { %5563 = vpow2.f32 %v4460_v34 }
 0x50d   :  { %5565 = vpow2.f32 %v4462_v22 }
 0x50e   :  { %5567 = vpow2.f32 %v4464_v20 }
 0x50f   :  { %5569 = vpow2.f32 %v4466_v6 }
 0x515   :  { %v5556_v50 = vpop.eup %5555 }
 0x516   :  { %v5558_v2 = vpop.eup %5557  ;;  %v4468_v15 = vsel %vm4412_vm9, %v5556_v50, 0.0 }
 0x517   :  { %v5560_v17 = vpop.eup %5559  ;;  %v4469_v3 = vsel %vm4413_vm6, %v5558_v2, 0.0  ;;  %v4476_v28 = vsel %vm4428_vm10, %v4468_v15, 0.0 }
 0x518   :  { %v5562_v29 = vpop.eup %5561  ;;  %v4470_v31 = vsel %vm4414_vm11, %v5560_v17, 0.0  ;;  %v4477_v27 = vsel %vm4428_vm10, %v4469_v3, 0.0 }
 0x519   :  { %v5564_v10 = vpop.eup %5563  ;;  %v4471_v11 = vsel %vm4415_vm12, %v5562_v29, 0.0  ;;  %v4478_v34 = vadd.f32 %v4477_v27, %v4476_v28  ;;  %v4479_v16 = vsel %vm4428_vm10, %v4470_v31, 0.0 }
 0x51a   :  { %v5566_v58 = vpop.eup %5565  ;;  %v4472_v14 = vsel %vm4416_vm7, %v5564_v10, 0.0  ;;  %v4481_v52 = vsel %vm4428_vm10, %v4471_v11, 0.0 }
 0x51b   :  { %v4480_v43 = vadd.f32 %v4479_v16, %v4478_v34  ;;  %v5568_v23 = vpop.eup %5567  ;;  %v4473_v24 = vsel %vm4417_vm5, %v5566_v58, 0.0  ;;  %v4483_v12 = vsel %vm4428_vm10, %v4472_v14, 0.0 }
 0x51c   :  { %v5570_v25 = vpop.eup %5569  ;;  %v4474_v56 = vsel %vm4418_vm8, %v5568_v23, 0.0  ;;  %v4485_v26 = vsel %vm4428_vm10, %v4473_v24, 0.0 }
 0x51d   :  { %v4482_v54 = vadd.f32 %v4481_v52, %v4480_v43  ;;  %v4475_v35 = vsel %vm4419_vm13, %v5570_v25, 0.0  ;;  %v4487_v57 = vsel %vm4428_vm10, %v4474_v56, 0.0 }
 0x51e   :  { %v4489_v18 = vsel %vm4428_vm10, %v4475_v35, 0.0 }
 0x51f   :  { %v4484_v1 = vadd.f32 %v4483_v12, %v4482_v54 }
 0x521   :  { %v4486_v36 = vadd.f32 %v4485_v26, %v4484_v1 }
 0x523   :  { %v4488_v13 = vadd.f32 %v4487_v57, %v4486_v36 }
 0x525   :  { %v4490_v21 = vadd.f32 %v4489_v18, %v4488_v13 }
 0x527   :  { %v4491_v22 = vmax.f32 %v4490_v21, 1e-30 }
 0x529   :  { %5571 = vrcp.f32 %v4491_v22 }
 0x536   :  { %v5572_v20 = vpop.eup %5571 }
 0x537   :  { %v4494_v6 = vmul.f32 %v5572_v20, %v4469_v3  ;;  %v4493_v50 = vmul.f32 %v5572_v20, %v4468_v15  ;;  %v4495_v2 = vmul.f32 %v5572_v20, %v4470_v31  ;;  %v4496_v17 = vmul.f32 %v5572_v20, %v4471_v11 }
 0x538   :  { %v4497_v28 = vmul.f32 %v5572_v20, %v4472_v14  ;;  %v4498_v29 = vmul.f32 %v5572_v20, %v4473_v24  ;;  %v4499_v27 = vmul.f32 %v5572_v20, %v4474_v56  ;;  %v4500_v10 = vmul.f32 %v5572_v20, %v4475_v35 }
 0x539   :  { %4508 = vperm.xlu1 %5538, %v4494_v6   ;;  %4503 = vperm.xlu0 %5537, %v4493_v50  }
 0x53d   :  { %4513 = vperm.xlu1 %5538, %v4495_v2  }
 0x541   :  { %4518 = vperm.xlu1 %5538, %v4496_v17  }
 0x545   :  { %4523 = vperm.xlu1 %5538, %v4497_v28  }
 0x549   :  { %4528 = vperm.xlu1 %5538, %v4498_v29  }
 0x54d   :  { %4533 = vperm.xlu1 %5538, %v4499_v27  }
 0x551   :  { %4538 = vperm.xlu1 %5538, %v4500_v10  }
 0x5b4   :  { %v4509_v34 = vpop.permute.xlu1 %4508  ;;  %v4504_v16 = vpop.permute.xlu0 %4503 }
 0x5b5   :  { %v4545_v3 = vmul.f32 %v4509_v34, %v7579_v37  ;;  %v4546_v15 = vmul.f32 %v4509_v34, %v7570_v59  ;;  %v4547_v31 = vmul.f32 %v4509_v34, %v7581_v38  ;;  %v4541_v11 = vmul.f32 %v4504_v16, %v7565_v51 }
 0x5b6   :  { %v4542_v14 = vmul.f32 %v4504_v16, %v7558_v19  ;;  %v4543_v43 = vmul.f32 %v4504_v16, %v7567_v30  ;;  %v4548_v52 = vmul.f32 %v4509_v34, %v7572_v32  ;;  %v4544_v24 = vmul.f32 %v4504_v16, %v7563_v42  ;;  %v7832_v16 = vld [vmem:[#allocation11_spill] sm:$0xff] }
 0x5b7   :  { %v4573_v59 = vadd.f32 %v4545_v3, %v4541_v11 }
 0x5b8   :  { %v4514_v58 = vpop.permute.xlu1 %4513  ;;  %v4580_v12 = vadd.f32 %v4546_v15, %v4542_v14  ;;  %v4587_v38 = vadd.f32 %v4547_v31, %v4543_v43  ;;  %v4594_v1 = vadd.f32 %v4548_v52, %v4544_v24 }
 0x5b9   :  { %v4549_v54 = vmul.f32 %v4514_v58, %v7591_v39  ;;  %v4550_v25 = vmul.f32 %v4514_v58, %v7583_v40  ;;  %v4551_v37 = vmul.f32 %v4514_v58, %v7593_v45  ;;  %v4552_v51 = vmul.f32 %v4514_v58, %v7585_v41 }
 0x5bb   :  { %v4574_v42 = vadd.f32 %v4573_v59, %v4549_v54  ;;  %v4581_v26 = vadd.f32 %v4580_v12, %v4550_v25  ;;  %v4588_v39 = vadd.f32 %v4587_v38, %v4551_v37  ;;  %v4595_v41 = vadd.f32 %v4594_v1, %v4552_v51 }
 0x5bc   :  { %v4519_v23 = vpop.permute.xlu1 %4518 }
 0x5bd   :  { %v4553_v19 = vmul.f32 %v4519_v23, %v7603_v48  ;;  %v4554_v30 = vmul.f32 %v4519_v23, %v7595_v46  ;;  %v4555_v32 = vmul.f32 %v4519_v23, %v7605_v49  ;;  %v4556_v40 = vmul.f32 %v4519_v23, %v7597_v47 }
 0x5bf   :  { %v4575_v13 = vadd.f32 %v4574_v42, %v4553_v19  ;;  %v4582_v48 = vadd.f32 %v4581_v26, %v4554_v30  ;;  %v4589_v18 = vadd.f32 %v4588_v39, %v4555_v32  ;;  %v4596_v47 = vadd.f32 %v4595_v41, %v4556_v40 }
 0x5c0   :  { %v4524_v56 = vpop.permute.xlu1 %4523 }
 0x5c1   :  { %v4557_v45 = vmul.f32 %v4524_v56, %v7615_v60  ;;  %v4558_v35 = vmul.f32 %v4524_v56, %v7607_v53  ;;  %v4559_v36 = vmul.f32 %v4524_v56, %v7617_v61  ;;  %v4560_v46 = vmul.f32 %v4524_v56, %v7609_v55 }
 0x5c2   :  { %v7835_v56 = vmov 0  }
 0x5c3   :  { %v4576_v20 = vadd.f32 %v4575_v13, %v4557_v45  ;;  %v4583_v60 = vadd.f32 %v4582_v48, %v4558_v35  ;;  %v4590_v6 = vadd.f32 %v4589_v18, %v4559_v36  ;;  %v4597_v55 = vadd.f32 %v4596_v47, %v4560_v46  ;;  %v4631_v45 = vld [vmem:[%s7805_s12] sm:$0xf]  ;;  %v7838_v13 = vld [vmem:[#allocation9_spill] sm:$0xff]  ;;  %v7839_v18 = vld [vmem:[#allocation10_spill] sm:$0xff] }
 0x5c4   :  { %v4529_v57 = vpop.permute.xlu1 %4528  ;;  %v4683_v51 = vsel %vm4412_vm9, 1, %v7835_v56  ;;  %v4657_v35 = vld [vmem:[%s7806_s13] sm:$0xf]  ;;  %v4636_v36 = vrot.slane %v4631_v45, %v7836_v44  ;;  %v4644_v48 = vrot.slane %v4631_v45, %v7838_v13  ;;  %v4648_v46 = vrot.slane %v4631_v45, %v7839_v18 }
 0x5c5   :  { %v4561_v49 = vmul.f32 %v4529_v57, %v7627_v63  ;;  %v4562_v21 = vmul.f32 %v4529_v57, %v7619_v8  ;;  %v4563_v22 = vmul.f32 %v4529_v57, %v7629_v0  ;;  %v4564_v53 = vmul.f32 %v4529_v57, %v7621_v62  ;;  %v7837_v57 = vld [vmem:[#allocation8_spill] sm:$0xff] }
 0x5c6   :  { %v4640_v41 = vrot.slane %v4631_v45, %v7837_v57 }
 0x5c7   :  { %v4577_v28 = vadd.f32 %v4576_v20, %v4561_v49  ;;  %v4584_v63 = vadd.f32 %v4583_v60, %v4562_v21  ;;  %v4591_v29 = vadd.f32 %v4590_v6, %v4563_v22  ;;  %v4598_v0 = vadd.f32 %v4597_v55, %v4564_v53 }
 0x5c8   :  { %v4534_v61 = vpop.permute.xlu1 %4533  ;;  %v4662_v60 = vrot.slane %v4657_v35, %v7836_v44  ;;  %v4666_v6 = vrot.slane %v4657_v35, %v7837_v57  ;;  %v4670_v53 = vrot.slane %v4657_v35, %v7838_v13 }
 0x5c9   :  { %v4565_v50 = vmul.f32 %v4534_v61, %v7639_v7  ;;  %v4566_v2 = vmul.f32 %v4534_v61, %v7631_v4  ;;  %v4567_v17 = vmul.f32 %v4534_v61, %v7641_v9  ;;  %v4568_v8 = vmul.f32 %v4534_v61, %v7633_v5  ;;  %v7833_v7 = vld [vmem:[#allocation13_spill] sm:$0xff]  ;;  %v7834_v4 = vld [vmem:[#allocation12_spill] sm:$0xff] }
 0x5ca   :  { %v4674_v61 = vrot.slane %v4657_v35, %v7839_v18 }
 0x5cb   :  { %v4578_v27 = vadd.f32 %v4577_v28, %v4565_v50  ;;  %v4585_v10 = vadd.f32 %v4584_v63, %v4566_v2  ;;  %v4592_v34 = vadd.f32 %v4591_v29, %v4567_v17  ;;  %v4599_v9 = vadd.f32 %v4598_v0, %v4568_v8 }
 0x5cc   :  { %v4539_v58 = vpop.permute.xlu1 %4538 }
 0x5cd   :  { %v4569_v62 = vmul.f32 %v4539_v58, %v7651_v33  ;;  %v4570_v3 = vmul.f32 %v4539_v58, %v7832_v16  ;;  %v4571_v15 = vmul.f32 %v4539_v58, %v7833_v7  ;;  %v4572_v31 = vmul.f32 %v4539_v58, %v7834_v4 }
 0x5cf   :  { %v4579_v11 = vadd.f32 %v4578_v27, %v4569_v62  ;;  %v4586_v14 = vadd.f32 %v4585_v10, %v4570_v3  ;;  %v4593_v43 = vadd.f32 %v4592_v34, %v4571_v15  ;;  %v4600_v23 = vadd.f32 %v4599_v9, %v4572_v31 }
 0x5d1   :  { %v4601_v52 = vadd.f32 %v4586_v14, %v4579_v11  ;;  %v4606_v5 = vmul.f32 %v4579_v11, %v4579_v11  ;;  %v4607_v24 = vmul.f32 %v4586_v14, %v4586_v14  ;;  %v4608_v25 = vmul.f32 %v4593_v43, %v4593_v43 }
 0x5d2   :  { %v4609_v12 = vmul.f32 %v4600_v23, %v4600_v23 }
 0x5d3   :  { %v4602_v54 = vadd.f32 %v4601_v52, %v4593_v43  ;;  %v4610_v37 = vadd.f32 %v4607_v24, %v4606_v5 }
 0x5d5   :  { %v4603_v59 = vadd.f32 %v4602_v54, %v4600_v23  ;;  %v4611_v33 = vadd.f32 %v4610_v37, %v4608_v25 }
 0x5d7   :  { %4604 = vadd.xlane.f32.xlu1 %v4603_v59  ;;  %v4612_v38 = vadd.f32 %v4611_v33, %v4609_v12 }
 0x5d9   :  { %4613 = vadd.xlane.f32.xlu0 %v4612_v38 }
 0x5ef   :  { %4685 = vperm.xlu0 %5537, %v4683_v51  }
 0x660   :  { %v4605_v19 = vpop.xlane.xlu1 %4604 }
 0x661   :  { %v4616_v30 = vmul.f32 0.0033333334, %v4605_v19 }
 0x662   :  { %v4614_v32 = vpop.xlane.xlu0 %4613 }
 0x663   :  { %v4617_v1 = vmul.f32 0.0033333334, %v4614_v32  ;;  %v4618_v42 = vmul.f32 %v4616_v30, %v4616_v30  ;;  %v4623_v49 = vsub.f32 %v4579_v11, %v4616_v30  ;;  %v4624_v21 = vsub.f32 %v4586_v14, %v4616_v30 }
 0x664   :  { %v4625_v22 = vsub.f32 %v4593_v43, %v4616_v30  ;;  %v4626_v47 = vsub.f32 %v4600_v23, %v4616_v30 }
 0x665   :  { %v4619_v26 = vsub.f32 %v4617_v1, %v4618_v42 }
 0x667   :  { %v4620_v39 = vmax.f32 %v4619_v26, 0.0 }
 0x669   :  { %v4621_v40 = vadd.f32 1e-05, %v4620_v39 }
 0x66a   :  { %v4686_v28 = vpop.permute.xlu0 %4685 }
 0x66b   :  { %5573 = vrsqrt.f32 %v4621_v40  ;;  %vm4687_vm14 = vcmp.eq.s32.totalorder %v4686_v28, 1 }
 0x678   :  { %v5574_v20 = vpop.eup %5573 }
 0x679   :  { %v4627_v50 = vmul.f32 %v5574_v20, %v4623_v49  ;;  %v4628_v2 = vmul.f32 %v5574_v20, %v4624_v21  ;;  %v4629_v17 = vmul.f32 %v5574_v20, %v4625_v22  ;;  %v4630_v55 = vmul.f32 %v5574_v20, %v4626_v47 }
 0x67b   :  { %v4653_v63 = vmul.f32 %v4636_v36, %v4627_v50  ;;  %v4654_v29 = vmul.f32 %v4640_v41, %v4628_v2  ;;  %v4655_v8 = vmul.f32 %v4644_v48, %v4629_v17  ;;  %v4656_v0 = vmul.f32 %v4648_v46, %v4630_v55 }
 0x67d   :  { %v4679_v27 = vadd.f32 %v4662_v60, %v4653_v63  ;;  %v4680_v10 = vadd.f32 %v4666_v6, %v4654_v29  ;;  %v4681_v34 = vadd.f32 %v4670_v53, %v4655_v8  ;;  %v4682_v58 = vadd.f32 %v4674_v61, %v4656_v0 }
 0x67f   :  { %v4688_v62 = vsel %vm4687_vm14, %v4679_v27, 0.0  ;;  %v4689_v16 = vsel %vm4687_vm14, %v4680_v10, 0.0  ;;  %v4690_v3 = vsel %vm4687_vm14, %v4681_v34, 0.0  ;;  %v4691_v7 = vsel %vm4687_vm14, %v4682_v58, 0.0 }
 0x680   :  { %4692 = vst [vmem:[%s7807_s14] sm:$0xff] %v4688_v62  ;;  %4693 = vst [vmem:[%s7807_s14 + $0x8] sm:$0xff] %v4689_v16 }
 0x681   :  { %4694 = vst [vmem:[%s7807_s14 + $0x10] sm:$0xff] %v4690_v3  ;;  %4695 = vst [vmem:[%s7807_s14 + $0x18] sm:$0xff] %v4691_v7 }

// kernel: document_model_forward.3
= control target key start
LH: loop header
LB: loop body
LE: loop exit
PB: predicated region body
PF: predicated region fallthrough
CT: control target
= control target key end

     0   :  { %v6832_v3 = vmov 0   ;;  %vm1053_vm0 = vcmask 1045504   ;;  %vm1046_vm1 = vcmask 359424   ;;  %s9515_s0 = inlined_call_operand.<no memory space> [shape: s32[1], index: 0, kind: input, shape index: {}]   ;;  %s9516_s3 = inlined_call_operand.vmem [shape: bf16[300,1024], index: 3, kind: input, shape index: {}]   ;;  %s9517_s7 = inlined_call_operand.vmem [shape: bf16[256,1024], index: 7, kind: input, shape index: {}]   ;;  %s9518_s8 = inlined_call_operand.vmem [shape: bf16[256,1024], index: 8, kind: input, shape index: {}]   ;;  %s9519_s9 = inlined_call_operand.vmem [shape: f32[512,32], index: 9, kind: input, shape index: {}]   ;;  %s9520_s10 = inlined_call_operand.vmem [shape: f32[1,32], index: 10, kind: input, shape index: {}]   ;;  %s9521_s11 = inlined_call_operand.vmem [shape: f32[1,32], index: 11, kind: input, shape index: {}]   ;;  %s9522_s12 = inlined_call_operand.vmem [shape: f32[1,512], index: 12, kind: input, shape index: {}]   ;;  %s9523_s13 = inlined_call_operand.vmem [shape: f32[1,512], index: 13, kind: input, shape index: {}]   ;;  %s9524_s14 = inlined_call_operand.vmem [shape: f32[512,128], index: 14, kind: input, shape index: {}]   ;;  %s9525_s15 = inlined_call_operand.vmem [shape: f32[1,128], index: 15, kind: input, shape index: {}]   ;;  %s9526_s16 = inlined_call_operand.vmem [shape: f32[8,128], index: 16, kind: output, shape index: {}]   ;;  %s9527_s1 = inlined_call_operand.vmem [shape: f32[3,8,300], index: 1, kind: input, shape index: {}]   ;;  %s9528_s4 = inlined_call_operand.vmem [shape: bf16[300,1024], index: 4, kind: input, shape index: {}]   ;;  %s9529_s5 = inlined_call_operand.vmem [shape: f32[1,1024], index: 5, kind: input, shape index: {}]   ;;  %s9530_s2 = inlined_call_operand.vmem [shape: s32[8,1], index: 2, kind: input, shape index: {}]   ;;  %s9531_s6 = inlined_call_operand.vmem [shape: f32[1,1024], index: 6, kind: input, shape index: {}]  }
   0x1   :  { %9533 = sst [smem:[#allocation7_spill]] %s9515_s0  ;;  %v146_v0 = vld [vmem:[%s9516_s3 + $0x1c0] sm:$0xff]  ;;  %1161 = vmatprep.mubr.bf16.mxu1 %v6832_v3  ;;  %v147_v26 = vld [vmem:[%s9516_s3 + $0x1c8] sm:$0xff]  ;;  %v56_v31 = vld [vmem:[%s9527_s1 + $0x10] sm:$0xff] }
   0x2   :  { %v150_v1 = vld [vmem:[%s9516_s3 + $0x1e0] sm:$0xff]  ;;  %v151_v27 = vld [vmem:[%s9516_s3 + $0x1e8] sm:$0xff] }
   0x3   :  { %v234_v2 = vld [vmem:[%s9516_s3 + $0x480] sm:$0xff]  ;;  %v5840_v4 = vcombine.high %v146_v0, %v150_v1  ;;  %v5839_v6 = vcombine.low %v146_v0, %v150_v1  ;;  %v59_v32 = vld [vmem:[%s9527_s1 + $0x28] sm:$0xff]  ;;  %v5842_v33 = vcombine.high %v147_v26, %v151_v27  ;;  %v5841_v40 = vcombine.low %v147_v26, %v151_v27 }
   0x4   :  { %v238_v5 = vld [vmem:[%s9516_s3 + $0x4a0] sm:$0x33]  ;;  %v139_v36 = vld [vmem:[%s9516_s3 + $0x188] sm:$0xff]  ;;  %v6989_v38 = vpack.c.bf16 %v59_v32, %v56_v31 }
   0x5   :  { %v138_v7 = vld [vmem:[%s9516_s3 + $0x180] sm:$0xff]  ;;  %v5928_v9 = vcombine.high %v234_v2, %v238_v5  ;;  %v5927_v10 = vcombine.low %v234_v2, %v238_v5  ;;  %1078 = vmatprep.subr.bf16.mxu0 %v5840_v4  ;;  %v143_v37 = vld [vmem:[%s9516_s3 + $0x1a8] sm:$0xff] }
   0x6   :  { %v142_v8 = vld [vmem:[%s9516_s3 + $0x1a0] sm:$0xff]  ;;  %1079 = vmatpush1.bf16.msra.mxu0 %v5839_v6  ;;  %v5834_v42 = vcombine.high %v139_v36, %v143_v37  ;;  %v131_v45 = vld [vmem:[%s9516_s3 + $0x148] sm:$0xff]  ;;  %v5833_v48 = vcombine.low %v139_v36, %v143_v37 }
   0x7   :  { %v5832_v11 = vcombine.high %v138_v7, %v142_v8  ;;  %v226_v12 = vld [vmem:[%s9516_s3 + $0x440] sm:$0xff]  ;;  %5935 = vmatprep.subr.msk.bf16.mxu1 %vm1053_vm0, %v5928_v9  ;;  %v1055_v19 = vsel %vm1053_vm0, %v5927_v10, 0  ;;  %v5831_v20 = vcombine.low %v138_v7, %v142_v8  ;;  %v135_v46 = vld [vmem:[%s9516_s3 + $0x168] sm:$0xff] }
   0x8   :  { %v230_v13 = vld [vmem:[%s9516_s3 + $0x460] sm:$0xff]  ;;  %1140 = vmatpush1.bf16.msra.mxu1 %v1055_v19  ;;  %v5826_v50 = vcombine.high %v131_v45, %v135_v46  ;;  %v123_v53 = vld [vmem:[%s9516_s3 + $0x108] sm:$0xff]  ;;  %v5825_v56 = vcombine.low %v131_v45, %v135_v46 }
   0x9   :  { %v130_v14 = vld [vmem:[%s9516_s3 + $0x140] sm:$0xff]  ;;  %v5920_v15 = vcombine.high %v226_v12, %v230_v13  ;;  %1080 = vmatprep.subr.bf16.mxu0 %v5832_v11  ;;  %v5919_v21 = vcombine.low %v226_v12, %v230_v13  ;;  %v127_v54 = vld [vmem:[%s9516_s3 + $0x128] sm:$0xff] }
   0xa   :  { %v134_v16 = vld [vmem:[%s9516_s3 + $0x160] sm:$0xff]  ;;  %1081 = vmatpush1.bf16.msra.mxu0 %v5831_v20  ;;  %v5818_v59 = vcombine.high %v123_v53, %v127_v54  ;;  %v55_v61 = vld [vmem:[%s9527_s1 + $0x8] sm:$0xff]  ;;  %v5817_v5 = vcombine.low %v123_v53, %v127_v54 }
   0xb   :  { %v218_v17 = vld [vmem:[%s9516_s3 + $0x400] sm:$0xff]  ;;  %v5824_v22 = vcombine.high %v130_v14, %v134_v16  ;;  %1141 = vmatprep.subr.bf16.mxu1 %v5920_v15  ;;  %v5823_v28 = vcombine.low %v130_v14, %v134_v16  ;;  %v115_v63 = vld [vmem:[%s9516_s3 + $0xc8] sm:$0xff] }
   0xc   :  { %v222_v18 = vld [vmem:[%s9516_s3 + $0x420] sm:$0xff]  ;;  %1142 = vmatpush1.bf16.msra.mxu1 %v5919_v21  ;;  %v119_v0 = vld [vmem:[%s9516_s3 + $0xe8] sm:$0xff] }
   0xd   :  { %v5912_v23 = vcombine.high %v218_v17, %v222_v18  ;;  %v122_v24 = vld [vmem:[%s9516_s3 + $0x100] sm:$0xff]  ;;  %1082 = vmatprep.subr.bf16.mxu0 %v5824_v22  ;;  %v5911_v29 = vcombine.low %v218_v17, %v222_v18  ;;  %v5810_v8 = vcombine.high %v115_v63, %v119_v0  ;;  %v107_v11 = vld [vmem:[%s9516_s3 + $0x88] sm:$0xff]  ;;  %v5809_v14 = vcombine.low %v115_v63, %v119_v0 }
   0xe   :  { %v126_v25 = vld [vmem:[%s9516_s3 + $0x120] sm:$0xff]  ;;  %1083 = vmatpush1.bf16.msra.mxu0 %v5823_v28  ;;  %v111_v12 = vld [vmem:[%s9516_s3 + $0xa8] sm:$0xff] }
   0xf   :  { %v5816_v30 = vcombine.high %v122_v24, %v126_v25  ;;  %1143 = vmatprep.subr.bf16.mxu1 %v5912_v23  ;;  %v114_v34 = vld [vmem:[%s9516_s3 + $0xc0] sm:$0xff]  ;;  %v5815_v39 = vcombine.low %v122_v24, %v126_v25  ;;  %v5802_v16 = vcombine.high %v107_v11, %v111_v12  ;;  %v99_v19 = vld [vmem:[%s9516_s3 + $0x48] sm:$0xff]  ;;  %v5801_v22 = vcombine.low %v107_v11, %v111_v12 }
  0x10   :  { %v118_v35 = vld [vmem:[%s9516_s3 + $0xe0] sm:$0xff]  ;;  %1144 = vmatpush1.bf16.msra.mxu1 %v5911_v29  ;;  %v103_v20 = vld [vmem:[%s9516_s3 + $0x68] sm:$0xff] }
  0x11   :  { %1084 = vmatprep.subr.bf16.mxu0 %v5816_v30  ;;  %v5808_v41 = vcombine.high %v114_v34, %v118_v35  ;;  %1180 = vmatprep.subr.bf16.mxu1 %v5842_v33  ;;  %v106_v43 = vld [vmem:[%s9516_s3 + $0x80] sm:$0xff]  ;;  %v5807_v47 = vcombine.low %v114_v34, %v118_v35  ;;  %v5794_v24 = vcombine.high %v99_v19, %v103_v20  ;;  %v91_v27 = vld [vmem:[%s9516_s3 + $0x8] sm:$0xff] }
  0x12   :  { %v110_v44 = vld [vmem:[%s9516_s3 + $0xa0] sm:$0xff]  ;;  %1085 = vmatpush1.bf16.msra.mxu0 %v5815_v39  ;;  %v95_v28 = vld [vmem:[%s9516_s3 + $0x28] sm:$0xff]  ;;  %v5793_v30 = vcombine.low %v99_v19, %v103_v20  ;;  %v57_v19 = vld [vmem:[%s9527_s1 + $0x18] sm:$0xff] }
  0x13   :  { %5936 = vmatmul.mubr.msk.bf16.vlgmr.msra.gmra.mxu1 %vm1046_vm1, %v6989_v38  ;;  %1086 = vmatprep.subr.bf16.mxu0 %v5808_v41  ;;  %v5800_v49 = vcombine.high %v106_v43, %v110_v44  ;;  %v98_v51 = vld [vmem:[%s9516_s3 + $0x40] sm:$0xff]  ;;  %v5799_v55 = vcombine.low %v106_v43, %v110_v44  ;;  %v5786_v32 = vcombine.high %v91_v27, %v95_v28  ;;  %v211_v35 = vld [vmem:[%s9516_s3 + $0x3c8] sm:$0xff] }
  0x14   :  { %1181 = vmatpush1.bf16.msra.mxu1 %v5841_v40  ;;  %v102_v52 = vld [vmem:[%s9516_s3 + $0x60] sm:$0xff]  ;;  %1171 = vmatprep.mubr.bf16.mxu1 %v6832_v3  ;;  %v215_v36 = vld [vmem:[%s9516_s3 + $0x3e8] sm:$0xff]  ;;  %v5785_v39 = vcombine.low %v91_v27, %v95_v28 }
  0x15   :  { %1182 = vmatprep.subr.bf16.mxu1 %v5834_v42  ;;  %v5792_v57 = vcombine.high %v98_v51, %v102_v52  ;;  %v90_v58 = vld [vmem:[%s9516_s3] sm:$0xff]  ;;  %v5791_v2 = vcombine.low %v98_v51, %v102_v52  ;;  %v5906_v41 = vcombine.high %v211_v35, %v215_v36  ;;  %v203_v44 = vld [vmem:[%s9516_s3 + $0x388] sm:$0xff] }
  0x16   :  { %1087 = vmatpush1.bf16.msra.mxu0 %v5807_v47  ;;  %v94_v60 = vld [vmem:[%s9516_s3 + $0x20] sm:$0xff]  ;;  %v207_v45 = vld [vmem:[%s9516_s3 + $0x3a8] sm:$0xff]  ;;  %v5905_v47 = vcombine.low %v211_v35, %v215_v36 }
  0x17   :  { %1088 = vmatprep.subr.bf16.mxu0 %v5800_v49  ;;  %v58_v62 = vld [vmem:[%s9527_s1 + $0x20] sm:$0xff]  ;;  %v5784_v6 = vcombine.high %v90_v58, %v94_v60  ;;  %v5783_v13 = vcombine.low %v90_v58, %v94_v60  ;;  %v5898_v49 = vcombine.high %v203_v44, %v207_v45  ;;  %v195_v52 = vld [vmem:[%s9516_s3 + $0x348] sm:$0xff] }
  0x18   :  { %1183 = vmatpush1.bf16.msra.mxu1 %v5833_v48  ;;  %v7036_v1 = vpack.c.bf16 %v58_v62, %v55_v61  ;;  %v62_v4 = vld [vmem:[%s9527_s1 + $0x40] sm:$0xff]  ;;  %v199_v53 = vld [vmem:[%s9516_s3 + $0x368] sm:$0xff] }
  0x19   :  { %1184 = vmatprep.subr.bf16.mxu1 %v5826_v50  ;;  %v7041_v7 = vpack.c.bf16 %v62_v4, %v62_v4  ;;  %v210_v9 = vld [vmem:[%s9516_s3 + $0x3c0] sm:$0xff]  ;;  %v187_v60 = vld [vmem:[%s9516_s3 + $0x308] sm:$0xff]  ;;  %v5889_v63 = vcombine.low %v195_v52, %v199_v53 }
  0x1a   :  { %1089 = vmatpush1.bf16.msra.mxu0 %v5799_v55  ;;  %v214_v10 = vld [vmem:[%s9516_s3 + $0x3e0] sm:$0xff]  ;;  %1110 = vmatprep.mubr.bf16.mxu0 %v7036_v1  ;;  %v5897_v55 = vcombine.low %v203_v44, %v207_v45  ;;  %v191_v61 = vld [vmem:[%s9516_s3 + $0x328] sm:$0xff]  ;;  %v236_v45 = vld [vmem:[%s9516_s3 + $0x490] sm:$0xff] }
  0x1b   :  { %1090 = vmatprep.subr.bf16.mxu0 %v5792_v57  ;;  %5937 = vmatmul.mubr.msk.bf16.gmra.mxu1 %vm1046_vm1, %v7041_v7  ;;  %v5904_v15 = vcombine.high %v210_v9, %v214_v10  ;;  %v202_v17 = vld [vmem:[%s9516_s3 + $0x380] sm:$0xff]  ;;  %v5903_v21 = vcombine.low %v210_v9, %v214_v10  ;;  %v5890_v57 = vcombine.high %v195_v52, %v199_v53  ;;  %v163_v28 = vld [vmem:[%s9516_s3 + $0x248] sm:$0xff] }
  0x1c   :  { %1185 = vmatpush1.bf16.msra.mxu1 %v5825_v56  ;;  %1212 = vmatprep.mubr.bf16.mxu1 %v7036_v1  ;;  %v206_v18 = vld [vmem:[%s9516_s3 + $0x3a0] sm:$0xff]  ;;  %v5881_v10 = vcombine.low %v187_v60, %v191_v61  ;;  %v219_v35 = vld [vmem:[%s9516_s3 + $0x408] sm:$0xff] }
  0x1d   :  { %1186 = vmatprep.subr.bf16.mxu1 %v5818_v59  ;;  %v5896_v23 = vcombine.high %v202_v17, %v206_v18  ;;  %v194_v25 = vld [vmem:[%s9516_s3 + $0x340] sm:$0xff]  ;;  %v5895_v29 = vcombine.low %v202_v17, %v206_v18  ;;  %v223_v36 = vld [vmem:[%s9516_s3 + $0x428] sm:$0xff] }
  0x1e   :  { %1091 = vmatpush1.bf16.msra.mxu0 %v5791_v2  ;;  %v198_v26 = vld [vmem:[%s9516_s3 + $0x360] sm:$0xff]  ;;  %v5882_v2 = vcombine.high %v187_v60, %v191_v61  ;;  %v232_v60 = vld [vmem:[%s9516_s3 + $0x470] sm:$0xff] }
  0x1f   :  { %1092 = vmatprep.subr.bf16.mxu0 %v5784_v6  ;;  %v5888_v31 = vcombine.high %v194_v25, %v198_v26  ;;  %v186_v33 = vld [vmem:[%s9516_s3 + $0x300] sm:$0xff]  ;;  %v5887_v37 = vcombine.low %v194_v25, %v198_v26  ;;  %v179_v6 = vld [vmem:[%s9516_s3 + $0x2c8] sm:$0xff]  ;;  %v132_v61 = vld [vmem:[%s9516_s3 + $0x150] sm:$0xff] }
  0x20   :  { %1187 = vmatpush1.bf16.msra.mxu1 %v5817_v5  ;;  %v190_v34 = vld [vmem:[%s9516_s3 + $0x320] sm:$0xff]  ;;  %v227_v25 = vld [vmem:[%s9516_s3 + $0x448] sm:$0xff] }
  0x21   :  { %1188 = vmatprep.subr.bf16.mxu1 %v5810_v8  ;;  %v5880_v40 = vcombine.high %v186_v33, %v190_v34  ;;  %v178_v42 = vld [vmem:[%s9516_s3 + $0x2c0] sm:$0xff]  ;;  %v5879_v46 = vcombine.low %v186_v33, %v190_v34  ;;  %v183_v8 = vld [vmem:[%s9516_s3 + $0x2e8] sm:$0xff] }
  0x22   :  { %1093 = vmatpush1.bf16.msra.mxu0 %v5783_v13  ;;  %v182_v43 = vld [vmem:[%s9516_s3 + $0x2e0] sm:$0xff]  ;;  %v5874_v12 = vcombine.high %v179_v6, %v183_v8  ;;  %v235_v13 = vld [vmem:[%s9516_s3 + $0x488] sm:$0xff]  ;;  %v5873_v20 = vcombine.low %v179_v6, %v183_v8  ;;  %v224_v6 = vld [vmem:[%s9516_s3 + $0x430] sm:$0xff] }
  0x23   :  { %1094 = vmatprep.subr.bf16.mxu0 %v5904_v15  ;;  %v5872_v48 = vcombine.high %v178_v42, %v182_v43  ;;  %v170_v50 = vld [vmem:[%s9516_s3 + $0x280] sm:$0xff]  ;;  %v5871_v54 = vcombine.low %v178_v42, %v182_v43  ;;  %v171_v15 = vld [vmem:[%s9516_s3 + $0x288] sm:$0xff]  ;;  %v5914_v43 = vcombine.high %v219_v35, %v223_v36  ;;  %v124_v8 = vld [vmem:[%s9516_s3 + $0x110] sm:$0xff] }
  0x24   :  { %1189 = vmatpush1.bf16.msra.mxu1 %v5809_v14  ;;  %v174_v51 = vld [vmem:[%s9516_s3 + $0x2a0] sm:$0xff]  ;;  %v239_v14 = vld [vmem:[%s9516_s3 + $0x4a8] sm:$0x33] }
  0x25   :  { %1190 = vmatprep.subr.bf16.mxu1 %v5802_v16  ;;  %v5864_v56 = vcombine.high %v170_v50, %v174_v51  ;;  %v162_v58 = vld [vmem:[%s9516_s3 + $0x240] sm:$0xff]  ;;  %v5863_v62 = vcombine.low %v170_v50, %v174_v51  ;;  %v175_v16 = vld [vmem:[%s9516_s3 + $0x2a8] sm:$0xff]  ;;  %v5913_v50 = vcombine.low %v219_v35, %v223_v36  ;;  %v133_v36 = vld [vmem:[%s9516_s3 + $0x158] sm:$0xff] }
  0x26   :  { %1095 = vmatpush2.bf16.msra.mxu0 %v5903_v21  ;;  %v166_v59 = vld [vmem:[%s9516_s3 + $0x260] sm:$0xff]  ;;  %v5930_v21 = vcombine.high %v235_v13, %v239_v14  ;;  %v231_v26 = vld [vmem:[%s9516_s3 + $0x468] sm:$0xff] }
  0x27   :  { %1096 = vmatprep.subr.bf16.mxu0 %v5896_v23  ;;  %v5856_v0 = vcombine.high %v162_v58, %v166_v59  ;;  %v154_v4 = vld [vmem:[%s9516_s3 + $0x200] sm:$0xff]  ;;  %v5855_v9 = vcombine.low %v162_v58, %v166_v59  ;;  %v61_v23 = vld [vmem:[%s9527_s1 + $0x38] sm:$0xff]  ;;  %v5922_v33 = vcombine.high %v227_v25, %v231_v26  ;;  %v228_v59 = vld [vmem:[%s9516_s3 + $0x450] sm:$0xff] }
  0x28   :  { %1191 = vmatpush1.bf16.msra.mxu1 %v5801_v22  ;;  %v158_v5 = vld [vmem:[%s9516_s3 + $0x220] sm:$0xff]  ;;  %v5929_v22 = vcombine.low %v235_v13, %v239_v14  ;;  %v149_v14 = vld [vmem:[%s9516_s3 + $0x1d8] sm:$0xff] }
  0x29   :  { %1192 = vmatprep.subr.bf16.mxu1 %v5794_v24  ;;  %v5848_v11 = vcombine.high %v154_v4, %v158_v5  ;;  %v5847_v17 = vcombine.low %v154_v4, %v158_v5  ;;  %v54_v18 = vld [vmem:[%s9527_s1] sm:$0xff]  ;;  %v5866_v24 = vcombine.high %v171_v15, %v175_v16  ;;  %v220_v5 = vld [vmem:[%s9516_s3 + $0x410] sm:$0xff] }
  0x2a   :  { %1097 = vmatpush2.bf16.msra.mxu0 %v5895_v29  ;;  %v7170_v27 = vpack.c.bf16 %v57_v19, %v54_v18  ;;  %v167_v29 = vld [vmem:[%s9516_s3 + $0x268] sm:$0xff]  ;;  %v5915_v18 = vcombine.low %v220_v5, %v224_v6 }
  0x2b   :  { %1098 = vmatprep.subr.bf16.mxu0 %v5888_v31  ;;  %v5865_v31 = vcombine.low %v171_v15, %v175_v16  ;;  %v5858_v34 = vcombine.high %v163_v28, %v167_v29  ;;  %v5857_v42 = vcombine.low %v163_v28, %v167_v29  ;;  %v153_v15 = vld [vmem:[%s9516_s3 + $0x1f8] sm:$0xff]  ;;  %v116_v16 = vld [vmem:[%s9516_s3 + $0xd0] sm:$0xff] }
  0x2c   :  { %1193 = vmatpush1.bf16.msra.mxu1 %v5793_v30  ;;  %v7178_v30 = vpack.c.bf16 %v61_v23, %v61_v23  ;;  %v112_v23 = vld [vmem:[%s9516_s3 + $0xb0] sm:$0xff]  ;;  %v145_v28 = vld [vmem:[%s9516_s3 + $0x1b8] sm:$0xff] }
  0x2d   :  { %1194 = vmatprep.subr.bf16.mxu1 %v5786_v32  ;;  %v1061_v32 = vsel %vm1053_vm0, %v5929_v22, 0  ;;  %v108_v22 = vld [vmem:[%s9516_s3 + $0x90] sm:$0xff] }
  0x2e   :  { %1099 = vmatpush2.bf16.msra.mxu0 %v5887_v37  ;;  %v155_v37 = vld [vmem:[%s9516_s3 + $0x208] sm:$0xff]  ;;  %v100_v29 = vld [vmem:[%s9516_s3 + $0x50] sm:$0xff] }
  0x2f   :  { %1100 = vmatprep.subr.bf16.mxu0 %v5880_v40  ;;  %v5921_v40 = vcombine.low %v227_v25, %v231_v26  ;;  %v5804_v25 = vcombine.high %v108_v22, %v112_v23  ;;  %v141_v26 = vld [vmem:[%s9516_s3 + $0x198] sm:$0xff] }
  0x30   :  { %1195 = vmatpush1.bf16.msra.mxu1 %v5785_v39  ;;  %v159_v39 = vld [vmem:[%s9516_s3 + $0x228] sm:$0xff] }
  0x31   :  { %1196 = vmatprep.subr.bf16.mxu1 %v5906_v41  ;;  %v60_v41 = vld [vmem:[%s9527_s1 + $0x30] sm:$0xff]  ;;  %v5850_v44 = vcombine.high %v155_v37, %v159_v39  ;;  %v5849_v51 = vcombine.low %v155_v37, %v159_v39  ;;  %v137_v37 = vld [vmem:[%s9516_s3 + $0x178] sm:$0xff] }
  0x32   :  { %1101 = vmatpush2.bf16.msra.mxu0 %v5879_v46  ;;  %v240_v46 = vld [vmem:[%s9516_s3 + $0x4b0] sm:$0x33] }
  0x33   :  { %1102 = vmatprep.subr.bf16.mxu0 %v5872_v48  ;;  %v148_v48 = vld [vmem:[%s9516_s3 + $0x1d0] sm:$0xff]  ;;  %v5932_v52 = vcombine.high %v236_v45, %v240_v46 }
  0x34   :  { %1197 = vmatpush2.bf16.msra.mxu1 %v5905_v47  ;;  %v7205_v47 = vpack.c.bf16 %v60_v41, %v60_v41  ;;  %v92_v39 = vld [vmem:[%s9516_s3 + $0x10] sm:$0xff]  ;;  %v5837_v41 = vcombine.low %v141_v26, %v145_v28 }
  0x35   :  { %1198 = vmatprep.subr.bf16.mxu1 %v5898_v49  ;;  %v152_v49 = vld [vmem:[%s9516_s3 + $0x1f0] sm:$0xff] }
  0x36   :  { %1103 = vmatpush2.bf16.msra.mxu0 %v5871_v54  ;;  %v5844_v53 = vcombine.high %v148_v48, %v152_v49  ;;  %v140_v54 = vld [vmem:[%s9516_s3 + $0x190] sm:$0xff] }
  0x37   :  { %1104 = vmatprep.subr.bf16.mxu0 %v5864_v56  ;;  %v5843_v56 = vcombine.low %v148_v48, %v152_v49  ;;  %v212_v48 = vld [vmem:[%s9516_s3 + $0x3d0] sm:$0xff] }
  0x38   :  { %1199 = vmatpush2.bf16.msra.mxu1 %v5897_v55  ;;  %v144_v55 = vld [vmem:[%s9516_s3 + $0x1b0] sm:$0xff] }
  0x39   :  { %1200 = vmatprep.subr.bf16.mxu1 %v5890_v57  ;;  %v5931_v57 = vcombine.low %v236_v45, %v240_v46  ;;  %v5836_v58 = vcombine.high %v140_v54, %v144_v55  ;;  %v125_v45 = vld [vmem:[%s9516_s3 + $0x118] sm:$0xff]  ;;  %v216_v49 = vld [vmem:[%s9516_s3 + $0x3f0] sm:$0xff] }
  0x3a   :  { %1105 = vmatpush2.bf16.msra.mxu0 %v5863_v62  ;;  %v136_v62 = vld [vmem:[%s9516_s3 + $0x170] sm:$0xff]  ;;  %v129_v46 = vld [vmem:[%s9516_s3 + $0x138] sm:$0xff] }
  0x3b   :  { %1106 = vmatprep.subr.bf16.mxu0 %v5856_v0  ;;  %v1067_v0 = vsel %vm1053_vm0, %v5931_v57, 0  ;;  %v5828_v4 = vcombine.high %v132_v61, %v136_v62  ;;  %v208_v57 = vld [vmem:[%s9516_s3 + $0x3b0] sm:$0xff] }
  0x3c   :  { %1201 = vmatpush2.bf16.msra.mxu1 %v5889_v63  ;;  %v5835_v63 = vcombine.low %v140_v54, %v144_v55  ;;  %v117_v54 = vld [vmem:[%s9516_s3 + $0xd8] sm:$0xff] }
  0x3d   :  { %1202 = vmatprep.subr.bf16.mxu1 %v5882_v2  ;;  %v5924_v2 = vcombine.high %v228_v59, %v232_v60  ;;  %v121_v55 = vld [vmem:[%s9516_s3 + $0xf8] sm:$0xff] }
  0x3e   :  { %1107 = vmatpush2.bf16.msra.mxu0 %v5855_v9  ;;  %v128_v9 = vld [vmem:[%s9516_s3 + $0x130] sm:$0xff] }
  0x3f   :  { %1108 = vmatprep.subr.bf16.mxu0 %v5848_v11  ;;  %v5827_v11 = vcombine.low %v132_v61, %v136_v62  ;;  %v5820_v13 = vcombine.high %v124_v8, %v128_v9  ;;  %v5819_v19 = vcombine.low %v124_v8, %v128_v9  ;;  %v109_v62 = vld [vmem:[%s9516_s3 + $0x98] sm:$0xff] }
  0x40   :  { %1203 = vmatpush2.bf16.msra.mxu1 %v5881_v10  ;;  %v5923_v10 = vcombine.low %v228_v59, %v232_v60  ;;  %v5907_v59 = vcombine.low %v212_v48, %v216_v49  ;;  %v5814_v60 = vcombine.high %v117_v54, %v121_v55  ;;  %v101_v9 = vld [vmem:[%s9516_s3 + $0x58] sm:$0xff] }
  0x41   :  { %1204 = vmatprep.subr.bf16.mxu1 %v5874_v12  ;;  %v5916_v12 = vcombine.high %v220_v5, %v224_v6 }
  0x42   :  { %1109 = vmatpush2.bf16.msra.mxu0 %v5847_v17  ;;  %v120_v17 = vld [vmem:[%s9516_s3 + $0xf0] sm:$0xff] }
  0x43   :  { %5938 = vmatprep.subr.msk.bf16.mxu0 %vm1053_vm0, %v5930_v21  ;;  %v5812_v21 = vcombine.high %v116_v16, %v120_v17 }
  0x44   :  { %1205 = vmatpush2.bf16.msra.mxu1 %v5873_v20  ;;  %v5846_v20 = vcombine.high %v149_v14, %v153_v15 }
  0x45   :  { %1206 = vmatprep.subr.bf16.mxu1 %v5866_v24  ;;  %1111 = vmatmul.mubr.bf16.vlgmr.msra.gmra.mxu0 %v7170_v27  ;;  %v5811_v24 = vcombine.low %v116_v16, %v120_v17  ;;  %v93_v17 = vld [vmem:[%s9516_s3 + $0x18] sm:$0xff] }
  0x46   :  { %1242 = vmatpush1.bf16.msra.mxu0 %v1061_v32  ;;  %1120 = vmatprep.mubr.bf16.mxu0 %v7178_v30  ;;  %v5845_v32 = vcombine.low %v149_v14, %v153_v15 }
  0x47   :  { %1243 = vmatprep.subr.bf16.mxu0 %v5922_v33  ;;  %v5803_v33 = vcombine.low %v108_v22, %v112_v23 }
  0x48   :  { %1207 = vmatpush2.bf16.msra.mxu1 %v5865_v31  ;;  %v104_v31 = vld [vmem:[%s9516_s3 + $0x70] sm:$0xff] }
  0x49   :  { %1208 = vmatprep.subr.bf16.mxu1 %v5858_v34  ;;  %v5838_v34 = vcombine.high %v141_v26, %v145_v28  ;;  %v5796_v35 = vcombine.high %v100_v29, %v104_v31  ;;  %v217_v26 = vld [vmem:[%s9516_s3 + $0x3f8] sm:$0xff]  ;;  %v172_v28 = vld [vmem:[%s9516_s3 + $0x290] sm:$0xff] }
  0x4a   :  { %1244 = vmatpush1.bf16.msra.mxu0 %v5921_v40  ;;  %v96_v40 = vld [vmem:[%s9516_s3 + $0x30] sm:$0xff] }
  0x4b   :  { %1245 = vmatprep.subr.bf16.mxu0 %v5914_v43  ;;  %v5830_v43 = vcombine.high %v133_v36, %v137_v37 }
  0x4c   :  { %1209 = vmatpush2.bf16.msra.mxu1 %v5857_v42  ;;  %v5795_v42 = vcombine.low %v100_v29, %v104_v31  ;;  %v176_v29 = vld [vmem:[%s9516_s3 + $0x2b0] sm:$0xff] }
  0x4d   :  { %1210 = vmatprep.subr.bf16.mxu1 %v5850_v44  ;;  %1121 = vmatmul.mubr.bf16.gmra.mxu0 %v7205_v47  ;;  %v5788_v44 = vcombine.high %v92_v39, %v96_v40 }
  0x4e   :  { %1246 = vmatpush1.bf16.msra.mxu0 %v5913_v50  ;;  %1263 = vmatprep.mubr.bf16.mxu0 %v6832_v3  ;;  %v5829_v50 = vcombine.low %v133_v36, %v137_v37  ;;  %v209_v36 = vld [vmem:[%s9516_s3 + $0x3b8] sm:$0xff]  ;;  %v164_v37 = vld [vmem:[%s9516_s3 + $0x250] sm:$0xff] }
  0x4f   :  { %5941 = vmatprep.subr.msk.bf16.mxu0 %vm1053_vm0, %v5932_v52  ;;  %v5822_v52 = vcombine.high %v125_v45, %v129_v46 }
  0x50   :  { %1211 = vmatpush2.bf16.msra.mxu1 %v5849_v51  ;;  %v5787_v51 = vcombine.low %v92_v39, %v96_v40  ;;  %v168_v39 = vld [vmem:[%s9516_s3 + $0x270] sm:$0xff] }
  0x51   :  { %1282 = vmatprep.subr.bf16.mxu1 %v5844_v53  ;;  %v5908_v53 = vcombine.high %v212_v48, %v216_v49  ;;  %v160_v48 = vld [vmem:[%s9516_s3 + $0x230] sm:$0xff] }
  0x53   :  { %1213 = vmatmul.mubr.bf16.vlgmr.msra.gmra.mxu1 %v7170_v27 }
  0x54   :  { %1283 = vmatpush1.bf16.msra.mxu1 %v5843_v56  ;;  %1222 = vmatprep.mubr.bf16.mxu1 %v7178_v30  ;;  %v204_v56 = vld [vmem:[%s9516_s3 + $0x390] sm:$0xff] }
  0x55   :  { %1284 = vmatprep.subr.bf16.mxu1 %v5836_v58  ;;  %5939 = vmatmul.mubr.msk.bf16.vlgmr.msra.gmra.mxu0 %vm1046_vm1, %v6989_v38  ;;  %v5821_v58 = vcombine.low %v125_v45, %v129_v46  ;;  %v5900_v61 = vcombine.high %v204_v56, %v208_v57  ;;  %v5899_v5 = vcombine.low %v204_v56, %v208_v57  ;;  %v201_v45 = vld [vmem:[%s9516_s3 + $0x378] sm:$0xff]  ;;  %v156_v46 = vld [vmem:[%s9516_s3 + $0x210] sm:$0xff] }
  0x56   :  { %1344 = vmatpush1.bf16.msra.mxu0 %v1067_v0  ;;  %1273 = vmatprep.mubr.bf16.mxu0 %v6832_v3  ;;  %v196_v0 = vld [vmem:[%s9516_s3 + $0x350] sm:$0xff]  ;;  %v241_v56 = vld [vmem:[%s9516_s3 + $0x4b8] sm:$0x33] }
  0x57   :  { %1345 = vmatprep.subr.bf16.mxu0 %v5924_v2  ;;  %v200_v2 = vld [vmem:[%s9516_s3 + $0x370] sm:$0xff] }
  0x58   :  { %1285 = vmatpush1.bf16.msra.mxu1 %v5835_v63  ;;  %v113_v63 = vld [vmem:[%s9516_s3 + $0xb8] sm:$0xff]  ;;  %v5892_v8 = vcombine.high %v196_v0, %v200_v2  ;;  %v5891_v14 = vcombine.low %v196_v0, %v200_v2 }
  0x59   :  { %1286 = vmatprep.subr.bf16.mxu1 %v5828_v4  ;;  %v5813_v4 = vcombine.low %v117_v54, %v121_v55  ;;  %v5806_v6 = vcombine.high %v109_v62, %v113_v63  ;;  %v193_v54 = vld [vmem:[%s9516_s3 + $0x338] sm:$0xff] }
  0x5a   :  { %1346 = vmatpush1.bf16.msra.mxu0 %v5923_v10  ;;  %v105_v10 = vld [vmem:[%s9516_s3 + $0x78] sm:$0xff] }
  0x5b   :  { %1223 = vmatmul.mubr.bf16.gmra.mxu1 %v7205_v47  ;;  %1347 = vmatprep.subr.bf16.mxu0 %v5916_v12  ;;  %v192_v12 = vld [vmem:[%s9516_s3 + $0x330] sm:$0xff]  ;;  %v5798_v15 = vcombine.high %v101_v9, %v105_v10  ;;  %v237_v55 = vld [vmem:[%s9516_s3 + $0x498] sm:$0xff] }
  0x5c   :  { %1287 = vmatpush1.bf16.msra.mxu1 %v5827_v11  ;;  %1314 = vmatprep.mubr.bf16.mxu1 %v7036_v1  ;;  %v188_v11 = vld [vmem:[%s9516_s3 + $0x310] sm:$0xff]  ;;  %v229_v0 = vld [vmem:[%s9516_s3 + $0x458] sm:$0xff] }
  0x5d   :  { %1288 = vmatprep.subr.bf16.mxu1 %v5820_v13  ;;  %5940 = vmatmul.mubr.msk.bf16.gmra.mxu0 %vm1046_vm1, %v7041_v7  ;;  %v5805_v13 = vcombine.low %v109_v62, %v113_v63  ;;  %v5884_v16 = vcombine.high %v188_v11, %v192_v12  ;;  %v5883_v22 = vcombine.low %v188_v11, %v192_v12  ;;  %v233_v2 = vld [vmem:[%s9516_s3 + $0x478] sm:$0xff] }
  0x5e   :  { %1348 = vmatpush1.bf16.msra.mxu0 %v5915_v18  ;;  %1365 = vmatprep.mubr.bf16.mxu0 %v6832_v3  ;;  %v97_v18 = vld [vmem:[%s9516_s3 + $0x38] sm:$0xff]  ;;  %v5934_v62 = vcombine.high %v237_v55, %v241_v56  ;;  %v5933_v63 = vcombine.low %v237_v55, %v241_v56 }
  0x5f   :  { %1384 = vmatprep.subr.bf16.mxu0 %v5846_v20  ;;  %v184_v20 = vld [vmem:[%s9516_s3 + $0x2f0] sm:$0xff]  ;;  %v5790_v23 = vcombine.high %v93_v17, %v97_v18  ;;  %v5789_v31 = vcombine.low %v93_v17, %v97_v18  ;;  %v221_v11 = vld [vmem:[%s9516_s3 + $0x418] sm:$0xff] }
  0x60   :  { %1289 = vmatpush1.bf16.msra.mxu1 %v5819_v19  ;;  %v180_v19 = vld [vmem:[%s9516_s3 + $0x2d0] sm:$0xff]  ;;  %v225_v12 = vld [vmem:[%s9516_s3 + $0x438] sm:$0xff] }
  0x61   :  { %1290 = vmatprep.subr.bf16.mxu1 %v5812_v21  ;;  %v5797_v21 = vcombine.low %v101_v9, %v105_v10  ;;  %v177_v9 = vld [vmem:[%s9516_s3 + $0x2b8] sm:$0xff]  ;;  %v5926_v10 = vcombine.high %v229_v0, %v233_v2  ;;  %v5918_v18 = vcombine.high %v221_v11, %v225_v12 }
  0x62   :  { %v169_v17 = vld [vmem:[%s9516_s3 + $0x278] sm:$0xff] }
  0x64   :  { %1291 = vmatpush1.bf16.msra.mxu1 %v5811_v24  ;;  %v5876_v24 = vcombine.high %v180_v19, %v184_v20 }
  0x65   :  { %1292 = vmatprep.subr.bf16.mxu1 %v5804_v25  ;;  %5942 = vmatmul.mubr.msk.bf16.vlgmr.msra.gmra.mxu0 %vm1046_vm1, %v6989_v38  ;;  %v213_v25 = vld [vmem:[%s9516_s3 + $0x3d8] sm:$0xff] }
  0x66   :  { %1385 = vmatpush1.bf16.msra.mxu0 %v5845_v32  ;;  %1375 = vmatprep.mubr.bf16.mxu0 %v6832_v3  ;;  %v5875_v32 = vcombine.low %v180_v19, %v184_v20  ;;  %v5909_v40 = vcombine.low %v213_v25, %v217_v26  ;;  %v1634_v19 = vld [vmem:[%s9528_s4 + $0x1c0] sm:$0xff] }
  0x67   :  { %1386 = vmatprep.subr.bf16.mxu0 %v5838_v34  ;;  %v5868_v34 = vcombine.high %v172_v28, %v176_v29  ;;  %v1638_v20 = vld [vmem:[%s9528_s4 + $0x1e0] sm:$0xff] }
  0x68   :  { %1293 = vmatpush1.bf16.msra.mxu1 %v5803_v33  ;;  %v5910_v33 = vcombine.high %v213_v25, %v217_v26  ;;  %v161_v25 = vld [vmem:[%s9516_s3 + $0x238] sm:$0xff]  ;;  %v6016_v26 = vcombine.high %v1634_v19, %v1638_v20 }
  0x69   :  { %1294 = vmatprep.subr.bf16.mxu1 %v5796_v35  ;;  %v205_v35 = vld [vmem:[%s9516_s3 + $0x398] sm:$0xff] }
  0x6a   :  { %1387 = vmatpush1.bf16.msra.mxu0 %v5837_v41  ;;  %v5867_v41 = vcombine.low %v172_v28, %v176_v29  ;;  %v5901_v49 = vcombine.low %v205_v35, %v209_v36 }
  0x6b   :  { %1388 = vmatprep.subr.bf16.mxu0 %v5830_v43  ;;  %v5860_v43 = vcombine.high %v164_v37, %v168_v39 }
  0x6c   :  { %1295 = vmatpush1.bf16.msra.mxu1 %v5795_v42  ;;  %v5902_v42 = vcombine.high %v205_v35, %v209_v36  ;;  %v6015_v36 = vcombine.low %v1634_v19, %v1638_v20  ;;  %v1578_v19 = vld [vmem:[%s9528_s4] sm:$0xff] }
  0x6d   :  { %1296 = vmatprep.subr.bf16.mxu1 %v5788_v44  ;;  %5943 = vmatmul.mubr.msk.bf16.gmra.mxu0 %vm1046_vm1, %v7041_v7  ;;  %v197_v44 = vld [vmem:[%s9516_s3 + $0x358] sm:$0xff]  ;;  %v1582_v20 = vld [vmem:[%s9528_s4 + $0x20] sm:$0xff] }
  0x6e   :  { %1389 = vmatpush1.bf16.msra.mxu0 %v5829_v50  ;;  %1416 = vmatprep.mubr.bf16.mxu0 %v7036_v1  ;;  %v5859_v50 = vcombine.low %v164_v37, %v168_v39  ;;  %v5893_v57 = vcombine.low %v197_v44, %v201_v45 }
  0x6f   :  { %1390 = vmatprep.subr.bf16.mxu0 %v5822_v52  ;;  %v5852_v52 = vcombine.high %v156_v46, %v160_v48 }
  0x70   :  { %1297 = vmatpush1.bf16.msra.mxu1 %v5787_v51  ;;  %v5894_v51 = vcombine.high %v197_v44, %v201_v45  ;;  %v1622_v44 = vld [vmem:[%s9528_s4 + $0x160] sm:$0xff] }
  0x71   :  { %1298 = vmatprep.subr.bf16.mxu1 %v5908_v53  ;;  %v189_v53 = vld [vmem:[%s9516_s3 + $0x318] sm:$0xff] }
  0x72   :  { %1391 = vmatpush1.bf16.msra.mxu0 %v5821_v58  ;;  %v5851_v58 = vcombine.low %v156_v46, %v160_v48 }
  0x73   :  { %1392 = vmatprep.subr.bf16.mxu0 %v5814_v60  ;;  %v181_v60 = vld [vmem:[%s9516_s3 + $0x2d8] sm:$0xff] }
  0x74   :  { %1299 = vmatpush2.bf16.msra.mxu1 %v5907_v59  ;;  %v5886_v59 = vcombine.high %v189_v53, %v193_v54 }
  0x75   :  { %1300 = vmatprep.subr.bf16.mxu1 %v5900_v61  ;;  %v185_v61 = vld [vmem:[%s9516_s3 + $0x2f8] sm:$0xff] }
  0x76   :  { %1393 = vmatpush1.bf16.msra.mxu0 %v5813_v4  ;;  %v5885_v4 = vcombine.low %v189_v53, %v193_v54  ;;  %v1614_v53 = vld [vmem:[%s9528_s4 + $0x120] sm:$0xff] }
  0x77   :  { %1394 = vmatprep.subr.bf16.mxu0 %v5806_v6  ;;  %v1073_v6 = vsel %vm1053_vm0, %v5933_v63, 0 }
  0x78   :  { %1301 = vmatpush2.bf16.msra.mxu1 %v5899_v5  ;;  %v5878_v5 = vcombine.high %v181_v60, %v185_v61 }
  0x79   :  { %1302 = vmatprep.subr.bf16.mxu1 %v5892_v8  ;;  %v173_v8 = vld [vmem:[%s9516_s3 + $0x298] sm:$0xff] }
  0x7a   :  { %1395 = vmatpush1.bf16.msra.mxu0 %v5805_v13  ;;  %v5877_v13 = vcombine.low %v181_v60, %v185_v61  ;;  %v1602_v60 = vld [vmem:[%s9528_s4 + $0xc0] sm:$0xff] }
  0x7b   :  { %1396 = vmatprep.subr.bf16.mxu0 %v5798_v15  ;;  %v5925_v15 = vcombine.low %v229_v0, %v233_v2  ;;  %v1606_v61 = vld [vmem:[%s9528_s4 + $0xe0] sm:$0xff] }
  0x7c   :  { %1303 = vmatpush2.bf16.msra.mxu1 %v5891_v14  ;;  %v5870_v14 = vcombine.high %v173_v8, %v177_v9  ;;  %v5984_v2 = vcombine.high %v1602_v60, %v1606_v61 }
  0x7d   :  { %1304 = vmatprep.subr.bf16.mxu1 %v5884_v16  ;;  %v165_v16 = vld [vmem:[%s9516_s3 + $0x258] sm:$0xff] }
  0x7e   :  { %1397 = vmatpush1.bf16.msra.mxu0 %v5797_v21  ;;  %v5869_v21 = vcombine.low %v173_v8, %v177_v9  ;;  %v5861_v28 = vcombine.low %v165_v16, %v169_v17  ;;  %v1627_v9 = vld [vmem:[%s9528_s4 + $0x188] sm:$0xff] }
  0x7f   :  { %1398 = vmatprep.subr.bf16.mxu0 %v5790_v23  ;;  %v5917_v23 = vcombine.low %v221_v11, %v225_v12  ;;  %v1586_v11 = vld [vmem:[%s9528_s4 + $0x40] sm:$0xff] }
  0x80   :  { %1305 = vmatpush2.bf16.msra.mxu1 %v5883_v22  ;;  %v5862_v22 = vcombine.high %v165_v16, %v169_v17  ;;  %v1590_v12 = vld [vmem:[%s9528_s4 + $0x60] sm:$0xff]  ;;  %v1619_v17 = vld [vmem:[%s9528_s4 + $0x148] sm:$0xff] }
  0x81   :  { %1306 = vmatprep.subr.bf16.mxu1 %v5876_v24  ;;  %v157_v24 = vld [vmem:[%s9516_s3 + $0x218] sm:$0xff]  ;;  %v5968_v16 = vcombine.high %v1586_v11, %v1590_v12 }
  0x82   :  { %1399 = vmatpush1.bf16.msra.mxu0 %v5789_v31  ;;  %v5854_v29 = vcombine.high %v157_v24, %v161_v25  ;;  %v1722_v31 = vld [vmem:[%s9528_s4 + $0x480] sm:$0xff]  ;;  %v5853_v35 = vcombine.low %v157_v24, %v161_v25  ;;  %v5960_v24 = vcombine.high %v1578_v19, %v1582_v20  ;;  %v1611_v25 = vld [vmem:[%s9528_s4 + $0x108] sm:$0xff] }
  0x83   :  { %1400 = vmatprep.subr.bf16.mxu0 %v5910_v33  ;;  %v1626_v33 = vld [vmem:[%s9528_s4 + $0x180] sm:$0xff] }
  0x84   :  { %1307 = vmatpush2.bf16.msra.mxu1 %v5875_v32  ;;  %v1726_v32 = vld [vmem:[%s9528_s4 + $0x4a0] sm:$0x33] }
  0x85   :  { %1308 = vmatprep.subr.bf16.mxu1 %v5868_v34  ;;  %v1630_v34 = vld [vmem:[%s9528_s4 + $0x1a0] sm:$0xff]  ;;  %v6104_v37 = vcombine.high %v1722_v31, %v1726_v32  ;;  %v6103_v39 = vcombine.low %v1722_v31, %v1726_v32  ;;  %v5959_v32 = vcombine.low %v1578_v19, %v1582_v20 }
  0x86   :  { %1401 = vmatpush2.bf16.msra.mxu0 %v5909_v40  ;;  %v6008_v40 = vcombine.high %v1626_v33, %v1630_v34  ;;  %v6007_v45 = vcombine.low %v1626_v33, %v1630_v34  ;;  %v1654_v19 = vld [vmem:[%s9528_s4 + $0x260] sm:$0xff] }
  0x87   :  { %1402 = vmatprep.subr.bf16.mxu0 %v5902_v42  ;;  %v1718_v42 = vld [vmem:[%s9528_s4 + $0x460] sm:$0xff]  ;;  %v2525_v46 = vsel %vm1053_vm0, %v6103_v39, 0 }
  0x88   :  { %1309 = vmatpush2.bf16.msra.mxu1 %v5867_v41  ;;  %v1714_v41 = vld [vmem:[%s9528_s4 + $0x440] sm:$0xff] }
  0x89   :  { %1310 = vmatprep.subr.bf16.mxu1 %v5860_v43  ;;  %v1618_v43 = vld [vmem:[%s9528_s4 + $0x140] sm:$0xff]  ;;  %v6096_v48 = vcombine.high %v1714_v41, %v1718_v42  ;;  %v6095_v54 = vcombine.low %v1714_v41, %v1718_v42 }
  0x8a   :  { %1403 = vmatpush2.bf16.msra.mxu0 %v5901_v49  ;;  %v6000_v49 = vcombine.high %v1618_v43, %v1622_v44  ;;  %v5999_v55 = vcombine.low %v1618_v43, %v1622_v44  ;;  %v1694_v39 = vld [vmem:[%s9528_s4 + $0x3a0] sm:$0xff]  ;;  %v1595_v44 = vld [vmem:[%s9528_s4 + $0x88] sm:$0xff] }
  0x8b   :  { %1404 = vmatprep.subr.bf16.mxu0 %v5894_v51  ;;  %v1710_v51 = vld [vmem:[%s9528_s4 + $0x420] sm:$0xff] }
  0x8c   :  { %1311 = vmatpush2.bf16.msra.mxu1 %v5859_v50  ;;  %v1706_v50 = vld [vmem:[%s9528_s4 + $0x400] sm:$0xff] }
  0x8d   :  { %1312 = vmatprep.subr.bf16.mxu1 %v5852_v52  ;;  %v1610_v52 = vld [vmem:[%s9528_s4 + $0x100] sm:$0xff]  ;;  %v6088_v56 = vcombine.high %v1706_v50, %v1710_v51 }
  0x8e   :  { %1405 = vmatpush2.bf16.msra.mxu0 %v5893_v57  ;;  %v5992_v57 = vcombine.high %v1610_v52, %v1614_v53  ;;  %v5991_v63 = vcombine.low %v1610_v52, %v1614_v53  ;;  %v1587_v53 = vld [vmem:[%s9528_s4 + $0x48] sm:$0xff] }
  0x8f   :  { %1406 = vmatprep.subr.bf16.mxu0 %v5886_v59  ;;  %v1639_v59 = vld [vmem:[%s9528_s4 + $0x1e8] sm:$0xff] }
  0x90   :  { %1313 = vmatpush2.bf16.msra.mxu1 %v5851_v58  ;;  %v1635_v58 = vld [vmem:[%s9528_s4 + $0x1c8] sm:$0xff] }
  0x91   :  { %5944 = vmatprep.subr.msk.bf16.mxu1 %vm1053_vm0, %v5934_v62  ;;  %v6087_v62 = vcombine.low %v1706_v50, %v1710_v51  ;;  %v6018_v0 = vcombine.high %v1635_v58, %v1639_v59 }
  0x92   :  { %1407 = vmatpush2.bf16.msra.mxu0 %v5885_v4  ;;  %v1594_v4 = vld [vmem:[%s9528_s4 + $0x80] sm:$0xff] }
  0x93   :  { %1315 = vmatmul.mubr.bf16.vlgmr.msra.gmra.mxu1 %v7170_v27  ;;  %1408 = vmatprep.subr.bf16.mxu0 %v5878_v5  ;;  %v1598_v5 = vld [vmem:[%s9528_s4 + $0xa0] sm:$0xff] }
  0x94   :  { %1446 = vmatpush1.bf16.msra.mxu1 %v1073_v6  ;;  %1324 = vmatprep.mubr.bf16.mxu1 %v7178_v30  ;;  %v5983_v6 = vcombine.low %v1602_v60, %v1606_v61  ;;  %v5976_v8 = vcombine.high %v1594_v4, %v1598_v5  ;;  %v1579_v61 = vld [vmem:[%s9528_s4 + $0x8] sm:$0xff] }
  0x95   :  { %1447 = vmatprep.subr.bf16.mxu1 %v5926_v10  ;;  %v1631_v10 = vld [vmem:[%s9528_s4 + $0x1a8] sm:$0xff] }
  0x96   :  { %1409 = vmatpush2.bf16.msra.mxu0 %v5877_v13  ;;  %v6017_v13 = vcombine.low %v1635_v58, %v1639_v59 }
  0x97   :  { %1410 = vmatprep.subr.bf16.mxu0 %v5870_v14  ;;  %v5975_v14 = vcombine.low %v1594_v4, %v1598_v5 }
  0x98   :  { %1448 = vmatpush1.bf16.msra.mxu1 %v5925_v15  ;;  %v6010_v15 = vcombine.high %v1627_v9, %v1631_v10 }
  0x99   :  { %1449 = vmatprep.subr.bf16.mxu1 %v5918_v18  ;;  %v1623_v18 = vld [vmem:[%s9528_s4 + $0x168] sm:$0xff] }
  0x9a   :  { %1411 = vmatpush2.bf16.msra.mxu0 %v5869_v21  ;;  %v6009_v21 = vcombine.low %v1627_v9, %v1631_v10  ;;  %v6001_v31 = vcombine.low %v1619_v17, %v1623_v18  ;;  %v1703_v9 = vld [vmem:[%s9528_s4 + $0x3e8] sm:$0xff]  ;;  %v1658_v10 = vld [vmem:[%s9528_s4 + $0x280] sm:$0xff] }
  0x9b   :  { %1325 = vmatmul.mubr.bf16.gmra.mxu1 %v7205_v47  ;;  %1412 = vmatprep.subr.bf16.mxu0 %v5862_v22  ;;  %v5967_v22 = vcombine.low %v1586_v11, %v1590_v12  ;;  %v1662_v11 = vld [vmem:[%s9528_s4 + $0x2a0] sm:$0xff] }
  0x9c   :  { %1450 = vmatpush1.bf16.msra.mxu1 %v5917_v23  ;;  %1467 = vmatprep.mubr.bf16.mxu1 %v6832_v3  ;;  %v6002_v23 = vcombine.high %v1619_v17, %v1623_v18  ;;  %v1695_v17 = vld [vmem:[%s9528_s4 + $0x3a8] sm:$0xff]  ;;  %v1650_v18 = vld [vmem:[%s9528_s4 + $0x240] sm:$0xff] }
  0x9d   :  { %2548 = vmatprep.subr.bf16.mxu1 %v6016_v26  ;;  %v1615_v26 = vld [vmem:[%s9528_s4 + $0x128] sm:$0xff] }
  0x9e   :  { %1413 = vmatpush2.bf16.msra.mxu0 %v5861_v28  ;;  %v1698_v28 = vld [vmem:[%s9528_s4 + $0x3c0] sm:$0xff]  ;;  %v5994_v33 = vcombine.high %v1611_v25, %v1615_v26 }
  0x9f   :  { %1414 = vmatprep.subr.bf16.mxu0 %v5854_v29  ;;  %v1702_v29 = vld [vmem:[%s9528_s4 + $0x3e0] sm:$0xff] }
  0xa0   :  { %v6080_v34 = vcombine.high %v1698_v28, %v1702_v29  ;;  %v6079_v41 = vcombine.low %v1698_v28, %v1702_v29  ;;  %v1687_v28 = vld [vmem:[%s9528_s4 + $0x368] sm:$0xff]  ;;  %v1642_v29 = vld [vmem:[%s9528_s4 + $0x200] sm:$0xff] }
  0xa2   :  { %1415 = vmatpush2.bf16.msra.mxu0 %v5853_v35  ;;  %v1603_v35 = vld [vmem:[%s9528_s4 + $0xc8] sm:$0xff] }
  0xa3   :  { %5945 = vmatmul.mubr.msk.bf16.vlgmr.msra.gmra.mxu1 %vm1046_vm1, %v6989_v38  ;;  %6111 = vmatprep.subr.msk.bf16.mxu0 %vm1053_vm0, %v6104_v37  ;;  %v1690_v37 = vld [vmem:[%s9528_s4 + $0x380] sm:$0xff] }
  0xa4   :  { %2549 = vmatpush1.bf16.msra.mxu1 %v6015_v36  ;;  %1477 = vmatprep.mubr.bf16.mxu1 %v6832_v3  ;;  %v1607_v36 = vld [vmem:[%s9528_s4 + $0xe8] sm:$0xff]  ;;  %v6072_v43 = vcombine.high %v1690_v37, %v1694_v39  ;;  %v6071_v50 = vcombine.low %v1690_v37, %v1694_v39 }
  0xa5   :  { %2550 = vmatprep.subr.bf16.mxu1 %v6008_v40  ;;  %1417 = vmatmul.mubr.bf16.vlgmr.msra.gmra.mxu0 %v7170_v27  ;;  %v5993_v40 = vcombine.low %v1611_v25, %v1615_v26  ;;  %v5986_v42 = vcombine.high %v1603_v35, %v1607_v36  ;;  %v6032_v25 = vcombine.high %v1650_v18, %v1654_v19  ;;  %v1683_v26 = vld [vmem:[%s9528_s4 + $0x348] sm:$0xff] }
  0xa6   :  { %2610 = vmatpush1.bf16.msra.mxu0 %v2525_v46  ;;  %1426 = vmatprep.mubr.bf16.mxu0 %v7178_v30  ;;  %v1682_v46 = vld [vmem:[%s9528_s4 + $0x340] sm:$0xff]  ;;  %v1675_v37 = vld [vmem:[%s9528_s4 + $0x308] sm:$0xff] }
  0xa7   :  { %2611 = vmatprep.subr.bf16.mxu0 %v6096_v48  ;;  %v1686_v48 = vld [vmem:[%s9528_s4 + $0x360] sm:$0xff]  ;;  %v1679_v39 = vld [vmem:[%s9528_s4 + $0x328] sm:$0xff] }
  0xa8   :  { %2551 = vmatpush1.bf16.msra.mxu1 %v6007_v45  ;;  %v1599_v45 = vld [vmem:[%s9528_s4 + $0xa8] sm:$0xff]  ;;  %v6064_v52 = vcombine.high %v1682_v46, %v1686_v48  ;;  %v6063_v58 = vcombine.low %v1682_v46, %v1686_v48 }
  0xa9   :  { %2552 = vmatprep.subr.bf16.mxu1 %v6000_v49  ;;  %v5985_v49 = vcombine.low %v1603_v35, %v1607_v36  ;;  %v5978_v51 = vcombine.high %v1595_v44, %v1599_v45  ;;  %v6066_v35 = vcombine.high %v1683_v26, %v1687_v28  ;;  %v1667_v46 = vld [vmem:[%s9528_s4 + $0x2c8] sm:$0xff] }
  0xaa   :  { %2612 = vmatpush1.bf16.msra.mxu0 %v6095_v54  ;;  %v1591_v54 = vld [vmem:[%s9528_s4 + $0x68] sm:$0xff] }
  0xab   :  { %5946 = vmatmul.mubr.msk.bf16.gmra.mxu1 %vm1046_vm1, %v7041_v7  ;;  %2613 = vmatprep.subr.bf16.mxu0 %v6088_v56  ;;  %v1678_v56 = vld [vmem:[%s9528_s4 + $0x320] sm:$0xff]  ;;  %v5970_v59 = vcombine.high %v1587_v53, %v1591_v54  ;;  %v1671_v48 = vld [vmem:[%s9528_s4 + $0x2e8] sm:$0xff] }
  0xac   :  { %2553 = vmatpush1.bf16.msra.mxu1 %v5999_v55  ;;  %2580 = vmatprep.mubr.bf16.mxu1 %v7036_v1  ;;  %v1674_v55 = vld [vmem:[%s9528_s4 + $0x300] sm:$0xff] }
  0xad   :  { %2554 = vmatprep.subr.bf16.mxu1 %v5992_v57  ;;  %1427 = vmatmul.mubr.bf16.gmra.mxu0 %v7205_v47  ;;  %v5977_v57 = vcombine.low %v1595_v44, %v1599_v45  ;;  %v6056_v60 = vcombine.high %v1674_v55, %v1678_v56  ;;  %v6055_v4 = vcombine.low %v1674_v55, %v1678_v56 }
  0xae   :  { %2614 = vmatpush1.bf16.msra.mxu0 %v6087_v62  ;;  %2631 = vmatprep.mubr.bf16.mxu0 %v6832_v3  ;;  %v1583_v62 = vld [vmem:[%s9528_s4 + $0x28] sm:$0xff]  ;;  %v6058_v45 = vcombine.high %v1675_v37, %v1679_v39  ;;  %v6050_v55 = vcombine.high %v1667_v46, %v1671_v48 }
  0xaf   :  { %2650 = vmatprep.subr.bf16.mxu0 %v6018_v0  ;;  %v1670_v0 = vld [vmem:[%s9528_s4 + $0x2e0] sm:$0xff]  ;;  %v5962_v5 = vcombine.high %v1579_v61, %v1583_v62  ;;  %v5961_v12 = vcombine.low %v1579_v61, %v1583_v62  ;;  %v1707_v61 = vld [vmem:[%s9528_s4 + $0x408] sm:$0xff] }
  0xb0   :  { %2555 = vmatpush1.bf16.msra.mxu1 %v5991_v63  ;;  %v1666_v63 = vld [vmem:[%s9528_s4 + $0x2c0] sm:$0xff]  ;;  %v1711_v62 = vld [vmem:[%s9528_s4 + $0x428] sm:$0xff] }
  0xb1   :  { %2556 = vmatprep.subr.bf16.mxu1 %v5984_v2  ;;  %v5969_v2 = vcombine.low %v1587_v53, %v1591_v54  ;;  %v6057_v54 = vcombine.low %v1675_v37, %v1679_v39  ;;  %v1624_v37 = vld [vmem:[%s9528_s4 + $0x170] sm:$0xff] }
  0xb4   :  { %2557 = vmatpush1.bf16.msra.mxu1 %v5983_v6  ;;  %v6048_v6 = vcombine.high %v1666_v63, %v1670_v0 }
  0xb5   :  { %2558 = vmatprep.subr.bf16.mxu1 %v5976_v8  ;;  %6112 = vmatmul.mubr.msk.bf16.vlgmr.msra.gmra.mxu0 %vm1046_vm1, %v6989_v38  ;;  %v1699_v8 = vld [vmem:[%s9528_s4 + $0x3c8] sm:$0xff] }
  0xb6   :  { %2651 = vmatpush1.bf16.msra.mxu0 %v6017_v13  ;;  %2641 = vmatprep.mubr.bf16.mxu0 %v6832_v3  ;;  %v6047_v13 = vcombine.low %v1666_v63, %v1670_v0  ;;  %v6049_v0 = vcombine.low %v1667_v46, %v1671_v48  ;;  %v1612_v46 = vld [vmem:[%s9528_s4 + $0x110] sm:$0xff] }
  0xb7   :  { %2652 = vmatprep.subr.bf16.mxu0 %v6010_v15  ;;  %v6040_v15 = vcombine.high %v1658_v10, %v1662_v11  ;;  %v1616_v48 = vld [vmem:[%s9528_s4 + $0x130] sm:$0xff] }
  0xb8   :  { %2559 = vmatpush1.bf16.msra.mxu1 %v5975_v14  ;;  %v6082_v14 = vcombine.high %v1699_v8, %v1703_v9 }
  0xb9   :  { %2560 = vmatprep.subr.bf16.mxu1 %v5968_v16  ;;  %v1691_v16 = vld [vmem:[%s9528_s4 + $0x388] sm:$0xff] }
  0xba   :  { %2653 = vmatpush1.bf16.msra.mxu0 %v6009_v21  ;;  %v6081_v21 = vcombine.low %v1699_v8, %v1703_v9  ;;  %v1655_v8 = vld [vmem:[%s9528_s4 + $0x268] sm:$0xff]  ;;  %v6090_v9 = vcombine.high %v1707_v61, %v1711_v62 }
  0xbb   :  { %2654 = vmatprep.subr.bf16.mxu0 %v6002_v23  ;;  %v6074_v23 = vcombine.high %v1691_v16, %v1695_v17 }
  0xbc   :  { %2561 = vmatpush1.bf16.msra.mxu1 %v5967_v22  ;;  %v6039_v22 = vcombine.low %v1658_v10, %v1662_v11  ;;  %v1636_v10 = vld [vmem:[%s9528_s4 + $0x1d0] sm:$0xff] }
  0xbd   :  { %2562 = vmatprep.subr.bf16.mxu1 %v5960_v24  ;;  %6113 = vmatmul.mubr.msk.bf16.gmra.mxu0 %vm1046_vm1, %v7041_v7  ;;  %v1640_v11 = vld [vmem:[%s9528_s4 + $0x1f0] sm:$0xff] }
  0xbe   :  { %2655 = vmatpush1.bf16.msra.mxu0 %v6001_v31  ;;  %2682 = vmatprep.mubr.bf16.mxu0 %v7036_v1  ;;  %v1646_v31 = vld [vmem:[%s9528_s4 + $0x220] sm:$0xff] }
  0xbf   :  { %2656 = vmatprep.subr.bf16.mxu0 %v5994_v33  ;;  %v6024_v36 = vcombine.high %v1642_v29, %v1646_v31  ;;  %v6023_v44 = vcombine.low %v1642_v29, %v1646_v31 }
  0xc0   :  { %2563 = vmatpush1.bf16.msra.mxu1 %v5959_v32  ;;  %v6073_v32 = vcombine.low %v1691_v16, %v1695_v17  ;;  %v1647_v16 = vld [vmem:[%s9528_s4 + $0x228] sm:$0xff]  ;;  %v6020_v17 = vcombine.high %v1636_v10, %v1640_v11 }
  0xc1   :  { %2564 = vmatprep.subr.bf16.mxu1 %v6080_v34  ;;  %v6031_v34 = vcombine.low %v1650_v18, %v1654_v19 }
  0xc2   :  { %2657 = vmatpush1.bf16.msra.mxu0 %v5993_v40  ;;  %v1723_v40 = vld [vmem:[%s9528_s4 + $0x488] sm:$0xff] }
  0xc3   :  { %2658 = vmatprep.subr.bf16.mxu0 %v5986_v42  ;;  %v6065_v42 = vcombine.low %v1683_v26, %v1687_v28  ;;  %v6019_v28 = vcombine.low %v1636_v10, %v1640_v11  ;;  %v1629_v10 = vld [vmem:[%s9528_s4 + $0x198] sm:$0xff] }
  0xc4   :  { %2565 = vmatpush2.bf16.msra.mxu1 %v6079_v41  ;;  %v1727_v41 = vld [vmem:[%s9528_s4 + $0x4a8] sm:$0x33]  ;;  %v1633_v11 = vld [vmem:[%s9528_s4 + $0x1b8] sm:$0xff] }
  0xc5   :  { %2566 = vmatprep.subr.bf16.mxu1 %v6072_v43 }
  0xc6   :  { %2659 = vmatpush1.bf16.msra.mxu0 %v5985_v49  ;;  %v6106_v49 = vcombine.high %v1723_v40, %v1727_v41 }
  0xc7   :  { %2660 = vmatprep.subr.bf16.mxu0 %v5978_v51  ;;  %v1715_v51 = vld [vmem:[%s9528_s4 + $0x448] sm:$0xff] }
  0xc8   :  { %2567 = vmatpush2.bf16.msra.mxu1 %v6071_v50  ;;  %v6105_v50 = vcombine.low %v1723_v40, %v1727_v41 }
  0xc9   :  { %2568 = vmatprep.subr.bf16.mxu1 %v6064_v52  ;;  %v1719_v52 = vld [vmem:[%s9528_s4 + $0x468] sm:$0xff] }
  0xca   :  { %2661 = vmatpush1.bf16.msra.mxu0 %v5977_v57  ;;  %v2531_v57 = vsel %vm1053_vm0, %v6105_v50, 0  ;;  %v244_v50 = vlaneseq }
  0xcb   :  { %2662 = vmatprep.subr.bf16.mxu0 %v5970_v59  ;;  %v1663_v59 = vld [vmem:[%s9528_s4 + $0x2a8] sm:$0xff] }
  0xcc   :  { %2569 = vmatpush2.bf16.msra.mxu1 %v6063_v58  ;;  %v1659_v58 = vld [vmem:[%s9528_s4 + $0x288] sm:$0xff] }
  0xcd   :  { %2570 = vmatprep.subr.bf16.mxu1 %v6056_v60  ;;  %v6098_v60 = vcombine.high %v1715_v51, %v1719_v52 }
  0xce   :  { %2663 = vmatpush1.bf16.msra.mxu0 %v5969_v2  ;;  %v6042_v2 = vcombine.high %v1659_v58, %v1663_v59 }
  0xcf   :  { %2664 = vmatprep.subr.bf16.mxu0 %v5962_v5 }
  0xd0   :  { %2571 = vmatpush2.bf16.msra.mxu1 %v6055_v4  ;;  %v6097_v4 = vcombine.low %v1715_v51, %v1719_v52 }
  0xd1   :  { %2572 = vmatprep.subr.bf16.mxu1 %v6048_v6  ;;  %v1651_v6 = vld [vmem:[%s9528_s4 + $0x248] sm:$0xff] }
  0xd2   :  { %2665 = vmatpush1.bf16.msra.mxu0 %v5961_v12  ;;  %v6041_v12 = vcombine.low %v1659_v58, %v1663_v59  ;;  %v6033_v18 = vcombine.low %v1651_v6, %v1655_v8  ;;  %v1604_v58 = vld [vmem:[%s9528_s4 + $0xd0] sm:$0xff] }
  0xd3   :  { %v7641_v20 = vpop.f32.mrf.mxu1  ;;  %2666 = vmatprep.subr.bf16.mxu0 %v6082_v14  ;;  %v6089_v14 = vcombine.low %v1707_v61, %v1711_v62  ;;  %v1608_v59 = vld [vmem:[%s9528_s4 + $0xf0] sm:$0xff]  ;;  %v7782_v61 = vshrl.u32 %v244_v50, 7  ;;  %v5995_v62 = vcombine.low %v1612_v46, %v1616_v48 }
  0xd4   :  { %2573 = vmatpush2.bf16.msra.mxu1 %v6047_v13  ;;  %v6034_v13 = vcombine.high %v1651_v6, %v1655_v8  ;;  %v5987_v6 = vcombine.low %v1604_v58, %v1608_v59  ;;  %v7799_v8 = vld [vmem:[%s9529_s5] sm:$0xff]  ;;  %s9534_s5 = sld [smem:[#allocation7_spill]] }
  0xd5   :  { %v7643_v24 = vpop.f32.mrf.mxu1  ;;  %2574 = vmatprep.subr.bf16.mxu1 %v6040_v15  ;;  %v1643_v15 = vld [vmem:[%s9528_s4 + $0x208] sm:$0xff] }
  0xd6   :  { %2667 = vmatpush2.bf16.msra.mxu0 %v6081_v21  ;;  %v6026_v19 = vcombine.high %v1643_v15, %v1647_v16  ;;  %v1724_v21 = vld [vmem:[%s9528_s4 + $0x490] sm:$0xff]  ;;  %v6025_v26 = vcombine.low %v1643_v15, %v1647_v16 }
  0xd7   :  { %v7657_v33 = vpop.f32.mrf.mxu1  ;;  %2668 = vmatprep.subr.bf16.mxu0 %v6074_v23  ;;  %v1628_v23 = vld [vmem:[%s9528_s4 + $0x190] sm:$0xff] }
  0xd8   :  { %2575 = vmatpush2.bf16.msra.mxu1 %v6039_v22  ;;  %v1728_v22 = vld [vmem:[%s9528_s4 + $0x4b0] sm:$0x33] }
  0xd9   :  { %2576 = vmatprep.subr.bf16.mxu1 %v6032_v25  ;;  %v7671_v43 = vpop.f32.mrf.mxu1  ;;  %v1632_v25 = vld [vmem:[%s9528_s4 + $0x1b0] sm:$0xff]  ;;  %v6108_v29 = vcombine.high %v1724_v21, %v1728_v22  ;;  %v6107_v31 = vcombine.low %v1724_v21, %v1728_v22  ;;  %v1621_v22 = vld [vmem:[%s9528_s4 + $0x158] sm:$0xff] }
  0xda   :  { %2669 = vmatpush2.bf16.msra.mxu0 %v6073_v32  ;;  %v6012_v32 = vcombine.high %v1628_v23, %v1632_v25  ;;  %v6011_v39 = vcombine.low %v1628_v23, %v1632_v25  ;;  %v1625_v23 = vld [vmem:[%s9528_s4 + $0x178] sm:$0xff]  ;;  %p6135_p0 = scmp.le.s32.totalorder %s9534_s5, 0 }
  0xdb   :  { %2670 = vmatprep.subr.bf16.mxu0 %v6066_v35  ;;  %v7685_v53 = vpop.f32.mrf.mxu1  ;;  %v1720_v35 = vld [vmem:[%s9528_s4 + $0x470] sm:$0xff]  ;;  %v2537_v40 = vsel %vm1053_vm0, %v6107_v31, 0  ;;  %v6013_v31 = vcombine.low %v1629_v10, %v1633_v11  ;;  %s8100_s0 = smov (!%p6135_p0), 0  }
  0xdc   :  { %2577 = vmatpush2.bf16.msra.mxu1 %v6031_v34  ;;  %v1716_v34 = vld [vmem:[%s9528_s4 + $0x450] sm:$0xff] }
  0xdd   :  { %2578 = vmatprep.subr.bf16.mxu1 %v6024_v36  ;;  %v7687_v56 = vpop.f32.mrf.mxu1  ;;  %v1620_v36 = vld [vmem:[%s9528_s4 + $0x150] sm:$0xff]  ;;  %v6100_v41 = vcombine.high %v1716_v34, %v1720_v35 }
  0xde   :  { %2671 = vmatpush2.bf16.msra.mxu0 %v6065_v42  ;;  %v6004_v42 = vcombine.high %v1620_v36, %v1624_v37  ;;  %v6003_v51 = vcombine.low %v1620_v36, %v1624_v37 }
  0xdf   :  { %2672 = vmatprep.subr.bf16.mxu0 %v6058_v45  ;;  %v1177_v63 = vpop.f32.mrf.mxu1  ;;  %v1712_v45 = vld [vmem:[%s9528_s4 + $0x430] sm:$0xff] }
  0xe0   :  { %2579 = vmatpush2.bf16.msra.mxu1 %v6023_v44  ;;  %v1708_v44 = vld [vmem:[%s9528_s4 + $0x410] sm:$0xff] }
  0xe1   :  { %6114 = vmatprep.subr.msk.bf16.mxu1 %vm1053_vm0, %v6106_v49  ;;  %v1178_v5 = vpop.f32.mrf.mxu1  ;;  %v6099_v49 = vcombine.low %v1716_v34, %v1720_v35  ;;  %v6092_v52 = vcombine.high %v1708_v44, %v1712_v45  ;;  %v6006_v35 = vcombine.high %v1621_v22, %v1625_v23 }
  0xe2   :  { %2673 = vmatpush2.bf16.msra.mxu0 %v6057_v54  ;;  %v5996_v54 = vcombine.high %v1612_v46, %v1616_v48  ;;  %v7794_v5 = vsub.s32 0, %v7782_v61 }
  0xe3   :  { %2581 = vmatmul.mubr.bf16.vlgmr.msra.gmra.mxu1 %v7170_v27  ;;  %2674 = vmatprep.subr.bf16.mxu0 %v6050_v55  ;;  %v1637_v55 = vld [vmem:[%s9528_s4 + $0x1d8] sm:$0xff] }
  0xe4   :  { %2712 = vmatpush1.bf16.msra.mxu1 %v2531_v57  ;;  %2590 = vmatprep.mubr.bf16.mxu1 %v7178_v30  ;;  %v1641_v57 = vld [vmem:[%s9528_s4 + $0x1f8] sm:$0xff]  ;;  %v247_v16 = vrot.slane %v7799_v8, %v7794_v5 }
  0xe5   :  { %2713 = vmatprep.subr.bf16.mxu1 %v6098_v60  ;;  %v6091_v60 = vcombine.low %v1708_v44, %v1712_v45  ;;  %v6022_v63 = vcombine.high %v1637_v55, %v1641_v57  ;;  %v6021_v15 = vcombine.low %v1637_v55, %v1641_v57  ;;  %v1704_v44 = vld [vmem:[%s9528_s4 + $0x3f0] sm:$0xff] }
  0xe6   :  { %2675 = vmatpush2.bf16.msra.mxu0 %v6049_v0  ;;  %v5988_v0 = vcombine.high %v1604_v58, %v1608_v59  ;;  %v7850_v58 = vsub.s32 2, %v7782_v61 }
  0xe7   :  { %2676 = vmatprep.subr.bf16.mxu0 %v6042_v2  ;;  %v1596_v2 = vld [vmem:[%s9528_s4 + $0x90] sm:$0xff] }
  0xe8   :  { %2714 = vmatpush1.bf16.msra.mxu1 %v6097_v4  ;;  %v1600_v4 = vld [vmem:[%s9528_s4 + $0xb0] sm:$0xff] }
  0xe9   :  { %2715 = vmatprep.subr.bf16.mxu1 %v6090_v9  ;;  %v5980_v9 = vcombine.high %v1596_v2, %v1600_v4 }
  0xea   :  { %2677 = vmatpush2.bf16.msra.mxu0 %v6041_v12  ;;  %v7808_v12 = vsub.s32 1, %v7782_v61 }
  0xeb   :  { %2591 = vmatmul.mubr.bf16.gmra.mxu1 %v7205_v47  ;;  %2678 = vmatprep.subr.bf16.mxu0 %v6034_v13  ;;  %v1588_v13 = vld [vmem:[%s9528_s4 + $0x50] sm:$0xff] }
  0xec   :  { %2716 = vmatpush1.bf16.msra.mxu1 %v6089_v14  ;;  %2733 = vmatprep.mubr.bf16.mxu1 %v6832_v3  ;;  %v1592_v14 = vld [vmem:[%s9528_s4 + $0x70] sm:$0xff] }
  0xed   :  { %2752 = vmatprep.subr.bf16.mxu1 %v6020_v17  ;;  %v5979_v17 = vcombine.low %v1596_v2, %v1600_v4  ;;  %v5972_v21 = vcombine.high %v1588_v13, %v1592_v14  ;;  %v5971_v34 = vcombine.low %v1588_v13, %v1592_v14 }
  0xee   :  { %2679 = vmatpush2.bf16.msra.mxu0 %v6033_v18  ;;  %v6014_v18 = vcombine.high %v1629_v10, %v1633_v11 }
  0xef   :  { %2680 = vmatprep.subr.bf16.mxu0 %v6026_v19  ;;  %v251_v19 = vrot.slane %v7799_v8, %v7808_v12 }
  0xf2   :  { %2681 = vmatpush2.bf16.msra.mxu0 %v6025_v26  ;;  %v1580_v26 = vld [vmem:[%s9528_s4 + $0x10] sm:$0xff] }
  0xf3   :  { %6115 = vmatmul.mubr.msk.bf16.vlgmr.msra.gmra.mxu1 %vm1046_vm1, %v6989_v38  ;;  %6117 = vmatprep.subr.msk.bf16.mxu0 %vm1053_vm0, %v6108_v29 }
  0xf4   :  { %2753 = vmatpush1.bf16.msra.mxu1 %v6019_v28  ;;  %2743 = vmatprep.mubr.bf16.mxu1 %v6832_v3  ;;  %v1584_v28 = vld [vmem:[%s9528_s4 + $0x30] sm:$0xff] }
  0xf5   :  { %2754 = vmatprep.subr.bf16.mxu1 %v6012_v32  ;;  %2683 = vmatmul.mubr.bf16.vlgmr.msra.gmra.mxu0 %v7170_v27  ;;  %v5964_v37 = vcombine.high %v1580_v26, %v1584_v28 }
  0xf6   :  { %2814 = vmatpush1.bf16.msra.mxu0 %v2537_v40  ;;  %2692 = vmatprep.mubr.bf16.mxu0 %v7178_v30  ;;  %v1617_v40 = vld [vmem:[%s9528_s4 + $0x138] sm:$0xff] }
  0xf7   :  { %2815 = vmatprep.subr.bf16.mxu0 %v6100_v41 }
  0xf8   :  { %2755 = vmatpush1.bf16.msra.mxu1 %v6011_v39  ;;  %v1613_v39 = vld [vmem:[%s9528_s4 + $0x118] sm:$0xff] }
  0xf9   :  { %2756 = vmatprep.subr.bf16.mxu1 %v6004_v42  ;;  %v1700_v42 = vld [vmem:[%s9528_s4 + $0x3d0] sm:$0xff] }
  0xfa   :  { %2816 = vmatpush1.bf16.msra.mxu0 %v6099_v49  ;;  %v6005_v49 = vcombine.low %v1621_v22, %v1625_v23  ;;  %v6084_v57 = vcombine.high %v1700_v42, %v1704_v44  ;;  %v6083_v10 = vcombine.low %v1700_v42, %v1704_v44 }
  0xfb   :  { %6116 = vmatmul.mubr.msk.bf16.gmra.mxu1 %vm1046_vm1, %v7041_v7  ;;  %2817 = vmatprep.subr.bf16.mxu0 %v6092_v52  ;;  %v5998_v52 = vcombine.high %v1613_v39, %v1617_v40 }
  0xfc   :  { %2757 = vmatpush1.bf16.msra.mxu1 %v6003_v51  ;;  %2784 = vmatprep.mubr.bf16.mxu1 %v7036_v1  ;;  %v5963_v51 = vcombine.low %v1580_v26, %v1584_v28 }
  0xfd   :  { %2758 = vmatprep.subr.bf16.mxu1 %v5996_v54  ;;  %2693 = vmatmul.mubr.bf16.gmra.mxu0 %v7205_v47 }
  0xfe   :  { %2818 = vmatpush1.bf16.msra.mxu0 %v6091_v60  ;;  %2835 = vmatprep.mubr.bf16.mxu0 %v6832_v3  ;;  %v5997_v60 = vcombine.low %v1613_v39, %v1617_v40  ;;  %v1676_v39 = vld [vmem:[%s9528_s4 + $0x310] sm:$0xff] }
  0xff   :  { %2854 = vmatprep.subr.bf16.mxu0 %v6022_v63  ;;  %v1692_v63 = vld [vmem:[%s9528_s4 + $0x390] sm:$0xff] }
 0x100   :  { %2759 = vmatpush1.bf16.msra.mxu1 %v5995_v62  ;;  %v7859_v62 = vsub.s32 3, %v7782_v61  ;;  %v1680_v40 = vld [vmem:[%s9528_s4 + $0x330] sm:$0xff] }
 0x101   :  { %2760 = vmatprep.subr.bf16.mxu1 %v5988_v0  ;;  %v1696_v0 = vld [vmem:[%s9528_s4 + $0x3b0] sm:$0xff] }
 0x102   :  { %v6075_v28 = vcombine.low %v1692_v63, %v1696_v0 }
 0x104   :  { %2761 = vmatpush1.bf16.msra.mxu1 %v5987_v6 }
 0x105   :  { %2762 = vmatprep.subr.bf16.mxu1 %v5980_v9  ;;  %6118 = vmatmul.mubr.msk.bf16.vlgmr.msra.gmra.mxu0 %vm1046_vm1, %v6989_v38  ;;  %v1112_v25 = vpop.f32.mrf.mxu0 }
 0x106   :  { %2855 = vmatpush1.bf16.msra.mxu0 %v6021_v15  ;;  %v1113_v29 = vadd.f32 %v1112_v25, %v247_v16  ;;  %2845 = vmatprep.mubr.bf16.mxu0 %v6832_v3  ;;  %v255_v15 = vrot.slane %v7799_v8, %v7850_v58 }
 0x107   :  { %2856 = vmatprep.subr.bf16.mxu0 %v6014_v18  ;;  %v1114_v32 = vpop.f32.mrf.mxu0  ;;  %v1684_v18 = vld [vmem:[%s9528_s4 + $0x350] sm:$0xff] }
 0x108   :  { %2763 = vmatpush1.bf16.msra.mxu1 %v5979_v17  ;;  %v1115_v36 = vadd.f32 %v1114_v32, %v251_v19  ;;  %v1164_v45 = vadd.f32 %v7641_v20, %v1113_v29  ;;  %v1605_v20 = vld [vmem:[%s9528_s4 + $0xd8] sm:$0xff]  ;;  %v6076_v17 = vcombine.high %v1692_v63, %v1696_v0 }
 0x109   :  { %2764 = vmatprep.subr.bf16.mxu1 %v5972_v21  ;;  %v1116_v41 = vpop.f32.mrf.mxu0 }
 0x10a   :  { %v1166_v46 = vadd.f32 %v7643_v24, %v1115_v36  ;;  %2857 = vmatpush1.bf16.msra.mxu0 %v6013_v31  ;;  %v1117_v48 = vadd.f32 %v1116_v41, %v247_v16  ;;  %v1609_v24 = vld [vmem:[%s9528_s4 + $0xf8] sm:$0xff] }
 0x10b   :  { %2858 = vmatprep.subr.bf16.mxu0 %v6006_v35  ;;  %v1118_v50 = vpop.f32.mrf.mxu0  ;;  %v5990_v11 = vcombine.high %v1605_v20, %v1609_v24  ;;  %v5989_v25 = vcombine.low %v1605_v20, %v1609_v24  ;;  %v1589_v36 = vld [vmem:[%s9528_s4 + $0x58] sm:$0xff]  ;;  %v1668_v20 = vld [vmem:[%s9528_s4 + $0x2d0] sm:$0xff] }
 0x10c   :  { %2765 = vmatpush1.bf16.msra.mxu1 %v5971_v34  ;;  %v6422_v54 = vpack.c.bf16 %v1166_v46, %v1164_v45  ;;  %v1119_v55 = vadd.f32 %v1118_v50, %v251_v19  ;;  %v1168_v2 = vadd.f32 %v7657_v33, %v1117_v48  ;;  %v1597_v33 = vld [vmem:[%s9528_s4 + $0x98] sm:$0xff]  ;;  %v1672_v24 = vld [vmem:[%s9528_s4 + $0x2f0] sm:$0xff] }
 0x10d   :  { %2766 = vmatprep.subr.bf16.mxu1 %v5964_v37  ;;  %v1122_v59 = vpop.f32.mrf.mxu0  ;;  %6119 = vmatmul.mubr.msk.bf16.gmra.mxu0 %vm1046_vm1, %v7041_v7 }
 0x10e   :  { %1566 = vst [vmem:[#allocation2] sm:$0xff] %v6422_v54  ;;  %v1170_v4 = vadd.f32 %v7671_v43, %v1119_v55  ;;  %2859 = vmatpush1.bf16.msra.mxu0 %v6005_v49  ;;  %v1123_v6 = vadd.f32 %v1122_v59, %v247_v16  ;;  %2886 = vmatprep.mubr.bf16.mxu0 %v7036_v1  ;;  %v1601_v1 = vld [vmem:[%s9528_s4 + $0xb8] sm:$0xff] }
 0x10f   :  { %2860 = vmatprep.subr.bf16.mxu0 %v5998_v52  ;;  %v1124_v9 = vpop.f32.mrf.mxu0  ;;  %v7882_v16 = vrot.slane %v7799_v8, %v7859_v62  ;;  %v5982_v29 = vcombine.high %v1597_v33, %v1601_v1  ;;  %v5981_v42 = vcombine.low %v1597_v33, %v1601_v1  ;;  %v6060_v52 = vcombine.high %v1676_v39, %v1680_v40  ;;  %v1581_v54 = vld [vmem:[%s9528_s4 + $0x18] sm:$0xff] }
 0x110   :  { %2767 = vmatpush1.bf16.msra.mxu1 %v5963_v51  ;;  %v6426_v13 = vpack.c.bf16 %v1170_v4, %v1168_v2  ;;  %v1125_v14 = vadd.f32 %v1124_v9, %v251_v19  ;;  %v1688_v19 = vld [vmem:[%s9528_s4 + $0x370] sm:$0xff]  ;;  %v1174_v21 = vadd.f32 %v7685_v53, %v1123_v6  ;;  %v1593_v53 = vld [vmem:[%s9528_s4 + $0x78] sm:$0xff]  ;;  %v6059_v4 = vcombine.low %v1676_v39, %v1680_v40 }
 0x111   :  { %2768 = vmatprep.subr.bf16.mxu1 %v6084_v57  ;;  %v1126_v43 = vpop.f32.mrf.mxu0  ;;  %v6068_v35 = vcombine.high %v1684_v18, %v1688_v19  ;;  %v6067_v45 = vcombine.low %v1684_v18, %v1688_v19  ;;  %v5974_v46 = vcombine.high %v1589_v36, %v1593_v53  ;;  %v1585_v55 = vld [vmem:[%s9528_s4 + $0x38] sm:$0xff]  ;;  %v5973_v63 = vcombine.low %v1589_v36, %v1593_v53  ;;  %v1660_v18 = vld [vmem:[%s9528_s4 + $0x290] sm:$0xff] }
 0x112   :  { %1570 = vst [vmem:[#allocation2 + $0x20] sm:$0xff] %v6426_v13  ;;  %v1176_v22 = vadd.f32 %v7687_v56, %v1125_v14  ;;  %2861 = vmatpush1.bf16.msra.mxu0 %v5997_v60  ;;  %v5966_v6 = vcombine.high %v1581_v54, %v1585_v55  ;;  %v6052_v14 = vcombine.high %v1668_v20, %v1672_v24  ;;  %v1705_v33 = vld [vmem:[%s9528_s4 + $0x3f8] sm:$0xff]  ;;  %v1652_v36 = vld [vmem:[%s9528_s4 + $0x250] sm:$0xff] }
 0x113   :  { %v1214_v23 = vpop.f32.mrf.mxu1  ;;  %2862 = vmatprep.subr.bf16.mxu0 %v5990_v11  ;;  %v1127_v26 = vpop.f32.mrf.mxu0  ;;  %v1656_v53 = vld [vmem:[%s9528_s4 + $0x270] sm:$0xff] }
 0x114   :  { %2769 = vmatpush2.bf16.msra.mxu1 %v6083_v10  ;;  %v6430_v31 = vpack.c.bf16 %v1176_v22, %v1174_v21  ;;  %v1215_v32 = vadd.f32 %v1214_v23, %v255_v15  ;;  %v5965_v21 = vcombine.low %v1581_v54, %v1585_v55 }
 0x115   :  { %v1216_v34 = vpop.f32.mrf.mxu1  ;;  %2770 = vmatprep.subr.bf16.mxu1 %v6076_v17  ;;  %v1265_v37 = vpop.f32.mrf.mxu0  ;;  %v1701_v17 = vld [vmem:[%s9528_s4 + $0x3d8] sm:$0xff] }
 0x116   :  { %v1217_v56 = vadd.f32 %v1216_v34, %v7882_v16  ;;  %1574 = vst [vmem:[#allocation2 + $0x40] sm:$0xff] %v6430_v31  ;;  %2863 = vmatpush1.bf16.msra.mxu0 %v5989_v25  ;;  %v1266_v49 = vadd.f32 %v1265_v37, %v1215_v32  ;;  %v6051_v25 = vcombine.low %v1668_v20, %v1672_v24  ;;  %v1693_v31 = vld [vmem:[%s9528_s4 + $0x398] sm:$0xff] }
 0x117   :  { %v1218_v41 = vpop.f32.mrf.mxu1  ;;  %2864 = vmatprep.subr.bf16.mxu0 %v5982_v29  ;;  %v1267_v44 = vpop.f32.mrf.mxu0  ;;  %v6086_v26 = vcombine.high %v1701_v17, %v1705_v33  ;;  %v1697_v32 = vld [vmem:[%s9528_s4 + $0x3b8] sm:$0xff]  ;;  %v6085_v37 = vcombine.low %v1701_v17, %v1705_v33 }
 0x118   :  { %2771 = vmatpush2.bf16.msra.mxu1 %v6075_v28  ;;  %v1219_v48 = vadd.f32 %v1218_v41, %v255_v15  ;;  %v1268_v51 = vadd.f32 %v1267_v44, %v1217_v56  ;;  %v6078_v41 = vcombine.high %v1693_v31, %v1697_v32  ;;  %v1685_v44 = vld [vmem:[%s9528_s4 + $0x358] sm:$0xff] }
 0x119   :  { %v1220_v50 = vpop.f32.mrf.mxu1  ;;  %2772 = vmatprep.subr.bf16.mxu1 %v6068_v35  ;;  %v1269_v57 = vpop.f32.mrf.mxu0  ;;  %v1681_v20 = vld [vmem:[%s9528_s4 + $0x338] sm:$0xff] }
 0x11a   :  { %v1221_v59 = vadd.f32 %v1220_v50, %v7882_v16  ;;  %v6423_v60 = vpack.c.bf16 %v1268_v51, %v1266_v49  ;;  %2865 = vmatpush1.bf16.msra.mxu0 %v5981_v42  ;;  %v1270_v9 = vadd.f32 %v1269_v57, %v1219_v48  ;;  %v6036_v42 = vcombine.high %v1652_v36, %v1656_v53  ;;  %v1644_v48 = vld [vmem:[%s9528_s4 + $0x210] sm:$0xff]  ;;  %v1677_v57 = vld [vmem:[%s9528_s4 + $0x318] sm:$0xff] }
 0x11b   :  { %v1224_v0 = vpop.f32.mrf.mxu1  ;;  %2866 = vmatprep.subr.bf16.mxu0 %v5974_v46  ;;  %v1271_v2 = vpop.f32.mrf.mxu0  ;;  %v1648_v49 = vld [vmem:[%s9528_s4 + $0x230] sm:$0xff]  ;;  %v6077_v50 = vcombine.low %v1693_v31, %v1697_v32  ;;  %v6061_v33 = vcombine.low %v1677_v57, %v1681_v20  ;;  %v1653_v31 = vld [vmem:[%s9528_s4 + $0x258] sm:$0xff] }
 0x11c   :  { %2773 = vmatpush2.bf16.msra.mxu1 %v6067_v45  ;;  %1567 = vst [vmem:[#allocation2 + $0x8] sm:$0xff] %v6423_v60  ;;  %v1225_v10 = vadd.f32 %v1224_v0, %v255_v15  ;;  %v1272_v11 = vadd.f32 %v1271_v2, %v1221_v59  ;;  %v1664_v15 = vld [vmem:[%s9528_s4 + $0x2b0] sm:$0xff]  ;;  %v1689_v45 = vld [vmem:[%s9528_s4 + $0x378] sm:$0xff]  ;;  %v6028_v55 = vcombine.high %v1644_v48, %v1648_v49 }
 0x11d   :  { %2774 = vmatprep.subr.bf16.mxu1 %v6060_v52  ;;  %v1226_v13 = vpop.f32.mrf.mxu1  ;;  %v1275_v43 = vpop.f32.mrf.mxu0  ;;  %v6044_v29 = vcombine.high %v1660_v18, %v1664_v15  ;;  %v6043_v40 = vcombine.low %v1660_v18, %v1664_v15  ;;  %v6035_v52 = vcombine.low %v1652_v36, %v1656_v53  ;;  %v6070_v54 = vcombine.high %v1685_v44, %v1689_v45  ;;  %v1725_v59 = vld [vmem:[%s9528_s4 + $0x498] sm:$0xff] }
 0x11e   :  { %v1227_v1 = vadd.f32 %v1226_v13, %v7882_v16  ;;  %v6427_v19 = vpack.c.bf16 %v1272_v11, %v1270_v9  ;;  %2867 = vmatpush1.bf16.msra.mxu0 %v5973_v63  ;;  %v1276_v16 = vadd.f32 %v1275_v43, %v1225_v10  ;;  %v1729_v60 = vld [vmem:[%s9528_s4 + $0x4b8] sm:$0x33]  ;;  %v6069_v63 = vcombine.low %v1685_v44, %v1689_v45 }
 0x11f   :  { %v1228_v22 = vpop.f32.mrf.mxu1  ;;  %2868 = vmatprep.subr.bf16.mxu0 %v5966_v6  ;;  %v1277_v23 = vpop.f32.mrf.mxu0  ;;  %v6027_v2 = vcombine.low %v1644_v48, %v1648_v49  ;;  %v1669_v6 = vld [vmem:[%s9528_s4 + $0x2d8] sm:$0xff]  ;;  %v6110_v10 = vcombine.high %v1725_v59, %v1729_v60  ;;  %v6109_v11 = vcombine.low %v1725_v59, %v1729_v60  ;;  %v266_v44 = vsub.s32 5, %v7782_v61 }
 0x120   :  { %2775 = vmatpush2.bf16.msra.mxu1 %v6059_v4  ;;  %1571 = vst [vmem:[#allocation2 + $0x28] sm:$0xff] %v6427_v19  ;;  %v1278_v28 = vadd.f32 %v1277_v23, %v1227_v1  ;;  %v6062_v4 = vcombine.high %v1677_v57, %v1681_v20  ;;  %v1673_v9 = vld [vmem:[%s9528_s4 + $0x2f8] sm:$0xff] }
 0x121   :  { %2776 = vmatprep.subr.bf16.mxu1 %v6052_v14  ;;  %v1229_v34 = vpop.f32.mrf.mxu1  ;;  %v1279_v35 = vpop.f32.mrf.mxu0  ;;  %v1717_v13 = vld [vmem:[%s9528_s4 + $0x458] sm:$0xff]  ;;  %v6054_v1 = vcombine.high %v1669_v6, %v1673_v9  ;;  %v2543_v18 = vsel %vm1053_vm0, %v6109_v11, 0 }
 0x122   :  { %v6431_v56 = vpack.c.bf16 %v1278_v28, %v1276_v16  ;;  %2869 = vmatpush1.bf16.msra.mxu0 %v5965_v21  ;;  %v1721_v14 = vld [vmem:[%s9528_s4 + $0x478] sm:$0xff] }
 0x123   :  { %2870 = vmatprep.subr.bf16.mxu0 %v6086_v26  ;;  %v1280_v39 = vpop.f32.mrf.mxu0  ;;  %v1661_v15 = vld [vmem:[%s9528_s4 + $0x298] sm:$0xff]  ;;  %v6102_v21 = vcombine.high %v1717_v13, %v1721_v14  ;;  %v6053_v26 = vcombine.low %v1669_v6, %v1673_v9  ;;  %v6101_v28 = vcombine.low %v1717_v13, %v1721_v14  ;;  %v274_v13 = vsub.s32 7, %v7782_v61 }
 0x124   :  { %2777 = vmatpush2.bf16.msra.mxu1 %v6051_v25  ;;  %1575 = vst [vmem:[#allocation2 + $0x48] sm:$0xff] %v6431_v56  ;;  %v1665_v19 = vld [vmem:[%s9528_s4 + $0x2b8] sm:$0xff] }
 0x125   :  { %2778 = vmatprep.subr.bf16.mxu1 %v6044_v29  ;;  %v7949_v46 = vpop.f32.mrf.mxu0  ;;  %v1709_v22 = vld [vmem:[%s9528_s4 + $0x418] sm:$0xff]  ;;  %v6046_v16 = vcombine.high %v1661_v15, %v1665_v19  ;;  %v6045_v35 = vcombine.low %v1661_v15, %v1665_v19 }
 0x126   :  { %2871 = vmatpush2.bf16.msra.mxu0 %v6085_v37  ;;  %v1713_v23 = vld [vmem:[%s9528_s4 + $0x438] sm:$0xff] }
 0x127   :  { %2872 = vmatprep.subr.bf16.mxu0 %v6078_v41  ;;  %v7957_v51 = vpop.f32.mrf.mxu0  ;;  %v1657_v32 = vld [vmem:[%s9528_s4 + $0x278] sm:$0xff]  ;;  %v6094_v34 = vcombine.high %v1709_v22, %v1713_v23  ;;  %v6093_v53 = vcombine.low %v1709_v22, %v1713_v23 }
 0x128   :  { %2779 = vmatpush2.bf16.msra.mxu1 %v6043_v40  ;;  %v6038_v36 = vcombine.high %v1653_v31, %v1657_v32  ;;  %v1645_v56 = vld [vmem:[%s9528_s4 + $0x218] sm:$0xff]  ;;  %v6037_v39 = vcombine.low %v1653_v31, %v1657_v32 }
 0x129   :  { %2780 = vmatprep.subr.bf16.mxu1 %v6036_v42  ;;  %v7965_v24 = vpop.f32.mrf.mxu0  ;;  %v1649_v37 = vld [vmem:[%s9528_s4 + $0x238] sm:$0xff]  ;;  %v262_v42 = vsub.s32 4, %v7782_v61 }
 0x12a   :  { %2873 = vmatpush2.bf16.msra.mxu0 %v6077_v50  ;;  %v6030_v40 = vcombine.high %v1645_v56, %v1649_v37  ;;  %v6029_v41 = vcombine.low %v1645_v56, %v1649_v37 }
 0x12b   :  { %2874 = vmatprep.subr.bf16.mxu0 %v6070_v54  ;;  %v7973_v0 = vpop.f32.mrf.mxu0  ;;  %v263_v45 = vrot.slane %v7799_v8, %v262_v42 }
 0x12c   :  { %2781 = vmatpush2.bf16.msra.mxu1 %v6035_v52 }
 0x12d   :  { %2782 = vmatprep.subr.bf16.mxu1 %v6028_v55  ;;  %v7987_v17 = vpop.f32.mrf.mxu0 }
 0x12e   :  { %2875 = vmatpush2.bf16.msra.mxu0 %v6069_v63 }
 0x12f   :  { %2876 = vmatprep.subr.bf16.mxu0 %v6062_v4  ;;  %v7989_v43 = vpop.f32.mrf.mxu0 }
 0x130   :  { %2783 = vmatpush2.bf16.msra.mxu1 %v6027_v2 }
 0x131   :  { %6120 = vmatprep.subr.msk.bf16.mxu1 %vm1053_vm0, %v6110_v10  ;;  %v1381_v25 = vpop.f32.mrf.mxu0 }
 0x132   :  { %2877 = vmatpush2.bf16.msra.mxu0 %v6061_v33 }
 0x133   :  { %2785 = vmatmul.mubr.bf16.vlgmr.msra.gmra.mxu1 %v7170_v27  ;;  %2878 = vmatprep.subr.bf16.mxu0 %v6054_v1  ;;  %v1382_v29 = vpop.f32.mrf.mxu0 }
 0x134   :  { %2916 = vmatpush1.bf16.msra.mxu1 %v2543_v18  ;;  %2794 = vmatprep.mubr.bf16.mxu1 %v7178_v30 }
 0x135   :  { %2917 = vmatprep.subr.bf16.mxu1 %v6102_v21 }
 0x136   :  { %2879 = vmatpush2.bf16.msra.mxu0 %v6053_v26 }
 0x137   :  { %2880 = vmatprep.subr.bf16.mxu0 %v6046_v16 }
 0x138   :  { %2918 = vmatpush1.bf16.msra.mxu1 %v6101_v28 }
 0x139   :  { %2919 = vmatprep.subr.bf16.mxu1 %v6094_v34 }
 0x13a   :  { %2881 = vmatpush2.bf16.msra.mxu0 %v6045_v35 }
 0x13b   :  { %2795 = vmatmul.mubr.bf16.gmra.mxu1 %v7205_v47  ;;  %2882 = vmatprep.subr.bf16.mxu0 %v6038_v36 }
 0x13c   :  { %2920 = vmatpush1.bf16.msra.mxu1 %v6093_v53  ;;  %2937 = vmatprep.mubr.bf16.mxu1 %v6832_v3 }
 0x13e   :  { %2883 = vmatpush2.bf16.msra.mxu0 %v6037_v39 }
 0x13f   :  { %2884 = vmatprep.subr.bf16.mxu0 %v6030_v40 }
 0x142   :  { %2885 = vmatpush2.bf16.msra.mxu0 %v6029_v41 }
 0x143   :  { %6121 = vmatmul.mubr.msk.bf16.vlgmr.msra.gmra.mxu1 %vm1046_vm1, %v6989_v38  ;;  %v267_v38 = vrot.slane %v7799_v8, %v266_v44 }
 0x144   :  { %2947 = vmatprep.mubr.bf16.mxu1 %v6832_v3 }
 0x145   :  { %2887 = vmatmul.mubr.bf16.vlgmr.msra.gmra.mxu0 %v7170_v27 }
 0x146   :  { %2896 = vmatprep.mubr.bf16.mxu0 %v7178_v30 }
 0x14b   :  { %6122 = vmatmul.mubr.msk.bf16.gmra.mxu1 %vm1046_vm1, %v7041_v7 }
 0x14d   :  { %2897 = vmatmul.mubr.bf16.gmra.mxu0 %v7205_v47 }
 0x153   :  { %v1316_v27 = vpop.f32.mrf.mxu1 }
 0x154   :  { %v1317_v48 = vadd.f32 %v1316_v27, %v263_v45 }
 0x155   :  { %v1318_v30 = vpop.f32.mrf.mxu1 }
 0x156   :  { %v1319_v49 = vadd.f32 %v1318_v30, %v267_v38  ;;  %v1368_v7 = vadd.f32 %v7949_v46, %v1317_v48  ;;  %v270_v46 = vsub.s32 6, %v7782_v61 }
 0x157   :  { %v1320_v50 = vpop.f32.mrf.mxu1 }
 0x158   :  { %v1370_v52 = vadd.f32 %v7957_v51, %v1319_v49  ;;  %v1321_v47 = vadd.f32 %v1320_v50, %v263_v45 }
 0x159   :  { %v1322_v54 = vpop.f32.mrf.mxu1 }
 0x15a   :  { %v6424_v55 = vpack.c.bf16 %v1370_v52, %v1368_v7  ;;  %v1323_v57 = vadd.f32 %v1322_v54, %v267_v38  ;;  %v1372_v59 = vadd.f32 %v7965_v24, %v1321_v47  ;;  %v271_v24 = vrot.slane %v7799_v8, %v270_v46 }
 0x15b   :  { %v1326_v20 = vpop.f32.mrf.mxu1 }
 0x15c   :  { %1568 = vst [vmem:[#allocation2 + $0x10] sm:$0xff] %v6424_v55  ;;  %v1374_v60 = vadd.f32 %v7973_v0, %v1323_v57  ;;  %v1327_v63 = vadd.f32 %v1326_v20, %v263_v45  ;;  %v6833_v57 = vmov 0.0   ;;  %v8054_v20 = vld [vmem:[%s9530_s2] sm:$0xff] }
 0x15d   :  { %v1328_v2 = vpop.f32.mrf.mxu1  ;;  %3048 = vst [vmem:[#allocation4] sm:$0xff] %v6833_v57  ;;  %3049 = vst [vmem:[#allocation4 + $0x8] sm:$0xff] %v6833_v57 }
 0x15e   :  { %v6428_v4 = vpack.c.bf16 %v1374_v60, %v1372_v59  ;;  %v1378_v6 = vadd.f32 %v7987_v17, %v1327_v63  ;;  %v1329_v9 = vadd.f32 %v1328_v2, %v267_v38  ;;  %v275_v17 = vrot.slane %v7799_v8, %v274_v13  ;;  %3050 = vst [vmem:[#allocation4 + $0x10] sm:$0xff] %v6833_v57  ;;  %v8059_v59 = vld [vmem:[%s9531_s6] sm:$0xff] }
 0x15f   :  { %v1330_v10 = vpop.f32.mrf.mxu1  ;;  %3051 = vst [vmem:[#allocation4 + $0x18] sm:$0xff] %v6833_v57  ;;  %3052 = vst [vmem:[#allocation4 + $0x20] sm:$0xff] %v6833_v57  ;;  %v1735_v60 = vrot.slane %v8059_v59, %v7794_v5  ;;  %v1739_v63 = vrot.slane %v8059_v59, %v7808_v12 }
 0x160   :  { %1572 = vst [vmem:[#allocation2 + $0x30] sm:$0xff] %v6428_v4  ;;  %v1380_v51 = vadd.f32 %v7989_v43, %v1329_v9  ;;  %3053 = vst [vmem:[#allocation4 + $0x28] sm:$0xff] %v6833_v57 }
 0x161   :  { %v1331_v11 = vpop.f32.mrf.mxu1  ;;  %3054 = vst [vmem:[#allocation4 + $0x30] sm:$0xff] %v6833_v57  ;;  %3055 = vst [vmem:[#allocation4 + $0x38] sm:$0xff] %v6833_v57 }
 0x162   :  { %v6432_v14 = vpack.c.bf16 %v1380_v51, %v1378_v6  ;;  %3056 = vst [vmem:[#allocation4 + $0x40] sm:$0xff] %v6833_v57  ;;  %3057 = vst [vmem:[#allocation4 + $0x48] sm:$0xff] %v6833_v57 }
 0x163   :  { %v1469_v33 = vpop.f32.mrf.mxu1  ;;  %3058 = vst [vmem:[#allocation4 + $0x50] sm:$0xff] %v6833_v57  ;;  %3059 = vst [vmem:[#allocation4 + $0x58] sm:$0xff] %v6833_v57 }
 0x164   :  { %1576 = vst [vmem:[#allocation2 + $0x50] sm:$0xff] %v6432_v14 }
 0x165   :  { %v1471_v0 = vpop.f32.mrf.mxu1  ;;  %v1418_v1 = vpop.f32.mrf.mxu0 }
 0x166   :  { %v1419_v18 = vadd.f32 %v1418_v1, %v271_v24 }
 0x167   :  { %v1473_v15 = vpop.f32.mrf.mxu1  ;;  %v1420_v19 = vpop.f32.mrf.mxu0 }
 0x168   :  { %v1421_v43 = vadd.f32 %v1420_v19, %v275_v17  ;;  %v1470_v23 = vadd.f32 %v1469_v33, %v1419_v18 }
 0x169   :  { %v1475_v21 = vpop.f32.mrf.mxu1  ;;  %v1422_v22 = vpop.f32.mrf.mxu0 }
 0x16a   :  { %v1472_v25 = vadd.f32 %v1471_v0, %v1421_v43  ;;  %v1423_v26 = vadd.f32 %v1422_v22, %v271_v24 }
 0x16b   :  { %v1479_v16 = vpop.f32.mrf.mxu1  ;;  %v1424_v28 = vpop.f32.mrf.mxu0 }
 0x16c   :  { %v6425_v29 = vpack.c.bf16 %v1472_v25, %v1470_v23  ;;  %v1425_v31 = vadd.f32 %v1424_v28, %v275_v17  ;;  %v1474_v35 = vadd.f32 %v1473_v15, %v1423_v26 }
 0x16d   :  { %v1481_v32 = vpop.f32.mrf.mxu1  ;;  %v1428_v34 = vpop.f32.mrf.mxu0 }
 0x16e   :  { %1569 = vst [vmem:[#allocation2 + $0x18] sm:$0xff] %v6425_v29  ;;  %v1476_v36 = vadd.f32 %v1475_v21, %v1425_v31  ;;  %v1429_v8 = vadd.f32 %v1428_v34, %v271_v24  ;;  %v1743_v29 = vrot.slane %v8059_v59, %v7850_v58 }
 0x16f   :  { %v1483_v53 = vpop.f32.mrf.mxu1  ;;  %v1430_v56 = vpop.f32.mrf.mxu0 }
 0x170   :  { %v6429_v37 = vpack.c.bf16 %v1476_v36, %v1474_v35  ;;  %v1431_v39 = vadd.f32 %v1430_v56, %v275_v17  ;;  %v1480_v45 = vadd.f32 %v1479_v16, %v1429_v8 }
 0x171   :  { %v1484_v40 = vpop.f32.mrf.mxu1  ;;  %v1432_v41 = vpop.f32.mrf.mxu0 }
 0x172   :  { %1573 = vst [vmem:[#allocation2 + $0x38] sm:$0xff] %v6429_v37  ;;  %v1482_v38 = vadd.f32 %v1481_v32, %v1431_v39  ;;  %v1747_v32 = vrot.slane %v8059_v59, %v7859_v62 }
 0x173   :  { %v1433_v27 = vpop.f32.mrf.mxu0 }
 0x174   :  { %v6433_v48 = vpack.c.bf16 %v1482_v38, %v1480_v45 }
 0x175   :  { %v2633_v30 = vpop.f32.mrf.mxu0 }
 0x176   :  { %1577 = vst [vmem:[#allocation2 + $0x58] sm:$0xff] %v6433_v48 }
 0x177   :  { %v2635_v49 = vpop.f32.mrf.mxu0 }
 0x179   :  { %v2637_v50 = vpop.f32.mrf.mxu0 }
 0x17b   :  { %v2639_v7 = vpop.f32.mrf.mxu0 }
 0x17d   :  { %v2643_v52 = vpop.f32.mrf.mxu0 }
 0x17f   :  { %v2645_v47 = vpop.f32.mrf.mxu0 }
 0x181   :  { %v2647_v54 = vpop.f32.mrf.mxu0 }
 0x183   :  { %v2648_v55 = vpop.f32.mrf.mxu0 }
 0x1a3   :  { %v2582_v2 = vpop.f32.mrf.mxu1 }
 0x1a4   :  { %v2583_v4 = vadd.f32 %v2582_v2, %v1735_v60 }
 0x1a5   :  { %v2584_v6 = vpop.f32.mrf.mxu1 }
 0x1a6   :  { %v2585_v9 = vadd.f32 %v2584_v6, %v1739_v63  ;;  %v2634_v51 = vadd.f32 %v2633_v30, %v2583_v4 }
 0x1a7   :  { %v2586_v10 = vpop.f32.mrf.mxu1 }
 0x1a8   :  { %v2636_v11 = vadd.f32 %v2635_v49, %v2585_v9  ;;  %v2587_v14 = vadd.f32 %v2586_v10, %v1735_v60 }
 0x1a9   :  { %v2588_v33 = vpop.f32.mrf.mxu1 }
 0x1aa   :  { %v6434_v24 = vpack.c.bf16 %v2636_v11, %v2634_v51  ;;  %v2589_v0 = vadd.f32 %v2588_v33, %v1739_v63  ;;  %v2638_v1 = vadd.f32 %v2637_v50, %v2587_v14 }
 0x1ab   :  { %v2592_v17 = vpop.f32.mrf.mxu1 }
 0x1ac   :  { %3036 = vst [vmem:[#allocation3] sm:$0xff] %v6434_v24  ;;  %v2640_v18 = vadd.f32 %v2639_v7, %v2589_v0  ;;  %v2593_v15 = vadd.f32 %v2592_v17, %v1735_v60 }
 0x1ad   :  { %v2594_v19 = vpop.f32.mrf.mxu1 }
 0x1ae   :  { %v6438_v43 = vpack.c.bf16 %v2640_v18, %v2638_v1  ;;  %v2644_v21 = vadd.f32 %v2643_v52, %v2593_v15  ;;  %v2595_v22 = vadd.f32 %v2594_v19, %v1739_v63  ;;  %v1751_v1 = vrot.slane %v8059_v59, %v262_v42 }
 0x1af   :  { %v2596_v23 = vpop.f32.mrf.mxu1  ;;  %v1755_v18 = vrot.slane %v8059_v59, %v266_v44 }
 0x1b0   :  { %3040 = vst [vmem:[#allocation3 + $0x20] sm:$0xff] %v6438_v43  ;;  %v2646_v25 = vadd.f32 %v2645_v47, %v2595_v22 }
 0x1b1   :  { %v2597_v26 = vpop.f32.mrf.mxu1 }
 0x1b2   :  { %v6442_v16 = vpack.c.bf16 %v2646_v25, %v2644_v21 }
 0x1b3   :  { %v2735_v28 = vpop.f32.mrf.mxu1 }
 0x1b4   :  { %3044 = vst [vmem:[#allocation3 + $0x40] sm:$0xff] %v6442_v16 }
 0x1b5   :  { %v2737_v31 = vpop.f32.mrf.mxu1  ;;  %v2684_v34 = vpop.f32.mrf.mxu0 }
 0x1b6   :  { %v2685_v35 = vadd.f32 %v2684_v34, %v1743_v29 }
 0x1b7   :  { %v2739_v36 = vpop.f32.mrf.mxu1  ;;  %v2686_v8 = vpop.f32.mrf.mxu0 }
 0x1b8   :  { %v2687_v53 = vadd.f32 %v2686_v8, %v1747_v32  ;;  %v2736_v39 = vadd.f32 %v2735_v28, %v2685_v35 }
 0x1b9   :  { %v2741_v56 = vpop.f32.mrf.mxu1  ;;  %v2688_v37 = vpop.f32.mrf.mxu0 }
 0x1ba   :  { %v2738_v40 = vadd.f32 %v2737_v31, %v2687_v53  ;;  %v2689_v41 = vadd.f32 %v2688_v37, %v1743_v29 }
 0x1bb   :  { %v2745_v45 = vpop.f32.mrf.mxu1  ;;  %v2690_v38 = vpop.f32.mrf.mxu0 }
 0x1bc   :  { %v6435_v27 = vpack.c.bf16 %v2738_v40, %v2736_v39  ;;  %v2691_v48 = vadd.f32 %v2690_v38, %v1747_v32  ;;  %v2740_v50 = vadd.f32 %v2739_v36, %v2689_v41  ;;  %v1759_v41 = vrot.slane %v8059_v59, %v270_v46 }
 0x1bd   :  { %v2747_v30 = vpop.f32.mrf.mxu1  ;;  %v2694_v49 = vpop.f32.mrf.mxu0  ;;  %v1763_v38 = vrot.slane %v8059_v59, %v274_v13 }
 0x1be   :  { %3037 = vst [vmem:[#allocation3 + $0x8] sm:$0xff] %v6435_v27  ;;  %v2742_v7 = vadd.f32 %v2741_v56, %v2691_v48  ;;  %v2695_v52 = vadd.f32 %v2694_v49, %v1743_v29 }
 0x1bf   :  { %v2749_v47 = vpop.f32.mrf.mxu1  ;;  %v2696_v54 = vpop.f32.mrf.mxu0 }
 0x1c0   :  { %v6439_v55 = vpack.c.bf16 %v2742_v7, %v2740_v50  ;;  %v2697_v57 = vadd.f32 %v2696_v54, %v1747_v32  ;;  %v2746_v2 = vadd.f32 %v2745_v45, %v2695_v52 }
 0x1c1   :  { %v2750_v60 = vpop.f32.mrf.mxu1  ;;  %v2698_v63 = vpop.f32.mrf.mxu0 }
 0x1c2   :  { %3041 = vst [vmem:[#allocation3 + $0x28] sm:$0xff] %v6439_v55  ;;  %v2748_v4 = vadd.f32 %v2747_v30, %v2697_v57 }
 0x1c3   :  { %v2699_v6 = vpop.f32.mrf.mxu0 }
 0x1c4   :  { %v6443_v9 = vpack.c.bf16 %v2748_v4, %v2746_v2 }
 0x1c5   :  { %v2837_v10 = vpop.f32.mrf.mxu0 }
 0x1c6   :  { %3045 = vst [vmem:[#allocation3 + $0x48] sm:$0xff] %v6443_v9 }
 0x1c7   :  { %v2839_v51 = vpop.f32.mrf.mxu0 }
 0x1c9   :  { %v2841_v11 = vpop.f32.mrf.mxu0 }
 0x1cb   :  { %v2843_v14 = vpop.f32.mrf.mxu0 }
 0x1cd   :  { %v2847_v33 = vpop.f32.mrf.mxu0 }
 0x1cf   :  { %v2849_v24 = vpop.f32.mrf.mxu0 }
 0x1d1   :  { %v2851_v0 = vpop.f32.mrf.mxu0 }
 0x1d3   :  { %v2852_v17 = vpop.f32.mrf.mxu0 }
 0x1f3   :  { %v2786_v15 = vpop.f32.mrf.mxu1 }
 0x1f4   :  { %v2787_v19 = vadd.f32 %v2786_v15, %v1751_v1 }
 0x1f5   :  { %v2788_v43 = vpop.f32.mrf.mxu1 }
 0x1f6   :  { %v2789_v21 = vadd.f32 %v2788_v43, %v1755_v18  ;;  %v2838_v23 = vadd.f32 %v2837_v10, %v2787_v19 }
 0x1f7   :  { %v2790_v22 = vpop.f32.mrf.mxu1 }
 0x1f8   :  { %v2840_v25 = vadd.f32 %v2839_v51, %v2789_v21  ;;  %v2791_v26 = vadd.f32 %v2790_v22, %v1751_v1 }
 0x1f9   :  { %v2792_v16 = vpop.f32.mrf.mxu1 }
 0x1fa   :  { %v6436_v28 = vpack.c.bf16 %v2840_v25, %v2838_v23  ;;  %v2793_v29 = vadd.f32 %v2792_v16, %v1755_v18  ;;  %v2842_v32 = vadd.f32 %v2841_v11, %v2791_v26 }
 0x1fb   :  { %v2796_v31 = vpop.f32.mrf.mxu1 }
 0x1fc   :  { %3038 = vst [vmem:[#allocation3 + $0x10] sm:$0xff] %v6436_v28  ;;  %v2844_v34 = vadd.f32 %v2843_v14, %v2793_v29  ;;  %v2797_v42 = vadd.f32 %v2796_v31, %v1751_v1 }
 0x1fd   :  { %v2798_v35 = vpop.f32.mrf.mxu1 }
 0x1fe   :  { %v6440_v36 = vpack.c.bf16 %v2844_v34, %v2842_v32  ;;  %v2848_v8 = vadd.f32 %v2847_v33, %v2797_v42  ;;  %v2799_v44 = vadd.f32 %v2798_v35, %v1755_v18 }
 0x1ff   :  { %v2800_v53 = vpop.f32.mrf.mxu1 }
 0x200   :  { %3042 = vst [vmem:[#allocation3 + $0x30] sm:$0xff] %v6440_v36  ;;  %v2850_v56 = vadd.f32 %v2849_v24, %v2799_v44 }
 0x201   :  { %v2801_v37 = vpop.f32.mrf.mxu1 }
 0x202   :  { %v6444_v39 = vpack.c.bf16 %v2850_v56, %v2848_v8 }
 0x203   :  { %v2939_v40 = vpop.f32.mrf.mxu1 }
 0x204   :  { %3046 = vst [vmem:[#allocation3 + $0x50] sm:$0xff] %v6444_v39 }
 0x205   :  { %v2941_v45 = vpop.f32.mrf.mxu1  ;;  %v2888_v27 = vpop.f32.mrf.mxu0 }
 0x206   :  { %v2889_v48 = vadd.f32 %v2888_v27, %v1759_v41 }
 0x207   :  { %v2943_v30 = vpop.f32.mrf.mxu1  ;;  %v2890_v49 = vpop.f32.mrf.mxu0 }
 0x208   :  { %v2891_v50 = vadd.f32 %v2890_v49, %v1763_v38  ;;  %v2940_v47 = vadd.f32 %v2939_v40, %v2889_v48 }
 0x209   :  { %v2945_v7 = vpop.f32.mrf.mxu1  ;;  %v2892_v52 = vpop.f32.mrf.mxu0 }
 0x20a   :  { %v2942_v54 = vadd.f32 %v2941_v45, %v2891_v50  ;;  %v2893_v55 = vadd.f32 %v2892_v52, %v1759_v41 }
 0x20b   :  { %v2949_v57 = vpop.f32.mrf.mxu1  ;;  %v2894_v60 = vpop.f32.mrf.mxu0 }
 0x20c   :  { %v6437_v63 = vpack.c.bf16 %v2942_v54, %v2940_v47  ;;  %v2895_v46 = vadd.f32 %v2894_v60, %v1763_v38  ;;  %v2944_v61 = vadd.f32 %v2943_v30, %v2893_v55 }
 0x20d   :  { %v2951_v2 = vpop.f32.mrf.mxu1  ;;  %v2898_v4 = vpop.f32.mrf.mxu0 }
 0x20e   :  { %3039 = vst [vmem:[#allocation3 + $0x18] sm:$0xff] %v6437_v63  ;;  %v2946_v6 = vadd.f32 %v2945_v7, %v2895_v46  ;;  %v2899_v13 = vadd.f32 %v2898_v4, %v1759_v41 }
 0x20f   :  { %v2953_v59 = vpop.f32.mrf.mxu1  ;;  %v2900_v9 = vpop.f32.mrf.mxu0 }
 0x210   :  { %v6441_v10 = vpack.c.bf16 %v2946_v6, %v2944_v61  ;;  %v2901_v51 = vadd.f32 %v2900_v9, %v1763_v38  ;;  %v2950_v33 = vadd.f32 %v2949_v57, %v2899_v13 }
 0x211   :  { %v2954_v11 = vpop.f32.mrf.mxu1  ;;  %v2902_v14 = vpop.f32.mrf.mxu0 }
 0x212   :  { %3043 = vst [vmem:[#allocation3 + $0x38] sm:$0xff] %v6441_v10  ;;  %v2952_v24 = vadd.f32 %v2951_v2, %v2901_v51  ;;  %5758 = sbr.rel (%p6135_p0) target bundleno = 1031 (0x407), region = 85 }
 0x213   :  { %v2903_v0 = vpop.f32.mrf.mxu0 }
 0x214   :  { %v6445_v17 = vpack.c.bf16 %v2952_v24, %v2950_v33 }
 0x216   :  { %3047 = vst [vmem:[#allocation3 + $0x58] sm:$0xff] %v6445_v17 }
 0x217   :  { %v8084_v1 = vmov 0.0   ;;  %v8086_v18 = vmov 0.0   ;;  %v8088_v15 = vmov 0.0   ;;  %v8090_v19 = vmov 0.0  }
 0x218   :  { %v8092_v43 = vmov 0.0   ;;  %v8094_v21 = vmov 0.0   ;;  %v8096_v22 = vmov 0.0   ;;  %v8098_v23 = vmov 0.0  }
 0x219 LB: > { %v3135_v25 = vld [vmem:[%s9517_s7 + $0x1c0] sm:$0xff]  ;;  %v3136_v16 = vld [vmem:[%s9517_s7 + $0x1c8] sm:$0xff]  ;;  %v8167_v41 = vpack.c.bf16 %v6822_v22, %v6822_v22  ;;  %s9535_s3 = sld [smem:[#allocation7_spill]]  ;;  %s6446_s19 = sshll.u32 %s6830_s0, 5  ;;  %s6830_s0 = sphi %s8100_s0, %s3064_s0   ;;  %v6826_v23 = vphi %v8098_v23, %v8958_v23   ;;  %v6822_v22 = vphi %v8096_v22, %v8965_v22   ;;  %v6818_v21 = vphi %v8094_v21, %v8949_v21   ;;  %v6814_v43 = vphi %v8092_v43, %v8953_v43   ;;  %v6810_v19 = vphi %v8090_v19, %v5103_v19   ;;  %v6806_v15 = vphi %v8088_v15, %v5104_v15   ;;  %v6802_v18 = vphi %v8086_v18, %v5105_v18   ;;  %v6798_v1 = vphi %v8084_v1, %v5106_v1  }
 0x21a   : > { %v3139_v26 = vld [vmem:[%s9517_s7 + $0x1e0] sm:$0xff]  ;;  %v3140_v29 = vld [vmem:[%s9517_s7 + $0x1e8] sm:$0xff]  ;;  %s3209_s20 = scalar_lea.vmem [#allocation2], %s6446_s19  ;;  %s5084_s21 = scalar_lea.vmem [#allocation4], %s6446_s19 }
 0x21b   : > { %v6196_v28 = vcombine.high %v3135_v25, %v3139_v26  ;;  %v6195_v31 = vcombine.low %v3135_v25, %v3139_v26  ;;  %v3127_v32 = vld [vmem:[%s9517_s7 + $0x180] sm:$0xff]  ;;  %v6198_v42 = vcombine.high %v3136_v16, %v3140_v29  ;;  %v6197_v35 = vcombine.low %v3136_v16, %v3140_v29  ;;  %v3128_v8 = vld [vmem:[%s9517_s7 + $0x188] sm:$0xff]  ;;  %3894 = vmatprep.mubr.bf16.mxu0 %v8167_v41 }
 0x21c   : > { %v3131_v34 = vld [vmem:[%s9517_s7 + $0x1a0] sm:$0xff]  ;;  %v3132_v44 = vld [vmem:[%s9517_s7 + $0x1a8] sm:$0xff]  ;;  %3935 = vmatprep.mubr.bf16.mxu1 %v8167_v41 }
 0x21d   : > { %v6188_v36 = vcombine.high %v3127_v32, %v3131_v34  ;;  %v3119_v53 = vld [vmem:[%s9517_s7 + $0x140] sm:$0xff]  ;;  %3862 = vmatprep.subr.bf16.mxu0 %v6196_v28  ;;  %v6190_v56 = vcombine.high %v3128_v8, %v3132_v44  ;;  %v3120_v39 = vld [vmem:[%s9517_s7 + $0x148] sm:$0xff]  ;;  %3903 = vmatprep.subr.bf16.mxu1 %v6198_v42  ;;  %v6187_v45 = vcombine.low %v3127_v32, %v3131_v34 }
 0x21e   : > { %v3123_v37 = vld [vmem:[%s9517_s7 + $0x160] sm:$0xff]  ;;  %v3124_v40 = vld [vmem:[%s9517_s7 + $0x168] sm:$0xff]  ;;  %3863 = vmatpush1.bf16.msra.mxu0 %v6195_v31  ;;  %3904 = vmatpush1.bf16.msra.mxu1 %v6197_v35  ;;  %v6189_v38 = vcombine.low %v3128_v8, %v3132_v44 }
 0x21f   : > { %3864 = vmatprep.subr.bf16.mxu0 %v6188_v36  ;;  %v6180_v27 = vcombine.high %v3119_v53, %v3123_v37  ;;  %3905 = vmatprep.subr.bf16.mxu1 %v6190_v56  ;;  %v6182_v48 = vcombine.high %v3120_v39, %v3124_v40  ;;  %v3111_v30 = vld [vmem:[%s9517_s7 + $0x100] sm:$0xff]  ;;  %v3112_v50 = vld [vmem:[%s9517_s7 + $0x108] sm:$0xff]  ;;  %v6179_v52 = vcombine.low %v3119_v53, %v3123_v37  ;;  %s6136_s26 = sadd.s32 4294967295, %s9535_s3 }
 0x220   : > { %v3115_v49 = vld [vmem:[%s9517_s7 + $0x120] sm:$0xff]  ;;  %v3116_v7 = vld [vmem:[%s9517_s7 + $0x128] sm:$0xff]  ;;  %v6181_v47 = vcombine.low %v3120_v39, %v3124_v40  ;;  %s8839_s27 = ssub.s32 %s6136_s26, %s6830_s0 }
 0x221   : > { %v6172_v54 = vcombine.high %v3111_v30, %v3115_v49  ;;  %v6174_v55 = vcombine.high %v3112_v50, %v3116_v7  ;;  %v3103_v57 = vld [vmem:[%s9517_s7 + $0xc0] sm:$0xff]  ;;  %v3104_v63 = vld [vmem:[%s9517_s7 + $0xc8] sm:$0xff]  ;;  %v6171_v2 = vcombine.low %v3111_v30, %v3115_v49  ;;  %v6173_v4 = vcombine.low %v3112_v50, %v3116_v7  ;;  %s6447_s22 = sshll.u32 %s8839_s27, 5 }
 0x222   : > { %3865 = vmatpush1.bf16.msra.mxu0 %v6187_v45  ;;  %3906 = vmatpush1.bf16.msra.mxu1 %v6189_v38  ;;  %v3107_v60 = vld [vmem:[%s9517_s7 + $0xe0] sm:$0xff]  ;;  %v3108_v46 = vld [vmem:[%s9517_s7 + $0xe8] sm:$0xff]  ;;  %s4158_s23 = scalar_lea.vmem [#allocation3], %s6447_s22  ;;  %s5096_s24 = scalar_lea.vmem [#allocation4], %s6447_s22 }
 0x223   : > { %3866 = vmatprep.subr.bf16.mxu0 %v6180_v27  ;;  %3907 = vmatprep.subr.bf16.mxu1 %v6182_v48  ;;  %v6164_v61 = vcombine.high %v3103_v57, %v3107_v60  ;;  %v6166_v6 = vcombine.high %v3104_v63, %v3108_v46  ;;  %v3095_v13 = vld [vmem:[%s9517_s7 + $0x80] sm:$0xff]  ;;  %v3096_v9 = vld [vmem:[%s9517_s7 + $0x88] sm:$0xff]  ;;  %v6163_v51 = vcombine.low %v3103_v57, %v3107_v60 }
 0x224   : > { %v3099_v59 = vld [vmem:[%s9517_s7 + $0xa0] sm:$0xff]  ;;  %v3100_v10 = vld [vmem:[%s9517_s7 + $0xa8] sm:$0xff]  ;;  %v6165_v11 = vcombine.low %v3104_v63, %v3108_v46 }
 0x225   : > { %v6156_v14 = vcombine.high %v3095_v13, %v3099_v59  ;;  %v6158_v33 = vcombine.high %v3096_v9, %v3100_v10  ;;  %v3087_v24 = vld [vmem:[%s9517_s7 + $0x40] sm:$0xff]  ;;  %v3088_v17 = vld [vmem:[%s9517_s7 + $0x48] sm:$0xff]  ;;  %v6155_v26 = vcombine.low %v3095_v13, %v3099_v59  ;;  %v6157_v16 = vcombine.low %v3096_v9, %v3100_v10 }
 0x226   : > { %3867 = vmatpush1.bf16.msra.mxu0 %v6179_v52  ;;  %3908 = vmatpush1.bf16.msra.mxu1 %v6181_v47  ;;  %v3091_v0 = vld [vmem:[%s9517_s7 + $0x60] sm:$0xff]  ;;  %v3092_v25 = vld [vmem:[%s9517_s7 + $0x68] sm:$0xff] }
 0x227   : > { %3868 = vmatprep.subr.bf16.mxu0 %v6172_v54  ;;  %3909 = vmatprep.subr.bf16.mxu1 %v6174_v55  ;;  %v6148_v28 = vcombine.high %v3087_v24, %v3091_v0  ;;  %v6150_v29 = vcombine.high %v3088_v17, %v3092_v25  ;;  %v3079_v31 = vld [vmem:[%s9517_s7] sm:$0xff]  ;;  %v3080_v34 = vld [vmem:[%s9517_s7 + $0x8] sm:$0xff]  ;;  %v6147_v35 = vcombine.low %v3087_v24, %v3091_v0 }
 0x228   : > { %v3083_v32 = vld [vmem:[%s9517_s7 + $0x20] sm:$0xff]  ;;  %v3084_v42 = vld [vmem:[%s9517_s7 + $0x28] sm:$0xff]  ;;  %v6149_v36 = vcombine.low %v3088_v17, %v3092_v25 }
 0x229   : > { %v6140_v8 = vcombine.high %v3079_v31, %v3083_v32  ;;  %v6142_v44 = vcombine.high %v3080_v34, %v3084_v42  ;;  %v3199_v53 = vld [vmem:[%s9517_s7 + $0x3c0] sm:$0xff]  ;;  %v3200_v37 = vld [vmem:[%s9517_s7 + $0x3c8] sm:$0xff]  ;;  %v6139_v40 = vcombine.low %v3079_v31, %v3083_v32  ;;  %v6141_v45 = vcombine.low %v3080_v34, %v3084_v42 }
 0x22a   : > { %3869 = vmatpush1.bf16.msra.mxu0 %v6171_v2  ;;  %3910 = vmatpush1.bf16.msra.mxu1 %v6173_v4  ;;  %v3203_v56 = vld [vmem:[%s9517_s7 + $0x3e0] sm:$0xff]  ;;  %v3204_v39 = vld [vmem:[%s9517_s7 + $0x3e8] sm:$0xff] }
 0x22b   : > { %3870 = vmatprep.subr.bf16.mxu0 %v6164_v61  ;;  %3911 = vmatprep.subr.bf16.mxu1 %v6166_v6  ;;  %v6260_v38 = vcombine.high %v3199_v53, %v3203_v56  ;;  %v6262_v27 = vcombine.high %v3200_v37, %v3204_v39  ;;  %v3191_v48 = vld [vmem:[%s9517_s7 + $0x380] sm:$0xff]  ;;  %v3192_v49 = vld [vmem:[%s9517_s7 + $0x388] sm:$0xff]  ;;  %v6259_v7 = vcombine.low %v3199_v53, %v3203_v56 }
 0x22c   : > { %v3195_v30 = vld [vmem:[%s9517_s7 + $0x3a0] sm:$0xff]  ;;  %v3196_v50 = vld [vmem:[%s9517_s7 + $0x3a8] sm:$0xff]  ;;  %v6261_v52 = vcombine.low %v3200_v37, %v3204_v39 }
 0x22d   : > { %v6252_v47 = vcombine.high %v3191_v48, %v3195_v30  ;;  %v6254_v54 = vcombine.high %v3192_v49, %v3196_v50  ;;  %v3183_v55 = vld [vmem:[%s9517_s7 + $0x340] sm:$0xff]  ;;  %v3184_v60 = vld [vmem:[%s9517_s7 + $0x348] sm:$0xff]  ;;  %v6251_v46 = vcombine.low %v3191_v48, %v3195_v30  ;;  %v6253_v2 = vcombine.low %v3192_v49, %v3196_v50 }
 0x22e   : > { %3871 = vmatpush1.bf16.msra.mxu0 %v6163_v51  ;;  %3912 = vmatpush1.bf16.msra.mxu1 %v6165_v11  ;;  %v3187_v57 = vld [vmem:[%s9517_s7 + $0x360] sm:$0xff]  ;;  %v3188_v63 = vld [vmem:[%s9517_s7 + $0x368] sm:$0xff] }
 0x22f   : > { %3872 = vmatprep.subr.bf16.mxu0 %v6156_v14  ;;  %3913 = vmatprep.subr.bf16.mxu1 %v6158_v33  ;;  %v6244_v4 = vcombine.high %v3183_v55, %v3187_v57  ;;  %v6246_v61 = vcombine.high %v3184_v60, %v3188_v63  ;;  %v3175_v6 = vld [vmem:[%s9517_s7 + $0x300] sm:$0xff]  ;;  %v3176_v59 = vld [vmem:[%s9517_s7 + $0x308] sm:$0xff]  ;;  %v6243_v10 = vcombine.low %v3183_v55, %v3187_v57  ;;  %v3141_v55 = vld [vmem:[%s9517_s7 + $0x1f0] sm:$0xff] }
 0x230   : > { %v3179_v13 = vld [vmem:[%s9517_s7 + $0x320] sm:$0xff]  ;;  %v3180_v9 = vld [vmem:[%s9517_s7 + $0x328] sm:$0xff]  ;;  %v6245_v51 = vcombine.low %v3184_v60, %v3188_v63  ;;  %v3138_v57 = vld [vmem:[%s9517_s7 + $0x1d8] sm:$0xff] }
 0x231   : > { %v6236_v11 = vcombine.high %v3175_v6, %v3179_v13  ;;  %v6238_v14 = vcombine.high %v3176_v59, %v3180_v9  ;;  %v3167_v33 = vld [vmem:[%s9517_s7 + $0x2c0] sm:$0xff]  ;;  %v3168_v0 = vld [vmem:[%s9517_s7 + $0x2c8] sm:$0xff]  ;;  %v6235_v25 = vcombine.low %v3175_v6, %v3179_v13  ;;  %v3142_v60 = vld [vmem:[%s9517_s7 + $0x1f8] sm:$0xff]  ;;  %v8347_v13 = vpack.c.bf16 %v6826_v23, %v6826_v23 }
 0x232   : > { %3873 = vmatpush1.bf16.msra.mxu0 %v6155_v26  ;;  %3914 = vmatpush1.bf16.msra.mxu1 %v6157_v16  ;;  %v3171_v24 = vld [vmem:[%s9517_s7 + $0x2e0] sm:$0xff]  ;;  %v3172_v17 = vld [vmem:[%s9517_s7 + $0x2e8] sm:$0xff]  ;;  %v6237_v26 = vcombine.low %v3176_v59, %v3180_v9  ;;  %v3133_v6 = vld [vmem:[%s9517_s7 + $0x1b0] sm:$0xff] }
 0x233   : > { %3874 = vmatprep.subr.bf16.mxu0 %v6148_v28  ;;  %3915 = vmatprep.subr.bf16.mxu1 %v6150_v29  ;;  %v6228_v16 = vcombine.high %v3167_v33, %v3171_v24  ;;  %v6230_v28 = vcombine.high %v3168_v0, %v3172_v17  ;;  %v3159_v29 = vld [vmem:[%s9517_s7 + $0x280] sm:$0xff]  ;;  %v3160_v32 = vld [vmem:[%s9517_s7 + $0x288] sm:$0xff]  ;;  %v6227_v42 = vcombine.low %v3167_v33, %v3171_v24  ;;  %v3130_v59 = vld [vmem:[%s9517_s7 + $0x198] sm:$0xff] }
 0x234   : > { %v3163_v31 = vld [vmem:[%s9517_s7 + $0x2a0] sm:$0xff]  ;;  %v3164_v34 = vld [vmem:[%s9517_s7 + $0x2a8] sm:$0xff]  ;;  %v3134_v9 = vld [vmem:[%s9517_s7 + $0x1b8] sm:$0xff] }
 0x235   : > { %v3155_v53 = vld [vmem:[%s9517_s7 + $0x260] sm:$0xff]  ;;  %v3152_v56 = vld [vmem:[%s9517_s7 + $0x248] sm:$0xff]  ;;  %v6219_v39 = vcombine.low %v3159_v29, %v3163_v31  ;;  %v3121_v33 = vld [vmem:[%s9517_s7 + $0x150] sm:$0xff] }
 0x236   : > { %3875 = vmatpush1.bf16.msra.mxu0 %v6147_v35  ;;  %3916 = vmatpush1.bf16.msra.mxu1 %v6149_v36  ;;  %v6229_v35 = vcombine.low %v3168_v0, %v3172_v17  ;;  %v6220_v36 = vcombine.high %v3159_v29, %v3163_v31  ;;  %v3156_v37 = vld [vmem:[%s9517_s7 + $0x268] sm:$0xff]  ;;  %v3147_v48 = vld [vmem:[%s9517_s7 + $0x220] sm:$0xff]  ;;  %v3125_v24 = vld [vmem:[%s9517_s7 + $0x170] sm:$0xff] }
 0x237   : > { %3876 = vmatprep.subr.bf16.mxu0 %v6140_v8  ;;  %3917 = vmatprep.subr.bf16.mxu1 %v6142_v44  ;;  %v6222_v8 = vcombine.high %v3160_v32, %v3164_v34  ;;  %v3151_v44 = vld [vmem:[%s9517_s7 + $0x240] sm:$0xff]  ;;  %v3144_v30 = vld [vmem:[%s9517_s7 + $0x208] sm:$0xff]  ;;  %v3122_v0 = vld [vmem:[%s9517_s7 + $0x158] sm:$0xff] }
 0x238   : > { %v3148_v49 = vld [vmem:[%s9517_s7 + $0x228] sm:$0xff]  ;;  %v6211_v50 = vcombine.low %v3151_v44, %v3155_v53  ;;  %v3126_v17 = vld [vmem:[%s9517_s7 + $0x178] sm:$0xff]  ;;  %v3113_v29 = vld [vmem:[%s9517_s7 + $0x110] sm:$0xff] }
 0x239   : > { %v3117_v31 = vld [vmem:[%s9517_s7 + $0x130] sm:$0xff] }
 0x23a   : > { %3877 = vmatpush1.bf16.msra.mxu0 %v6139_v40  ;;  %3918 = vmatpush1.bf16.msra.mxu1 %v6141_v45  ;;  %v6221_v40 = vcombine.low %v3160_v32, %v3164_v34  ;;  %v6212_v45 = vcombine.high %v3151_v44, %v3155_v53  ;;  %v3114_v32 = vld [vmem:[%s9517_s7 + $0x118] sm:$0xff]  ;;  %v3105_v44 = vld [vmem:[%s9517_s7 + $0xd0] sm:$0xff] }
 0x23b   : > { %3878 = vmatprep.subr.bf16.mxu0 %v6260_v38  ;;  %3919 = vmatprep.subr.bf16.mxu1 %v6262_v27  ;;  %v6214_v38 = vcombine.high %v3152_v56, %v3156_v37  ;;  %v3143_v27 = vld [vmem:[%s9517_s7 + $0x200] sm:$0xff]  ;;  %v3118_v34 = vld [vmem:[%s9517_s7 + $0x138] sm:$0xff]  ;;  %v3109_v53 = vld [vmem:[%s9517_s7 + $0xf0] sm:$0xff] }
 0x23c   : > { %v6203_v63 = vcombine.low %v3143_v27, %v3147_v48 }
 0x23e   : > { %3879 = vmatpush2.bf16.msra.mxu0 %v6259_v7  ;;  %3920 = vmatpush2.bf16.msra.mxu1 %v6261_v52  ;;  %v6213_v7 = vcombine.low %v3152_v56, %v3156_v37  ;;  %v6204_v52 = vcombine.high %v3143_v27, %v3147_v48  ;;  %v3110_v56 = vld [vmem:[%s9517_s7 + $0xf8] sm:$0xff]  ;;  %v6175_v37 = vcombine.low %v3113_v29, %v3117_v31  ;;  %v3101_v27 = vld [vmem:[%s9517_s7 + $0xb0] sm:$0xff] }
 0x23f   : > { %3880 = vmatprep.subr.bf16.mxu0 %v6252_v47  ;;  %3921 = vmatprep.subr.bf16.mxu1 %v6254_v54  ;;  %v6206_v47 = vcombine.high %v3144_v30, %v3148_v49  ;;  %v3137_v54 = vld [vmem:[%s9517_s7 + $0x1d0] sm:$0xff]  ;;  %v3098_v48 = vld [vmem:[%s9517_s7 + $0x98] sm:$0xff] }
 0x242   : > { %3881 = vmatpush2.bf16.msra.mxu0 %v6251_v46  ;;  %3922 = vmatpush2.bf16.msra.mxu1 %v6253_v2  ;;  %v6205_v46 = vcombine.low %v3144_v30, %v3148_v49  ;;  %v6200_v2 = vcombine.high %v3137_v54, %v3141_v55  ;;  %v3102_v30 = vld [vmem:[%s9517_s7 + $0xb8] sm:$0xff]  ;;  %v6167_v49 = vcombine.low %v3105_v44, %v3109_v53 }
 0x243   : > { %3882 = vmatprep.subr.bf16.mxu0 %v6244_v4  ;;  %3923 = vmatprep.subr.bf16.mxu1 %v6246_v61  ;;  %v6202_v4 = vcombine.high %v3138_v57, %v3142_v60  ;;  %v3129_v61 = vld [vmem:[%s9517_s7 + $0x190] sm:$0xff] }
 0x246   : > { %3883 = vmatpush2.bf16.msra.mxu0 %v6243_v10  ;;  %3924 = vmatpush2.bf16.msra.mxu1 %v6245_v51  ;;  %v6199_v10 = vcombine.low %v3137_v54, %v3141_v55  ;;  %v6201_v51 = vcombine.low %v3138_v57, %v3142_v60  ;;  %v3093_v54 = vld [vmem:[%s9517_s7 + $0x70] sm:$0xff]  ;;  %v3090_v55 = vld [vmem:[%s9517_s7 + $0x58] sm:$0xff] }
 0x247   : > { %3884 = vmatprep.subr.bf16.mxu0 %v6236_v11  ;;  %3925 = vmatprep.subr.bf16.mxu1 %v6238_v14  ;;  %v6192_v11 = vcombine.high %v3129_v61, %v3133_v6  ;;  %v6194_v14 = vcombine.high %v3130_v59, %v3134_v9  ;;  %v3094_v57 = vld [vmem:[%s9517_s7 + $0x78] sm:$0xff] }
 0x24a   : > { %3885 = vmatpush2.bf16.msra.mxu0 %v6235_v25  ;;  %3926 = vmatpush2.bf16.msra.mxu1 %v6237_v26  ;;  %v6191_v25 = vcombine.low %v3129_v61, %v3133_v6  ;;  %v6193_v26 = vcombine.low %v3130_v59, %v3134_v9  ;;  %v3085_v61 = vld [vmem:[%s9517_s7 + $0x30] sm:$0xff]  ;;  %v3082_v6 = vld [vmem:[%s9517_s7 + $0x18] sm:$0xff] }
 0x24b   : > { %3886 = vmatprep.subr.bf16.mxu0 %v6228_v16  ;;  %3927 = vmatprep.subr.bf16.mxu1 %v6230_v28  ;;  %v6184_v16 = vcombine.high %v3121_v33, %v3125_v24  ;;  %v6186_v28 = vcombine.high %v3122_v0, %v3126_v17  ;;  %v3086_v59 = vld [vmem:[%s9517_s7 + $0x38] sm:$0xff] }
 0x24e   : > { %3887 = vmatpush2.bf16.msra.mxu0 %v6227_v42  ;;  %3928 = vmatpush2.bf16.msra.mxu1 %v6229_v35  ;;  %v6183_v42 = vcombine.low %v3121_v33, %v3125_v24  ;;  %v6185_v35 = vcombine.low %v3122_v0, %v3126_v17  ;;  %v3201_v33 = vld [vmem:[%s9517_s7 + $0x3d0] sm:$0xff]  ;;  %v6834_v0 = vmov 0   ;;  %v3202_v17 = vld [vmem:[%s9517_s7 + $0x3d8] sm:$0xff] }
 0x24f   : > { %3888 = vmatprep.subr.bf16.mxu0 %v6220_v36  ;;  %3929 = vmatprep.subr.bf16.mxu1 %v6222_v8  ;;  %v6176_v36 = vcombine.high %v3113_v29, %v3117_v31  ;;  %v6178_v8 = vcombine.high %v3114_v32, %v3118_v34  ;;  %v3205_v24 = vld [vmem:[%s9517_s7 + $0x3f0] sm:$0xff] }
 0x250   : > { %6677 = vset.pattern.permute.xlu0 %v6834_v0  ;;  %v6264_v29 = vcombine.high %v3201_v33, %v3205_v24 }
 0x252   : > { %3889 = vmatpush2.bf16.msra.mxu0 %v6219_v39  ;;  %3930 = vmatpush2.bf16.msra.mxu1 %v6221_v40  ;;  %v6177_v39 = vcombine.low %v3114_v32, %v3118_v34  ;;  %v6168_v40 = vcombine.high %v3105_v44, %v3109_v53  ;;  %v3193_v32 = vld [vmem:[%s9517_s7 + $0x390] sm:$0xff] }
 0x253   : > { %3890 = vmatprep.subr.bf16.mxu0 %v6212_v45  ;;  %3931 = vmatprep.subr.bf16.mxu1 %v6214_v38  ;;  %v3097_v38 = vld [vmem:[%s9517_s7 + $0x90] sm:$0xff] }
 0x254   : > { %v6159_v60 = vcombine.low %v3097_v38, %v3101_v27  ;;  %v3197_v34 = vld [vmem:[%s9517_s7 + $0x3b0] sm:$0xff] }
 0x255   : > { %v6256_v44 = vcombine.high %v3193_v32, %v3197_v34 }
 0x256   : > { %3891 = vmatpush2.bf16.msra.mxu0 %v6211_v50  ;;  %3932 = vmatpush2.bf16.msra.mxu1 %v6213_v7  ;;  %v6160_v7 = vcombine.high %v3097_v38, %v3101_v27 }
 0x257   : > { %3892 = vmatprep.subr.bf16.mxu0 %v6204_v52  ;;  %3933 = vmatprep.subr.bf16.mxu1 %v6206_v47  ;;  %v6162_v52 = vcombine.high %v3098_v48, %v3102_v30  ;;  %v3089_v47 = vld [vmem:[%s9517_s7 + $0x50] sm:$0xff] }
 0x258   : > { %v6151_v9 = vcombine.low %v3089_v47, %v3093_v54 }
 0x25a   : > { %3893 = vmatpush2.bf16.msra.mxu0 %v6203_v63  ;;  %3934 = vmatpush2.bf16.msra.mxu1 %v6205_v46  ;;  %v6161_v63 = vcombine.low %v3098_v48, %v3102_v30  ;;  %v6152_v46 = vcombine.high %v3089_v47, %v3093_v54  ;;  %v3177_v48 = vld [vmem:[%s9517_s7 + $0x310] sm:$0xff] }
 0x25b   : > { %3944 = vmatprep.subr.bf16.mxu0 %v6200_v2  ;;  %3985 = vmatprep.subr.bf16.mxu1 %v6202_v4  ;;  %v6154_v2 = vcombine.high %v3090_v55, %v3094_v57  ;;  %v3081_v4 = vld [vmem:[%s9517_s7 + $0x10] sm:$0xff] }
 0x25c   : > { %v3181_v30 = vld [vmem:[%s9517_s7 + $0x330] sm:$0xff] }
 0x25d   : > { %3895 = vmatmul.mubr.bf16.vlgmr.msra.gmra.mxu0 %v8347_v13  ;;  %3936 = vmatmul.mubr.bf16.vlgmr.msra.gmra.mxu1 %v8347_v13  ;;  %v6240_v47 = vcombine.high %v3177_v48, %v3181_v30 }
 0x25e   : > { %3945 = vmatpush1.bf16.msra.mxu0 %v6199_v10  ;;  %3986 = vmatpush1.bf16.msra.mxu1 %v6201_v51  ;;  %v6153_v10 = vcombine.low %v3090_v55, %v3094_v57  ;;  %v6144_v51 = vcombine.high %v3081_v4, %v3085_v61  ;;  %v3169_v55 = vld [vmem:[%s9517_s7 + $0x2d0] sm:$0xff] }
 0x25f   : > { %3946 = vmatprep.subr.bf16.mxu0 %v6192_v11  ;;  %3987 = vmatprep.subr.bf16.mxu1 %v6194_v14  ;;  %v5071_v11 = vstv %s6830_s0  ;;  %v6146_v14 = vcombine.high %v3082_v6, %v3086_v59  ;;  %v3173_v57 = vld [vmem:[%s9517_s7 + $0x2f0] sm:$0xff]  ;;  %s3064_s0 = sadd.s32 1, %s6830_s0  }
 0x260   : > { %3976 = vmatprep.mubr.bf16.mxu0 %v8167_v41  ;;  %4017 = vmatprep.mubr.bf16.mxu1 %v8167_v41  ;;  %v3106_v41 = vld [vmem:[%s9517_s7 + $0xd8] sm:$0xff]  ;;  %vm5072_vm2 = vcmp.lt.s32.totalorder %v5071_v11, %v8054_v20  ;;  %p3063_p1 = scmp.ge.s32.totalorder %s3064_s0, %s9535_s3 }
 0x261   : > { %v6170_v45 = vcombine.high %v3106_v41, %v3110_v56  ;;  %v6169_v50 = vcombine.low %v3106_v41, %v3110_v56  ;;  %v3185_v41 = vld [vmem:[%s9517_s7 + $0x350] sm:$0xff] }
 0x262   : > { %3947 = vmatpush1.bf16.msra.mxu0 %v6191_v25  ;;  %3988 = vmatpush1.bf16.msra.mxu1 %v6193_v26  ;;  %v3206_v25 = vld [vmem:[%s9517_s7 + $0x3f8] sm:$0xff]  ;;  %v5075_v26 = vsel %vm5072_vm2, 1, %v6834_v0  ;;  %v3189_v56 = vld [vmem:[%s9517_s7 + $0x370] sm:$0xff] }
 0x263   : > { %3948 = vmatprep.subr.bf16.mxu0 %v6184_v16  ;;  %3989 = vmatprep.subr.bf16.mxu1 %v6186_v28  ;;  %v6143_v16 = vcombine.low %v3081_v4, %v3085_v61  ;;  %v6145_v28 = vcombine.low %v3082_v6, %v3086_v59  ;;  %v6266_v31 = vcombine.high %v3202_v17, %v3206_v25  ;;  %v3161_v6 = vld [vmem:[%s9517_s7 + $0x290] sm:$0xff] }
 0x264   : > { %5077 = vperm.xlu0 %6677, %v5075_v26   ;;  %v6248_v38 = vcombine.high %v3185_v41, %v3189_v56  ;;  %v6232_v4 = vcombine.high %v3169_v55, %v3173_v57  ;;  %v3165_v59 = vld [vmem:[%s9517_s7 + $0x2b0] sm:$0xff]  ;;  %v3158_v26 = vld [vmem:[%s9517_s7 + $0x278] sm:$0xff] }
 0x266   : > { %3949 = vmatpush1.bf16.msra.mxu0 %v6183_v42  ;;  %3990 = vmatpush1.bf16.msra.mxu1 %v6185_v35  ;;  %v3194_v42 = vld [vmem:[%s9517_s7 + $0x398] sm:$0xff] }
 0x267   : > { %3950 = vmatprep.subr.bf16.mxu0 %v6176_v36  ;;  %3991 = vmatprep.subr.bf16.mxu1 %v6178_v8  ;;  %v3198_v35 = vld [vmem:[%s9517_s7 + $0x3b8] sm:$0xff]  ;;  %v6263_v36 = vcombine.low %v3201_v33, %v3205_v24  ;;  %v6265_v8 = vcombine.low %v3202_v17, %v3206_v25  ;;  %v3153_v24 = vld [vmem:[%s9517_s7 + $0x250] sm:$0xff] }
 0x268   : > { %v6258_v53 = vcombine.high %v3194_v42, %v3198_v35  ;;  %v3157_v17 = vld [vmem:[%s9517_s7 + $0x270] sm:$0xff]  ;;  %v3154_v25 = vld [vmem:[%s9517_s7 + $0x258] sm:$0xff] }
 0x26a   : > { %3951 = vmatpush1.bf16.msra.mxu0 %v6175_v37  ;;  %3992 = vmatpush1.bf16.msra.mxu1 %v6177_v39  ;;  %v3186_v37 = vld [vmem:[%s9517_s7 + $0x358] sm:$0xff] }
 0x26b   : > { %3952 = vmatprep.subr.bf16.mxu0 %v6168_v40  ;;  %3993 = vmatprep.subr.bf16.mxu1 %v6170_v45  ;;  %v3190_v39 = vld [vmem:[%s9517_s7 + $0x378] sm:$0xff]  ;;  %v6255_v40 = vcombine.low %v3193_v32, %v3197_v34  ;;  %v6257_v45 = vcombine.low %v3194_v42, %v3198_v35  ;;  %v3145_v32 = vld [vmem:[%s9517_s7 + $0x210] sm:$0xff] }
 0x26c   : > { %v6250_v27 = vcombine.high %v3186_v37, %v3190_v39  ;;  %v3149_v34 = vld [vmem:[%s9517_s7 + $0x230] sm:$0xff]  ;;  %v3146_v42 = vld [vmem:[%s9517_s7 + $0x218] sm:$0xff] }
 0x26d   : > { %v3150_v35 = vld [vmem:[%s9517_s7 + $0x238] sm:$0xff] }
 0x26e   : > { %3953 = vmatpush1.bf16.msra.mxu0 %v6167_v49  ;;  %3994 = vmatpush1.bf16.msra.mxu1 %v6169_v50  ;;  %v3178_v49 = vld [vmem:[%s9517_s7 + $0x318] sm:$0xff] }
 0x26f   : > { %3954 = vmatprep.subr.bf16.mxu0 %v6160_v7  ;;  %3995 = vmatprep.subr.bf16.mxu1 %v6162_v52  ;;  %v3182_v50 = vld [vmem:[%s9517_s7 + $0x338] sm:$0xff]  ;;  %v6247_v7 = vcombine.low %v3185_v41, %v3189_v56  ;;  %v6249_v52 = vcombine.low %v3186_v37, %v3190_v39  ;;  %v4084_v41 = vld [vmem:[%s9518_s8 + $0x1c0] sm:$0xff]  ;;  %v4085_v37 = vld [vmem:[%s9518_s8 + $0x1c8] sm:$0xff] }
 0x270   : > { %v6242_v54 = vcombine.high %v3178_v49, %v3182_v50  ;;  %v4088_v56 = vld [vmem:[%s9518_s8 + $0x1e0] sm:$0xff]  ;;  %v4089_v39 = vld [vmem:[%s9518_s8 + $0x1e8] sm:$0xff] }
 0x272   : > { %3955 = vmatpush1.bf16.msra.mxu0 %v6159_v60  ;;  %3996 = vmatpush1.bf16.msra.mxu1 %v6161_v63  ;;  %v3170_v60 = vld [vmem:[%s9517_s7 + $0x2d8] sm:$0xff] }
 0x273   : > { %3956 = vmatprep.subr.bf16.mxu0 %v6152_v46  ;;  %3997 = vmatprep.subr.bf16.mxu1 %v6154_v2  ;;  %v3174_v63 = vld [vmem:[%s9517_s7 + $0x2f8] sm:$0xff]  ;;  %v6239_v46 = vcombine.low %v3177_v48, %v3181_v30  ;;  %v6241_v2 = vcombine.low %v3178_v49, %v3182_v50  ;;  %v4076_v48 = vld [vmem:[%s9518_s8 + $0x180] sm:$0xff]  ;;  %v4077_v49 = vld [vmem:[%s9518_s8 + $0x188] sm:$0xff] }
 0x274   : > { %v6234_v61 = vcombine.high %v3170_v60, %v3174_v63  ;;  %v6233_v11 = vcombine.low %v3170_v60, %v3174_v63  ;;  %v4080_v30 = vld [vmem:[%s9518_s8 + $0x1a0] sm:$0xff]  ;;  %v4081_v50 = vld [vmem:[%s9518_s8 + $0x1a8] sm:$0xff]  ;;  %v8563_v60 = vpack.c.bf16 %v6806_v15, %v6806_v15 }
 0x275   : > { %v4069_v63 = vld [vmem:[%s9518_s8 + $0x148] sm:$0xff] }
 0x276   : > { %3957 = vmatpush1.bf16.msra.mxu0 %v6151_v9  ;;  %3998 = vmatpush1.bf16.msra.mxu1 %v6153_v10  ;;  %v3162_v9 = vld [vmem:[%s9517_s7 + $0x298] sm:$0xff] }
 0x277   : > { %3958 = vmatprep.subr.bf16.mxu0 %v6144_v51  ;;  %3999 = vmatprep.subr.bf16.mxu1 %v6146_v14  ;;  %v3166_v10 = vld [vmem:[%s9517_s7 + $0x2b8] sm:$0xff]  ;;  %v6231_v51 = vcombine.low %v3169_v55, %v3173_v57  ;;  %v6224_v14 = vcombine.high %v3161_v6, %v3165_v59  ;;  %v4068_v55 = vld [vmem:[%s9518_s8 + $0x140] sm:$0xff] }
 0x278   : > { %v6226_v33 = vcombine.high %v3162_v9, %v3166_v10  ;;  %v4072_v57 = vld [vmem:[%s9518_s8 + $0x160] sm:$0xff] }
 0x27a   : > { %3959 = vmatpush1.bf16.msra.mxu0 %v6143_v16  ;;  %4000 = vmatpush1.bf16.msra.mxu1 %v6145_v28  ;;  %v6223_v16 = vcombine.low %v3161_v6, %v3165_v59  ;;  %v6225_v28 = vcombine.low %v3162_v9, %v3166_v10  ;;  %v4060_v59 = vld [vmem:[%s9518_s8 + $0x100] sm:$0xff]  ;;  %v4065_v10 = vld [vmem:[%s9518_s8 + $0x128] sm:$0xff] }
 0x27b   : > { %3960 = vmatprep.subr.bf16.mxu0 %v6264_v29  ;;  %4001 = vmatprep.subr.bf16.mxu1 %v6266_v31  ;;  %v6216_v29 = vcombine.high %v3153_v24, %v3157_v17  ;;  %v6218_v31 = vcombine.high %v3154_v25, %v3158_v26  ;;  %v4064_v9 = vld [vmem:[%s9518_s8 + $0x120] sm:$0xff] }
 0x27e   : > { %3961 = vmatpush2.bf16.msra.mxu0 %v6263_v36  ;;  %4002 = vmatpush2.bf16.msra.mxu1 %v6265_v8  ;;  %v6215_v36 = vcombine.low %v3153_v24, %v3157_v17  ;;  %v6217_v8 = vcombine.low %v3154_v25, %v3158_v26  ;;  %v4052_v24 = vld [vmem:[%s9518_s8 + $0xc0] sm:$0xff]  ;;  %v4053_v25 = vld [vmem:[%s9518_s8 + $0xc8] sm:$0xff] }
 0x27f   : > { %3962 = vmatprep.subr.bf16.mxu0 %v6256_v44  ;;  %4003 = vmatprep.subr.bf16.mxu1 %v6258_v53  ;;  %v6208_v44 = vcombine.high %v3145_v32, %v3149_v34  ;;  %v6210_v53 = vcombine.high %v3146_v42, %v3150_v35  ;;  %v4056_v17 = vld [vmem:[%s9518_s8 + $0xe0] sm:$0xff]  ;;  %v4057_v26 = vld [vmem:[%s9518_s8 + $0xe8] sm:$0xff] }
 0x282   : > { %3963 = vmatpush2.bf16.msra.mxu0 %v6255_v40  ;;  %4004 = vmatpush2.bf16.msra.mxu1 %v6257_v45  ;;  %v6207_v40 = vcombine.low %v3145_v32, %v3149_v34  ;;  %v6209_v45 = vcombine.low %v3146_v42, %v3150_v35  ;;  %v4044_v32 = vld [vmem:[%s9518_s8 + $0x80] sm:$0xff]  ;;  %v4045_v42 = vld [vmem:[%s9518_s8 + $0x88] sm:$0xff] }
 0x283   : > { %3964 = vmatprep.subr.bf16.mxu0 %v6248_v38  ;;  %4005 = vmatprep.subr.bf16.mxu1 %v6250_v27  ;;  %v6326_v38 = vcombine.high %v4084_v41, %v4088_v56  ;;  %v6328_v27 = vcombine.high %v4085_v37, %v4089_v39  ;;  %v4048_v34 = vld [vmem:[%s9518_s8 + $0xa0] sm:$0xff]  ;;  %v4049_v35 = vld [vmem:[%s9518_s8 + $0xa8] sm:$0xff] }
 0x286   : > { %3965 = vmatpush2.bf16.msra.mxu0 %v6247_v7  ;;  %4006 = vmatpush2.bf16.msra.mxu1 %v6249_v52  ;;  %v6325_v7 = vcombine.low %v4084_v41, %v4088_v56  ;;  %v6327_v52 = vcombine.low %v4085_v37, %v4089_v39  ;;  %v4036_v41 = vld [vmem:[%s9518_s8 + $0x40] sm:$0xff]  ;;  %v4037_v37 = vld [vmem:[%s9518_s8 + $0x48] sm:$0xff] }
 0x287   : > { %3966 = vmatprep.subr.bf16.mxu0 %v6240_v47  ;;  %4007 = vmatprep.subr.bf16.mxu1 %v6242_v54  ;;  %v6318_v47 = vcombine.high %v4076_v48, %v4080_v30  ;;  %v6320_v54 = vcombine.high %v4077_v49, %v4081_v50  ;;  %v4040_v56 = vld [vmem:[%s9518_s8 + $0x60] sm:$0xff]  ;;  %v4041_v39 = vld [vmem:[%s9518_s8 + $0x68] sm:$0xff] }
 0x28a   : > { %3967 = vmatpush2.bf16.msra.mxu0 %v6239_v46  ;;  %4008 = vmatpush2.bf16.msra.mxu1 %v6241_v2  ;;  %v4073_v46 = vld [vmem:[%s9518_s8 + $0x168] sm:$0xff]  ;;  %v6317_v2 = vcombine.low %v4076_v48, %v4080_v30  ;;  %v4028_v48 = vld [vmem:[%s9518_s8] sm:$0xff] }
 0x28b   : > { %3968 = vmatprep.subr.bf16.mxu0 %v6232_v4  ;;  %4009 = vmatprep.subr.bf16.mxu1 %v6234_v61  ;;  %v6319_v4 = vcombine.low %v4077_v49, %v4081_v50  ;;  %v6310_v61 = vcombine.high %v4068_v55, %v4072_v57  ;;  %v6312_v6 = vcombine.high %v4069_v63, %v4073_v46  ;;  %v4032_v30 = vld [vmem:[%s9518_s8 + $0x20] sm:$0xff]  ;;  %v4029_v49 = vld [vmem:[%s9518_s8 + $0x8] sm:$0xff] }
 0x28c   : > { %v4033_v50 = vld [vmem:[%s9518_s8 + $0x28] sm:$0xff] }
 0x28e   : > { %3969 = vmatpush2.bf16.msra.mxu0 %v6231_v51  ;;  %4010 = vmatpush2.bf16.msra.mxu1 %v6233_v11  ;;  %v6309_v51 = vcombine.low %v4068_v55, %v4072_v57  ;;  %v6311_v11 = vcombine.low %v4069_v63, %v4073_v46  ;;  %v4148_v55 = vld [vmem:[%s9518_s8 + $0x3c0] sm:$0xff]  ;;  %v4149_v63 = vld [vmem:[%s9518_s8 + $0x3c8] sm:$0xff] }
 0x28f   : > { %3970 = vmatprep.subr.bf16.mxu0 %v6224_v14  ;;  %4011 = vmatprep.subr.bf16.mxu1 %v6226_v33  ;;  %v6302_v14 = vcombine.high %v4060_v59, %v4064_v9  ;;  %v4152_v57 = vld [vmem:[%s9518_s8 + $0x3e0] sm:$0xff]  ;;  %v4153_v46 = vld [vmem:[%s9518_s8 + $0x3e8] sm:$0xff] }
 0x292   : > { %3971 = vmatpush2.bf16.msra.mxu0 %v6223_v16  ;;  %4012 = vmatpush2.bf16.msra.mxu1 %v6225_v28  ;;  %v6301_v16 = vcombine.low %v4060_v59, %v4064_v9  ;;  %v4140_v59 = vld [vmem:[%s9518_s8 + $0x380] sm:$0xff] }
 0x293   : > { %3972 = vmatprep.subr.bf16.mxu0 %v6216_v29  ;;  %4013 = vmatprep.subr.bf16.mxu1 %v6218_v31  ;;  %v6294_v29 = vcombine.high %v4052_v24, %v4056_v17  ;;  %v6296_v31 = vcombine.high %v4053_v25, %v4057_v26  ;;  %v4144_v9 = vld [vmem:[%s9518_s8 + $0x3a0] sm:$0xff] }
 0x296   : > { %3973 = vmatpush2.bf16.msra.mxu0 %v6215_v36  ;;  %4014 = vmatpush2.bf16.msra.mxu1 %v6217_v8  ;;  %v6293_v36 = vcombine.low %v4052_v24, %v4056_v17  ;;  %v6295_v8 = vcombine.low %v4053_v25, %v4057_v26  ;;  %v4132_v24 = vld [vmem:[%s9518_s8 + $0x340] sm:$0xff]  ;;  %v4133_v25 = vld [vmem:[%s9518_s8 + $0x348] sm:$0xff] }
 0x297   : > { %3974 = vmatprep.subr.bf16.mxu0 %v6208_v44  ;;  %4015 = vmatprep.subr.bf16.mxu1 %v6210_v53  ;;  %v6286_v44 = vcombine.high %v4044_v32, %v4048_v34  ;;  %v6288_v53 = vcombine.high %v4045_v42, %v4049_v35  ;;  %v4136_v17 = vld [vmem:[%s9518_s8 + $0x360] sm:$0xff]  ;;  %v4137_v26 = vld [vmem:[%s9518_s8 + $0x368] sm:$0xff] }
 0x29a   : > { %3975 = vmatpush2.bf16.msra.mxu0 %v6207_v40  ;;  %4016 = vmatpush2.bf16.msra.mxu1 %v6209_v45  ;;  %v6285_v40 = vcombine.low %v4044_v32, %v4048_v34  ;;  %v6287_v45 = vcombine.low %v4045_v42, %v4049_v35  ;;  %v4124_v32 = vld [vmem:[%s9518_s8 + $0x300] sm:$0xff]  ;;  %v4125_v42 = vld [vmem:[%s9518_s8 + $0x308] sm:$0xff] }
 0x29b   : > { %4811 = vmatprep.subr.bf16.mxu0 %v6326_v38  ;;  %4852 = vmatprep.subr.bf16.mxu1 %v6328_v27  ;;  %v6278_v38 = vcombine.high %v4036_v41, %v4040_v56  ;;  %v6280_v27 = vcombine.high %v4037_v37, %v4041_v39  ;;  %v4128_v34 = vld [vmem:[%s9518_s8 + $0x320] sm:$0xff]  ;;  %v4129_v35 = vld [vmem:[%s9518_s8 + $0x328] sm:$0xff] }
 0x29d   : > { %3977 = vmatmul.mubr.bf16.vlgmr.msra.gmra.mxu0 %v8347_v13  ;;  %4018 = vmatmul.mubr.bf16.vlgmr.msra.gmra.mxu1 %v8347_v13  ;;  %v4061_v13 = vld [vmem:[%s9518_s8 + $0x108] sm:$0xff] }
 0x29e   : > { %4812 = vmatpush1.bf16.msra.mxu0 %v6325_v7  ;;  %4853 = vmatpush1.bf16.msra.mxu1 %v6327_v52  ;;  %v6304_v33 = vcombine.high %v4061_v13, %v4065_v10  ;;  %v6303_v28 = vcombine.low %v4061_v13, %v4065_v10  ;;  %v6277_v7 = vcombine.low %v4036_v41, %v4040_v56  ;;  %v4141_v13 = vld [vmem:[%s9518_s8 + $0x388] sm:$0xff]  ;;  %v4116_v41 = vld [vmem:[%s9518_s8 + $0x2c0] sm:$0xff] }
 0x29f   : > { %4813 = vmatprep.subr.bf16.mxu0 %v6318_v47  ;;  %4854 = vmatprep.subr.bf16.mxu1 %v6320_v54  ;;  %v6279_v52 = vcombine.low %v4037_v37, %v4041_v39  ;;  %v6270_v47 = vcombine.high %v4028_v48, %v4032_v30  ;;  %v6272_v54 = vcombine.high %v4029_v49, %v4033_v50  ;;  %v4145_v10 = vld [vmem:[%s9518_s8 + $0x3a8] sm:$0xff]  ;;  %v4120_v56 = vld [vmem:[%s9518_s8 + $0x2e0] sm:$0xff] }
 0x2a0   : > { %4843 = vmatprep.mubr.bf16.mxu0 %v8563_v60  ;;  %4884 = vmatprep.mubr.bf16.mxu1 %v8563_v60  ;;  %v4117_v37 = vld [vmem:[%s9518_s8 + $0x2c8] sm:$0xff] }
 0x2a1   : > { %v4121_v39 = vld [vmem:[%s9518_s8 + $0x2e8] sm:$0xff] }
 0x2a2   : > { %4814 = vmatpush1.bf16.msra.mxu0 %v6317_v2  ;;  %4855 = vmatpush1.bf16.msra.mxu1 %v6319_v4  ;;  %v6269_v2 = vcombine.low %v4028_v48, %v4032_v30  ;;  %v6271_v4 = vcombine.low %v4029_v49, %v4033_v50  ;;  %v4108_v48 = vld [vmem:[%s9518_s8 + $0x280] sm:$0xff]  ;;  %v4109_v49 = vld [vmem:[%s9518_s8 + $0x288] sm:$0xff] }
 0x2a3   : > { %4815 = vmatprep.subr.bf16.mxu0 %v6310_v61  ;;  %4856 = vmatprep.subr.bf16.mxu1 %v6312_v6  ;;  %v6390_v61 = vcombine.high %v4148_v55, %v4152_v57  ;;  %v6392_v6 = vcombine.high %v4149_v63, %v4153_v46  ;;  %v4112_v30 = vld [vmem:[%s9518_s8 + $0x2a0] sm:$0xff]  ;;  %v4113_v50 = vld [vmem:[%s9518_s8 + $0x2a8] sm:$0xff] }
 0x2a6   : > { %4816 = vmatpush1.bf16.msra.mxu0 %v6309_v51  ;;  %4857 = vmatpush1.bf16.msra.mxu1 %v6311_v11  ;;  %v6389_v51 = vcombine.low %v4148_v55, %v4152_v57  ;;  %v6391_v11 = vcombine.low %v4149_v63, %v4153_v46  ;;  %v4100_v55 = vld [vmem:[%s9518_s8 + $0x240] sm:$0xff]  ;;  %v4101_v63 = vld [vmem:[%s9518_s8 + $0x248] sm:$0xff] }
 0x2a7   : > { %4817 = vmatprep.subr.bf16.mxu0 %v6302_v14  ;;  %4858 = vmatprep.subr.bf16.mxu1 %v6304_v33  ;;  %v6382_v14 = vcombine.high %v4140_v59, %v4144_v9  ;;  %v6384_v33 = vcombine.high %v4141_v13, %v4145_v10  ;;  %v4104_v57 = vld [vmem:[%s9518_s8 + $0x260] sm:$0xff]  ;;  %v4105_v46 = vld [vmem:[%s9518_s8 + $0x268] sm:$0xff] }
 0x2aa   : > { %4818 = vmatpush1.bf16.msra.mxu0 %v6301_v16  ;;  %4859 = vmatpush1.bf16.msra.mxu1 %v6303_v28  ;;  %v6381_v16 = vcombine.low %v4140_v59, %v4144_v9  ;;  %v6383_v28 = vcombine.low %v4141_v13, %v4145_v10  ;;  %v4092_v59 = vld [vmem:[%s9518_s8 + $0x200] sm:$0xff]  ;;  %v4093_v13 = vld [vmem:[%s9518_s8 + $0x208] sm:$0xff] }
 0x2ab   : > { %4819 = vmatprep.subr.bf16.mxu0 %v6294_v29  ;;  %4860 = vmatprep.subr.bf16.mxu1 %v6296_v31  ;;  %v6374_v29 = vcombine.high %v4132_v24, %v4136_v17  ;;  %v6376_v31 = vcombine.high %v4133_v25, %v4137_v26  ;;  %v4096_v9 = vld [vmem:[%s9518_s8 + $0x220] sm:$0xff]  ;;  %v4097_v10 = vld [vmem:[%s9518_s8 + $0x228] sm:$0xff] }
 0x2ae   : > { %4820 = vmatpush1.bf16.msra.mxu0 %v6293_v36  ;;  %4861 = vmatpush1.bf16.msra.mxu1 %v6295_v8  ;;  %v6373_v36 = vcombine.low %v4132_v24, %v4136_v17  ;;  %v6375_v8 = vcombine.low %v4133_v25, %v4137_v26  ;;  %v4086_v24 = vld [vmem:[%s9518_s8 + $0x1d0] sm:$0xff]  ;;  %v4087_v25 = vld [vmem:[%s9518_s8 + $0x1d8] sm:$0xff] }
 0x2af   : > { %4821 = vmatprep.subr.bf16.mxu0 %v6286_v44  ;;  %4862 = vmatprep.subr.bf16.mxu1 %v6288_v53  ;;  %v6366_v44 = vcombine.high %v4124_v32, %v4128_v34  ;;  %v6368_v53 = vcombine.high %v4125_v42, %v4129_v35  ;;  %v4090_v17 = vld [vmem:[%s9518_s8 + $0x1f0] sm:$0xff]  ;;  %v4091_v26 = vld [vmem:[%s9518_s8 + $0x1f8] sm:$0xff] }
 0x2b2   : > { %4822 = vmatpush1.bf16.msra.mxu0 %v6285_v40  ;;  %4863 = vmatpush1.bf16.msra.mxu1 %v6287_v45  ;;  %v6365_v40 = vcombine.low %v4124_v32, %v4128_v34  ;;  %v6367_v45 = vcombine.low %v4125_v42, %v4129_v35  ;;  %v4078_v32 = vld [vmem:[%s9518_s8 + $0x190] sm:$0xff]  ;;  %v8751_v42 = vpack.c.bf16 %v6810_v19, %v6810_v19  ;;  %v4079_v35 = vld [vmem:[%s9518_s8 + $0x198] sm:$0xff] }
 0x2b3   : > { %4823 = vmatprep.subr.bf16.mxu0 %v6278_v38  ;;  %4864 = vmatprep.subr.bf16.mxu1 %v6280_v27  ;;  %v6358_v38 = vcombine.high %v4116_v41, %v4120_v56  ;;  %v6360_v27 = vcombine.high %v4117_v37, %v4121_v39  ;;  %v4082_v34 = vld [vmem:[%s9518_s8 + $0x1b0] sm:$0xff] }
 0x2b6   : > { %4824 = vmatpush1.bf16.msra.mxu0 %v6277_v7  ;;  %4865 = vmatpush1.bf16.msra.mxu1 %v6279_v52  ;;  %v6357_v7 = vcombine.low %v4116_v41, %v4120_v56  ;;  %v6359_v52 = vcombine.low %v4117_v37, %v4121_v39  ;;  %v4070_v56 = vld [vmem:[%s9518_s8 + $0x150] sm:$0xff]  ;;  %v4071_v39 = vld [vmem:[%s9518_s8 + $0x158] sm:$0xff] }
 0x2b7   : > { %4825 = vmatprep.subr.bf16.mxu0 %v6270_v47  ;;  %4866 = vmatprep.subr.bf16.mxu1 %v6272_v54  ;;  %v6350_v47 = vcombine.high %v4108_v48, %v4112_v30  ;;  %v6352_v54 = vcombine.high %v4109_v49, %v4113_v50  ;;  %v4074_v37 = vld [vmem:[%s9518_s8 + $0x170] sm:$0xff] }
 0x2ba   : > { %4826 = vmatpush1.bf16.msra.mxu0 %v6269_v2  ;;  %4867 = vmatpush1.bf16.msra.mxu1 %v6271_v4  ;;  %v6349_v2 = vcombine.low %v4108_v48, %v4112_v30  ;;  %v6351_v4 = vcombine.low %v4109_v49, %v4113_v50  ;;  %v4062_v30 = vld [vmem:[%s9518_s8 + $0x110] sm:$0xff]  ;;  %v4063_v50 = vld [vmem:[%s9518_s8 + $0x118] sm:$0xff] }
 0x2bb   : > { %4827 = vmatprep.subr.bf16.mxu0 %v6390_v61  ;;  %4868 = vmatprep.subr.bf16.mxu1 %v6392_v6  ;;  %v6342_v61 = vcombine.high %v4100_v55, %v4104_v57  ;;  %v6344_v6 = vcombine.high %v4101_v63, %v4105_v46  ;;  %v4066_v49 = vld [vmem:[%s9518_s8 + $0x130] sm:$0xff] }
 0x2be   : > { %4828 = vmatpush2.bf16.msra.mxu0 %v6389_v51  ;;  %4869 = vmatpush2.bf16.msra.mxu1 %v6391_v11  ;;  %v6341_v51 = vcombine.low %v4100_v55, %v4104_v57  ;;  %v6343_v11 = vcombine.low %v4101_v63, %v4105_v46  ;;  %v4054_v57 = vld [vmem:[%s9518_s8 + $0xd0] sm:$0xff]  ;;  %v4059_v46 = vld [vmem:[%s9518_s8 + $0xf8] sm:$0xff] }
 0x2bf   : > { %4829 = vmatprep.subr.bf16.mxu0 %v6382_v14  ;;  %4870 = vmatprep.subr.bf16.mxu1 %v6384_v33  ;;  %v6334_v14 = vcombine.high %v4092_v59, %v4096_v9  ;;  %v6336_v33 = vcombine.high %v4093_v13, %v4097_v10  ;;  %v4058_v63 = vld [vmem:[%s9518_s8 + $0xf0] sm:$0xff] }
 0x2c2   : > { %4830 = vmatpush2.bf16.msra.mxu0 %v6381_v16  ;;  %4871 = vmatpush2.bf16.msra.mxu1 %v6383_v28  ;;  %v6333_v16 = vcombine.low %v4092_v59, %v4096_v9  ;;  %v6335_v28 = vcombine.low %v4093_v13, %v4097_v10  ;;  %v4046_v59 = vld [vmem:[%s9518_s8 + $0x90] sm:$0xff]  ;;  %v4047_v13 = vld [vmem:[%s9518_s8 + $0x98] sm:$0xff] }
 0x2c3   : > { %4831 = vmatprep.subr.bf16.mxu0 %v6374_v29  ;;  %4872 = vmatprep.subr.bf16.mxu1 %v6376_v31  ;;  %v6330_v29 = vcombine.high %v4086_v24, %v4090_v17  ;;  %v6332_v31 = vcombine.high %v4087_v25, %v4091_v26  ;;  %v4050_v9 = vld [vmem:[%s9518_s8 + $0xb0] sm:$0xff]  ;;  %v4051_v10 = vld [vmem:[%s9518_s8 + $0xb8] sm:$0xff] }
 0x2c6   : > { %4832 = vmatpush2.bf16.msra.mxu0 %v6373_v36  ;;  %4873 = vmatpush2.bf16.msra.mxu1 %v6375_v8  ;;  %v4083_v36 = vld [vmem:[%s9518_s8 + $0x1b8] sm:$0xff]  ;;  %v6329_v8 = vcombine.low %v4086_v24, %v4090_v17  ;;  %v4038_v24 = vld [vmem:[%s9518_s8 + $0x50] sm:$0xff] }
 0x2c7   : > { %4833 = vmatprep.subr.bf16.mxu0 %v6366_v44  ;;  %4874 = vmatprep.subr.bf16.mxu1 %v6368_v53  ;;  %v6331_v44 = vcombine.low %v4087_v25, %v4091_v26  ;;  %v6322_v53 = vcombine.high %v4078_v32, %v4082_v34  ;;  %v6324_v41 = vcombine.high %v4079_v35, %v4083_v36  ;;  %v4042_v17 = vld [vmem:[%s9518_s8 + $0x70] sm:$0xff]  ;;  %v4039_v25 = vld [vmem:[%s9518_s8 + $0x58] sm:$0xff] }
 0x2c8   : > { %v4043_v26 = vld [vmem:[%s9518_s8 + $0x78] sm:$0xff] }
 0x2ca   : > { %4834 = vmatpush2.bf16.msra.mxu0 %v6365_v40  ;;  %4875 = vmatpush2.bf16.msra.mxu1 %v6367_v45  ;;  %v4075_v40 = vld [vmem:[%s9518_s8 + $0x178] sm:$0xff]  ;;  %v6321_v45 = vcombine.low %v4078_v32, %v4082_v34  ;;  %v4030_v32 = vld [vmem:[%s9518_s8 + $0x10] sm:$0xff] }
 0x2cb   : > { %4835 = vmatprep.subr.bf16.mxu0 %v6358_v38  ;;  %4876 = vmatprep.subr.bf16.mxu1 %v6360_v27  ;;  %v6323_v38 = vcombine.low %v4079_v35, %v4083_v36  ;;  %v6314_v27 = vcombine.high %v4070_v56, %v4074_v37  ;;  %v6316_v48 = vcombine.high %v4071_v39, %v4075_v40  ;;  %v4034_v34 = vld [vmem:[%s9518_s8 + $0x30] sm:$0xff]  ;;  %v4031_v35 = vld [vmem:[%s9518_s8 + $0x18] sm:$0xff] }
 0x2cc   : > { %v4035_v36 = vld [vmem:[%s9518_s8 + $0x38] sm:$0xff] }
 0x2ce   : > { %4836 = vmatpush2.bf16.msra.mxu0 %v6357_v7  ;;  %4877 = vmatpush2.bf16.msra.mxu1 %v6359_v52  ;;  %v4067_v7 = vld [vmem:[%s9518_s8 + $0x138] sm:$0xff]  ;;  %v6313_v52 = vcombine.low %v4070_v56, %v4074_v37  ;;  %v6276_v56 = vcombine.high %v4031_v35, %v4035_v36  ;;  %v4150_v37 = vld [vmem:[%s9518_s8 + $0x3d0] sm:$0xff] }
 0x2cf   : > { %4837 = vmatprep.subr.bf16.mxu0 %v6350_v47  ;;  %4878 = vmatprep.subr.bf16.mxu1 %v6352_v54  ;;  %v6315_v47 = vcombine.low %v4071_v39, %v4075_v40  ;;  %v6306_v54 = vcombine.high %v4062_v30, %v4066_v49  ;;  %v6308_v55 = vcombine.high %v4063_v50, %v4067_v7  ;;  %v4154_v39 = vld [vmem:[%s9518_s8 + $0x3f0] sm:$0xff]  ;;  %v4151_v40 = vld [vmem:[%s9518_s8 + $0x3d8] sm:$0xff] }
 0x2d2   : > { %4838 = vmatpush2.bf16.msra.mxu0 %v6349_v2  ;;  %4879 = vmatpush2.bf16.msra.mxu1 %v6351_v4  ;;  %v6305_v2 = vcombine.low %v4062_v30, %v4066_v49  ;;  %v6307_v4 = vcombine.low %v4063_v50, %v4067_v7  ;;  %v6394_v30 = vcombine.high %v4150_v37, %v4154_v39  ;;  %v4142_v50 = vld [vmem:[%s9518_s8 + $0x390] sm:$0xff] }
 0x2d3   : > { %4839 = vmatprep.subr.bf16.mxu0 %v6342_v61  ;;  %4880 = vmatprep.subr.bf16.mxu1 %v6344_v6  ;;  %v6298_v61 = vcombine.high %v4054_v57, %v4058_v63  ;;  %v4146_v7 = vld [vmem:[%s9518_s8 + $0x3b0] sm:$0xff] }
 0x2d6   : > { %4840 = vmatpush2.bf16.msra.mxu0 %v6341_v51  ;;  %4881 = vmatpush2.bf16.msra.mxu1 %v6343_v11  ;;  %v6297_v51 = vcombine.low %v4054_v57, %v4058_v63  ;;  %v4134_v63 = vld [vmem:[%s9518_s8 + $0x350] sm:$0xff] }
 0x2d7   : > { %4841 = vmatprep.subr.bf16.mxu0 %v6334_v14  ;;  %4882 = vmatprep.subr.bf16.mxu1 %v6336_v33  ;;  %v6290_v14 = vcombine.high %v4046_v59, %v4050_v9  ;;  %v6292_v33 = vcombine.high %v4047_v13, %v4051_v10 }
 0x2da   : > { %4842 = vmatpush2.bf16.msra.mxu0 %v6333_v16  ;;  %4883 = vmatpush2.bf16.msra.mxu1 %v6335_v28  ;;  %v6289_v16 = vcombine.low %v4046_v59, %v4050_v9  ;;  %v6291_v28 = vcombine.low %v4047_v13, %v4051_v10  ;;  %v4126_v9 = vld [vmem:[%s9518_s8 + $0x310] sm:$0xff]  ;;  %v4127_v10 = vld [vmem:[%s9518_s8 + $0x318] sm:$0xff] }
 0x2db   : > { %4893 = vmatprep.subr.bf16.mxu0 %v6330_v29  ;;  %4934 = vmatprep.subr.bf16.mxu1 %v6332_v31  ;;  %v6282_v29 = vcombine.high %v4038_v24, %v4042_v17  ;;  %v6284_v31 = vcombine.high %v4039_v25, %v4043_v26  ;;  %v4130_v13 = vld [vmem:[%s9518_s8 + $0x330] sm:$0xff] }
 0x2dd   : > { %4844 = vmatmul.mubr.bf16.vlgmr.msra.gmra.mxu0 %v8751_v42  ;;  %4885 = vmatmul.mubr.bf16.vlgmr.msra.gmra.mxu1 %v8751_v42 }
 0x2de   : > { %4894 = vmatpush1.bf16.msra.mxu0 %v6329_v8  ;;  %4935 = vmatpush1.bf16.msra.mxu1 %v6331_v44  ;;  %v6281_v8 = vcombine.low %v4038_v24, %v4042_v17  ;;  %v6283_v44 = vcombine.low %v4039_v25, %v4043_v26  ;;  %v4118_v17 = vld [vmem:[%s9518_s8 + $0x2d0] sm:$0xff]  ;;  %v4119_v26 = vld [vmem:[%s9518_s8 + $0x2d8] sm:$0xff] }
 0x2df   : > { %4895 = vmatprep.subr.bf16.mxu0 %v6322_v53  ;;  %4936 = vmatprep.subr.bf16.mxu1 %v6324_v41  ;;  %v6274_v53 = vcombine.high %v4030_v32, %v4034_v34  ;;  %v5073_v41 = vstv %s8839_s27  ;;  %v4122_v25 = vld [vmem:[%s9518_s8 + $0x2f0] sm:$0xff] }
 0x2e0   : > { %4925 = vmatprep.mubr.bf16.mxu0 %v8563_v60  ;;  %4966 = vmatprep.mubr.bf16.mxu1 %v8563_v60  ;;  %v4055_v60 = vld [vmem:[%s9518_s8 + $0xd8] sm:$0xff]  ;;  %vm5074_vm3 = vcmp.lt.s32.totalorder %v5073_v41, %v8054_v20 }
 0x2e1   : > { %v6300_v6 = vcombine.high %v4055_v60, %v4059_v46  ;;  %v6299_v11 = vcombine.low %v4055_v60, %v4059_v46  ;;  %v4138_v60 = vld [vmem:[%s9518_s8 + $0x370] sm:$0xff]  ;;  %v4135_v46 = vld [vmem:[%s9518_s8 + $0x358] sm:$0xff] }
 0x2e2   : > { %4896 = vmatpush1.bf16.msra.mxu0 %v6321_v45  ;;  %4937 = vmatpush1.bf16.msra.mxu1 %v6323_v38  ;;  %v4155_v45 = vld [vmem:[%s9518_s8 + $0x3f8] sm:$0xff]  ;;  %v5087_v38 = vsel %vm5074_vm3, 1, %v6834_v0 }
 0x2e3   : > { %4897 = vmatprep.subr.bf16.mxu0 %v6314_v27  ;;  %4938 = vmatprep.subr.bf16.mxu1 %v6316_v48  ;;  %v6273_v27 = vcombine.low %v4030_v32, %v4034_v34  ;;  %v6275_v48 = vcombine.low %v4031_v35, %v4035_v36  ;;  %v6396_v49 = vcombine.high %v4151_v40, %v4155_v45  ;;  %v4143_v0 = vld [vmem:[%s9518_s8 + $0x398] sm:$0xff]  ;;  %v4110_v34 = vld [vmem:[%s9518_s8 + $0x290] sm:$0xff] }
 0x2e4   : > { %5089 = vperm.xlu0 %6677, %v5087_v38   ;;  %v4114_v35 = vld [vmem:[%s9518_s8 + $0x2b0] sm:$0xff]  ;;  %v4111_v36 = vld [vmem:[%s9518_s8 + $0x298] sm:$0xff] }
 0x2e5   : > { %v6354_v41 = vcombine.high %v4110_v34, %v4114_v35  ;;  %v6353_v38 = vcombine.low %v4110_v34, %v4114_v35  ;;  %v3212_v34 = vld [vmem:[%s3209_s20 + $0x10] sm:$0xff] }
 0x2e6   : > { %4898 = vmatpush1.bf16.msra.mxu0 %v6313_v52  ;;  %4939 = vmatpush1.bf16.msra.mxu1 %v6315_v47  ;;  %v4147_v52 = vld [vmem:[%s9518_s8 + $0x3b8] sm:$0xff]  ;;  %v6393_v47 = vcombine.low %v4150_v37, %v4154_v39  ;;  %v4102_v37 = vld [vmem:[%s9518_s8 + $0x250] sm:$0xff] }
 0x2e7   : > { %4899 = vmatprep.subr.bf16.mxu0 %v6306_v54  ;;  %4940 = vmatprep.subr.bf16.mxu1 %v6308_v55  ;;  %v6395_v54 = vcombine.low %v4151_v40, %v4155_v45  ;;  %v6386_v55 = vcombine.high %v4142_v50, %v4146_v7  ;;  %v6388_v57 = vcombine.high %v4143_v0, %v4147_v52  ;;  %v4106_v39 = vld [vmem:[%s9518_s8 + $0x270] sm:$0xff]  ;;  %v4103_v40 = vld [vmem:[%s9518_s8 + $0x258] sm:$0xff] }
 0x2e8   : > { %v4107_v45 = vld [vmem:[%s9518_s8 + $0x278] sm:$0xff] }
 0x2ea   : > { %4900 = vmatpush1.bf16.msra.mxu0 %v6305_v2  ;;  %4941 = vmatpush1.bf16.msra.mxu1 %v6307_v4  ;;  %v4139_v2 = vld [vmem:[%s9518_s8 + $0x378] sm:$0xff]  ;;  %v6385_v4 = vcombine.low %v4142_v50, %v4146_v7  ;;  %v4098_v50 = vld [vmem:[%s9518_s8 + $0x230] sm:$0xff] }
 0x2eb   : > { %4901 = vmatprep.subr.bf16.mxu0 %v6298_v61  ;;  %4942 = vmatprep.subr.bf16.mxu1 %v6300_v6  ;;  %v6387_v61 = vcombine.low %v4143_v0, %v4147_v52  ;;  %v6378_v6 = vcombine.high %v4134_v63, %v4138_v60  ;;  %v6380_v59 = vcombine.high %v4135_v46, %v4139_v2  ;;  %v4095_v7 = vld [vmem:[%s9518_s8 + $0x218] sm:$0xff] }
 0x2ec   : > { %v4099_v0 = vld [vmem:[%s9518_s8 + $0x238] sm:$0xff]  ;;  %v6345_v52 = vcombine.low %v4102_v37, %v4106_v39 }
 0x2ee   : > { %4902 = vmatpush1.bf16.msra.mxu0 %v6297_v51  ;;  %4943 = vmatpush1.bf16.msra.mxu1 %v6299_v11  ;;  %v4131_v51 = vld [vmem:[%s9518_s8 + $0x338] sm:$0xff]  ;;  %v6377_v11 = vcombine.low %v4134_v63, %v4138_v60  ;;  %v6339_v63 = vcombine.low %v4095_v7, %v4099_v0 }
 0x2ef   : > { %4903 = vmatprep.subr.bf16.mxu0 %v6290_v14  ;;  %4944 = vmatprep.subr.bf16.mxu1 %v6292_v33  ;;  %v6379_v14 = vcombine.low %v4135_v46, %v4139_v2  ;;  %v6370_v33 = vcombine.high %v4126_v9, %v4130_v13  ;;  %v6372_v24 = vcombine.high %v4127_v10, %v4131_v51 }
 0x2f2   : > { %4904 = vmatpush1.bf16.msra.mxu0 %v6289_v16  ;;  %4945 = vmatpush1.bf16.msra.mxu1 %v6291_v28  ;;  %v4123_v16 = vld [vmem:[%s9518_s8 + $0x2f8] sm:$0xff]  ;;  %v6369_v28 = vcombine.low %v4126_v9, %v4130_v13  ;;  %v3210_v13 = vld [vmem:[%s3209_s20] sm:$0xff] }
 0x2f3   : > { %4905 = vmatprep.subr.bf16.mxu0 %v6282_v29  ;;  %4946 = vmatprep.subr.bf16.mxu1 %v6284_v31  ;;  %v6371_v29 = vcombine.low %v4127_v10, %v4131_v51  ;;  %v6362_v31 = vcombine.high %v4118_v17, %v4122_v25  ;;  %v6364_v32 = vcombine.high %v4119_v26, %v4123_v16  ;;  %v3211_v10 = vld [vmem:[%s3209_s20 + $0x8] sm:$0xff]  ;;  %v3214_v51 = vunpack.c.l.bf16 %v3210_v13 }
 0x2f6   : > { %4906 = vmatpush1.bf16.msra.mxu0 %v6281_v8  ;;  %4947 = vmatpush1.bf16.msra.mxu1 %v6283_v44  ;;  %v4115_v8 = vld [vmem:[%s9518_s8 + $0x2b8] sm:$0xff]  ;;  %v6361_v44 = vcombine.low %v4118_v17, %v4122_v25 }
 0x2f7   : > { %4907 = vmatprep.subr.bf16.mxu0 %v6274_v53  ;;  %4948 = vmatprep.subr.bf16.mxu1 %v6276_v56  ;;  %v6363_v53 = vcombine.low %v4119_v26, %v4123_v16  ;;  %v6356_v56 = vcombine.high %v4111_v36, %v4115_v8 }
 0x2fa   : > { %4908 = vmatpush1.bf16.msra.mxu0 %v6273_v27  ;;  %4949 = vmatpush1.bf16.msra.mxu1 %v6275_v48  ;;  %v6355_v27 = vcombine.low %v4111_v36, %v4115_v8  ;;  %v6346_v48 = vcombine.high %v4102_v37, %v4106_v39  ;;  %v3213_v36 = vld [vmem:[%s3209_s20 + $0x18] sm:$0xff]  ;;  %v3219_v39 = vunpack.c.h.bf16 %v3212_v34 }
 0x2fb   : > { %4909 = vmatprep.subr.bf16.mxu0 %v6394_v30  ;;  %4950 = vmatprep.subr.bf16.mxu1 %v6396_v49  ;;  %v6348_v30 = vcombine.high %v4103_v40, %v4107_v45  ;;  %v4094_v49 = vld [vmem:[%s9518_s8 + $0x210] sm:$0xff]  ;;  %v3220_v37 = vunpack.c.l.bf16 %v3213_v36 }
 0x2fe   : > { %4910 = vmatpush2.bf16.msra.mxu0 %v6393_v47  ;;  %4951 = vmatpush2.bf16.msra.mxu1 %v6395_v54  ;;  %v6347_v47 = vcombine.low %v4103_v40, %v4107_v45  ;;  %v6338_v54 = vcombine.high %v4094_v49, %v4098_v50 }
 0x2ff   : > { %4911 = vmatprep.subr.bf16.mxu0 %v6386_v55  ;;  %4952 = vmatprep.subr.bf16.mxu1 %v6388_v57  ;;  %v6340_v55 = vcombine.high %v4095_v7, %v4099_v0  ;;  %v6337_v57 = vcombine.low %v4094_v49, %v4098_v50 }
 0x302   : > { %4912 = vmatpush2.bf16.msra.mxu0 %v6385_v4  ;;  %4953 = vmatpush2.bf16.msra.mxu1 %v6387_v61 }
 0x303   : > { %4913 = vmatprep.subr.bf16.mxu0 %v6378_v6  ;;  %4954 = vmatprep.subr.bf16.mxu1 %v6380_v59 }
 0x306   : > { %4914 = vmatpush2.bf16.msra.mxu0 %v6377_v11  ;;  %4955 = vmatpush2.bf16.msra.mxu1 %v6379_v14  ;;  %v3216_v11 = vunpack.c.l.bf16 %v3211_v10  ;;  %v3217_v14 = vunpack.c.h.bf16 %v3211_v10 }
 0x307   : > { %4915 = vmatprep.subr.bf16.mxu0 %v6370_v33  ;;  %4956 = vmatprep.subr.bf16.mxu1 %v6372_v24  ;;  %v3215_v24 = vunpack.c.h.bf16 %v3210_v13 }
 0x30a   : > { %4916 = vmatpush2.bf16.msra.mxu0 %v6369_v28  ;;  %4957 = vmatpush2.bf16.msra.mxu1 %v6371_v29 }
 0x30b   : > { %4917 = vmatprep.subr.bf16.mxu0 %v6362_v31  ;;  %4958 = vmatprep.subr.bf16.mxu1 %v6364_v32 }
 0x30e   : > { %4918 = vmatpush2.bf16.msra.mxu0 %v6361_v44  ;;  %4959 = vmatpush2.bf16.msra.mxu1 %v6363_v53 }
 0x30f   : > { %4919 = vmatprep.subr.bf16.mxu0 %v6354_v41  ;;  %4960 = vmatprep.subr.bf16.mxu1 %v6356_v56  ;;  %v3218_v41 = vunpack.c.l.bf16 %v3212_v34 }
 0x312   : > { %4920 = vmatpush2.bf16.msra.mxu0 %v6353_v38  ;;  %4961 = vmatpush2.bf16.msra.mxu1 %v6355_v27  ;;  %v3221_v38 = vunpack.c.h.bf16 %v3213_v36 }
 0x313   : > { %4921 = vmatprep.subr.bf16.mxu0 %v6346_v48  ;;  %4962 = vmatprep.subr.bf16.mxu1 %v6348_v30 }
 0x316   : > { %4922 = vmatpush2.bf16.msra.mxu0 %v6345_v52  ;;  %4963 = vmatpush2.bf16.msra.mxu1 %v6347_v47 }
 0x317   : > { %4923 = vmatprep.subr.bf16.mxu0 %v6338_v54  ;;  %4964 = vmatprep.subr.bf16.mxu1 %v6340_v55 }
 0x31a   : > { %4924 = vmatpush2.bf16.msra.mxu0 %v6337_v57  ;;  %4965 = vmatpush2.bf16.msra.mxu1 %v6339_v63 }
 0x31d   : > { %v3896_v60 = vpop.f32.mrf.mxu0  ;;  %4926 = vmatmul.mubr.bf16.vlgmr.msra.gmra.mxu0 %v8751_v42  ;;  %v3937_v46 = vpop.f32.mrf.mxu1  ;;  %4967 = vmatmul.mubr.bf16.vlgmr.msra.gmra.mxu1 %v8751_v42 }
 0x31e   : > { %v3897_v33 = vadd.f32 %v3896_v60, %v3214_v51  ;;  %v3938_v17 = vadd.f32 %v3937_v46, %v3216_v11 }
 0x31f   : > { %v3898_v2 = vpop.f32.mrf.mxu0  ;;  %v3939_v4 = vpop.f32.mrf.mxu1 }
 0x320   : > { %v3940_v25 = vadd.f32 %v3939_v4, %v3217_v14  ;;  %v6397_v26 = vmul.f32 -1.442695, %v3897_v33  ;;  %v3899_v42 = vadd.f32 %v3898_v2, %v3215_v24  ;;  %v6399_v16 = vmul.f32 -1.442695, %v3938_v17  ;;  %v5078_v4 = vpop.permute.xlu0 %5077 }
 0x321   : > { %v3900_v61 = vpop.f32.mrf.mxu0  ;;  %v3941_v6 = vpop.f32.mrf.mxu1  ;;  %vm5079_vm4 = vcmp.eq.s32.totalorder %v5078_v4, 1 }
 0x322   : > { %v6400_v28 = vmul.f32 -1.442695, %v3940_v25  ;;  %6678 = vpow2.f32 %v6397_v26  ;;  %v6398_v29 = vmul.f32 -1.442695, %v3899_v42 }
 0x323   : > { %v3901_v59 = vpop.f32.mrf.mxu0  ;;  %v3942_v9 = vpop.f32.mrf.mxu1  ;;  %6680 = vpow2.f32 %v6399_v16 }
 0x324   : > { %6682 = vpow2.f32 %v6400_v28 }
 0x325   : > { %6684 = vpow2.f32 %v6398_v29 }
 0x32f   : > { %v6679_v31 = vpop.eup %6678 }
 0x330   : > { %v6681_v32 = vpop.eup %6680  ;;  %v4981_v8 = vadd.f32 1.0, %v6679_v31 }
 0x331   : > { %v6683_v35 = vpop.eup %6682  ;;  %v4993_v53 = vadd.f32 1.0, %v6681_v32 }
 0x332   : > { %v6685_v44 = vpop.eup %6684  ;;  %v4994_v56 = vadd.f32 1.0, %v6683_v35  ;;  %6686 = vrcp.f32 %v4981_v8 }
 0x333   : > { %v4982_v40 = vadd.f32 1.0, %v6685_v44  ;;  %6688 = vrcp.f32 %v4993_v53 }
 0x334   : > { %6690 = vrcp.f32 %v4994_v56 }
 0x33f   : > { %v6687_v60 = vpop.eup %6686 }
 0x340   : > { %v6689_v46 = vpop.eup %6688 }
 0x341   : > { %v6691_v2 = vpop.eup %6690  ;;  %v5013_v9 = vmul.f32 %v6818_v21, %v6689_v46  ;;  %v4162_v46 = vld [vmem:[%s4158_s23 + $0x18] sm:$0xff] }
 0x342   : > { %v5014_v11 = vmul.f32 %v6814_v43, %v6691_v2 }
 0x35d   : > { %v3978_v45 = vpop.f32.mrf.mxu0  ;;  %v4019_v48 = vpop.f32.mrf.mxu1 }
 0x35e   : > { %v3979_v27 = vadd.f32 %v3978_v45, %v3218_v41  ;;  %v4020_v30 = vadd.f32 %v4019_v48, %v3220_v37 }
 0x35f   : > { %v3980_v49 = vpop.f32.mrf.mxu0  ;;  %v4021_v7 = vpop.f32.mrf.mxu1 }
 0x360   : > { %6692 = vtanh.f32 %v3979_v27  ;;  %v3981_v50 = vadd.f32 %v3980_v49, %v3219_v39  ;;  %v6401_v0 = vmul.f32 -1.442695, %v4020_v30  ;;  %v4022_v52 = vadd.f32 %v4021_v7, %v3221_v38  ;;  %v4159_v39 = vld [vmem:[%s4158_s23] sm:$0xff] }
 0x361   : > { %6694 = vrcp.f32 %v4982_v40  ;;  %v3982_v47 = vpop.f32.mrf.mxu0  ;;  %v4023_v54 = vpop.f32.mrf.mxu1  ;;  %v4160_v40 = vld [vmem:[%s4158_s23 + $0x8] sm:$0xff]  ;;  %v4163_v45 = vunpack.c.l.bf16 %v4159_v39  ;;  %v4164_v30 = vunpack.c.h.bf16 %v4159_v39 }
 0x362   : > { %6696 = vtanh.f32 %v3981_v50  ;;  %v6402_v55 = vmul.f32 -1.442695, %v4022_v52  ;;  %v4165_v38 = vunpack.c.l.bf16 %v4160_v40  ;;  %v4166_v27 = vunpack.c.h.bf16 %v4160_v40 }
 0x363   : > { %6698 = vpow2.f32 %v6401_v0  ;;  %v3983_v57 = vpop.f32.mrf.mxu0  ;;  %v4024_v63 = vpop.f32.mrf.mxu1 }
 0x364   : > { %6700 = vpow2.f32 %v6402_v55  ;;  %v4161_v63 = vld [vmem:[%s4158_s23 + $0x10] sm:$0xff] }
 0x36d   : > { %v6693_v61 = vpop.eup %6692 }
 0x36e   : > { %v6695_v6 = vpop.eup %6694  ;;  %v5015_v59 = vmul.f32 %v6693_v61, %v6687_v60 }
 0x36f   : > { %v6697_v13 = vpop.eup %6696 }
 0x370   : > { %v6699_v10 = vpop.eup %6698  ;;  %v5016_v51 = vmul.f32 %v6697_v13, %v6695_v6  ;;  %v5017_v14 = vadd.f32 %v5015_v59, %v5013_v9  ;;  %v4167_v6 = vunpack.c.l.bf16 %v4161_v63  ;;  %v4169_v9 = vunpack.c.l.bf16 %v4162_v46 }
 0x371   : > { %v5007_v33 = vadd.f32 1.0, %v6699_v10  ;;  %v6701_v24 = vpop.eup %6700  ;;  %v4168_v13 = vunpack.c.h.bf16 %v4161_v63 }
 0x372   : > { %v5018_v17 = vadd.f32 %v5016_v51, %v5014_v11  ;;  %6702 = vtanh.f32 %v5017_v14  ;;  %v8949_v21 = vsel %vm5079_vm4, %v5017_v14, %v6818_v21   ;;  %v5008_v25 = vadd.f32 1.0, %v6701_v24 }
 0x373   : > { %6704 = vrcp.f32 %v5007_v33  ;;  %v4170_v11 = vunpack.c.h.bf16 %v4162_v46 }
 0x374   : > { %6706 = vtanh.f32 %v5018_v17  ;;  %v8953_v43 = vsel %vm5079_vm4, %v5018_v17, %v6814_v43  }
 0x375   : > { %6708 = vrcp.f32 %v5008_v25 }
 0x37f   : > { %v6703_v26 = vpop.eup %6702 }
 0x380   : > { %v6705_v42 = vpop.eup %6704 }
 0x381   : > { %v6707_v16 = vpop.eup %6706  ;;  %v5021_v28 = vmul.f32 %v6705_v42, %v6703_v26 }
 0x382   : > { %v6709_v29 = vpop.eup %6708 }
 0x383   : > { %v5022_v31 = vmul.f32 %v6709_v29, %v6707_v16  ;;  %v5080_v32 = vsel %vm5079_vm4, %v5021_v28, 0.0  ;;  %v8958_v23 = vsel %vm5079_vm4, %v5021_v28, %v6826_v23  }
 0x384   : > { %5085 = vst [vmem:[%s5084_s21] sm:$0xff] %v5080_v32 }
 0x385   : > { %v5081_v34 = vsel %vm5079_vm4, %v5022_v31, 0.0  ;;  %v8965_v22 = vsel %vm5079_vm4, %v5022_v31, %v6822_v22  }
 0x386   : > { %5086 = vst [vmem:[%s5084_s21 + $0x8] sm:$0xff] %v5081_v34 }
 0x39d   : > { %v4845_v35 = vpop.f32.mrf.mxu0  ;;  %v4886_v36 = vpop.f32.mrf.mxu1 }
 0x39e   : > { %v4846_v48 = vadd.f32 %v4845_v35, %v4163_v45  ;;  %v4887_v49 = vadd.f32 %v4886_v36, %v4165_v38 }
 0x39f   : > { %v4847_v8 = vpop.f32.mrf.mxu0  ;;  %v4888_v44 = vpop.f32.mrf.mxu1 }
 0x3a0   : > { %v4889_v50 = vadd.f32 %v4888_v44, %v4166_v27  ;;  %v6403_v7 = vmul.f32 -1.442695, %v4846_v48  ;;  %v4848_v0 = vadd.f32 %v4847_v8, %v4164_v30  ;;  %v6405_v52 = vmul.f32 -1.442695, %v4887_v49  ;;  %v5090_v44 = vpop.permute.xlu0 %5089 }
 0x3a1   : > { %v4849_v53 = vpop.f32.mrf.mxu0  ;;  %v4890_v41 = vpop.f32.mrf.mxu1  ;;  %vm5091_vm5 = vcmp.eq.s32.totalorder %v5090_v44, 1 }
 0x3a2   : > { %v6406_v47 = vmul.f32 -1.442695, %v4889_v50  ;;  %6710 = vpow2.f32 %v6403_v7  ;;  %v6404_v54 = vmul.f32 -1.442695, %v4848_v0 }
 0x3a3   : > { %v4850_v56 = vpop.f32.mrf.mxu0  ;;  %v4891_v37 = vpop.f32.mrf.mxu1  ;;  %6712 = vpow2.f32 %v6405_v52 }
 0x3a4   : > { %6714 = vpow2.f32 %v6406_v47 }
 0x3a5   : > { %6716 = vpow2.f32 %v6404_v54 }
 0x3af   : > { %v6711_v55 = vpop.eup %6710 }
 0x3b0   : > { %v6713_v57 = vpop.eup %6712  ;;  %v5029_v2 = vadd.f32 1.0, %v6711_v55 }
 0x3b1   : > { %v6715_v60 = vpop.eup %6714  ;;  %v5041_v61 = vadd.f32 1.0, %v6713_v57 }
 0x3b2   : > { %v6717_v4 = vpop.eup %6716  ;;  %v5042_v59 = vadd.f32 1.0, %v6715_v60  ;;  %6718 = vrcp.f32 %v5029_v2 }
 0x3b3   : > { %v5030_v10 = vadd.f32 1.0, %v6717_v4  ;;  %6720 = vrcp.f32 %v5041_v61 }
 0x3b4   : > { %6722 = vrcp.f32 %v5042_v59 }
 0x3bf   : > { %v6719_v35 = vpop.eup %6718 }
 0x3c0   : > { %v6721_v36 = vpop.eup %6720 }
 0x3c1   : > { %v6723_v8 = vpop.eup %6722  ;;  %v5061_v37 = vmul.f32 %v6802_v18, %v6721_v36 }
 0x3c2   : > { %v5062_v38 = vmul.f32 %v6798_v1, %v6723_v8 }
 0x3dd   : > { %v4927_v51 = vpop.f32.mrf.mxu0  ;;  %v4968_v33 = vpop.f32.mrf.mxu1 }
 0x3de   : > { %v4928_v14 = vadd.f32 %v4927_v51, %v4167_v6  ;;  %v4969_v24 = vadd.f32 %v4968_v33, %v4169_v9 }
 0x3df   : > { %v4929_v17 = vpop.f32.mrf.mxu0  ;;  %v4970_v26 = vpop.f32.mrf.mxu1 }
 0x3e0   : > { %6724 = vtanh.f32 %v4928_v14  ;;  %v4930_v25 = vadd.f32 %v4929_v17, %v4168_v13  ;;  %v6407_v42 = vmul.f32 -1.442695, %v4969_v24  ;;  %v4971_v16 = vadd.f32 %v4970_v26, %v4170_v11 }
 0x3e1   : > { %6726 = vrcp.f32 %v5030_v10  ;;  %v4931_v28 = vpop.f32.mrf.mxu0  ;;  %v4972_v29 = vpop.f32.mrf.mxu1 }
 0x3e2   : > { %6728 = vtanh.f32 %v4930_v25  ;;  %v6408_v31 = vmul.f32 -1.442695, %v4971_v16 }
 0x3e3   : > { %6730 = vpow2.f32 %v6407_v42  ;;  %v4932_v32 = vpop.f32.mrf.mxu0  ;;  %v4973_v34 = vpop.f32.mrf.mxu1 }
 0x3e4   : > { %6732 = vpow2.f32 %v6408_v31 }
 0x3ed   : > { %v6725_v53 = vpop.eup %6724 }
 0x3ee   : > { %v6727_v41 = vpop.eup %6726  ;;  %v5063_v56 = vmul.f32 %v6725_v53, %v6719_v35 }
 0x3ef   : > { %v6729_v39 = vpop.eup %6728 }
 0x3f0   : > { %v6731_v40 = vpop.eup %6730  ;;  %v5064_v45 = vmul.f32 %v6729_v39, %v6727_v41  ;;  %v5065_v27 = vadd.f32 %v5063_v56, %v5061_v37 }
 0x3f1   : > { %v5055_v48 = vadd.f32 1.0, %v6731_v40  ;;  %v6733_v30 = vpop.eup %6732 }
 0x3f2   : > { %v5066_v49 = vadd.f32 %v5064_v45, %v5062_v38  ;;  %6734 = vtanh.f32 %v5065_v27  ;;  %v5105_v18 = vsel %vm5091_vm5, %v5065_v27, %v6802_v18   ;;  %v5056_v50 = vadd.f32 1.0, %v6733_v30 }
 0x3f3   : > { %6736 = vrcp.f32 %v5055_v48 }
 0x3f4   : > { %6738 = vtanh.f32 %v5066_v49  ;;  %v5106_v1 = vsel %vm5091_vm5, %v5066_v49, %v6798_v1  }
 0x3f5   : > { %6740 = vrcp.f32 %v5056_v50 }
 0x3ff   : > { %v6735_v7 = vpop.eup %6734 }
 0x400   : > { %v6737_v0 = vpop.eup %6736 }
 0x401   : > { %v6739_v52 = vpop.eup %6738  ;;  %v5069_v47 = vmul.f32 %v6737_v0, %v6735_v7 }
 0x402   : > { %v6741_v54 = vpop.eup %6740  ;;  %3066 = sbr.rel (!%p3063_p1) target bundleno = 537 (0x219), region = 91 }
 0x403   : > { %v5070_v55 = vmul.f32 %v6741_v54, %v6739_v52  ;;  %v5092_v57 = vsel %vm5091_vm5, %v5069_v47, 0.0  ;;  %v5103_v19 = vsel %vm5091_vm5, %v5069_v47, %v6810_v19  }
 0x404   : > { %5097 = vst [vmem:[%s5096_s24 + $0x10] sm:$0xff] %v5092_v57 }
 0x405   : > { %v5093_v63 = vsel %vm5091_vm5, %v5070_v55, 0.0  ;;  %v5104_v15 = vsel %vm5091_vm5, %v5070_v55, %v6806_v15  }
 0x406   : > { %5098 = vst [vmem:[%s5096_s24 + $0x18] sm:$0xff] %v5093_v63 }
 0x407 PF:  { %v5150_v60 = vld [vmem:[%s9519_s9 + $0xf8] sm:$0xff]  ;;  %6743 = vset.pattern.permute.xlu0 %v6832_v3  ;;  %6742 = vset.pattern.permute.xlu1 %v6832_v3  ;;  %v5149_v18 = vld [vmem:[%s9519_s9 + $0xf0] sm:$0xff]  ;;  %v5148_v43 = vld [vmem:[%s9519_s9 + $0xe8] sm:$0xff]  ;;  %vm5363_vm6 = vcmask 261120   ;;  %vm5373_vm7 = vcmp.gt.s32.totalorder %v8054_v20, 0  ;;  %vm5374_vm8 = vcmp.gt.s32.totalorder %v8054_v20, 1 }
 0x408   :  { %v5182_v46 = vld [vmem:[%s9519_s9 + $0x1f8] sm:$0xff]  ;;  %6450 = vmatprep.subr.mxu0 %v5150_v60  ;;  %v5181_v15 = vld [vmem:[%s9519_s9 + $0x1f0] sm:$0xff]  ;;  %v5180_v21 = vld [vmem:[%s9519_s9 + $0x1e8] sm:$0xff]  ;;  %vm5379_vm9 = vcmask 7168   ;;  %vm5375_vm10 = vcmp.gt.s32.totalorder %v8054_v20, 2 }
 0x409   :  { %v5134_v2 = vld [vmem:[%s9519_s9 + $0x78] sm:$0xff]  ;;  %6491 = vmatprep.subr.mxu1 %v5182_v46  ;;  %v5133_v3 = vld [vmem:[%s9519_s9 + $0x70] sm:$0xff]  ;;  %v5132_v22 = vld [vmem:[%s9519_s9 + $0x68] sm:$0xff] }
 0x40a   :  { %v5166_v1 = vld [vmem:[%s9519_s9 + $0x178] sm:$0xff]  ;;  %6451 = vmatpush3.msra.mxu0 %v5134_v2  ;;  %v5165_v19 = vld [vmem:[%s9519_s9 + $0x170] sm:$0xff]  ;;  %v5164_v23 = vld [vmem:[%s9519_s9 + $0x168] sm:$0xff] }
 0x40b   :  { %6492 = vmatpush3.msra.mxu1 %v5166_v1  ;;  %6452 = vmatprep.subr.mxu0 %v5149_v18  ;;  %v5147_v4 = vld [vmem:[%s9519_s9 + $0xe0] sm:$0xff]  ;;  %v5146_v9 = vld [vmem:[%s9519_s9 + $0xd8] sm:$0xff]  ;;  %v5145_v11 = vld [vmem:[%s9519_s9 + $0xd0] sm:$0xff] }
 0x40c   :  { %6493 = vmatprep.subr.mxu1 %v5181_v15  ;;  %6453 = vmatpush3.msra.mxu0 %v5133_v3  ;;  %v5179_v61 = vld [vmem:[%s9519_s9 + $0x1e0] sm:$0xff]  ;;  %v5178_v13 = vld [vmem:[%s9519_s9 + $0x1d8] sm:$0xff]  ;;  %v5177_v14 = vld [vmem:[%s9519_s9 + $0x1d0] sm:$0xff] }
 0x40d   :  { %6494 = vmatpush3.msra.mxu1 %v5165_v19  ;;  %6454 = vmatprep.subr.mxu0 %v5148_v43  ;;  %v5131_v6 = vld [vmem:[%s9519_s9 + $0x60] sm:$0xff]  ;;  %v5130_v10 = vld [vmem:[%s9519_s9 + $0x58] sm:$0xff]  ;;  %v5129_v33 = vld [vmem:[%s9519_s9 + $0x50] sm:$0xff] }
 0x40e   :  { %6495 = vmatprep.subr.mxu1 %v5180_v21  ;;  %v5163_v59 = vld [vmem:[%s9519_s9 + $0x160] sm:$0xff]  ;;  %6455 = vmatpush3.msra.mxu0 %v5132_v22  ;;  %v5162_v51 = vld [vmem:[%s9519_s9 + $0x158] sm:$0xff]  ;;  %v5161_v24 = vld [vmem:[%s9519_s9 + $0x150] sm:$0xff] }
 0x40f   :  { %6496 = vmatpush3.msra.mxu1 %v5164_v23  ;;  %6456 = vmatprep.subr.mxu0 %v5147_v4  ;;  %v5144_v17 = vld [vmem:[%s9519_s9 + $0xc8] sm:$0xff]  ;;  %v5143_v16 = vld [vmem:[%s9519_s9 + $0xc0] sm:$0xff]  ;;  %v5142_v32 = vld [vmem:[%s9519_s9 + $0xb8] sm:$0xff] }
 0x410   :  { %6497 = vmatprep.subr.mxu1 %v5179_v61  ;;  %6457 = vmatpush3.msra.mxu0 %v5131_v6  ;;  %v5176_v25 = vld [vmem:[%s9519_s9 + $0x1c8] sm:$0xff]  ;;  %v5175_v28 = vld [vmem:[%s9519_s9 + $0x1c0] sm:$0xff]  ;;  %v5174_v34 = vld [vmem:[%s9519_s9 + $0x1b8] sm:$0xff] }
 0x411   :  { %6498 = vmatpush3.msra.mxu1 %v5163_v59  ;;  %6458 = vmatprep.subr.mxu0 %v5146_v9  ;;  %v5128_v26 = vld [vmem:[%s9519_s9 + $0x48] sm:$0xff]  ;;  %v5127_v29 = vld [vmem:[%s9519_s9 + $0x40] sm:$0xff]  ;;  %v5126_v35 = vld [vmem:[%s9519_s9 + $0x38] sm:$0xff] }
 0x412   :  { %6499 = vmatprep.subr.mxu1 %v5178_v13  ;;  %6459 = vmatpush3.msra.mxu0 %v5130_v10  ;;  %v5160_v42 = vld [vmem:[%s9519_s9 + $0x148] sm:$0xff]  ;;  %v5159_v31 = vld [vmem:[%s9519_s9 + $0x140] sm:$0xff]  ;;  %v5158_v36 = vld [vmem:[%s9519_s9 + $0x138] sm:$0xff] }
 0x413   :  { %6500 = vmatpush3.msra.mxu1 %v5162_v51  ;;  %6460 = vmatprep.subr.mxu0 %v5145_v11  ;;  %v5141_v8 = vld [vmem:[%s9519_s9 + $0xb0] sm:$0xff]  ;;  %v5140_v56 = vld [vmem:[%s9519_s9 + $0xa8] sm:$0xff]  ;;  %v5139_v45 = vld [vmem:[%s9519_s9 + $0xa0] sm:$0xff] }
 0x414   :  { %6501 = vmatprep.subr.mxu1 %v5177_v14  ;;  %6461 = vmatpush3.msra.mxu0 %v5129_v33  ;;  %v5173_v44 = vld [vmem:[%s9519_s9 + $0x1b0] sm:$0xff]  ;;  %v5172_v37 = vld [vmem:[%s9519_s9 + $0x1a8] sm:$0xff]  ;;  %v5171_v38 = vld [vmem:[%s9519_s9 + $0x1a0] sm:$0xff] }
 0x415   :  { %6502 = vmatpush3.msra.mxu1 %v5161_v24  ;;  %6462 = vmatprep.subr.mxu0 %v5144_v17  ;;  %v5125_v53 = vld [vmem:[%s9519_s9 + $0x30] sm:$0xff]  ;;  %v5124_v39 = vld [vmem:[%s9519_s9 + $0x28] sm:$0xff]  ;;  %v5123_v27 = vld [vmem:[%s9519_s9 + $0x20] sm:$0xff] }
 0x416   :  { %6503 = vmatprep.subr.mxu1 %v5176_v25  ;;  %6463 = vmatpush3.msra.mxu0 %v5128_v26  ;;  %v5157_v41 = vld [vmem:[%s9519_s9 + $0x130] sm:$0xff]  ;;  %v5156_v40 = vld [vmem:[%s9519_s9 + $0x128] sm:$0xff]  ;;  %v5155_v48 = vld [vmem:[%s9519_s9 + $0x120] sm:$0xff] }
 0x417   :  { %6504 = vmatpush3.msra.mxu1 %v5160_v42  ;;  %6464 = vmatprep.subr.mxu0 %v5143_v16  ;;  %v5138_v30 = vld [vmem:[%s9519_s9 + $0x98] sm:$0xff]  ;;  %v5137_v0 = vld [vmem:[%s9519_s9 + $0x90] sm:$0xff]  ;;  %v5136_v55 = vld [vmem:[%s9519_s9 + $0x88] sm:$0xff] }
 0x418   :  { %6505 = vmatprep.subr.mxu1 %v5175_v28  ;;  %6465 = vmatpush3.msra.mxu0 %v5127_v29  ;;  %v5170_v49 = vld [vmem:[%s9519_s9 + $0x198] sm:$0xff]  ;;  %v5169_v52 = vld [vmem:[%s9519_s9 + $0x190] sm:$0xff]  ;;  %v5168_v57 = vld [vmem:[%s9519_s9 + $0x188] sm:$0xff] }
 0x419   :  { %6506 = vmatpush3.msra.mxu1 %v5159_v31  ;;  %6466 = vmatprep.subr.mxu0 %v5142_v32  ;;  %v5122_v50 = vld [vmem:[%s9519_s9 + $0x18] sm:$0xff]  ;;  %v5121_v47 = vld [vmem:[%s9519_s9 + $0x10] sm:$0xff]  ;;  %v5120_v63 = vld [vmem:[%s9519_s9 + $0x8] sm:$0xff] }
 0x41a   :  { %6507 = vmatprep.subr.mxu1 %v5174_v34  ;;  %6467 = vmatpush3.msra.mxu0 %v5126_v35  ;;  %v5154_v7 = vld [vmem:[%s9519_s9 + $0x118] sm:$0xff]  ;;  %v5153_v54 = vld [vmem:[%s9519_s9 + $0x110] sm:$0xff]  ;;  %v5152_v60 = vld [vmem:[%s9519_s9 + $0x108] sm:$0xff] }
 0x41b   :  { %6508 = vmatpush3.msra.mxu1 %v5158_v36  ;;  %6468 = vmatprep.subr.mxu0 %v5141_v8  ;;  %v5135_v46 = vld [vmem:[%s9519_s9 + $0x80] sm:$0xff]  ;;  %v9201_v18 = vld [vmem:[#allocation4 + $0x8] sm:$0xff]  ;;  %v9206_v3 = vld [vmem:[#allocation4 + $0x18] sm:$0xff] }
 0x41c   :  { %6509 = vmatprep.subr.mxu1 %v5173_v44  ;;  %6469 = vmatpush3.msra.mxu0 %v5125_v53  ;;  %v5167_v2 = vld [vmem:[%s9519_s9 + $0x180] sm:$0xff]  ;;  %v9210_v43 = vld [vmem:[#allocation4 + $0x10] sm:$0xff]  ;;  %v9213_v21 = vld [vmem:[#allocation4 + $0x28] sm:$0xff] }
 0x41d   :  { %6510 = vmatpush3.msra.mxu1 %v5157_v41  ;;  %6470 = vmatprep.subr.mxu0 %v5140_v56  ;;  %v5119_v1 = vld [vmem:[%s9519_s9] sm:$0xff]  ;;  %v9215_v22 = vld [vmem:[#allocation4 + $0x38] sm:$0xff]  ;;  %v9224_v4 = vld [vmem:[#allocation4 + $0x30] sm:$0xff] }
 0x41e   :  { %6511 = vmatprep.subr.mxu1 %v5172_v37  ;;  %6471 = vmatpush3.msra.mxu0 %v5124_v39  ;;  %v5151_v15 = vld [vmem:[%s9519_s9 + $0x100] sm:$0xff]  ;;  %v9226_v61 = vld [vmem:[#allocation4 + $0x48] sm:$0xff]  ;;  %v9228_v6 = vld [vmem:[#allocation4 + $0x58] sm:$0xff] }
 0x41f   :  { %6512 = vmatpush3.msra.mxu1 %v5156_v40  ;;  %6472 = vmatprep.subr.mxu0 %v5139_v45  ;;  %v9208_v19 = vld [vmem:[#allocation4] sm:$0xff]  ;;  %v9236_v9 = vld [vmem:[#allocation4 + $0x50] sm:$0xff]  ;;  %v5555_v20 = vld [vmem:[%s9524_s14 + $0xf8] sm:$0xff] }
 0x420   :  { %6513 = vmatprep.subr.mxu1 %v5171_v38  ;;  %6473 = vmatpush3.msra.mxu0 %v5123_v27  ;;  %v9222_v23 = vld [vmem:[#allocation4 + $0x20] sm:$0xff] }
 0x421   :  { %6514 = vmatpush3.msra.mxu1 %v5155_v48  ;;  %6474 = vmatprep.subr.mxu0 %v5138_v30  ;;  %v9234_v59 = vld [vmem:[#allocation4 + $0x40] sm:$0xff] }
 0x422   :  { %6515 = vmatprep.subr.mxu1 %v5170_v49  ;;  %6475 = vmatpush3.msra.mxu0 %v5122_v50  ;;  %v6413_v51 = vld [vmem:[%s9520_s10] ss:$0 sm:$0xff] }
 0x423   :  { %6516 = vmatpush3.msra.mxu1 %v5154_v7  ;;  %6476 = vmatprep.subr.mxu0 %v5137_v0  ;;  %v6414_v39 = vld [vmem:[%s9521_s11] ss:$0 sm:$0xff] }
 0x424   :  { %6517 = vmatprep.subr.mxu1 %v5169_v52  ;;  %6477 = vmatpush3.msra.mxu0 %v5121_v47 }
 0x425   :  { %6518 = vmatpush3.msra.mxu1 %v5153_v54  ;;  %6478 = vmatprep.subr.mxu0 %v5136_v55 }
 0x426   :  { %6519 = vmatprep.subr.mxu1 %v5168_v57  ;;  %6479 = vmatpush3.msra.mxu0 %v5120_v63 }
 0x427   :  { %6520 = vmatpush3.msra.mxu1 %v5152_v60  ;;  %6480 = vmatprep.subr.mxu0 %v5135_v46 }
 0x428   :  { %6521 = vmatprep.subr.mxu1 %v5167_v2  ;;  %6481 = vmatpush3.msra.mxu0 %v5119_v1 }
 0x429   :  { %5254 = vmatprep.mubr.f32.mxu0 %v9201_v18  ;;  %6522 = vmatpush3.msra.mxu1 %v5151_v15 }
 0x42a   :  { %5334 = vmatprep.mubr.f32.mxu1 %v9206_v3  ;;  %5255 = vmatmul.mubr.f32.vlgmr.msra.gmra.mxu0 %v9208_v19 }
 0x42b   :  { %5335 = vmatmul.mubr.f32.vlgmr.msra.gmra.mxu1 %v9210_v43  ;;  %5259 = vmatprep.mubr.f32.mxu0 %v9213_v21 }
 0x42c   :  { %5339 = vmatprep.mubr.f32.mxu1 %v9215_v22  ;;  %6532 = vmatprep.subr.mxu0 %v5555_v20  ;;  %v5565_v20 = vld [vmem:[%s9524_s14 + $0x148] sm:$0xff] }
 0x42e   :  { %5260 = vmatmul.mubr.f32.gmra.mxu0 %v9222_v23 }
 0x42f   :  { %5340 = vmatmul.mubr.f32.gmra.mxu1 %v9224_v4  ;;  %5264 = vmatprep.mubr.f32.mxu0 %v9226_v61 }
 0x430   :  { %5344 = vmatprep.mubr.f32.mxu1 %v9228_v6 }
 0x432   :  { %5265 = vmatmul.mubr.f32.gmra.mxu0 %v9234_v59 }
 0x433   :  { %5345 = vmatmul.mubr.f32.gmra.mxu1 %v9236_v9 }
 0x4ea   :  { %v6482_v13 = vpop.f32.mrf.mxu0 }
 0x4eb   :  { %v6523_v10 = vpop.f32.mrf.mxu1 }
 0x4ec   :  { %v6483_v11 = vpop.f32.mrf.mxu0 }
 0x4ed   :  { %v6524_v14 = vpop.f32.mrf.mxu1  ;;  %v6484_v33 = vadd.f32 %v6483_v11, %v6482_v13 }
 0x4ee   :  { %v6485_v24 = vpop.f32.mrf.mxu0  ;;  %v6525_v26 = vadd.f32 %v6524_v14, %v6523_v10 }
 0x4ef   :  { %v6526_v17 = vpop.f32.mrf.mxu1  ;;  %v5257_v25 = vadd.f32 %v6484_v33, %v6413_v51 }
 0x4f0   :  { %v6486_v42 = vpop.f32.mrf.mxu0 }
 0x4f1   :  { %v6527_v16 = vpop.f32.mrf.mxu1  ;;  %v5337_v28 = vadd.f32 %v6525_v26, %v5257_v25  ;;  %v6487_v29 = vadd.f32 %v6486_v42, %v6485_v24 }
 0x4f2   :  { %v6488_v31 = vpop.f32.mrf.mxu0  ;;  %v6528_v35 = vadd.f32 %v6527_v16, %v6526_v17 }
 0x4f3   :  { %v6529_v32 = vpop.f32.mrf.mxu1  ;;  %6744 = vtanh.f32 %v5337_v28  ;;  %v5262_v34 = vadd.f32 %v6487_v29, %v6413_v51 }
 0x4f4   :  { %v6489_v36 = vpop.f32.mrf.mxu0 }
 0x4f5   :  { %v6530_v8 = vpop.f32.mrf.mxu1  ;;  %v5342_v44 = vadd.f32 %v6528_v35, %v5262_v34  ;;  %v6490_v53 = vadd.f32 %v6489_v36, %v6488_v31 }
 0x4f6   :  { %v6531_v56 = vadd.f32 %v6530_v8, %v6529_v32 }
 0x4f7   :  { %6746 = vtanh.f32 %v5342_v44  ;;  %v5267_v41 = vadd.f32 %v6490_v53, %v6413_v51  ;;  %v5587_v53 = vld [vmem:[%s9524_s14 + $0x1f8] sm:$0xff] }
 0x4f8   :  { %6567 = vmatprep.subr.mxu1 %v5587_v53  ;;  %v5548_v53 = vld [vmem:[%s9524_s14 + $0xc0] sm:$0xff] }
 0x4f9   :  { %v5347_v37 = vadd.f32 %v6531_v56, %v5267_v41 }
 0x4fb   :  { %6748 = vtanh.f32 %v5347_v37 }
 0x500   :  { %v6745_v40 = vpop.eup %6744 }
 0x501   :  { %v5360_v45 = vmul.f32 %v6745_v40, %v6414_v39 }
 0x503   :  { %v5364_v38 = vsel %vm5363_vm6, %v5360_v45, 0.0 }
 0x504   :  { %v6747_v27 = vpop.eup %6746  ;;  %5365 = vadd.xlane.f32.xlu0 %v5364_v38 }
 0x505   :  { %v5361_v48 = vmul.f32 %v6747_v27, %v6414_v39 }
 0x507   :  { %v5367_v30 = vsel %vm5363_vm6, %v5361_v48, 0.0 }
 0x508   :  { %v6749_v49 = vpop.eup %6748  ;;  %5368 = vadd.xlane.f32.xlu0 %v5367_v30 }
 0x509   :  { %v5362_v50 = vmul.f32 %v6749_v49, %v6414_v39 }
 0x50b   :  { %v5370_v7 = vsel %vm5363_vm6, %v5362_v50, 0.0 }
 0x50c   :  { %5371 = vadd.xlane.f32.xlu1 %v5370_v7 }
 0x58d   :  { %v5366_v0 = vpop.xlane.xlu0 %5365 }
 0x58e   :  { %v5376_v47 = vsel %vm5373_vm7, %v5366_v0, -1e+30 }
 0x58f   :  { %v5380_v57 = vsel %vm5379_vm9, %v5376_v47, -inf }
 0x591   :  { %v5369_v52 = vpop.xlane.xlu0 %5368 }
 0x592   :  { %v5377_v54 = vsel %vm5374_vm8, %v5369_v52, -1e+30 }
 0x593   :  { %v5381_v55 = vsel %vm5379_vm9, %v5377_v54, -inf }
 0x594   :  { %v5383_v60 = vmax.f32 %v5380_v57, %v5381_v55 }
 0x595   :  { %v5372_v63 = vpop.xlane.xlu1 %5371 }
 0x596   :  { %v5378_v46 = vsel %vm5375_vm10, %v5372_v63, -1e+30 }
 0x597   :  { %v5382_v2 = vsel %vm5379_vm9, %v5378_v46, -inf }
 0x598   :  { %v5384_v1 = vmax.f32 %v5383_v60, %v5382_v2  ;;  %v5571_v2 = vld [vmem:[%s9524_s14 + $0x178] sm:$0xff] }
 0x599   :  { %6568 = vmatpush3.msra.mxu1 %v5571_v2  ;;  %v5557_v2 = vld [vmem:[%s9524_s14 + $0x108] sm:$0xff] }
 0x59a   :  { %v5385_v15 = vsub.f32 %v5376_v47, %v5384_v1  ;;  %v5386_v13 = vsub.f32 %v5377_v54, %v5384_v1  ;;  %v5387_v10 = vsub.f32 %v5378_v46, %v5384_v1  ;;  %v5539_v46 = vld [vmem:[%s9524_s14 + $0x78] sm:$0xff]  ;;  %v5554_v1 = vld [vmem:[%s9524_s14 + $0xf0] sm:$0xff] }
 0x59b   :  { %6533 = vmatpush3.msra.mxu0 %v5539_v46  ;;  %v5525_v46 = vld [vmem:[%s9524_s14 + $0x8] sm:$0xff] }
 0x59c   :  { %v5388_v51 = vmul.f32 1.442695, %v5385_v15  ;;  %v5390_v11 = vmul.f32 1.442695, %v5386_v13  ;;  %v5392_v14 = vmul.f32 1.442695, %v5387_v10  ;;  %6534 = vmatprep.subr.mxu0 %v5554_v1 }
 0x59d   :  { %v5586_v15 = vld [vmem:[%s9524_s14 + $0x1f0] sm:$0xff]  ;;  %v5540_v1 = vld [vmem:[%s9524_s14 + $0x80] sm:$0xff] }
 0x59e   :  { %6750 = vpow2.f32 %v5388_v51  ;;  %6569 = vmatprep.subr.mxu1 %v5586_v15  ;;  %v5538_v13 = vld [vmem:[%s9524_s14 + $0x70] sm:$0xff]  ;;  %v5553_v51 = vld [vmem:[%s9524_s14 + $0xe8] sm:$0xff]  ;;  %v5572_v15 = vld [vmem:[%s9524_s14 + $0x180] sm:$0xff] }
 0x59f   :  { %6752 = vpow2.f32 %v5390_v11  ;;  %v5570_v10 = vld [vmem:[%s9524_s14 + $0x170] sm:$0xff]  ;;  %6535 = vmatpush3.msra.mxu0 %v5538_v13  ;;  %v5585_v11 = vld [vmem:[%s9524_s14 + $0x1e8] sm:$0xff]  ;;  %v5524_v13 = vld [vmem:[%s9524_s14] sm:$0xff] }
 0x5a0   :  { %6754 = vpow2.f32 %v5392_v14  ;;  %6570 = vmatpush3.msra.mxu1 %v5570_v10  ;;  %6536 = vmatprep.subr.mxu0 %v5553_v51  ;;  %v5537_v14 = vld [vmem:[%s9524_s14 + $0x68] sm:$0xff]  ;;  %v5556_v10 = vld [vmem:[%s9524_s14 + $0x100] sm:$0xff] }
 0x5a1   :  { %6571 = vmatprep.subr.mxu1 %v5585_v11  ;;  %6537 = vmatpush3.msra.mxu0 %v5537_v14 }
 0x5ab   :  { %v6751_v33 = vpop.eup %6750 }
 0x5ac   :  { %v6753_v24 = vpop.eup %6752  ;;  %v5394_v17 = vsel %vm5373_vm7, %v6751_v33, 0.0  ;;  %v5569_v33 = vld [vmem:[%s9524_s14 + $0x168] sm:$0xff] }
 0x5ad   :  { %v6755_v25 = vpop.eup %6754  ;;  %v5395_v26 = vsel %vm5374_vm8, %v6753_v24, 0.0  ;;  %v5397_v42 = vsel %vm5379_vm9, %v5394_v17, 0.0  ;;  %6572 = vmatpush3.msra.mxu1 %v5569_v33  ;;  %v5552_v24 = vld [vmem:[%s9524_s14 + $0xe0] sm:$0xff] }
 0x5ae   :  { %v5396_v16 = vsel %vm5375_vm10, %v6755_v25, 0.0  ;;  %v5398_v28 = vsel %vm5379_vm9, %v5395_v26, 0.0  ;;  %6538 = vmatprep.subr.mxu0 %v5552_v24  ;;  %v5536_v25 = vld [vmem:[%s9524_s14 + $0x60] sm:$0xff] }
 0x5af   :  { %v5399_v29 = vadd.f32 %v5398_v28, %v5397_v42  ;;  %v5400_v31 = vsel %vm5379_vm9, %v5396_v16, 0.0  ;;  %6539 = vmatpush3.msra.mxu0 %v5536_v25  ;;  %v5551_v42 = vld [vmem:[%s9524_s14 + $0xd8] sm:$0xff] }
 0x5b0   :  { %6540 = vmatprep.subr.mxu0 %v5551_v42  ;;  %v5535_v28 = vld [vmem:[%s9524_s14 + $0x58] sm:$0xff]  ;;  %v5472_v42 = vld [vmem:[%s9522_s12] sm:$0xf] }
 0x5b1   :  { %v5401_v32 = vadd.f32 %v5400_v31, %v5399_v29  ;;  %v5567_v29 = vld [vmem:[%s9524_s14 + $0x158] sm:$0xff]  ;;  %6541 = vmatpush3.msra.mxu0 %v5535_v28  ;;  %v5550_v31 = vld [vmem:[%s9524_s14 + $0xd0] sm:$0xff]  ;;  %v5481_v28 = vrot.slane %v5472_v42, %v7808_v12 }
 0x5b2   :  { %6542 = vmatprep.subr.mxu0 %v5550_v31  ;;  %v5477_v31 = vrot.slane %v5472_v42, %v7794_v5 }
 0x5b3   :  { %v5402_v34 = vmax.f32 %v5401_v32, 1e-30  ;;  %v5582_v32 = vld [vmem:[%s9524_s14 + $0x1d0] sm:$0xff] }
 0x5b5   :  { %6756 = vrcp.f32 %v5402_v34  ;;  %v5534_v34 = vld [vmem:[%s9524_s14 + $0x50] sm:$0xff] }
 0x5b6   :  { %6543 = vmatpush3.msra.mxu0 %v5534_v34 }
 0x5c2   :  { %v6757_v35 = vpop.eup %6756 }
 0x5c3   :  { %v5405_v36 = vmul.f32 %v6757_v35, %v5395_v26  ;;  %v5404_v8 = vmul.f32 %v6757_v35, %v5394_v17  ;;  %v5406_v44 = vmul.f32 %v6757_v35, %v5396_v16  ;;  %v5584_v17 = vld [vmem:[%s9524_s14 + $0x1e0] sm:$0xff]  ;;  %v5583_v16 = vld [vmem:[%s9524_s14 + $0x1d8] sm:$0xff]  ;;  %v5566_v35 = vld [vmem:[%s9524_s14 + $0x150] sm:$0xff] }
 0x5c4   :  { %6573 = vmatprep.subr.mxu1 %v5584_v17  ;;  %v5568_v26 = vld [vmem:[%s9524_s14 + $0x160] sm:$0xff] }
 0x5c5   :  { %5414 = vperm.xlu0 %6743, %v5405_v36   ;;  %5409 = vperm.xlu1 %6742, %v5404_v8   ;;  %v5549_v36 = vld [vmem:[%s9524_s14 + $0xc8] sm:$0xff] }
 0x5c6   :  { %6574 = vmatpush3.msra.mxu1 %v5568_v26  ;;  %v5581_v8 = vld [vmem:[%s9524_s14 + $0x1c8] sm:$0xff]  ;;  %6544 = vmatprep.subr.mxu0 %v5549_v36 }
 0x5c7   :  { %6575 = vmatprep.subr.mxu1 %v5583_v16  ;;  %v5498_v16 = vld [vmem:[%s9523_s13] sm:$0xf] }
 0x5c8   :  { %6576 = vmatpush3.msra.mxu1 %v5567_v29  ;;  %v5489_v29 = vrot.slane %v5472_v42, %v7859_v62 }
 0x5c9   :  { %5419 = vperm.xlu1 %6742, %v5406_v44   ;;  %6577 = vmatprep.subr.mxu1 %v5582_v32  ;;  %v5533_v44 = vld [vmem:[%s9524_s14 + $0x48] sm:$0xff]  ;;  %v5485_v32 = vrot.slane %v5472_v42, %v7850_v58 }
 0x5ca   :  { %6578 = vmatpush3.msra.mxu1 %v5566_v35  ;;  %6545 = vmatpush3.msra.mxu0 %v5533_v44 }
 0x5cb   :  { %6579 = vmatprep.subr.mxu1 %v5581_v8  ;;  %6546 = vmatprep.subr.mxu0 %v5548_v53  ;;  %v5515_v53 = vrot.slane %v5498_v16, %v7859_v62 }
 0x5cc   :  { %6580 = vmatpush3.msra.mxu1 %v5565_v20  ;;  %v5507_v20 = vrot.slane %v5498_v16, %v7808_v12 }
 0x640   :  { %v5415_v41 = vpop.permute.xlu0 %5414  ;;  %v5410_v56 = vpop.permute.xlu1 %5409 }
 0x641   :  { %v5426_v37 = vmul.f32 %v5415_v41, %v9222_v23  ;;  %v5427_v39 = vmul.f32 %v5415_v41, %v9213_v21  ;;  %v5428_v40 = vmul.f32 %v5415_v41, %v9224_v4  ;;  %v5422_v45 = vmul.f32 %v5410_v56, %v9208_v19 }
 0x642   :  { %v5423_v38 = vmul.f32 %v5410_v56, %v9201_v18  ;;  %v5424_v27 = vmul.f32 %v5410_v56, %v9210_v43  ;;  %v5429_v48 = vmul.f32 %v5415_v41, %v9215_v22  ;;  %v5425_v30 = vmul.f32 %v5410_v56, %v9206_v3  ;;  %v5580_v41 = vld [vmem:[%s9524_s14 + $0x1c0] sm:$0xff] }
 0x643   :  { %v5434_v49 = vadd.f32 %v5426_v37, %v5422_v45  ;;  %v5532_v56 = vld [vmem:[%s9524_s14 + $0x40] sm:$0xff]  ;;  %6581 = vmatprep.subr.mxu1 %v5580_v41  ;;  %v5531_v45 = vld [vmem:[%s9524_s14 + $0x38] sm:$0xff]  ;;  %v5503_v41 = vrot.slane %v5498_v16, %v7794_v5 }
 0x644   :  { %v5436_v50 = vadd.f32 %v5427_v39, %v5423_v38  ;;  %v5438_v7 = vadd.f32 %v5428_v40, %v5424_v27  ;;  %v5420_v0 = vpop.permute.xlu1 %5419  ;;  %v5440_v52 = vadd.f32 %v5429_v48, %v5425_v30  ;;  %v5564_v37 = vld [vmem:[%s9524_s14 + $0x140] sm:$0xff]  ;;  %v5547_v39 = vld [vmem:[%s9524_s14 + $0xb8] sm:$0xff]  ;;  %6547 = vmatpush3.msra.mxu0 %v5532_v56  ;;  %v5546_v27 = vld [vmem:[%s9524_s14 + $0xb0] sm:$0xff]  ;;  %v5511_v56 = vrot.slane %v5498_v16, %v7850_v58 }
 0x645   :  { %v5430_v23 = vmul.f32 %v5420_v0, %v9234_v59  ;;  %v5431_v21 = vmul.f32 %v5420_v0, %v9226_v61  ;;  %v5432_v4 = vmul.f32 %v5420_v0, %v9236_v9  ;;  %v5433_v19 = vmul.f32 %v5420_v0, %v9228_v6  ;;  %v5579_v40 = vld [vmem:[%s9524_s14 + $0x1b8] sm:$0xff]  ;;  %6582 = vmatpush3.msra.mxu1 %v5564_v37  ;;  %v5578_v48 = vld [vmem:[%s9524_s14 + $0x1b0] sm:$0xff]  ;;  %v5529_v0 = vld [vmem:[%s9524_s14 + $0x28] sm:$0xff] }
 0x646   :  { %v5563_v38 = vld [vmem:[%s9524_s14 + $0x138] sm:$0xff]  ;;  %6548 = vmatprep.subr.mxu0 %v5547_v39  ;;  %6583 = vmatprep.subr.mxu1 %v5579_v40  ;;  %v5530_v30 = vld [vmem:[%s9524_s14 + $0x30] sm:$0xff]  ;;  %v6415_v58 = vld [vmem:[%s9525_s15] ss:$0 sm:$0xff] }
 0x647   :  { %v9285_v18 = vadd.f32 %v5434_v49, %v5430_v23  ;;  %v9287_v43 = vadd.f32 %v5436_v50, %v5431_v21  ;;  %v9289_v22 = vadd.f32 %v5438_v7, %v5432_v4  ;;  %v9291_v3 = vadd.f32 %v5440_v52, %v5433_v19  ;;  %v5562_v49 = vld [vmem:[%s9524_s14 + $0x130] sm:$0xff]  ;;  %6549 = vmatpush3.msra.mxu0 %v5531_v45  ;;  %v5545_v50 = vld [vmem:[%s9524_s14 + $0xa8] sm:$0xff]  ;;  %v5544_v21 = vld [vmem:[%s9524_s14 + $0xa0] sm:$0xff] }
 0x648   :  { %6584 = vmatpush3.msra.mxu1 %v5563_v38  ;;  %v5577_v7 = vld [vmem:[%s9524_s14 + $0x1a8] sm:$0xff]  ;;  %6550 = vmatprep.subr.mxu0 %v5546_v27  ;;  %v5576_v4 = vld [vmem:[%s9524_s14 + $0x1a0] sm:$0xff] }
 0x649   :  { %v5442_v47 = vadd.f32 %v9287_v43, %v9285_v18  ;;  %v5447_v59 = vmul.f32 %v9285_v18, %v9285_v18  ;;  %v5448_v61 = vmul.f32 %v9287_v43, %v9287_v43  ;;  %v5449_v9 = vmul.f32 %v9289_v22, %v9289_v22  ;;  %6585 = vmatprep.subr.mxu1 %v5578_v48  ;;  %v5561_v23 = vld [vmem:[%s9524_s14 + $0x128] sm:$0xff]  ;;  %v5528_v19 = vld [vmem:[%s9524_s14 + $0x20] sm:$0xff] }
 0x64a   :  { %v5450_v57 = vmul.f32 %v9291_v3, %v9291_v3  ;;  %6551 = vmatpush3.msra.mxu0 %v5530_v30  ;;  %6586 = vmatpush3.msra.mxu1 %v5562_v49  ;;  %v5560_v52 = vld [vmem:[%s9524_s14 + $0x120] sm:$0xff] }
 0x64b   :  { %v5443_v6 = vadd.f32 %v5442_v47, %v9289_v22  ;;  %v5451_v54 = vadd.f32 %v5448_v61, %v5447_v59  ;;  %6552 = vmatprep.subr.mxu0 %v5545_v50  ;;  %6587 = vmatprep.subr.mxu1 %v5577_v7  ;;  %v5543_v47 = vld [vmem:[%s9524_s14 + $0x98] sm:$0xff] }
 0x64c   :  { %6553 = vmatpush3.msra.mxu0 %v5529_v0  ;;  %6588 = vmatpush3.msra.mxu1 %v5561_v23  ;;  %v5575_v59 = vld [vmem:[%s9524_s14 + $0x198] sm:$0xff] }
 0x64d   :  { %v5444_v55 = vadd.f32 %v5443_v6, %v9291_v3  ;;  %v5452_v63 = vadd.f32 %v5451_v54, %v5449_v9  ;;  %6554 = vmatprep.subr.mxu0 %v5544_v21  ;;  %6589 = vmatprep.subr.mxu1 %v5576_v4  ;;  %v5527_v61 = vld [vmem:[%s9524_s14 + $0x18] sm:$0xff]  ;;  %v5542_v9 = vld [vmem:[%s9524_s14 + $0x90] sm:$0xff] }
 0x64e   :  { %v5559_v6 = vld [vmem:[%s9524_s14 + $0x118] sm:$0xff]  ;;  %6555 = vmatpush3.msra.mxu0 %v5528_v19  ;;  %6590 = vmatpush3.msra.mxu1 %v5560_v52  ;;  %v5574_v54 = vld [vmem:[%s9524_s14 + $0x190] sm:$0xff] }
 0x64f   :  { %5445 = vadd.xlane.f32.xlu1 %v5444_v55  ;;  %v5453_v60 = vadd.f32 %v5452_v63, %v5450_v57  ;;  %6556 = vmatprep.subr.mxu0 %v5543_v47  ;;  %v5526_v55 = vld [vmem:[%s9524_s14 + $0x10] sm:$0xff]  ;;  %v5541_v63 = vld [vmem:[%s9524_s14 + $0x88] sm:$0xff] }
 0x650   :  { %6591 = vmatprep.subr.mxu1 %v5575_v59  ;;  %v5558_v57 = vld [vmem:[%s9524_s14 + $0x110] sm:$0xff]  ;;  %6557 = vmatpush3.msra.mxu0 %v5527_v61 }
 0x651   :  { %5454 = vadd.xlane.f32.xlu0 %v5453_v60  ;;  %6592 = vmatpush3.msra.mxu1 %v5559_v6  ;;  %v5573_v60 = vld [vmem:[%s9524_s14 + $0x188] sm:$0xff] }
 0x652   :  { %6558 = vmatprep.subr.mxu0 %v5542_v9  ;;  %6593 = vmatprep.subr.mxu1 %v5574_v54 }
 0x653   :  { %6559 = vmatpush3.msra.mxu0 %v5526_v55  ;;  %6594 = vmatpush3.msra.mxu1 %v5558_v57 }
 0x654   :  { %6560 = vmatprep.subr.mxu0 %v5541_v63  ;;  %6595 = vmatprep.subr.mxu1 %v5573_v60 }
 0x655   :  { %6561 = vmatpush3.msra.mxu0 %v5525_v46  ;;  %6596 = vmatpush3.msra.mxu1 %v5557_v2 }
 0x656   :  { %6562 = vmatprep.subr.mxu0 %v5540_v1  ;;  %6597 = vmatprep.subr.mxu1 %v5572_v15 }
 0x657   :  { %6563 = vmatpush3.msra.mxu0 %v5524_v13  ;;  %6598 = vmatpush3.msra.mxu1 %v5556_v10 }
 0x6d8   :  { %v5446_v51 = vpop.xlane.xlu1 %5445 }
 0x6d9   :  { %v5457_v11 = vmul.f32 0.0033333334, %v5446_v51 }
 0x6da   :  { %v5455_v14 = vpop.xlane.xlu0 %5454 }
 0x6db   :  { %v5458_v33 = vmul.f32 0.0033333334, %v5455_v14  ;;  %v5459_v24 = vmul.f32 %v5457_v11, %v5457_v11  ;;  %v5464_v34 = vsub.f32 %v9285_v18, %v5457_v11  ;;  %v5466_v35 = vsub.f32 %v9289_v22, %v5457_v11 }
 0x6dc   :  { %v5465_v36 = vsub.f32 %v9287_v43, %v5457_v11  ;;  %v5467_v8 = vsub.f32 %v9291_v3, %v5457_v11 }
 0x6dd   :  { %v5460_v17 = vsub.f32 %v5458_v33, %v5459_v24 }
 0x6df   :  { %v5461_v25 = vmax.f32 %v5460_v17, 0.0 }
 0x6e1   :  { %v5462_v26 = vadd.f32 1e-05, %v5461_v25 }
 0x6e3   :  { %6758 = vrsqrt.f32 %v5462_v26 }
 0x6f0   :  { %v6759_v44 = vpop.eup %6758 }
 0x6f1   :  { %v5469_v37 = vmul.f32 %v6759_v44, %v5465_v36  ;;  %v5471_v39 = vmul.f32 %v6759_v44, %v5467_v8  ;;  %v5468_v40 = vmul.f32 %v6759_v44, %v5464_v34  ;;  %v5470_v45 = vmul.f32 %v6759_v44, %v5466_v35 }
 0x6f3   :  { %v5495_v18 = vmul.f32 %v5481_v28, %v5469_v37  ;;  %v5497_v38 = vmul.f32 %v5489_v29, %v5471_v39  ;;  %v5494_v22 = vmul.f32 %v5477_v31, %v5468_v40  ;;  %v5496_v27 = vmul.f32 %v5485_v32, %v5470_v45 }
 0x6f5   :  { %v5521_v43 = vadd.f32 %v5507_v20, %v5495_v18  ;;  %v5523_v48 = vadd.f32 %v5515_v53, %v5497_v38  ;;  %v5520_v3 = vadd.f32 %v5503_v41, %v5494_v22  ;;  %v5522_v30 = vadd.f32 %v5511_v56, %v5496_v27 }
 0x6f7   :  { %5659 = vmatprep.mubr.f32.mxu0 %v5521_v43  ;;  %5729 = vmatprep.mubr.f32.mxu1 %v5523_v48 }
 0x6f8   :  { %5660 = vmatmul.mubr.f32.vlgmr.msra.gmra.mxu0 %v5520_v3  ;;  %5730 = vmatmul.mubr.f32.vlgmr.msra.gmra.mxu1 %v5522_v30 }
 0x7b8   :  { %v6564_v12 = vpop.f32.mrf.mxu0  ;;  %v6599_v5 = vpop.f32.mrf.mxu1 }
 0x7ba   :  { %v6565_v62 = vpop.f32.mrf.mxu0  ;;  %v6600_v49 = vpop.f32.mrf.mxu1 }
 0x7bb   :  { %v6566_v50 = vadd.f32 %v6565_v62, %v6564_v12  ;;  %v6601_v0 = vadd.f32 %v6600_v49, %v6599_v5 }
 0x7bd   :  { %v5662_v7 = vadd.f32 %v6566_v50, %v6415_v58 }
 0x7bf   :  { %v5732_v23 = vadd.f32 %v6601_v0, %v5662_v7 }
 0x7c1   :  { %5735 = vst [vmem:[%s9526_s16] sm:$0xff] %v5732_v23 }

</bundles_post_ra>
